<compile_context>
chip_gen: v5e
topology: v5e:2x2
jax: 0.10.0
libtpu: 0.0.40
codegen_flags: <defaults>
</compile_context>

<pallas_src>
import functools

import jax
import jax.numpy as jnp
from jax.experimental import pallas as pl
from jax.experimental.pallas import tpu as pltpu

SELU_ALPHA = 1.6732632423543772
SELU_SCALE = 1.0507009873554805
BN_EPS = 1e-5
COUT_PAD = 128   # lane-dense width for the final (Cout=2) conv output


# ----------------------------- in-kernel helpers -----------------------------

def _selu(x):
    # TODO(synk): jnp.expm1 would be marginally more accurate for small
    # negative x; exp(x)-1 is kept for guaranteed Mosaic lowering and is well
    # inside the test tolerance.
    return SELU_SCALE * jnp.where(x > 0, x, SELU_ALPHA * (jnp.exp(x) - 1.0))


def _batchnorm_train(y, gamma, beta):
    """Single-pass train-mode BN. y: [R, C]; gamma/beta: [1, C]."""
    inv_r = 1.0 / y.shape[0]
    mean = jnp.sum(y, axis=0, keepdims=True) * inv_r
    mean_sq = jnp.sum(y * y, axis=0, keepdims=True) * inv_r
    var = mean_sq - mean * mean                      # biased batch variance
    scale = gamma * jax.lax.rsqrt(var + BN_EPS)
    shift = beta - mean * scale
    return y * scale + shift


# --------------------------------- kernel ------------------------------------

def chessnet_kernel(x_ref, w_in_ref, b_in_ref,
                    w1_ref, b1_ref, g1_ref, be1_ref,
                    w2_ref, b2_ref, g2_ref, be2_ref,
                    w_out_ref, b_out_ref,
                    o_ref, xpad_ref, patch_ref, *, num_blocks):
    N, H, W, C = x_ref.shape
    R = N * H * W

    # Zero the padded scratch once; the halo stays zero for the whole network
    # since every layer only rewrites the interior.
    xpad_ref[...] = jnp.zeros_like(xpad_ref)

    def write_interior(y4d):
        xpad_ref[:, 1:H + 1, 1:W + 1, :] = y4d

    def im2col():
        # Pack the nine shifted windows into channel bands of the patch buffer,
        # then read it back as one [R, 9*C] matrix for a single MXU dot.
        k = 0
        for dy in range(3):
            for dx in range(3):
                patch_ref[:, :, :, k * C:(k + 1) * C] = (
                    xpad_ref[:, dy:dy + H, dx:dx + W, :])
                k += 1
        return patch_ref[...].reshape(R, 9 * C)

    def conv(w, b):
        return jnp.dot(im2col(), w, preferred_element_type=jnp.float32) + b

    # ---- input conv + ReLU ----
    write_interior(x_ref[...])
    y = jnp.maximum(conv(w_in_ref[...], b_in_ref[...]), 0.0)
    write_interior(y.reshape(N, H, W, C))

    # ---- residual blocks (statically unrolled; L is small) ----
    for l in range(num_blocks):
        res = y
        z = _selu(_batchnorm_train(conv(w1_ref[l], b1_ref[l]),
                                   g1_ref[l], be1_ref[l]))
        write_interior(z.reshape(N, H, W, C))
        z = _selu(_batchnorm_train(conv(w2_ref[l], b2_ref[l]),
                                   g2_ref[l], be2_ref[l]) + res)
        write_interior(z.reshape(N, H, W, C))
        y = z

    # ---- output conv (weights zero-padded to 128 lanes -> lane-dense store) --
    o_ref[...] = jnp.dot(im2col(), w_out_ref[...],
                         preferred_element_type=jnp.float32) + b_out_ref[...]


# ------------------------------ pallas wrapper --------------------------------

def _vmem_spec():
    return pl.BlockSpec(memory_space=pltpu.MemorySpace.VMEM)


def chessnet_forward(x_nchw, params):
    w_in_hwio = params["in_w"]                       # [3, 3, 6, C]
    C = w_in_hwio.shape[-1]
    cin = w_in_hwio.shape[-2]
    blocks = params["blocks"]
    L = len(blocks)
    N, _, H, W = x_nchw.shape
    R = N * H * W

    # NCHW -> NHWC; zero-pad the input planes up to C so every conv in the
    # fused kernel has the uniform [9*C, C] shape (extra channels/weights = 0).
    x = jnp.transpose(x_nchw, (0, 2, 3, 1)).astype(jnp.float32)
    x = jnp.pad(x, ((0, 0), (0, 0), (0, 0), (0, C - cin)))

    w_in = jnp.pad(w_in_hwio, ((0, 0), (0, 0), (0, C - cin), (0, 0)))
    w_in = w_in.reshape(9 * C, C)
    b_in = params["in_b"].reshape(1, C)

    def stack(key, shape):
        return jnp.stack([blk[key].reshape(shape) for blk in blocks])

    w1 = stack("w1", (9 * C, C)); b1 = stack("b1", (1, C))
    g1 = stack("g1", (1, C));     be1 = stack("be1", (1, C))
    w2 = stack("w2", (9 * C, C)); b2 = stack("b2", (1, C))
    g2 = stack("g2", (1, C));     be2 = stack("be2", (1, C))

    w_out_hwio = params["out_w"]                     # [3, 3, C, 2]
    cout = w_out_hwio.shape[-1]
    w_out = jnp.pad(w_out_hwio, ((0, 0), (0, 0), (0, 0), (0, COUT_PAD - cout)))
    w_out = w_out.reshape(9 * C, COUT_PAD)
    b_out = jnp.pad(params["out_b"], (0, COUT_PAD - cout)).reshape(1, COUT_PAD)

    out = pl.pallas_call(
        functools.partial(chessnet_kernel, num_blocks=L),
        out_shape=jax.ShapeDtypeStruct((R, COUT_PAD), jnp.float32),
        in_specs=[_vmem_spec()] * 13,
        out_specs=_vmem_spec(),
        scratch_shapes=[
            pltpu.VMEM((N, H + 2, W + 2, C), jnp.float32),   # padded activation
            pltpu.VMEM((N, H, W, 9 * C), jnp.float32),       # im2col patches
        ],
    )(x, w_in, b_in, w1, b1, g1, be1, w2, b2, g2, be2, w_out, b_out)

    out = out[:, :cout].reshape(N, H, W, cout)
    return jnp.transpose(out, (0, 3, 1, 2))          # -> NCHW, as in PyTorch


# --------------------------- parameters (PyTorch-like) ------------------------

def init_params(key, hidden_layers, hidden_size):
    """Deterministic init (PyTorch-style uniform(+-1/sqrt(fan_in))) in HWIO."""
    def conv_init(k, cin, cout):
        k1, k2 = jax.random.split(k)
        bound = 1.0 / jnp.sqrt(cin * 9.0)
        w = jax.random.uniform(k1, (3, 3, cin, cout), jnp.float32, -bound, bound)
        b = jax.random.uniform(k2, (cout,), jnp.float32, -bound, bound)
        return w, b

    keys = jax.random.split(key, hidden_layers * 2 + 2)
    params = {}
    params["in_w"], params["in_b"] = conv_init(keys[0], 6, hidden_size)
    blocks = []
    for i in range(hidden_layers):
        w1, b1 = conv_init(keys[1 + 2 * i], hidden_size, hidden_size)
        w2, b2 = conv_init(keys[2 + 2 * i], hidden_size, hidden_size)
        blocks.append(dict(
            w1=w1, b1=b1, g1=jnp.ones((hidden_size,), jnp.float32),
            be1=jnp.zeros((hidden_size,), jnp.float32),
            w2=w2, b2=b2, g2=jnp.ones((hidden_size,), jnp.float32),
            be2=jnp.zeros((hidden_size,), jnp.float32)))
    params["blocks"] = blocks
    params["out_w"], params["out_b"] = conv_init(keys[-1], hidden_size, 2)
    return params


# ------------------------------ pure-JAX reference ----------------------------

def _ref_conv(x, w, b):
    y = jax.lax.conv_general_dilated(
        x, w, window_strides=(1, 1), padding="SAME",
        dimension_numbers=("NHWC", "HWIO", "NHWC"))
    return y + b


def _ref_bn(x, gamma, beta):
    mean = jnp.mean(x, axis=(0, 1, 2), keepdims=True)
    var = jnp.mean((x - mean) ** 2, axis=(0, 1, 2), keepdims=True)
    return (x - mean) * jax.lax.rsqrt(var + BN_EPS) * gamma + beta


def chessnet_reference(x_nchw, params):
    x = jnp.transpose(x_nchw, (0, 2, 3, 1)).astype(jnp.float32)
    x = jnp.maximum(_ref_conv(x, params["in_w"], params["in_b"]), 0.0)
    for blk in params["blocks"]:
        h = _selu(_ref_bn(_ref_conv(x, blk["w1"], blk["b1"]), blk["g1"],
                          blk["be1"]))
        x = _selu(_ref_bn(_ref_conv(h, blk["w2"], blk["b2"]), blk["g2"],
                          blk["be2"]) + x)
    x = _ref_conv(x, params["out_w"], params["out_b"])
    return jnp.transpose(x, (0, 3, 1, 2))


# ----------------------------------- main --------------------------------------

if __name__ == "__main__":
    HIDDEN_LAYERS = 2     # small, consistent with ChessNet(hidden_layers=...)
    HIDDEN_SIZE = 32      # small, consistent with ChessNet(hidden_size=...)
    N, C, H, W = 2, 6, 8, 8   # chess board: 6 input planes, 8x8

    key = jax.random.PRNGKey(0)
    k_x, k_p = jax.random.split(key)
    x = jax.random.normal(k_x, (N, C, H, W), jnp.float32)
    params = init_params(k_p, HIDDEN_LAYERS, HIDDEN_SIZE)

    out = jax.jit(chessnet_forward)(x, params)
    out = jax.block_until_ready(out)
    assert out.shape == (N, 2, H, W), out.shape

    ref = jax.block_until_ready(chessnet_reference(x, params))
    assert jnp.allclose(out, ref, atol=2e-3, rtol=2e-3), (
        float(jnp.max(jnp.abs(out - ref))))

    print("KERNEL_OK")
</pallas_src>

<mosaic_0001>
module attributes {stable_mosaic.version = 11 : i64} {
  func.func @chessnet_kernel(%arg0: memref<2x8x8x32xf32, #tpu.memory_space<vmem>>, %arg1: memref<288x32xf32, #tpu.memory_space<vmem>>, %arg2: memref<1x32xf32, #tpu.memory_space<vmem>>, %arg3: memref<2x288x32xf32, #tpu.memory_space<vmem>>, %arg4: memref<2x1x32xf32, #tpu.memory_space<vmem>>, %arg5: memref<2x1x32xf32, #tpu.memory_space<vmem>>, %arg6: memref<2x1x32xf32, #tpu.memory_space<vmem>>, %arg7: memref<2x288x32xf32, #tpu.memory_space<vmem>>, %arg8: memref<2x1x32xf32, #tpu.memory_space<vmem>>, %arg9: memref<2x1x32xf32, #tpu.memory_space<vmem>>, %arg10: memref<2x1x32xf32, #tpu.memory_space<vmem>>, %arg11: memref<288x128xf32, #tpu.memory_space<vmem>>, %arg12: memref<1x128xf32, #tpu.memory_space<vmem>>, %arg13: memref<128x128xf32, #tpu.memory_space<vmem>>, %arg14: memref<2x10x10x32xf32, #tpu.memory_space<vmem>>, %arg15: memref<2x8x8x288xf32, #tpu.memory_space<vmem>>) attributes {dimension_semantics = [], scalar_prefetch = 0 : i64, scratch_operands = 2 : i64, tpu.core_type = #tpu.core_type<tc>} {
    %cst = arith.constant 0.000000e+00 : f32
    %0 = vector.broadcast %cst : f32 to vector<2x10x10x32xf32>
    %c0 = arith.constant 0 : index
    %c0_0 = arith.constant 0 : index
    %c0_1 = arith.constant 0 : index
    %c0_2 = arith.constant 0 : index
    %1 = vector.load %arg14[%c0, %c0_0, %c0_1, %c0_2] : memref<2x10x10x32xf32, #tpu.memory_space<vmem>>, vector<2x10x10x32xf32>
    tpu.vector_store %arg14[%c0, %c0_0, %c0_1, %c0_2], %0 {strides = array<i32>} : memref<2x10x10x32xf32, #tpu.memory_space<vmem>>, vector<2x10x10x32xf32>,
    %c0_3 = arith.constant 0 : index
    %c0_4 = arith.constant 0 : index
    %c0_5 = arith.constant 0 : index
    %c0_6 = arith.constant 0 : index
    %2 = vector.load %arg0[%c0_3, %c0_4, %c0_5, %c0_6] : memref<2x8x8x32xf32, #tpu.memory_space<vmem>>, vector<2x8x8x32xf32>
    %c0_7 = arith.constant 0 : index
    %c1 = arith.constant 1 : index
    %c1_8 = arith.constant 1 : index
    %c0_9 = arith.constant 0 : index
    %3 = vector.load %arg14[%c0_7, %c1, %c1_8, %c0_9] : memref<2x10x10x32xf32, #tpu.memory_space<vmem>>, vector<2x8x8x32xf32>
    tpu.vector_store %arg14[%c0_7, %c1, %c1_8, %c0_9], %2 {strides = array<i32>} : memref<2x10x10x32xf32, #tpu.memory_space<vmem>>, vector<2x8x8x32xf32>,
    %c0_10 = arith.constant 0 : index
    %c0_11 = arith.constant 0 : index
    %4 = vector.load %arg1[%c0_10, %c0_11] : memref<288x32xf32, #tpu.memory_space<vmem>>, vector<288x32xf32>
    %c0_12 = arith.constant 0 : index
    %c0_13 = arith.constant 0 : index
    %5 = vector.load %arg2[%c0_12, %c0_13] : memref<1x32xf32, #tpu.memory_space<vmem>>, vector<1x32xf32>
    %c0_14 = arith.constant 0 : index
    %c0_15 = arith.constant 0 : index
    %c0_16 = arith.constant 0 : index
    %c0_17 = arith.constant 0 : index
    %6 = vector.load %arg14[%c0_14, %c0_15, %c0_16, %c0_17] : memref<2x10x10x32xf32, #tpu.memory_space<vmem>>, vector<2x8x8x32xf32>
    %c0_18 = arith.constant 0 : index
    %c0_19 = arith.constant 0 : index
    %c0_20 = arith.constant 0 : index
    %c0_21 = arith.constant 0 : index
    %7 = vector.load %arg15[%c0_18, %c0_19, %c0_20, %c0_21] : memref<2x8x8x288xf32, #tpu.memory_space<vmem>>, vector<2x8x8x32xf32>
    tpu.vector_store %arg15[%c0_18, %c0_19, %c0_20, %c0_21], %6 {strides = array<i32>} : memref<2x8x8x288xf32, #tpu.memory_space<vmem>>, vector<2x8x8x32xf32>,
    %c0_22 = arith.constant 0 : index
    %c0_23 = arith.constant 0 : index
    %c1_24 = arith.constant 1 : index
    %c0_25 = arith.constant 0 : index
    %8 = vector.load %arg14[%c0_22, %c0_23, %c1_24, %c0_25] : memref<2x10x10x32xf32, #tpu.memory_space<vmem>>, vector<2x8x8x32xf32>
    %c0_26 = arith.constant 0 : index
    %c0_27 = arith.constant 0 : index
    %c0_28 = arith.constant 0 : index
    %c32 = arith.constant 32 : index
    %9 = vector.load %arg15[%c0_26, %c0_27, %c0_28, %c32] : memref<2x8x8x288xf32, #tpu.memory_space<vmem>>, vector<2x8x8x32xf32>
    tpu.vector_store %arg15[%c0_26, %c0_27, %c0_28, %c32], %8 {strides = array<i32>} : memref<2x8x8x288xf32, #tpu.memory_space<vmem>>, vector<2x8x8x32xf32>,
    %c0_29 = arith.constant 0 : index
    %c0_30 = arith.constant 0 : index
    %c2 = arith.constant 2 : index
    %c0_31 = arith.constant 0 : index
    %10 = vector.load %arg14[%c0_29, %c0_30, %c2, %c0_31] : memref<2x10x10x32xf32, #tpu.memory_space<vmem>>, vector<2x8x8x32xf32>
    %c0_32 = arith.constant 0 : index
    %c0_33 = arith.constant 0 : index
    %c0_34 = arith.constant 0 : index
    %c64 = arith.constant 64 : index
    %11 = vector.load %arg15[%c0_32, %c0_33, %c0_34, %c64] : memref<2x8x8x288xf32, #tpu.memory_space<vmem>>, vector<2x8x8x32xf32>
    tpu.vector_store %arg15[%c0_32, %c0_33, %c0_34, %c64], %10 {strides = array<i32>} : memref<2x8x8x288xf32, #tpu.memory_space<vmem>>, vector<2x8x8x32xf32>,
    %c0_35 = arith.constant 0 : index
    %c1_36 = arith.constant 1 : index
    %c0_37 = arith.constant 0 : index
    %c0_38 = arith.constant 0 : index
    %12 = vector.load %arg14[%c0_35, %c1_36, %c0_37, %c0_38] : memref<2x10x10x32xf32, #tpu.memory_space<vmem>>, vector<2x8x8x32xf32>
    %c0_39 = arith.constant 0 : index
    %c0_40 = arith.constant 0 : index
    %c0_41 = arith.constant 0 : index
    %c96 = arith.constant 96 : index
    %13 = vector.load %arg15[%c0_39, %c0_40, %c0_41, %c96] : memref<2x8x8x288xf32, #tpu.memory_space<vmem>>, vector<2x8x8x32xf32>
    tpu.vector_store %arg15[%c0_39, %c0_40, %c0_41, %c96], %12 {strides = array<i32>} : memref<2x8x8x288xf32, #tpu.memory_space<vmem>>, vector<2x8x8x32xf32>,
    %c0_42 = arith.constant 0 : index
    %c1_43 = arith.constant 1 : index
    %c1_44 = arith.constant 1 : index
    %c0_45 = arith.constant 0 : index
    %14 = vector.load %arg14[%c0_42, %c1_43, %c1_44, %c0_45] : memref<2x10x10x32xf32, #tpu.memory_space<vmem>>, vector<2x8x8x32xf32>
    %c0_46 = arith.constant 0 : index
    %c0_47 = arith.constant 0 : index
    %c0_48 = arith.constant 0 : index
    %c128 = arith.constant 128 : index
    %15 = vector.load %arg15[%c0_46, %c0_47, %c0_48, %c128] : memref<2x8x8x288xf32, #tpu.memory_space<vmem>>, vector<2x8x8x32xf32>
    tpu.vector_store %arg15[%c0_46, %c0_47, %c0_48, %c128], %14 {strides = array<i32>} : memref<2x8x8x288xf32, #tpu.memory_space<vmem>>, vector<2x8x8x32xf32>,
    %c0_49 = arith.constant 0 : index
    %c1_50 = arith.constant 1 : index
    %c2_51 = arith.constant 2 : index
    %c0_52 = arith.constant 0 : index
    %16 = vector.load %arg14[%c0_49, %c1_50, %c2_51, %c0_52] : memref<2x10x10x32xf32, #tpu.memory_space<vmem>>, vector<2x8x8x32xf32>
    %c0_53 = arith.constant 0 : index
    %c0_54 = arith.constant 0 : index
    %c0_55 = arith.constant 0 : index
    %c160 = arith.constant 160 : index
    %17 = vector.load %arg15[%c0_53, %c0_54, %c0_55, %c160] : memref<2x8x8x288xf32, #tpu.memory_space<vmem>>, vector<2x8x8x32xf32>
    tpu.vector_store %arg15[%c0_53, %c0_54, %c0_55, %c160], %16 {strides = array<i32>} : memref<2x8x8x288xf32, #tpu.memory_space<vmem>>, vector<2x8x8x32xf32>,
    %c0_56 = arith.constant 0 : index
    %c2_57 = arith.constant 2 : index
    %c0_58 = arith.constant 0 : index
    %c0_59 = arith.constant 0 : index
    %18 = vector.load %arg14[%c0_56, %c2_57, %c0_58, %c0_59] : memref<2x10x10x32xf32, #tpu.memory_space<vmem>>, vector<2x8x8x32xf32>
    %c0_60 = arith.constant 0 : index
    %c0_61 = arith.constant 0 : index
    %c0_62 = arith.constant 0 : index
    %c192 = arith.constant 192 : index
    %19 = vector.load %arg15[%c0_60, %c0_61, %c0_62, %c192] : memref<2x8x8x288xf32, #tpu.memory_space<vmem>>, vector<2x8x8x32xf32>
    tpu.vector_store %arg15[%c0_60, %c0_61, %c0_62, %c192], %18 {strides = array<i32>} : memref<2x8x8x288xf32, #tpu.memory_space<vmem>>, vector<2x8x8x32xf32>,
    %c0_63 = arith.constant 0 : index
    %c2_64 = arith.constant 2 : index
    %c1_65 = arith.constant 1 : index
    %c0_66 = arith.constant 0 : index
    %20 = vector.load %arg14[%c0_63, %c2_64, %c1_65, %c0_66] : memref<2x10x10x32xf32, #tpu.memory_space<vmem>>, vector<2x8x8x32xf32>
    %c0_67 = arith.constant 0 : index
    %c0_68 = arith.constant 0 : index
    %c0_69 = arith.constant 0 : index
    %c224 = arith.constant 224 : index
    %21 = vector.load %arg15[%c0_67, %c0_68, %c0_69, %c224] : memref<2x8x8x288xf32, #tpu.memory_space<vmem>>, vector<2x8x8x32xf32>
    tpu.vector_store %arg15[%c0_67, %c0_68, %c0_69, %c224], %20 {strides = array<i32>} : memref<2x8x8x288xf32, #tpu.memory_space<vmem>>, vector<2x8x8x32xf32>,
    %c0_70 = arith.constant 0 : index
    %c2_71 = arith.constant 2 : index
    %c2_72 = arith.constant 2 : index
    %c0_73 = arith.constant 0 : index
    %22 = vector.load %arg14[%c0_70, %c2_71, %c2_72, %c0_73] : memref<2x10x10x32xf32, #tpu.memory_space<vmem>>, vector<2x8x8x32xf32>
    %c0_74 = arith.constant 0 : index
    %c0_75 = arith.constant 0 : index
    %c0_76 = arith.constant 0 : index
    %c256 = arith.constant 256 : index
    %23 = vector.load %arg15[%c0_74, %c0_75, %c0_76, %c256] : memref<2x8x8x288xf32, #tpu.memory_space<vmem>>, vector<2x8x8x32xf32>
    tpu.vector_store %arg15[%c0_74, %c0_75, %c0_76, %c256], %22 {strides = array<i32>} : memref<2x8x8x288xf32, #tpu.memory_space<vmem>>, vector<2x8x8x32xf32>,
    %c0_77 = arith.constant 0 : index
    %c0_78 = arith.constant 0 : index
    %c0_79 = arith.constant 0 : index
    %c0_80 = arith.constant 0 : index
    %24 = vector.load %arg15[%c0_77, %c0_78, %c0_79, %c0_80] : memref<2x8x8x288xf32, #tpu.memory_space<vmem>>, vector<2x8x8x288xf32>
    %25 = vector.shape_cast %24 : vector<2x8x8x288xf32> to vector<128x288xf32>
    %cst_81 = arith.constant dense<0.000000e+00> : vector<128x32xf32>
    %26 = tpu.matmul %25, %4, %cst_81 {dimension_numbers = #tpu.dot_dimension_numbers<[1], [0], [0], [1], [0, 0, 1, 1], [], []>} : vector<128x288xf32>, vector<288x32xf32>, vector<128x32xf32> -> vector<128x32xf32>
    %27 = vector.broadcast %5 : vector<1x32xf32> to vector<128x32xf32>
    %28 = arith.addf %26, %27 : vector<128x32xf32>
    %cst_82 = arith.constant 0.000000e+00 : f32
    %29 = vector.broadcast %cst_82 : f32 to vector<128x32xf32>
    %30 = arith.maximumf %28, %29 : vector<128x32xf32>
    %31 = vector.shape_cast %30 : vector<128x32xf32> to vector<2x8x8x32xf32>
    %c0_83 = arith.constant 0 : index
    %c1_84 = arith.constant 1 : index
    %c1_85 = arith.constant 1 : index
    %c0_86 = arith.constant 0 : index
    %32 = vector.load %arg14[%c0_83, %c1_84, %c1_85, %c0_86] : memref<2x10x10x32xf32, #tpu.memory_space<vmem>>, vector<2x8x8x32xf32>
    tpu.vector_store %arg14[%c0_83, %c1_84, %c1_85, %c0_86], %31 {strides = array<i32>} : memref<2x10x10x32xf32, #tpu.memory_space<vmem>>, vector<2x8x8x32xf32>,
    %c0_87 = arith.constant 0 : index
    %c0_88 = arith.constant 0 : index
    %c0_89 = arith.constant 0 : index
    %33 = vector.load %arg3[%c0_87, %c0_88, %c0_89] : memref<2x288x32xf32, #tpu.memory_space<vmem>>, vector<1x288x32xf32>
    %34 = vector.shape_cast %33 : vector<1x288x32xf32> to vector<288x32xf32>
    %c0_90 = arith.constant 0 : index
    %c0_91 = arith.constant 0 : index
    %c0_92 = arith.constant 0 : index
    %35 = vector.load %arg4[%c0_90, %c0_91, %c0_92] : memref<2x1x32xf32, #tpu.memory_space<vmem>>, vector<1x1x32xf32>
    %36 = vector.shape_cast %35 : vector<1x1x32xf32> to vector<1x32xf32>
    %c0_93 = arith.constant 0 : index
    %c0_94 = arith.constant 0 : index
    %c0_95 = arith.constant 0 : index
    %c0_96 = arith.constant 0 : index
    %37 = vector.load %arg14[%c0_93, %c0_94, %c0_95, %c0_96] : memref<2x10x10x32xf32, #tpu.memory_space<vmem>>, vector<2x8x8x32xf32>
    %c0_97 = arith.constant 0 : index
    %c0_98 = arith.constant 0 : index
    %c0_99 = arith.constant 0 : index
    %c0_100 = arith.constant 0 : index
    %38 = vector.load %arg15[%c0_97, %c0_98, %c0_99, %c0_100] : memref<2x8x8x288xf32, #tpu.memory_space<vmem>>, vector<2x8x8x32xf32>
    tpu.vector_store %arg15[%c0_97, %c0_98, %c0_99, %c0_100], %37 {strides = array<i32>} : memref<2x8x8x288xf32, #tpu.memory_space<vmem>>, vector<2x8x8x32xf32>,
    %c0_101 = arith.constant 0 : index
    %c0_102 = arith.constant 0 : index
    %c1_103 = arith.constant 1 : index
    %c0_104 = arith.constant 0 : index
    %39 = vector.load %arg14[%c0_101, %c0_102, %c1_103, %c0_104] : memref<2x10x10x32xf32, #tpu.memory_space<vmem>>, vector<2x8x8x32xf32>
    %c0_105 = arith.constant 0 : index
    %c0_106 = arith.constant 0 : index
    %c0_107 = arith.constant 0 : index
    %c32_108 = arith.constant 32 : index
    %40 = vector.load %arg15[%c0_105, %c0_106, %c0_107, %c32_108] : memref<2x8x8x288xf32, #tpu.memory_space<vmem>>, vector<2x8x8x32xf32>
    tpu.vector_store %arg15[%c0_105, %c0_106, %c0_107, %c32_108], %39 {strides = array<i32>} : memref<2x8x8x288xf32, #tpu.memory_space<vmem>>, vector<2x8x8x32xf32>,
    %c0_109 = arith.constant 0 : index
    %c0_110 = arith.constant 0 : index
    %c2_111 = arith.constant 2 : index
    %c0_112 = arith.constant 0 : index
    %41 = vector.load %arg14[%c0_109, %c0_110, %c2_111, %c0_112] : memref<2x10x10x32xf32, #tpu.memory_space<vmem>>, vector<2x8x8x32xf32>
    %c0_113 = arith.constant 0 : index
    %c0_114 = arith.constant 0 : index
    %c0_115 = arith.constant 0 : index
    %c64_116 = arith.constant 64 : index
    %42 = vector.load %arg15[%c0_113, %c0_114, %c0_115, %c64_116] : memref<2x8x8x288xf32, #tpu.memory_space<vmem>>, vector<2x8x8x32xf32>
    tpu.vector_store %arg15[%c0_113, %c0_114, %c0_115, %c64_116], %41 {strides = array<i32>} : memref<2x8x8x288xf32, #tpu.memory_space<vmem>>, vector<2x8x8x32xf32>,
    %c0_117 = arith.constant 0 : index
    %c1_118 = arith.constant 1 : index
    %c0_119 = arith.constant 0 : index
    %c0_120 = arith.constant 0 : index
    %43 = vector.load %arg14[%c0_117, %c1_118, %c0_119, %c0_120] : memref<2x10x10x32xf32, #tpu.memory_space<vmem>>, vector<2x8x8x32xf32>
    %c0_121 = arith.constant 0 : index
    %c0_122 = arith.constant 0 : index
    %c0_123 = arith.constant 0 : index
    %c96_124 = arith.constant 96 : index
    %44 = vector.load %arg15[%c0_121, %c0_122, %c0_123, %c96_124] : memref<2x8x8x288xf32, #tpu.memory_space<vmem>>, vector<2x8x8x32xf32>
    tpu.vector_store %arg15[%c0_121, %c0_122, %c0_123, %c96_124], %43 {strides = array<i32>} : memref<2x8x8x288xf32, #tpu.memory_space<vmem>>, vector<2x8x8x32xf32>,
    %c0_125 = arith.constant 0 : index
    %c1_126 = arith.constant 1 : index
    %c1_127 = arith.constant 1 : index
    %c0_128 = arith.constant 0 : index
    %45 = vector.load %arg14[%c0_125, %c1_126, %c1_127, %c0_128] : memref<2x10x10x32xf32, #tpu.memory_space<vmem>>, vector<2x8x8x32xf32>
    %c0_129 = arith.constant 0 : index
    %c0_130 = arith.constant 0 : index
    %c0_131 = arith.constant 0 : index
    %c128_132 = arith.constant 128 : index
    %46 = vector.load %arg15[%c0_129, %c0_130, %c0_131, %c128_132] : memref<2x8x8x288xf32, #tpu.memory_space<vmem>>, vector<2x8x8x32xf32>
    tpu.vector_store %arg15[%c0_129, %c0_130, %c0_131, %c128_132], %45 {strides = array<i32>} : memref<2x8x8x288xf32, #tpu.memory_space<vmem>>, vector<2x8x8x32xf32>,
    %c0_133 = arith.constant 0 : index
    %c1_134 = arith.constant 1 : index
    %c2_135 = arith.constant 2 : index
    %c0_136 = arith.constant 0 : index
    %47 = vector.load %arg14[%c0_133, %c1_134, %c2_135, %c0_136] : memref<2x10x10x32xf32, #tpu.memory_space<vmem>>, vector<2x8x8x32xf32>
    %c0_137 = arith.constant 0 : index
    %c0_138 = arith.constant 0 : index
    %c0_139 = arith.constant 0 : index
    %c160_140 = arith.constant 160 : index
    %48 = vector.load %arg15[%c0_137, %c0_138, %c0_139, %c160_140] : memref<2x8x8x288xf32, #tpu.memory_space<vmem>>, vector<2x8x8x32xf32>
    tpu.vector_store %arg15[%c0_137, %c0_138, %c0_139, %c160_140], %47 {strides = array<i32>} : memref<2x8x8x288xf32, #tpu.memory_space<vmem>>, vector<2x8x8x32xf32>,
    %c0_141 = arith.constant 0 : index
    %c2_142 = arith.constant 2 : index
    %c0_143 = arith.constant 0 : index
    %c0_144 = arith.constant 0 : index
    %49 = vector.load %arg14[%c0_141, %c2_142, %c0_143, %c0_144] : memref<2x10x10x32xf32, #tpu.memory_space<vmem>>, vector<2x8x8x32xf32>
    %c0_145 = arith.constant 0 : index
    %c0_146 = arith.constant 0 : index
    %c0_147 = arith.constant 0 : index
    %c192_148 = arith.constant 192 : index
    %50 = vector.load %arg15[%c0_145, %c0_146, %c0_147, %c192_148] : memref<2x8x8x288xf32, #tpu.memory_space<vmem>>, vector<2x8x8x32xf32>
    tpu.vector_store %arg15[%c0_145, %c0_146, %c0_147, %c192_148], %49 {strides = array<i32>} : memref<2x8x8x288xf32, #tpu.memory_space<vmem>>, vector<2x8x8x32xf32>,
    %c0_149 = arith.constant 0 : index
    %c2_150 = arith.constant 2 : index
    %c1_151 = arith.constant 1 : index
    %c0_152 = arith.constant 0 : index
    %51 = vector.load %arg14[%c0_149, %c2_150, %c1_151, %c0_152] : memref<2x10x10x32xf32, #tpu.memory_space<vmem>>, vector<2x8x8x32xf32>
    %c0_153 = arith.constant 0 : index
    %c0_154 = arith.constant 0 : index
    %c0_155 = arith.constant 0 : index
    %c224_156 = arith.constant 224 : index
    %52 = vector.load %arg15[%c0_153, %c0_154, %c0_155, %c224_156] : memref<2x8x8x288xf32, #tpu.memory_space<vmem>>, vector<2x8x8x32xf32>
    tpu.vector_store %arg15[%c0_153, %c0_154, %c0_155, %c224_156], %51 {strides = array<i32>} : memref<2x8x8x288xf32, #tpu.memory_space<vmem>>, vector<2x8x8x32xf32>,
    %c0_157 = arith.constant 0 : index
    %c2_158 = arith.constant 2 : index
    %c2_159 = arith.constant 2 : index
    %c0_160 = arith.constant 0 : index
    %53 = vector.load %arg14[%c0_157, %c2_158, %c2_159, %c0_160] : memref<2x10x10x32xf32, #tpu.memory_space<vmem>>, vector<2x8x8x32xf32>
    %c0_161 = arith.constant 0 : index
    %c0_162 = arith.constant 0 : index
    %c0_163 = arith.constant 0 : index
    %c256_164 = arith.constant 256 : index
    %54 = vector.load %arg15[%c0_161, %c0_162, %c0_163, %c256_164] : memref<2x8x8x288xf32, #tpu.memory_space<vmem>>, vector<2x8x8x32xf32>
    tpu.vector_store %arg15[%c0_161, %c0_162, %c0_163, %c256_164], %53 {strides = array<i32>} : memref<2x8x8x288xf32, #tpu.memory_space<vmem>>, vector<2x8x8x32xf32>,
    %c0_165 = arith.constant 0 : index
    %c0_166 = arith.constant 0 : index
    %c0_167 = arith.constant 0 : index
    %c0_168 = arith.constant 0 : index
    %55 = vector.load %arg15[%c0_165, %c0_166, %c0_167, %c0_168] : memref<2x8x8x288xf32, #tpu.memory_space<vmem>>, vector<2x8x8x288xf32>
    %56 = vector.shape_cast %55 : vector<2x8x8x288xf32> to vector<128x288xf32>
    %cst_169 = arith.constant dense<0.000000e+00> : vector<128x32xf32>
    %57 = tpu.matmul %56, %34, %cst_169 {dimension_numbers = #tpu.dot_dimension_numbers<[1], [0], [0], [1], [0, 0, 1, 1], [], []>} : vector<128x288xf32>, vector<288x32xf32>, vector<128x32xf32> -> vector<128x32xf32>
    %58 = vector.broadcast %36 : vector<1x32xf32> to vector<128x32xf32>
    %59 = arith.addf %57, %58 : vector<128x32xf32>
    %c0_170 = arith.constant 0 : index
    %c0_171 = arith.constant 0 : index
    %c0_172 = arith.constant 0 : index
    %60 = vector.load %arg5[%c0_170, %c0_171, %c0_172] : memref<2x1x32xf32, #tpu.memory_space<vmem>>, vector<1x1x32xf32>
    %61 = vector.shape_cast %60 : vector<1x1x32xf32> to vector<1x32xf32>
    %c0_173 = arith.constant 0 : index
    %c0_174 = arith.constant 0 : index
    %c0_175 = arith.constant 0 : index
    %62 = vector.load %arg6[%c0_173, %c0_174, %c0_175] : memref<2x1x32xf32, #tpu.memory_space<vmem>>, vector<1x1x32xf32>
    %63 = vector.shape_cast %62 : vector<1x1x32xf32> to vector<1x32xf32>
    %cst_176 = arith.constant dense<0.000000e+00> : vector<32xf32>
    %64 = vector.multi_reduction <add>, %59, %cst_176 [0] : vector<128x32xf32> to vector<32xf32>
    %65 = vector.shape_cast %64 : vector<32xf32> to vector<1x32xf32>
    %cst_177 = arith.constant 7.812500e-03 : f32
    %66 = vector.broadcast %cst_177 : f32 to vector<1x32xf32>
    %67 = arith.mulf %65, %66 : vector<1x32xf32>
    %68 = arith.mulf %59, %59 : vector<128x32xf32>
    %cst_178 = arith.constant dense<0.000000e+00> : vector<32xf32>
    %69 = vector.multi_reduction <add>, %68, %cst_178 [0] : vector<128x32xf32> to vector<32xf32>
    %70 = vector.shape_cast %69 : vector<32xf32> to vector<1x32xf32>
    %cst_179 = arith.constant 7.812500e-03 : f32
    %71 = vector.broadcast %cst_179 : f32 to vector<1x32xf32>
    %72 = arith.mulf %70, %71 : vector<1x32xf32>
    %73 = arith.mulf %67, %67 : vector<1x32xf32>
    %74 = arith.subf %72, %73 : vector<1x32xf32>
    %cst_180 = arith.constant 9.99999974E-6 : f32
    %75 = vector.broadcast %cst_180 : f32 to vector<1x32xf32>
    %76 = arith.addf %74, %75 : vector<1x32xf32>
    %77 = math.rsqrt %76 : vector<1x32xf32>
    %78 = arith.mulf %61, %77 : vector<1x32xf32>
    %79 = arith.mulf %67, %78 : vector<1x32xf32>
    %80 = arith.subf %63, %79 : vector<1x32xf32>
    %81 = vector.broadcast %78 : vector<1x32xf32> to vector<128x32xf32>
    %82 = arith.mulf %59, %81 : vector<128x32xf32>
    %83 = vector.broadcast %80 : vector<1x32xf32> to vector<128x32xf32>
    %84 = arith.addf %82, %83 : vector<128x32xf32>
    %cst_181 = arith.constant 0.000000e+00 : f32
    %85 = vector.broadcast %cst_181 : f32 to vector<128x32xf32>
    %86 = arith.cmpf ogt, %84, %85 : vector<128x32xf32>
    %87 = math.exp %84 : vector<128x32xf32>
    %cst_182 = arith.constant 1.000000e+00 : f32
    %88 = vector.broadcast %cst_182 : f32 to vector<128x32xf32>
    %89 = arith.subf %87, %88 : vector<128x32xf32>
    %cst_183 = arith.constant 1.67326319 : f32
    %90 = vector.broadcast %cst_183 : f32 to vector<128x32xf32>
    %91 = arith.mulf %90, %89 : vector<128x32xf32>
    %92 = arith.select %86, %84, %91 : vector<128x32xi1>, vector<128x32xf32>
    %cst_184 = arith.constant 1.05070102 : f32
    %93 = vector.broadcast %cst_184 : f32 to vector<128x32xf32>
    %94 = arith.mulf %93, %92 : vector<128x32xf32>
    %95 = vector.shape_cast %94 : vector<128x32xf32> to vector<2x8x8x32xf32>
    %c0_185 = arith.constant 0 : index
    %c1_186 = arith.constant 1 : index
    %c1_187 = arith.constant 1 : index
    %c0_188 = arith.constant 0 : index
    %96 = vector.load %arg14[%c0_185, %c1_186, %c1_187, %c0_188] : memref<2x10x10x32xf32, #tpu.memory_space<vmem>>, vector<2x8x8x32xf32>
    tpu.vector_store %arg14[%c0_185, %c1_186, %c1_187, %c0_188], %95 {strides = array<i32>} : memref<2x10x10x32xf32, #tpu.memory_space<vmem>>, vector<2x8x8x32xf32>,
    %c0_189 = arith.constant 0 : index
    %c0_190 = arith.constant 0 : index
    %c0_191 = arith.constant 0 : index
    %97 = vector.load %arg7[%c0_189, %c0_190, %c0_191] : memref<2x288x32xf32, #tpu.memory_space<vmem>>, vector<1x288x32xf32>
    %98 = vector.shape_cast %97 : vector<1x288x32xf32> to vector<288x32xf32>
    %c0_192 = arith.constant 0 : index
    %c0_193 = arith.constant 0 : index
    %c0_194 = arith.constant 0 : index
    %99 = vector.load %arg8[%c0_192, %c0_193, %c0_194] : memref<2x1x32xf32, #tpu.memory_space<vmem>>, vector<1x1x32xf32>
    %100 = vector.shape_cast %99 : vector<1x1x32xf32> to vector<1x32xf32>
    %c0_195 = arith.constant 0 : index
    %c0_196 = arith.constant 0 : index
    %c0_197 = arith.constant 0 : index
    %c0_198 = arith.constant 0 : index
    %101 = vector.load %arg14[%c0_195, %c0_196, %c0_197, %c0_198] : memref<2x10x10x32xf32, #tpu.memory_space<vmem>>, vector<2x8x8x32xf32>
    %c0_199 = arith.constant 0 : index
    %c0_200 = arith.constant 0 : index
    %c0_201 = arith.constant 0 : index
    %c0_202 = arith.constant 0 : index
    %102 = vector.load %arg15[%c0_199, %c0_200, %c0_201, %c0_202] : memref<2x8x8x288xf32, #tpu.memory_space<vmem>>, vector<2x8x8x32xf32>
    tpu.vector_store %arg15[%c0_199, %c0_200, %c0_201, %c0_202], %101 {strides = array<i32>} : memref<2x8x8x288xf32, #tpu.memory_space<vmem>>, vector<2x8x8x32xf32>,
    %c0_203 = arith.constant 0 : index
    %c0_204 = arith.constant 0 : index
    %c1_205 = arith.constant 1 : index
    %c0_206 = arith.constant 0 : index
    %103 = vector.load %arg14[%c0_203, %c0_204, %c1_205, %c0_206] : memref<2x10x10x32xf32, #tpu.memory_space<vmem>>, vector<2x8x8x32xf32>
    %c0_207 = arith.constant 0 : index
    %c0_208 = arith.constant 0 : index
    %c0_209 = arith.constant 0 : index
    %c32_210 = arith.constant 32 : index
    %104 = vector.load %arg15[%c0_207, %c0_208, %c0_209, %c32_210] : memref<2x8x8x288xf32, #tpu.memory_space<vmem>>, vector<2x8x8x32xf32>
    tpu.vector_store %arg15[%c0_207, %c0_208, %c0_209, %c32_210], %103 {strides = array<i32>} : memref<2x8x8x288xf32, #tpu.memory_space<vmem>>, vector<2x8x8x32xf32>,
    %c0_211 = arith.constant 0 : index
    %c0_212 = arith.constant 0 : index
    %c2_213 = arith.constant 2 : index
    %c0_214 = arith.constant 0 : index
    %105 = vector.load %arg14[%c0_211, %c0_212, %c2_213, %c0_214] : memref<2x10x10x32xf32, #tpu.memory_space<vmem>>, vector<2x8x8x32xf32>
    %c0_215 = arith.constant 0 : index
    %c0_216 = arith.constant 0 : index
    %c0_217 = arith.constant 0 : index
    %c64_218 = arith.constant 64 : index
    %106 = vector.load %arg15[%c0_215, %c0_216, %c0_217, %c64_218] : memref<2x8x8x288xf32, #tpu.memory_space<vmem>>, vector<2x8x8x32xf32>
    tpu.vector_store %arg15[%c0_215, %c0_216, %c0_217, %c64_218], %105 {strides = array<i32>} : memref<2x8x8x288xf32, #tpu.memory_space<vmem>>, vector<2x8x8x32xf32>,
    %c0_219 = arith.constant 0 : index
    %c1_220 = arith.constant 1 : index
    %c0_221 = arith.constant 0 : index
    %c0_222 = arith.constant 0 : index
    %107 = vector.load %arg14[%c0_219, %c1_220, %c0_221, %c0_222] : memref<2x10x10x32xf32, #tpu.memory_space<vmem>>, vector<2x8x8x32xf32>
    %c0_223 = arith.constant 0 : index
    %c0_224 = arith.constant 0 : index
    %c0_225 = arith.constant 0 : index
    %c96_226 = arith.constant 96 : index
    %108 = vector.load %arg15[%c0_223, %c0_224, %c0_225, %c96_226] : memref<2x8x8x288xf32, #tpu.memory_space<vmem>>, vector<2x8x8x32xf32>
    tpu.vector_store %arg15[%c0_223, %c0_224, %c0_225, %c96_226], %107 {strides = array<i32>} : memref<2x8x8x288xf32, #tpu.memory_space<vmem>>, vector<2x8x8x32xf32>,
    %c0_227 = arith.constant 0 : index
    %c1_228 = arith.constant 1 : index
    %c1_229 = arith.constant 1 : index
    %c0_230 = arith.constant 0 : index
    %109 = vector.load %arg14[%c0_227, %c1_228, %c1_229, %c0_230] : memref<2x10x10x32xf32, #tpu.memory_space<vmem>>, vector<2x8x8x32xf32>
    %c0_231 = arith.constant 0 : index
    %c0_232 = arith.constant 0 : index
    %c0_233 = arith.constant 0 : index
    %c128_234 = arith.constant 128 : index
    %110 = vector.load %arg15[%c0_231, %c0_232, %c0_233, %c128_234] : memref<2x8x8x288xf32, #tpu.memory_space<vmem>>, vector<2x8x8x32xf32>
    tpu.vector_store %arg15[%c0_231, %c0_232, %c0_233, %c128_234], %109 {strides = array<i32>} : memref<2x8x8x288xf32, #tpu.memory_space<vmem>>, vector<2x8x8x32xf32>,
    %c0_235 = arith.constant 0 : index
    %c1_236 = arith.constant 1 : index
    %c2_237 = arith.constant 2 : index
    %c0_238 = arith.constant 0 : index
    %111 = vector.load %arg14[%c0_235, %c1_236, %c2_237, %c0_238] : memref<2x10x10x32xf32, #tpu.memory_space<vmem>>, vector<2x8x8x32xf32>
    %c0_239 = arith.constant 0 : index
    %c0_240 = arith.constant 0 : index
    %c0_241 = arith.constant 0 : index
    %c160_242 = arith.constant 160 : index
    %112 = vector.load %arg15[%c0_239, %c0_240, %c0_241, %c160_242] : memref<2x8x8x288xf32, #tpu.memory_space<vmem>>, vector<2x8x8x32xf32>
    tpu.vector_store %arg15[%c0_239, %c0_240, %c0_241, %c160_242], %111 {strides = array<i32>} : memref<2x8x8x288xf32, #tpu.memory_space<vmem>>, vector<2x8x8x32xf32>,
    %c0_243 = arith.constant 0 : index
    %c2_244 = arith.constant 2 : index
    %c0_245 = arith.constant 0 : index
    %c0_246 = arith.constant 0 : index
    %113 = vector.load %arg14[%c0_243, %c2_244, %c0_245, %c0_246] : memref<2x10x10x32xf32, #tpu.memory_space<vmem>>, vector<2x8x8x32xf32>
    %c0_247 = arith.constant 0 : index
    %c0_248 = arith.constant 0 : index
    %c0_249 = arith.constant 0 : index
    %c192_250 = arith.constant 192 : index
    %114 = vector.load %arg15[%c0_247, %c0_248, %c0_249, %c192_250] : memref<2x8x8x288xf32, #tpu.memory_space<vmem>>, vector<2x8x8x32xf32>
    tpu.vector_store %arg15[%c0_247, %c0_248, %c0_249, %c192_250], %113 {strides = array<i32>} : memref<2x8x8x288xf32, #tpu.memory_space<vmem>>, vector<2x8x8x32xf32>,
    %c0_251 = arith.constant 0 : index
    %c2_252 = arith.constant 2 : index
    %c1_253 = arith.constant 1 : index
    %c0_254 = arith.constant 0 : index
    %115 = vector.load %arg14[%c0_251, %c2_252, %c1_253, %c0_254] : memref<2x10x10x32xf32, #tpu.memory_space<vmem>>, vector<2x8x8x32xf32>
    %c0_255 = arith.constant 0 : index
    %c0_256 = arith.constant 0 : index
    %c0_257 = arith.constant 0 : index
    %c224_258 = arith.constant 224 : index
    %116 = vector.load %arg15[%c0_255, %c0_256, %c0_257, %c224_258] : memref<2x8x8x288xf32, #tpu.memory_space<vmem>>, vector<2x8x8x32xf32>
    tpu.vector_store %arg15[%c0_255, %c0_256, %c0_257, %c224_258], %115 {strides = array<i32>} : memref<2x8x8x288xf32, #tpu.memory_space<vmem>>, vector<2x8x8x32xf32>,
    %c0_259 = arith.constant 0 : index
    %c2_260 = arith.constant 2 : index
    %c2_261 = arith.constant 2 : index
    %c0_262 = arith.constant 0 : index
    %117 = vector.load %arg14[%c0_259, %c2_260, %c2_261, %c0_262] : memref<2x10x10x32xf32, #tpu.memory_space<vmem>>, vector<2x8x8x32xf32>
    %c0_263 = arith.constant 0 : index
    %c0_264 = arith.constant 0 : index
    %c0_265 = arith.constant 0 : index
    %c256_266 = arith.constant 256 : index
    %118 = vector.load %arg15[%c0_263, %c0_264, %c0_265, %c256_266] : memref<2x8x8x288xf32, #tpu.memory_space<vmem>>, vector<2x8x8x32xf32>
    tpu.vector_store %arg15[%c0_263, %c0_264, %c0_265, %c256_266], %117 {strides = array<i32>} : memref<2x8x8x288xf32, #tpu.memory_space<vmem>>, vector<2x8x8x32xf32>,
    %c0_267 = arith.constant 0 : index
    %c0_268 = arith.constant 0 : index
    %c0_269 = arith.constant 0 : index
    %c0_270 = arith.constant 0 : index
    %119 = vector.load %arg15[%c0_267, %c0_268, %c0_269, %c0_270] : memref<2x8x8x288xf32, #tpu.memory_space<vmem>>, vector<2x8x8x288xf32>
    %120 = vector.shape_cast %119 : vector<2x8x8x288xf32> to vector<128x288xf32>
    %cst_271 = arith.constant dense<0.000000e+00> : vector<128x32xf32>
    %121 = tpu.matmul %120, %98, %cst_271 {dimension_numbers = #tpu.dot_dimension_numbers<[1], [0], [0], [1], [0, 0, 1, 1], [], []>} : vector<128x288xf32>, vector<288x32xf32>, vector<128x32xf32> -> vector<128x32xf32>
    %122 = vector.broadcast %100 : vector<1x32xf32> to vector<128x32xf32>
    %123 = arith.addf %121, %122 : vector<128x32xf32>
    %c0_272 = arith.constant 0 : index
    %c0_273 = arith.constant 0 : index
    %c0_274 = arith.constant 0 : index
    %124 = vector.load %arg9[%c0_272, %c0_273, %c0_274] : memref<2x1x32xf32, #tpu.memory_space<vmem>>, vector<1x1x32xf32>
    %125 = vector.shape_cast %124 : vector<1x1x32xf32> to vector<1x32xf32>
    %c0_275 = arith.constant 0 : index
    %c0_276 = arith.constant 0 : index
    %c0_277 = arith.constant 0 : index
    %126 = vector.load %arg10[%c0_275, %c0_276, %c0_277] : memref<2x1x32xf32, #tpu.memory_space<vmem>>, vector<1x1x32xf32>
    %127 = vector.shape_cast %126 : vector<1x1x32xf32> to vector<1x32xf32>
    %cst_278 = arith.constant dense<0.000000e+00> : vector<32xf32>
    %128 = vector.multi_reduction <add>, %123, %cst_278 [0] : vector<128x32xf32> to vector<32xf32>
    %129 = vector.shape_cast %128 : vector<32xf32> to vector<1x32xf32>
    %cst_279 = arith.constant 7.812500e-03 : f32
    %130 = vector.broadcast %cst_279 : f32 to vector<1x32xf32>
    %131 = arith.mulf %129, %130 : vector<1x32xf32>
    %132 = arith.mulf %123, %123 : vector<128x32xf32>
    %cst_280 = arith.constant dense<0.000000e+00> : vector<32xf32>
    %133 = vector.multi_reduction <add>, %132, %cst_280 [0] : vector<128x32xf32> to vector<32xf32>
    %134 = vector.shape_cast %133 : vector<32xf32> to vector<1x32xf32>
    %cst_281 = arith.constant 7.812500e-03 : f32
    %135 = vector.broadcast %cst_281 : f32 to vector<1x32xf32>
    %136 = arith.mulf %134, %135 : vector<1x32xf32>
    %137 = arith.mulf %131, %131 : vector<1x32xf32>
    %138 = arith.subf %136, %137 : vector<1x32xf32>
    %cst_282 = arith.constant 9.99999974E-6 : f32
    %139 = vector.broadcast %cst_282 : f32 to vector<1x32xf32>
    %140 = arith.addf %138, %139 : vector<1x32xf32>
    %141 = math.rsqrt %140 : vector<1x32xf32>
    %142 = arith.mulf %125, %141 : vector<1x32xf32>
    %143 = arith.mulf %131, %142 : vector<1x32xf32>
    %144 = arith.subf %127, %143 : vector<1x32xf32>
    %145 = vector.broadcast %142 : vector<1x32xf32> to vector<128x32xf32>
    %146 = arith.mulf %123, %145 : vector<128x32xf32>
    %147 = vector.broadcast %144 : vector<1x32xf32> to vector<128x32xf32>
    %148 = arith.addf %146, %147 : vector<128x32xf32>
    %149 = arith.addf %148, %30 : vector<128x32xf32>
    %cst_283 = arith.constant 0.000000e+00 : f32
    %150 = vector.broadcast %cst_283 : f32 to vector<128x32xf32>
    %151 = arith.cmpf ogt, %149, %150 : vector<128x32xf32>
    %152 = math.exp %149 : vector<128x32xf32>
    %cst_284 = arith.constant 1.000000e+00 : f32
    %153 = vector.broadcast %cst_284 : f32 to vector<128x32xf32>
    %154 = arith.subf %152, %153 : vector<128x32xf32>
    %cst_285 = arith.constant 1.67326319 : f32
    %155 = vector.broadcast %cst_285 : f32 to vector<128x32xf32>
    %156 = arith.mulf %155, %154 : vector<128x32xf32>
    %157 = arith.select %151, %149, %156 : vector<128x32xi1>, vector<128x32xf32>
    %cst_286 = arith.constant 1.05070102 : f32
    %158 = vector.broadcast %cst_286 : f32 to vector<128x32xf32>
    %159 = arith.mulf %158, %157 : vector<128x32xf32>
    %160 = vector.shape_cast %159 : vector<128x32xf32> to vector<2x8x8x32xf32>
    %c0_287 = arith.constant 0 : index
    %c1_288 = arith.constant 1 : index
    %c1_289 = arith.constant 1 : index
    %c0_290 = arith.constant 0 : index
    %161 = vector.load %arg14[%c0_287, %c1_288, %c1_289, %c0_290] : memref<2x10x10x32xf32, #tpu.memory_space<vmem>>, vector<2x8x8x32xf32>
    tpu.vector_store %arg14[%c0_287, %c1_288, %c1_289, %c0_290], %160 {strides = array<i32>} : memref<2x10x10x32xf32, #tpu.memory_space<vmem>>, vector<2x8x8x32xf32>,
    %c1_291 = arith.constant 1 : index
    %c0_292 = arith.constant 0 : index
    %c0_293 = arith.constant 0 : index
    %162 = vector.load %arg3[%c1_291, %c0_292, %c0_293] : memref<2x288x32xf32, #tpu.memory_space<vmem>>, vector<1x288x32xf32>
    %163 = vector.shape_cast %162 : vector<1x288x32xf32> to vector<288x32xf32>
    %c1_294 = arith.constant 1 : index
    %c0_295 = arith.constant 0 : index
    %c0_296 = arith.constant 0 : index
    %164 = vector.load %arg4[%c1_294, %c0_295, %c0_296] : memref<2x1x32xf32, #tpu.memory_space<vmem>>, vector<1x1x32xf32>
    %165 = vector.shape_cast %164 : vector<1x1x32xf32> to vector<1x32xf32>
    %c0_297 = arith.constant 0 : index
    %c0_298 = arith.constant 0 : index
    %c0_299 = arith.constant 0 : index
    %c0_300 = arith.constant 0 : index
    %166 = vector.load %arg14[%c0_297, %c0_298, %c0_299, %c0_300] : memref<2x10x10x32xf32, #tpu.memory_space<vmem>>, vector<2x8x8x32xf32>
    %c0_301 = arith.constant 0 : index
    %c0_302 = arith.constant 0 : index
    %c0_303 = arith.constant 0 : index
    %c0_304 = arith.constant 0 : index
    %167 = vector.load %arg15[%c0_301, %c0_302, %c0_303, %c0_304] : memref<2x8x8x288xf32, #tpu.memory_space<vmem>>, vector<2x8x8x32xf32>
    tpu.vector_store %arg15[%c0_301, %c0_302, %c0_303, %c0_304], %166 {strides = array<i32>} : memref<2x8x8x288xf32, #tpu.memory_space<vmem>>, vector<2x8x8x32xf32>,
    %c0_305 = arith.constant 0 : index
    %c0_306 = arith.constant 0 : index
    %c1_307 = arith.constant 1 : index
    %c0_308 = arith.constant 0 : index
    %168 = vector.load %arg14[%c0_305, %c0_306, %c1_307, %c0_308] : memref<2x10x10x32xf32, #tpu.memory_space<vmem>>, vector<2x8x8x32xf32>
    %c0_309 = arith.constant 0 : index
    %c0_310 = arith.constant 0 : index
    %c0_311 = arith.constant 0 : index
    %c32_312 = arith.constant 32 : index
    %169 = vector.load %arg15[%c0_309, %c0_310, %c0_311, %c32_312] : memref<2x8x8x288xf32, #tpu.memory_space<vmem>>, vector<2x8x8x32xf32>
    tpu.vector_store %arg15[%c0_309, %c0_310, %c0_311, %c32_312], %168 {strides = array<i32>} : memref<2x8x8x288xf32, #tpu.memory_space<vmem>>, vector<2x8x8x32xf32>,
    %c0_313 = arith.constant 0 : index
    %c0_314 = arith.constant 0 : index
    %c2_315 = arith.constant 2 : index
    %c0_316 = arith.constant 0 : index
    %170 = vector.load %arg14[%c0_313, %c0_314, %c2_315, %c0_316] : memref<2x10x10x32xf32, #tpu.memory_space<vmem>>, vector<2x8x8x32xf32>
    %c0_317 = arith.constant 0 : index
    %c0_318 = arith.constant 0 : index
    %c0_319 = arith.constant 0 : index
    %c64_320 = arith.constant 64 : index
    %171 = vector.load %arg15[%c0_317, %c0_318, %c0_319, %c64_320] : memref<2x8x8x288xf32, #tpu.memory_space<vmem>>, vector<2x8x8x32xf32>
    tpu.vector_store %arg15[%c0_317, %c0_318, %c0_319, %c64_320], %170 {strides = array<i32>} : memref<2x8x8x288xf32, #tpu.memory_space<vmem>>, vector<2x8x8x32xf32>,
    %c0_321 = arith.constant 0 : index
    %c1_322 = arith.constant 1 : index
    %c0_323 = arith.constant 0 : index
    %c0_324 = arith.constant 0 : index
    %172 = vector.load %arg14[%c0_321, %c1_322, %c0_323, %c0_324] : memref<2x10x10x32xf32, #tpu.memory_space<vmem>>, vector<2x8x8x32xf32>
    %c0_325 = arith.constant 0 : index
    %c0_326 = arith.constant 0 : index
    %c0_327 = arith.constant 0 : index
    %c96_328 = arith.constant 96 : index
    %173 = vector.load %arg15[%c0_325, %c0_326, %c0_327, %c96_328] : memref<2x8x8x288xf32, #tpu.memory_space<vmem>>, vector<2x8x8x32xf32>
    tpu.vector_store %arg15[%c0_325, %c0_326, %c0_327, %c96_328], %172 {strides = array<i32>} : memref<2x8x8x288xf32, #tpu.memory_space<vmem>>, vector<2x8x8x32xf32>,
    %c0_329 = arith.constant 0 : index
    %c1_330 = arith.constant 1 : index
    %c1_331 = arith.constant 1 : index
    %c0_332 = arith.constant 0 : index
    %174 = vector.load %arg14[%c0_329, %c1_330, %c1_331, %c0_332] : memref<2x10x10x32xf32, #tpu.memory_space<vmem>>, vector<2x8x8x32xf32>
    %c0_333 = arith.constant 0 : index
    %c0_334 = arith.constant 0 : index
    %c0_335 = arith.constant 0 : index
    %c128_336 = arith.constant 128 : index
    %175 = vector.load %arg15[%c0_333, %c0_334, %c0_335, %c128_336] : memref<2x8x8x288xf32, #tpu.memory_space<vmem>>, vector<2x8x8x32xf32>
    tpu.vector_store %arg15[%c0_333, %c0_334, %c0_335, %c128_336], %174 {strides = array<i32>} : memref<2x8x8x288xf32, #tpu.memory_space<vmem>>, vector<2x8x8x32xf32>,
    %c0_337 = arith.constant 0 : index
    %c1_338 = arith.constant 1 : index
    %c2_339 = arith.constant 2 : index
    %c0_340 = arith.constant 0 : index
    %176 = vector.load %arg14[%c0_337, %c1_338, %c2_339, %c0_340] : memref<2x10x10x32xf32, #tpu.memory_space<vmem>>, vector<2x8x8x32xf32>
    %c0_341 = arith.constant 0 : index
    %c0_342 = arith.constant 0 : index
    %c0_343 = arith.constant 0 : index
    %c160_344 = arith.constant 160 : index
    %177 = vector.load %arg15[%c0_341, %c0_342, %c0_343, %c160_344] : memref<2x8x8x288xf32, #tpu.memory_space<vmem>>, vector<2x8x8x32xf32>
    tpu.vector_store %arg15[%c0_341, %c0_342, %c0_343, %c160_344], %176 {strides = array<i32>} : memref<2x8x8x288xf32, #tpu.memory_space<vmem>>, vector<2x8x8x32xf32>,
    %c0_345 = arith.constant 0 : index
    %c2_346 = arith.constant 2 : index
    %c0_347 = arith.constant 0 : index
    %c0_348 = arith.constant 0 : index
    %178 = vector.load %arg14[%c0_345, %c2_346, %c0_347, %c0_348] : memref<2x10x10x32xf32, #tpu.memory_space<vmem>>, vector<2x8x8x32xf32>
    %c0_349 = arith.constant 0 : index
    %c0_350 = arith.constant 0 : index
    %c0_351 = arith.constant 0 : index
    %c192_352 = arith.constant 192 : index
    %179 = vector.load %arg15[%c0_349, %c0_350, %c0_351, %c192_352] : memref<2x8x8x288xf32, #tpu.memory_space<vmem>>, vector<2x8x8x32xf32>
    tpu.vector_store %arg15[%c0_349, %c0_350, %c0_351, %c192_352], %178 {strides = array<i32>} : memref<2x8x8x288xf32, #tpu.memory_space<vmem>>, vector<2x8x8x32xf32>,
    %c0_353 = arith.constant 0 : index
    %c2_354 = arith.constant 2 : index
    %c1_355 = arith.constant 1 : index
    %c0_356 = arith.constant 0 : index
    %180 = vector.load %arg14[%c0_353, %c2_354, %c1_355, %c0_356] : memref<2x10x10x32xf32, #tpu.memory_space<vmem>>, vector<2x8x8x32xf32>
    %c0_357 = arith.constant 0 : index
    %c0_358 = arith.constant 0 : index
    %c0_359 = arith.constant 0 : index
    %c224_360 = arith.constant 224 : index
    %181 = vector.load %arg15[%c0_357, %c0_358, %c0_359, %c224_360] : memref<2x8x8x288xf32, #tpu.memory_space<vmem>>, vector<2x8x8x32xf32>
    tpu.vector_store %arg15[%c0_357, %c0_358, %c0_359, %c224_360], %180 {strides = array<i32>} : memref<2x8x8x288xf32, #tpu.memory_space<vmem>>, vector<2x8x8x32xf32>,
    %c0_361 = arith.constant 0 : index
    %c2_362 = arith.constant 2 : index
    %c2_363 = arith.constant 2 : index
    %c0_364 = arith.constant 0 : index
    %182 = vector.load %arg14[%c0_361, %c2_362, %c2_363, %c0_364] : memref<2x10x10x32xf32, #tpu.memory_space<vmem>>, vector<2x8x8x32xf32>
    %c0_365 = arith.constant 0 : index
    %c0_366 = arith.constant 0 : index
    %c0_367 = arith.constant 0 : index
    %c256_368 = arith.constant 256 : index
    %183 = vector.load %arg15[%c0_365, %c0_366, %c0_367, %c256_368] : memref<2x8x8x288xf32, #tpu.memory_space<vmem>>, vector<2x8x8x32xf32>
    tpu.vector_store %arg15[%c0_365, %c0_366, %c0_367, %c256_368], %182 {strides = array<i32>} : memref<2x8x8x288xf32, #tpu.memory_space<vmem>>, vector<2x8x8x32xf32>,
    %c0_369 = arith.constant 0 : index
    %c0_370 = arith.constant 0 : index
    %c0_371 = arith.constant 0 : index
    %c0_372 = arith.constant 0 : index
    %184 = vector.load %arg15[%c0_369, %c0_370, %c0_371, %c0_372] : memref<2x8x8x288xf32, #tpu.memory_space<vmem>>, vector<2x8x8x288xf32>
    %185 = vector.shape_cast %184 : vector<2x8x8x288xf32> to vector<128x288xf32>
    %cst_373 = arith.constant dense<0.000000e+00> : vector<128x32xf32>
    %186 = tpu.matmul %185, %163, %cst_373 {dimension_numbers = #tpu.dot_dimension_numbers<[1], [0], [0], [1], [0, 0, 1, 1], [], []>} : vector<128x288xf32>, vector<288x32xf32>, vector<128x32xf32> -> vector<128x32xf32>
    %187 = vector.broadcast %165 : vector<1x32xf32> to vector<128x32xf32>
    %188 = arith.addf %186, %187 : vector<128x32xf32>
    %c1_374 = arith.constant 1 : index
    %c0_375 = arith.constant 0 : index
    %c0_376 = arith.constant 0 : index
    %189 = vector.load %arg5[%c1_374, %c0_375, %c0_376] : memref<2x1x32xf32, #tpu.memory_space<vmem>>, vector<1x1x32xf32>
    %190 = vector.shape_cast %189 : vector<1x1x32xf32> to vector<1x32xf32>
    %c1_377 = arith.constant 1 : index
    %c0_378 = arith.constant 0 : index
    %c0_379 = arith.constant 0 : index
    %191 = vector.load %arg6[%c1_377, %c0_378, %c0_379] : memref<2x1x32xf32, #tpu.memory_space<vmem>>, vector<1x1x32xf32>
    %192 = vector.shape_cast %191 : vector<1x1x32xf32> to vector<1x32xf32>
    %cst_380 = arith.constant dense<0.000000e+00> : vector<32xf32>
    %193 = vector.multi_reduction <add>, %188, %cst_380 [0] : vector<128x32xf32> to vector<32xf32>
    %194 = vector.shape_cast %193 : vector<32xf32> to vector<1x32xf32>
    %cst_381 = arith.constant 7.812500e-03 : f32
    %195 = vector.broadcast %cst_381 : f32 to vector<1x32xf32>
    %196 = arith.mulf %194, %195 : vector<1x32xf32>
    %197 = arith.mulf %188, %188 : vector<128x32xf32>
    %cst_382 = arith.constant dense<0.000000e+00> : vector<32xf32>
    %198 = vector.multi_reduction <add>, %197, %cst_382 [0] : vector<128x32xf32> to vector<32xf32>
    %199 = vector.shape_cast %198 : vector<32xf32> to vector<1x32xf32>
    %cst_383 = arith.constant 7.812500e-03 : f32
    %200 = vector.broadcast %cst_383 : f32 to vector<1x32xf32>
    %201 = arith.mulf %199, %200 : vector<1x32xf32>
    %202 = arith.mulf %196, %196 : vector<1x32xf32>
    %203 = arith.subf %201, %202 : vector<1x32xf32>
    %cst_384 = arith.constant 9.99999974E-6 : f32
    %204 = vector.broadcast %cst_384 : f32 to vector<1x32xf32>
    %205 = arith.addf %203, %204 : vector<1x32xf32>
    %206 = math.rsqrt %205 : vector<1x32xf32>
    %207 = arith.mulf %190, %206 : vector<1x32xf32>
    %208 = arith.mulf %196, %207 : vector<1x32xf32>
    %209 = arith.subf %192, %208 : vector<1x32xf32>
    %210 = vector.broadcast %207 : vector<1x32xf32> to vector<128x32xf32>
    %211 = arith.mulf %188, %210 : vector<128x32xf32>
    %212 = vector.broadcast %209 : vector<1x32xf32> to vector<128x32xf32>
    %213 = arith.addf %211, %212 : vector<128x32xf32>
    %cst_385 = arith.constant 0.000000e+00 : f32
    %214 = vector.broadcast %cst_385 : f32 to vector<128x32xf32>
    %215 = arith.cmpf ogt, %213, %214 : vector<128x32xf32>
    %216 = math.exp %213 : vector<128x32xf32>
    %cst_386 = arith.constant 1.000000e+00 : f32
    %217 = vector.broadcast %cst_386 : f32 to vector<128x32xf32>
    %218 = arith.subf %216, %217 : vector<128x32xf32>
    %cst_387 = arith.constant 1.67326319 : f32
    %219 = vector.broadcast %cst_387 : f32 to vector<128x32xf32>
    %220 = arith.mulf %219, %218 : vector<128x32xf32>
    %221 = arith.select %215, %213, %220 : vector<128x32xi1>, vector<128x32xf32>
    %cst_388 = arith.constant 1.05070102 : f32
    %222 = vector.broadcast %cst_388 : f32 to vector<128x32xf32>
    %223 = arith.mulf %222, %221 : vector<128x32xf32>
    %224 = vector.shape_cast %223 : vector<128x32xf32> to vector<2x8x8x32xf32>
    %c0_389 = arith.constant 0 : index
    %c1_390 = arith.constant 1 : index
    %c1_391 = arith.constant 1 : index
    %c0_392 = arith.constant 0 : index
    %225 = vector.load %arg14[%c0_389, %c1_390, %c1_391, %c0_392] : memref<2x10x10x32xf32, #tpu.memory_space<vmem>>, vector<2x8x8x32xf32>
    tpu.vector_store %arg14[%c0_389, %c1_390, %c1_391, %c0_392], %224 {strides = array<i32>} : memref<2x10x10x32xf32, #tpu.memory_space<vmem>>, vector<2x8x8x32xf32>,
    %c1_393 = arith.constant 1 : index
    %c0_394 = arith.constant 0 : index
    %c0_395 = arith.constant 0 : index
    %226 = vector.load %arg7[%c1_393, %c0_394, %c0_395] : memref<2x288x32xf32, #tpu.memory_space<vmem>>, vector<1x288x32xf32>
    %227 = vector.shape_cast %226 : vector<1x288x32xf32> to vector<288x32xf32>
    %c1_396 = arith.constant 1 : index
    %c0_397 = arith.constant 0 : index
    %c0_398 = arith.constant 0 : index
    %228 = vector.load %arg8[%c1_396, %c0_397, %c0_398] : memref<2x1x32xf32, #tpu.memory_space<vmem>>, vector<1x1x32xf32>
    %229 = vector.shape_cast %228 : vector<1x1x32xf32> to vector<1x32xf32>
    %c0_399 = arith.constant 0 : index
    %c0_400 = arith.constant 0 : index
    %c0_401 = arith.constant 0 : index
    %c0_402 = arith.constant 0 : index
    %230 = vector.load %arg14[%c0_399, %c0_400, %c0_401, %c0_402] : memref<2x10x10x32xf32, #tpu.memory_space<vmem>>, vector<2x8x8x32xf32>
    %c0_403 = arith.constant 0 : index
    %c0_404 = arith.constant 0 : index
    %c0_405 = arith.constant 0 : index
    %c0_406 = arith.constant 0 : index
    %231 = vector.load %arg15[%c0_403, %c0_404, %c0_405, %c0_406] : memref<2x8x8x288xf32, #tpu.memory_space<vmem>>, vector<2x8x8x32xf32>
    tpu.vector_store %arg15[%c0_403, %c0_404, %c0_405, %c0_406], %230 {strides = array<i32>} : memref<2x8x8x288xf32, #tpu.memory_space<vmem>>, vector<2x8x8x32xf32>,
    %c0_407 = arith.constant 0 : index
    %c0_408 = arith.constant 0 : index
    %c1_409 = arith.constant 1 : index
    %c0_410 = arith.constant 0 : index
    %232 = vector.load %arg14[%c0_407, %c0_408, %c1_409, %c0_410] : memref<2x10x10x32xf32, #tpu.memory_space<vmem>>, vector<2x8x8x32xf32>
    %c0_411 = arith.constant 0 : index
    %c0_412 = arith.constant 0 : index
    %c0_413 = arith.constant 0 : index
    %c32_414 = arith.constant 32 : index
    %233 = vector.load %arg15[%c0_411, %c0_412, %c0_413, %c32_414] : memref<2x8x8x288xf32, #tpu.memory_space<vmem>>, vector<2x8x8x32xf32>
    tpu.vector_store %arg15[%c0_411, %c0_412, %c0_413, %c32_414], %232 {strides = array<i32>} : memref<2x8x8x288xf32, #tpu.memory_space<vmem>>, vector<2x8x8x32xf32>,
    %c0_415 = arith.constant 0 : index
    %c0_416 = arith.constant 0 : index
    %c2_417 = arith.constant 2 : index
    %c0_418 = arith.constant 0 : index
    %234 = vector.load %arg14[%c0_415, %c0_416, %c2_417, %c0_418] : memref<2x10x10x32xf32, #tpu.memory_space<vmem>>, vector<2x8x8x32xf32>
    %c0_419 = arith.constant 0 : index
    %c0_420 = arith.constant 0 : index
    %c0_421 = arith.constant 0 : index
    %c64_422 = arith.constant 64 : index
    %235 = vector.load %arg15[%c0_419, %c0_420, %c0_421, %c64_422] : memref<2x8x8x288xf32, #tpu.memory_space<vmem>>, vector<2x8x8x32xf32>
    tpu.vector_store %arg15[%c0_419, %c0_420, %c0_421, %c64_422], %234 {strides = array<i32>} : memref<2x8x8x288xf32, #tpu.memory_space<vmem>>, vector<2x8x8x32xf32>,
    %c0_423 = arith.constant 0 : index
    %c1_424 = arith.constant 1 : index
    %c0_425 = arith.constant 0 : index
    %c0_426 = arith.constant 0 : index
    %236 = vector.load %arg14[%c0_423, %c1_424, %c0_425, %c0_426] : memref<2x10x10x32xf32, #tpu.memory_space<vmem>>, vector<2x8x8x32xf32>
    %c0_427 = arith.constant 0 : index
    %c0_428 = arith.constant 0 : index
    %c0_429 = arith.constant 0 : index
    %c96_430 = arith.constant 96 : index
    %237 = vector.load %arg15[%c0_427, %c0_428, %c0_429, %c96_430] : memref<2x8x8x288xf32, #tpu.memory_space<vmem>>, vector<2x8x8x32xf32>
    tpu.vector_store %arg15[%c0_427, %c0_428, %c0_429, %c96_430], %236 {strides = array<i32>} : memref<2x8x8x288xf32, #tpu.memory_space<vmem>>, vector<2x8x8x32xf32>,
    %c0_431 = arith.constant 0 : index
    %c1_432 = arith.constant 1 : index
    %c1_433 = arith.constant 1 : index
    %c0_434 = arith.constant 0 : index
    %238 = vector.load %arg14[%c0_431, %c1_432, %c1_433, %c0_434] : memref<2x10x10x32xf32, #tpu.memory_space<vmem>>, vector<2x8x8x32xf32>
    %c0_435 = arith.constant 0 : index
    %c0_436 = arith.constant 0 : index
    %c0_437 = arith.constant 0 : index
    %c128_438 = arith.constant 128 : index
    %239 = vector.load %arg15[%c0_435, %c0_436, %c0_437, %c128_438] : memref<2x8x8x288xf32, #tpu.memory_space<vmem>>, vector<2x8x8x32xf32>
    tpu.vector_store %arg15[%c0_435, %c0_436, %c0_437, %c128_438], %238 {strides = array<i32>} : memref<2x8x8x288xf32, #tpu.memory_space<vmem>>, vector<2x8x8x32xf32>,
    %c0_439 = arith.constant 0 : index
    %c1_440 = arith.constant 1 : index
    %c2_441 = arith.constant 2 : index
    %c0_442 = arith.constant 0 : index
    %240 = vector.load %arg14[%c0_439, %c1_440, %c2_441, %c0_442] : memref<2x10x10x32xf32, #tpu.memory_space<vmem>>, vector<2x8x8x32xf32>
    %c0_443 = arith.constant 0 : index
    %c0_444 = arith.constant 0 : index
    %c0_445 = arith.constant 0 : index
    %c160_446 = arith.constant 160 : index
    %241 = vector.load %arg15[%c0_443, %c0_444, %c0_445, %c160_446] : memref<2x8x8x288xf32, #tpu.memory_space<vmem>>, vector<2x8x8x32xf32>
    tpu.vector_store %arg15[%c0_443, %c0_444, %c0_445, %c160_446], %240 {strides = array<i32>} : memref<2x8x8x288xf32, #tpu.memory_space<vmem>>, vector<2x8x8x32xf32>,
    %c0_447 = arith.constant 0 : index
    %c2_448 = arith.constant 2 : index
    %c0_449 = arith.constant 0 : index
    %c0_450 = arith.constant 0 : index
    %242 = vector.load %arg14[%c0_447, %c2_448, %c0_449, %c0_450] : memref<2x10x10x32xf32, #tpu.memory_space<vmem>>, vector<2x8x8x32xf32>
    %c0_451 = arith.constant 0 : index
    %c0_452 = arith.constant 0 : index
    %c0_453 = arith.constant 0 : index
    %c192_454 = arith.constant 192 : index
    %243 = vector.load %arg15[%c0_451, %c0_452, %c0_453, %c192_454] : memref<2x8x8x288xf32, #tpu.memory_space<vmem>>, vector<2x8x8x32xf32>
    tpu.vector_store %arg15[%c0_451, %c0_452, %c0_453, %c192_454], %242 {strides = array<i32>} : memref<2x8x8x288xf32, #tpu.memory_space<vmem>>, vector<2x8x8x32xf32>,
    %c0_455 = arith.constant 0 : index
    %c2_456 = arith.constant 2 : index
    %c1_457 = arith.constant 1 : index
    %c0_458 = arith.constant 0 : index
    %244 = vector.load %arg14[%c0_455, %c2_456, %c1_457, %c0_458] : memref<2x10x10x32xf32, #tpu.memory_space<vmem>>, vector<2x8x8x32xf32>
    %c0_459 = arith.constant 0 : index
    %c0_460 = arith.constant 0 : index
    %c0_461 = arith.constant 0 : index
    %c224_462 = arith.constant 224 : index
    %245 = vector.load %arg15[%c0_459, %c0_460, %c0_461, %c224_462] : memref<2x8x8x288xf32, #tpu.memory_space<vmem>>, vector<2x8x8x32xf32>
    tpu.vector_store %arg15[%c0_459, %c0_460, %c0_461, %c224_462], %244 {strides = array<i32>} : memref<2x8x8x288xf32, #tpu.memory_space<vmem>>, vector<2x8x8x32xf32>,
    %c0_463 = arith.constant 0 : index
    %c2_464 = arith.constant 2 : index
    %c2_465 = arith.constant 2 : index
    %c0_466 = arith.constant 0 : index
    %246 = vector.load %arg14[%c0_463, %c2_464, %c2_465, %c0_466] : memref<2x10x10x32xf32, #tpu.memory_space<vmem>>, vector<2x8x8x32xf32>
    %c0_467 = arith.constant 0 : index
    %c0_468 = arith.constant 0 : index
    %c0_469 = arith.constant 0 : index
    %c256_470 = arith.constant 256 : index
    %247 = vector.load %arg15[%c0_467, %c0_468, %c0_469, %c256_470] : memref<2x8x8x288xf32, #tpu.memory_space<vmem>>, vector<2x8x8x32xf32>
    tpu.vector_store %arg15[%c0_467, %c0_468, %c0_469, %c256_470], %246 {strides = array<i32>} : memref<2x8x8x288xf32, #tpu.memory_space<vmem>>, vector<2x8x8x32xf32>,
    %c0_471 = arith.constant 0 : index
    %c0_472 = arith.constant 0 : index
    %c0_473 = arith.constant 0 : index
    %c0_474 = arith.constant 0 : index
    %248 = vector.load %arg15[%c0_471, %c0_472, %c0_473, %c0_474] : memref<2x8x8x288xf32, #tpu.memory_space<vmem>>, vector<2x8x8x288xf32>
    %249 = vector.shape_cast %248 : vector<2x8x8x288xf32> to vector<128x288xf32>
    %cst_475 = arith.constant dense<0.000000e+00> : vector<128x32xf32>
    %250 = tpu.matmul %249, %227, %cst_475 {dimension_numbers = #tpu.dot_dimension_numbers<[1], [0], [0], [1], [0, 0, 1, 1], [], []>} : vector<128x288xf32>, vector<288x32xf32>, vector<128x32xf32> -> vector<128x32xf32>
    %251 = vector.broadcast %229 : vector<1x32xf32> to vector<128x32xf32>
    %252 = arith.addf %250, %251 : vector<128x32xf32>
    %c1_476 = arith.constant 1 : index
    %c0_477 = arith.constant 0 : index
    %c0_478 = arith.constant 0 : index
    %253 = vector.load %arg9[%c1_476, %c0_477, %c0_478] : memref<2x1x32xf32, #tpu.memory_space<vmem>>, vector<1x1x32xf32>
    %254 = vector.shape_cast %253 : vector<1x1x32xf32> to vector<1x32xf32>
    %c1_479 = arith.constant 1 : index
    %c0_480 = arith.constant 0 : index
    %c0_481 = arith.constant 0 : index
    %255 = vector.load %arg10[%c1_479, %c0_480, %c0_481] : memref<2x1x32xf32, #tpu.memory_space<vmem>>, vector<1x1x32xf32>
    %256 = vector.shape_cast %255 : vector<1x1x32xf32> to vector<1x32xf32>
    %cst_482 = arith.constant dense<0.000000e+00> : vector<32xf32>
    %257 = vector.multi_reduction <add>, %252, %cst_482 [0] : vector<128x32xf32> to vector<32xf32>
    %258 = vector.shape_cast %257 : vector<32xf32> to vector<1x32xf32>
    %cst_483 = arith.constant 7.812500e-03 : f32
    %259 = vector.broadcast %cst_483 : f32 to vector<1x32xf32>
    %260 = arith.mulf %258, %259 : vector<1x32xf32>
    %261 = arith.mulf %252, %252 : vector<128x32xf32>
    %cst_484 = arith.constant dense<0.000000e+00> : vector<32xf32>
    %262 = vector.multi_reduction <add>, %261, %cst_484 [0] : vector<128x32xf32> to vector<32xf32>
    %263 = vector.shape_cast %262 : vector<32xf32> to vector<1x32xf32>
    %cst_485 = arith.constant 7.812500e-03 : f32
    %264 = vector.broadcast %cst_485 : f32 to vector<1x32xf32>
    %265 = arith.mulf %263, %264 : vector<1x32xf32>
    %266 = arith.mulf %260, %260 : vector<1x32xf32>
    %267 = arith.subf %265, %266 : vector<1x32xf32>
    %cst_486 = arith.constant 9.99999974E-6 : f32
    %268 = vector.broadcast %cst_486 : f32 to vector<1x32xf32>
    %269 = arith.addf %267, %268 : vector<1x32xf32>
    %270 = math.rsqrt %269 : vector<1x32xf32>
    %271 = arith.mulf %254, %270 : vector<1x32xf32>
    %272 = arith.mulf %260, %271 : vector<1x32xf32>
    %273 = arith.subf %256, %272 : vector<1x32xf32>
    %274 = vector.broadcast %271 : vector<1x32xf32> to vector<128x32xf32>
    %275 = arith.mulf %252, %274 : vector<128x32xf32>
    %276 = vector.broadcast %273 : vector<1x32xf32> to vector<128x32xf32>
    %277 = arith.addf %275, %276 : vector<128x32xf32>
    %278 = arith.addf %277, %159 : vector<128x32xf32>
    %cst_487 = arith.constant 0.000000e+00 : f32
    %279 = vector.broadcast %cst_487 : f32 to vector<128x32xf32>
    %280 = arith.cmpf ogt, %278, %279 : vector<128x32xf32>
    %281 = math.exp %278 : vector<128x32xf32>
    %cst_488 = arith.constant 1.000000e+00 : f32
    %282 = vector.broadcast %cst_488 : f32 to vector<128x32xf32>
    %283 = arith.subf %281, %282 : vector<128x32xf32>
    %cst_489 = arith.constant 1.67326319 : f32
    %284 = vector.broadcast %cst_489 : f32 to vector<128x32xf32>
    %285 = arith.mulf %284, %283 : vector<128x32xf32>
    %286 = arith.select %280, %278, %285 : vector<128x32xi1>, vector<128x32xf32>
    %cst_490 = arith.constant 1.05070102 : f32
    %287 = vector.broadcast %cst_490 : f32 to vector<128x32xf32>
    %288 = arith.mulf %287, %286 : vector<128x32xf32>
    %289 = vector.shape_cast %288 : vector<128x32xf32> to vector<2x8x8x32xf32>
    %c0_491 = arith.constant 0 : index
    %c1_492 = arith.constant 1 : index
    %c1_493 = arith.constant 1 : index
    %c0_494 = arith.constant 0 : index
    %290 = vector.load %arg14[%c0_491, %c1_492, %c1_493, %c0_494] : memref<2x10x10x32xf32, #tpu.memory_space<vmem>>, vector<2x8x8x32xf32>
    tpu.vector_store %arg14[%c0_491, %c1_492, %c1_493, %c0_494], %289 {strides = array<i32>} : memref<2x10x10x32xf32, #tpu.memory_space<vmem>>, vector<2x8x8x32xf32>,
    %c0_495 = arith.constant 0 : index
    %c0_496 = arith.constant 0 : index
    %c0_497 = arith.constant 0 : index
    %c0_498 = arith.constant 0 : index
    %291 = vector.load %arg14[%c0_495, %c0_496, %c0_497, %c0_498] : memref<2x10x10x32xf32, #tpu.memory_space<vmem>>, vector<2x8x8x32xf32>
    %c0_499 = arith.constant 0 : index
    %c0_500 = arith.constant 0 : index
    %c0_501 = arith.constant 0 : index
    %c0_502 = arith.constant 0 : index
    %292 = vector.load %arg15[%c0_499, %c0_500, %c0_501, %c0_502] : memref<2x8x8x288xf32, #tpu.memory_space<vmem>>, vector<2x8x8x32xf32>
    tpu.vector_store %arg15[%c0_499, %c0_500, %c0_501, %c0_502], %291 {strides = array<i32>} : memref<2x8x8x288xf32, #tpu.memory_space<vmem>>, vector<2x8x8x32xf32>,
    %c0_503 = arith.constant 0 : index
    %c0_504 = arith.constant 0 : index
    %c1_505 = arith.constant 1 : index
    %c0_506 = arith.constant 0 : index
    %293 = vector.load %arg14[%c0_503, %c0_504, %c1_505, %c0_506] : memref<2x10x10x32xf32, #tpu.memory_space<vmem>>, vector<2x8x8x32xf32>
    %c0_507 = arith.constant 0 : index
    %c0_508 = arith.constant 0 : index
    %c0_509 = arith.constant 0 : index
    %c32_510 = arith.constant 32 : index
    %294 = vector.load %arg15[%c0_507, %c0_508, %c0_509, %c32_510] : memref<2x8x8x288xf32, #tpu.memory_space<vmem>>, vector<2x8x8x32xf32>
    tpu.vector_store %arg15[%c0_507, %c0_508, %c0_509, %c32_510], %293 {strides = array<i32>} : memref<2x8x8x288xf32, #tpu.memory_space<vmem>>, vector<2x8x8x32xf32>,
    %c0_511 = arith.constant 0 : index
    %c0_512 = arith.constant 0 : index
    %c2_513 = arith.constant 2 : index
    %c0_514 = arith.constant 0 : index
    %295 = vector.load %arg14[%c0_511, %c0_512, %c2_513, %c0_514] : memref<2x10x10x32xf32, #tpu.memory_space<vmem>>, vector<2x8x8x32xf32>
    %c0_515 = arith.constant 0 : index
    %c0_516 = arith.constant 0 : index
    %c0_517 = arith.constant 0 : index
    %c64_518 = arith.constant 64 : index
    %296 = vector.load %arg15[%c0_515, %c0_516, %c0_517, %c64_518] : memref<2x8x8x288xf32, #tpu.memory_space<vmem>>, vector<2x8x8x32xf32>
    tpu.vector_store %arg15[%c0_515, %c0_516, %c0_517, %c64_518], %295 {strides = array<i32>} : memref<2x8x8x288xf32, #tpu.memory_space<vmem>>, vector<2x8x8x32xf32>,
    %c0_519 = arith.constant 0 : index
    %c1_520 = arith.constant 1 : index
    %c0_521 = arith.constant 0 : index
    %c0_522 = arith.constant 0 : index
    %297 = vector.load %arg14[%c0_519, %c1_520, %c0_521, %c0_522] : memref<2x10x10x32xf32, #tpu.memory_space<vmem>>, vector<2x8x8x32xf32>
    %c0_523 = arith.constant 0 : index
    %c0_524 = arith.constant 0 : index
    %c0_525 = arith.constant 0 : index
    %c96_526 = arith.constant 96 : index
    %298 = vector.load %arg15[%c0_523, %c0_524, %c0_525, %c96_526] : memref<2x8x8x288xf32, #tpu.memory_space<vmem>>, vector<2x8x8x32xf32>
    tpu.vector_store %arg15[%c0_523, %c0_524, %c0_525, %c96_526], %297 {strides = array<i32>} : memref<2x8x8x288xf32, #tpu.memory_space<vmem>>, vector<2x8x8x32xf32>,
    %c0_527 = arith.constant 0 : index
    %c1_528 = arith.constant 1 : index
    %c1_529 = arith.constant 1 : index
    %c0_530 = arith.constant 0 : index
    %299 = vector.load %arg14[%c0_527, %c1_528, %c1_529, %c0_530] : memref<2x10x10x32xf32, #tpu.memory_space<vmem>>, vector<2x8x8x32xf32>
    %c0_531 = arith.constant 0 : index
    %c0_532 = arith.constant 0 : index
    %c0_533 = arith.constant 0 : index
    %c128_534 = arith.constant 128 : index
    %300 = vector.load %arg15[%c0_531, %c0_532, %c0_533, %c128_534] : memref<2x8x8x288xf32, #tpu.memory_space<vmem>>, vector<2x8x8x32xf32>
    tpu.vector_store %arg15[%c0_531, %c0_532, %c0_533, %c128_534], %299 {strides = array<i32>} : memref<2x8x8x288xf32, #tpu.memory_space<vmem>>, vector<2x8x8x32xf32>,
    %c0_535 = arith.constant 0 : index
    %c1_536 = arith.constant 1 : index
    %c2_537 = arith.constant 2 : index
    %c0_538 = arith.constant 0 : index
    %301 = vector.load %arg14[%c0_535, %c1_536, %c2_537, %c0_538] : memref<2x10x10x32xf32, #tpu.memory_space<vmem>>, vector<2x8x8x32xf32>
    %c0_539 = arith.constant 0 : index
    %c0_540 = arith.constant 0 : index
    %c0_541 = arith.constant 0 : index
    %c160_542 = arith.constant 160 : index
    %302 = vector.load %arg15[%c0_539, %c0_540, %c0_541, %c160_542] : memref<2x8x8x288xf32, #tpu.memory_space<vmem>>, vector<2x8x8x32xf32>
    tpu.vector_store %arg15[%c0_539, %c0_540, %c0_541, %c160_542], %301 {strides = array<i32>} : memref<2x8x8x288xf32, #tpu.memory_space<vmem>>, vector<2x8x8x32xf32>,
    %c0_543 = arith.constant 0 : index
    %c2_544 = arith.constant 2 : index
    %c0_545 = arith.constant 0 : index
    %c0_546 = arith.constant 0 : index
    %303 = vector.load %arg14[%c0_543, %c2_544, %c0_545, %c0_546] : memref<2x10x10x32xf32, #tpu.memory_space<vmem>>, vector<2x8x8x32xf32>
    %c0_547 = arith.constant 0 : index
    %c0_548 = arith.constant 0 : index
    %c0_549 = arith.constant 0 : index
    %c192_550 = arith.constant 192 : index
    %304 = vector.load %arg15[%c0_547, %c0_548, %c0_549, %c192_550] : memref<2x8x8x288xf32, #tpu.memory_space<vmem>>, vector<2x8x8x32xf32>
    tpu.vector_store %arg15[%c0_547, %c0_548, %c0_549, %c192_550], %303 {strides = array<i32>} : memref<2x8x8x288xf32, #tpu.memory_space<vmem>>, vector<2x8x8x32xf32>,
    %c0_551 = arith.constant 0 : index
    %c2_552 = arith.constant 2 : index
    %c1_553 = arith.constant 1 : index
    %c0_554 = arith.constant 0 : index
    %305 = vector.load %arg14[%c0_551, %c2_552, %c1_553, %c0_554] : memref<2x10x10x32xf32, #tpu.memory_space<vmem>>, vector<2x8x8x32xf32>
    %c0_555 = arith.constant 0 : index
    %c0_556 = arith.constant 0 : index
    %c0_557 = arith.constant 0 : index
    %c224_558 = arith.constant 224 : index
    %306 = vector.load %arg15[%c0_555, %c0_556, %c0_557, %c224_558] : memref<2x8x8x288xf32, #tpu.memory_space<vmem>>, vector<2x8x8x32xf32>
    tpu.vector_store %arg15[%c0_555, %c0_556, %c0_557, %c224_558], %305 {strides = array<i32>} : memref<2x8x8x288xf32, #tpu.memory_space<vmem>>, vector<2x8x8x32xf32>,
    %c0_559 = arith.constant 0 : index
    %c2_560 = arith.constant 2 : index
    %c2_561 = arith.constant 2 : index
    %c0_562 = arith.constant 0 : index
    %307 = vector.load %arg14[%c0_559, %c2_560, %c2_561, %c0_562] : memref<2x10x10x32xf32, #tpu.memory_space<vmem>>, vector<2x8x8x32xf32>
    %c0_563 = arith.constant 0 : index
    %c0_564 = arith.constant 0 : index
    %c0_565 = arith.constant 0 : index
    %c256_566 = arith.constant 256 : index
    %308 = vector.load %arg15[%c0_563, %c0_564, %c0_565, %c256_566] : memref<2x8x8x288xf32, #tpu.memory_space<vmem>>, vector<2x8x8x32xf32>
    tpu.vector_store %arg15[%c0_563, %c0_564, %c0_565, %c256_566], %307 {strides = array<i32>} : memref<2x8x8x288xf32, #tpu.memory_space<vmem>>, vector<2x8x8x32xf32>,
    %c0_567 = arith.constant 0 : index
    %c0_568 = arith.constant 0 : index
    %c0_569 = arith.constant 0 : index
    %c0_570 = arith.constant 0 : index
    %309 = vector.load %arg15[%c0_567, %c0_568, %c0_569, %c0_570] : memref<2x8x8x288xf32, #tpu.memory_space<vmem>>, vector<2x8x8x288xf32>
    %310 = vector.shape_cast %309 : vector<2x8x8x288xf32> to vector<128x288xf32>
    %c0_571 = arith.constant 0 : index
    %c0_572 = arith.constant 0 : index
    %311 = vector.load %arg11[%c0_571, %c0_572] : memref<288x128xf32, #tpu.memory_space<vmem>>, vector<288x128xf32>
    %cst_573 = arith.constant dense<0.000000e+00> : vector<128x128xf32>
    %312 = tpu.matmul %310, %311, %cst_573 {dimension_numbers = #tpu.dot_dimension_numbers<[1], [0], [0], [1], [0, 0, 1, 1], [], []>} : vector<128x288xf32>, vector<288x128xf32>, vector<128x128xf32> -> vector<128x128xf32>
    %c0_574 = arith.constant 0 : index
    %c0_575 = arith.constant 0 : index
    %313 = vector.load %arg12[%c0_574, %c0_575] : memref<1x128xf32, #tpu.memory_space<vmem>>, vector<1x128xf32>
    %314 = vector.broadcast %313 : vector<1x128xf32> to vector<128x128xf32>
    %315 = arith.addf %312, %314 : vector<128x128xf32>
    %c0_576 = arith.constant 0 : index
    %c0_577 = arith.constant 0 : index
    %316 = vector.load %arg13[%c0_576, %c0_577] : memref<128x128xf32, #tpu.memory_space<vmem>>, vector<128x128xf32>
    tpu.vector_store %arg13[%c0_576, %c0_577], %315 {strides = array<i32>} : memref<128x128xf32, #tpu.memory_space<vmem>>, vector<128x128xf32>,
    return
  }
}

</mosaic_0001>

<bundles_post_ra>
// kernel: chessnet_forward.1
= control target key start
LH: loop header
LB: loop body
LE: loop exit
PB: predicated region body
PF: predicated region fallthrough
CT: control target
= control target key end

     0   :  { %vm44_vm0 = vcmask 261120   ;;  %vm46_vm1 = vcmask 254976   ;;  %v7757_v0 = vmov 0.0   ;;  %s7758_s25 = smov 32   ;;  %s7759_s26 = smov 64   ;;  %vm268_vm2 = vcmask 523520   ;;  %s12728_s0 = inlined_call_operand.vmem [shape: f32[2,8,8,32], index: 0, kind: input, shape index: {}]   ;;  %s12729_s1 = inlined_call_operand.vmem [shape: f32[288,32], index: 1, kind: input, shape index: {}]   ;;  %s12730_s2 = inlined_call_operand.vmem [shape: f32[1,32], index: 2, kind: input, shape index: {}]   ;;  %s12731_s3 = inlined_call_operand.vmem [shape: f32[2,288,32], index: 3, kind: input, shape index: {}]   ;;  %s12732_s4 = inlined_call_operand.vmem [shape: f32[2,1,32], index: 4, kind: input, shape index: {}]   ;;  %s12733_s5 = inlined_call_operand.vmem [shape: f32[2,1,32], index: 5, kind: input, shape index: {}]   ;;  %s12734_s6 = inlined_call_operand.vmem [shape: f32[2,1,32], index: 6, kind: input, shape index: {}]   ;;  %s12735_s7 = inlined_call_operand.vmem [shape: f32[2,288,32], index: 7, kind: input, shape index: {}]   ;;  %s12736_s8 = inlined_call_operand.vmem [shape: f32[2,1,32], index: 8, kind: input, shape index: {}]   ;;  %s12737_s9 = inlined_call_operand.vmem [shape: f32[2,1,32], index: 9, kind: input, shape index: {}]   ;;  %s12738_s10 = inlined_call_operand.vmem [shape: f32[2,1,32], index: 10, kind: input, shape index: {}]   ;;  %s12739_s11 = inlined_call_operand.vmem [shape: f32[288,128], index: 11, kind: input, shape index: {}]   ;;  %s12740_s12 = inlined_call_operand.vmem [shape: f32[1,128], index: 12, kind: input, shape index: {}]   ;;  %s12741_s13 = inlined_call_operand.vmem [shape: f32[128,128], index: 13, kind: output, shape index: {}]  }
   0x1   :  { %66 = vst.msk [vmem:[#allocation2 + $0xa0] sm:$0xff] %vm44_vm0, %v7757_v0  ;;  %v94_v3 = vld [vmem:[%s12728_s0 + $0x40] sm:$0xff]  ;;  %v95_v4 = vld [vmem:[%s12728_s0 + $0x48] sm:$0xff]  ;;  %v96_v5 = vld [vmem:[%s12728_s0 + $0x50] sm:$0xff]  ;;  %s7760_s20 = smov 96   ;;  %vm365_vm3 = vcmask 785920  }
   0x2   :  { %67 = vst.msk [vmem:[#allocation2 + $0xa8] sm:$0x3] %vm46_vm1, %v7757_v0  ;;  %v97_v6 = vld [vmem:[%s12728_s0 + $0x58] sm:$0xff]  ;;  %v98_v7 = vld [vmem:[%s12728_s0 + $0x60] sm:$0xff]  ;;  %v99_v14 = vld [vmem:[%s12728_s0 + $0x68] sm:$0xff]  ;;  %vm462_vm4 = vcmask 1048320  }
   0x3   :  { %45 = vst.msk [vmem:[#allocation2] sm:$0xff] %vm44_vm0, %v7757_v0  ;;  %v100_v18 = vld [vmem:[%s12728_s0 + $0x70] sm:$0xff]  ;;  %v86_v25 = vld [vmem:[%s12728_s0] sm:$0xff]  ;;  %v87_v26 = vld [vmem:[%s12728_s0 + $0x8] sm:$0xff] }
   0x4   :  { %47 = vst.msk [vmem:[#allocation2 + $0x8] sm:$0x3] %vm46_vm1, %v7757_v0  ;;  %v101_v31 = vld [vmem:[%s12728_s0 + $0x78] sm:$0xff]  ;;  %v88_v36 = vld [vmem:[%s12728_s0 + $0x10] sm:$0xff]  ;;  %v132_v49 = vld [vmem:[%s12729_s1 + $0x68] sm:$0xff] }
   0x5   :  { %48 = vst.msk [vmem:[#allocation2 + $0x10] sm:$0xff] %vm44_vm0, %v7757_v0  ;;  %v89_v45 = vld [vmem:[%s12728_s0 + $0x18] sm:$0xff]  ;;  %v133_v47 = vld [vmem:[%s12729_s1 + $0x70] sm:$0xff]  ;;  %v131_v51 = vld [vmem:[%s12729_s1 + $0x60] sm:$0xff] }
   0x6   :  { %49 = vst.msk [vmem:[#allocation2 + $0x18] sm:$0x3] %vm46_vm1, %v7757_v0  ;;  %v134_v46 = vld [vmem:[%s12729_s1 + $0x78] sm:$0xff]  ;;  %v129_v54 = vld [vmem:[%s12729_s1 + $0x50] sm:$0xff]  ;;  %v128_v55 = vld [vmem:[%s12729_s1 + $0x48] sm:$0xff] }
   0x7   :  { %50 = vst.msk [vmem:[#allocation2 + $0x20] sm:$0xff] %vm44_vm0, %v7757_v0  ;;  %7575 = vmatpush.msra.mxu1 %v134_v46  ;;  %931 = vmatpush.msra.mxu0 %v134_v46  ;;  %v130_v52 = vld [vmem:[%s12729_s1 + $0x58] sm:$0xff]  ;;  %v90_v56 = vld [vmem:[%s12728_s0 + $0x20] sm:$0xff]  ;;  %v125_v61 = vld [vmem:[%s12729_s1 + $0x30] sm:$0xff] }
   0x8   :  { %51 = vst.msk [vmem:[#allocation2 + $0x28] sm:$0x3] %vm46_vm1, %v7757_v0  ;;  %v164_v58 = vld [vmem:[#allocation2 + $0xa0] sm:$0xff]  ;;  %v126_v60 = vld [vmem:[%s12729_s1 + $0x38] sm:$0xff]  ;;  %v124_v63 = vld [vmem:[%s12729_s1 + $0x28] sm:$0xff] }
   0x9   :  { %v196_v1 = vld [vmem:[#allocation2 + $0xa1] sm:$0xff]  ;;  %52 = vst.msk [vmem:[#allocation2 + $0x30] sm:$0xff] %vm44_vm0, %v7757_v0  ;;  %7576 = vmatpush.msra.mxu1 %v133_v47  ;;  %932 = vmatpush.msra.mxu0 %v133_v47 }
   0xa   :  { %236 = vrot.lane.b32.xlu0 %v196_v1, %s7758_s25  ;;  %53 = vst.msk [vmem:[#allocation2 + $0x38] sm:$0x3] %vm46_vm1, %v7757_v0  ;;  %v293_v2 = vld [vmem:[#allocation2 + $0xa2] sm:$0xff] }
   0xb   :  { %54 = vst.msk [vmem:[#allocation2 + $0x40] sm:$0xff] %vm44_vm0, %v7757_v0  ;;  %v188_v35 = vld [vmem:[#allocation2 + $0x1] sm:$0xff]  ;;  %7577 = vmatpush.msra.mxu1 %v132_v49  ;;  %933 = vmatpush.msra.mxu0 %v132_v49 }
   0xc   :  { %55 = vst.msk [vmem:[#allocation2 + $0x48] sm:$0x3] %vm46_vm1, %v7757_v0  ;;  %v285_v44 = vld [vmem:[#allocation2 + $0x2] sm:$0xff] }
   0xd   :  { %56 = vst.msk [vmem:[#allocation2 + $0x50] sm:$0xff] %vm44_vm0, %v7757_v0  ;;  %7578 = vmatpush.msra.mxu1 %v131_v51  ;;  %934 = vmatpush.msra.mxu0 %v131_v51  ;;  %v127_v59 = vld [vmem:[%s12729_s1 + $0x40] sm:$0xff]  ;;  %v144_v51 = vld [vmem:[%s12729_s1 + $0xc8] sm:$0xff] }
   0xe   :  { %57 = vst.msk [vmem:[#allocation2 + $0x58] sm:$0x3] %vm46_vm1, %v7757_v0 }
   0xf   :  { %58 = vst.msk [vmem:[#allocation2 + $0x60] sm:$0xff] %vm44_vm0, %v7757_v0  ;;  %7579 = vmatpush.msra.mxu1 %v130_v52  ;;  %935 = vmatpush.msra.mxu0 %v130_v52  ;;  %v143_v52 = vld [vmem:[%s12729_s1 + $0xc0] sm:$0xff] }
  0x10   :  { %59 = vst.msk [vmem:[#allocation2 + $0x68] sm:$0x3] %vm46_vm1, %v7757_v0 }
  0x11   :  { %60 = vst.msk [vmem:[#allocation2 + $0x70] sm:$0xff] %vm44_vm0, %v7757_v0  ;;  %7580 = vmatpush.msra.mxu1 %v129_v54  ;;  %936 = vmatpush.msra.mxu0 %v129_v54  ;;  %v93_v54 = vld [vmem:[%s12728_s0 + $0x38] sm:$0xff] }
  0x12   :  { %61 = vst.msk [vmem:[#allocation2 + $0x78] sm:$0x3] %vm46_vm1, %v7757_v0  ;;  %333 = vrot.lane.b32.xlu0 %v293_v2, %s7759_s26  ;;  %v123_v2 = vld [vmem:[%s12729_s1 + $0x20] sm:$0xff] }
  0x13   :  { %62 = vst.msk [vmem:[#allocation2 + $0x80] sm:$0xff] %vm44_vm0, %v7757_v0  ;;  %7581 = vmatpush.msra.mxu1 %v128_v55  ;;  %937 = vmatpush.msra.mxu0 %v128_v55 }
  0x14   :  { %63 = vst.msk [vmem:[#allocation2 + $0x88] sm:$0x3] %vm46_vm1, %v7757_v0 }
  0x15   :  { %64 = vst.msk [vmem:[#allocation2 + $0x90] sm:$0xff] %vm44_vm0, %v7757_v0  ;;  %7582 = vmatpush.msra.mxu1 %v127_v59  ;;  %938 = vmatpush.msra.mxu0 %v127_v59  ;;  %v142_v59 = vld [vmem:[%s12729_s1 + $0xb8] sm:$0xff] }
  0x16   :  { %65 = vst.msk [vmem:[#allocation2 + $0x98] sm:$0x3] %vm46_vm1, %v7757_v0 }
  0x17   :  { %68 = vst.msk [vmem:[#allocation2 + $0xb0] sm:$0xff] %vm44_vm0, %v7757_v0  ;;  %7583 = vmatpush.msra.mxu1 %v126_v60  ;;  %939 = vmatpush.msra.mxu0 %v126_v60 }
  0x18   :  { %69 = vst.msk [vmem:[#allocation2 + $0xb8] sm:$0x3] %vm46_vm1, %v7757_v0 }
  0x19   :  { %70 = vst.msk [vmem:[#allocation2 + $0xc0] sm:$0xff] %vm44_vm0, %v7757_v0  ;;  %7584 = vmatpush.msra.mxu1 %v125_v61  ;;  %940 = vmatpush.msra.mxu0 %v125_v61  ;;  %v141_v61 = vld [vmem:[%s12729_s1 + $0xb0] sm:$0xff] }
  0x1a   :  { %71 = vst.msk [vmem:[#allocation2 + $0xc8] sm:$0x3] %vm46_vm1, %v7757_v0 }
  0x1b   :  { %72 = vst.msk [vmem:[#allocation2 + $0xd0] sm:$0xff] %vm44_vm0, %v7757_v0  ;;  %7585 = vmatpush.msra.mxu1 %v124_v63  ;;  %941 = vmatpush.msra.mxu0 %v124_v63 }
  0x1c   :  { %73 = vst.msk [vmem:[#allocation2 + $0xd8] sm:$0x3] %vm46_vm1, %v7757_v0 }
  0x1d   :  { %74 = vst.msk [vmem:[#allocation2 + $0xe0] sm:$0xff] %vm44_vm0, %v7757_v0  ;;  %7586 = vmatpush.msra.mxu1 %v123_v2  ;;  %942 = vmatpush.msra.mxu0 %v123_v2  ;;  %v140_v2 = vld [vmem:[%s12729_s1 + $0xa8] sm:$0xff] }
  0x1e   :  { %75 = vst.msk [vmem:[#allocation2 + $0xe8] sm:$0x3] %vm46_vm1, %v7757_v0 }
  0x1f   :  { %76 = vst.msk [vmem:[#allocation2 + $0xf0] sm:$0xff] %vm44_vm0, %v7757_v0 }
  0x20   :  { %77 = vst.msk [vmem:[#allocation2 + $0xf8] sm:$0x3] %vm46_vm1, %v7757_v0 }
  0x21   :  { %78 = vst.msk [vmem:[#allocation2 + $0x100] sm:$0xff] %vm44_vm0, %v7757_v0 }
  0x22   :  { %79 = vst.msk [vmem:[#allocation2 + $0x108] sm:$0x3] %vm46_vm1, %v7757_v0 }
  0x23   :  { %80 = vst.msk [vmem:[#allocation2 + $0x110] sm:$0xff] %vm44_vm0, %v7757_v0 }
  0x24   :  { %81 = vst.msk [vmem:[#allocation2 + $0x118] sm:$0x3] %vm46_vm1, %v7757_v0 }
  0x25   :  { %82 = vst.msk [vmem:[#allocation2 + $0x120] sm:$0xff] %vm44_vm0, %v7757_v0 }
  0x26   :  { %83 = vst.msk [vmem:[#allocation2 + $0x128] sm:$0x3] %vm46_vm1, %v7757_v0 }
  0x27   :  { %84 = vst.msk [vmem:[#allocation2 + $0x130] sm:$0xff] %vm44_vm0, %v7757_v0 }
  0x28   :  { %85 = vst.msk [vmem:[#allocation2 + $0x138] sm:$0x3] %vm46_vm1, %v7757_v0 }
  0x29   :  { %111 = vst.msk [vmem:[#allocation2 + $0xb1] sm:$0xff] %vm44_vm0, %v94_v3 }
  0x2a   :  { %112 = vst.msk [vmem:[#allocation2 + $0xc1] sm:$0xff] %vm44_vm0, %v95_v4  ;;  %v122_v4 = vld [vmem:[%s12729_s1 + $0x18] sm:$0xff] }
  0x2b   :  { %113 = vst.msk [vmem:[#allocation2 + $0xd1] sm:$0xff] %vm44_vm0, %v96_v5  ;;  %7587 = vmatpush.msra.mxu1 %v122_v4  ;;  %v121_v5 = vld [vmem:[%s12729_s1 + $0x10] sm:$0xff]  ;;  %943 = vmatpush.msra.mxu0 %v122_v4  ;;  %v139_v4 = vld [vmem:[%s12729_s1 + $0xa0] sm:$0xff] }
  0x2c   :  { %114 = vst.msk [vmem:[#allocation2 + $0xe1] sm:$0xff] %vm44_vm0, %v97_v6 }
  0x2d   :  { %115 = vst.msk [vmem:[#allocation2 + $0xf1] sm:$0xff] %vm44_vm0, %v98_v7  ;;  %7588 = vmatpush.msra.mxu1 %v121_v5  ;;  %v120_v7 = vld [vmem:[%s12729_s1 + $0x8] sm:$0xff]  ;;  %944 = vmatpush.msra.mxu0 %v121_v5  ;;  %v156_v5 = vld [vmem:[#allocation2] sm:$0xff] }
  0x2e   :  { %116 = vst.msk [vmem:[#allocation2 + $0x101] sm:$0xff] %vm44_vm0, %v99_v14 }
  0x2f   :  { %117 = vst.msk [vmem:[#allocation2 + $0x111] sm:$0xff] %vm44_vm0, %v100_v18  ;;  %7589 = vmatpush.msra.mxu1 %v120_v7  ;;  %v150_v18 = vld [vmem:[%s12729_s1 + $0xf8] sm:$0xff]  ;;  %945 = vmatpush.msra.mxu0 %v120_v7 }
  0x30   :  { %v390_v8 = vld [vmem:[#allocation2 + $0xb0] sm:$0xff]  ;;  %103 = vst.msk [vmem:[#allocation2 + $0x11] sm:$0xff] %vm44_vm0, %v86_v25 }
  0x31   :  { %v7892_v9 = vld [vmem:[#allocation2 + $0xb2] sm:$0xff]  ;;  %430 = vrot.lane.b32.xlu1 %v390_v8, %s7760_s20  ;;  %v7896_v10 = vld [vmem:[#allocation2 + $0xc1] sm:$0xff]  ;;  %181 = vst.msk [vmem:[#allocation3 + $0xd8] sm:$0xff] %vm44_vm0, %v390_v8 }
  0x32   :  { %335 = vrot.lane.b32.xlu2 %v7892_v9, %s7759_s26  ;;  %v7900_v11 = vld [vmem:[#allocation2 + $0xc0] sm:$0xff]  ;;  %240 = vrot.lane.b32.xlu0 %v7896_v10, %s7758_s25  ;;  %v197_v12 = vld [vmem:[#allocation2 + $0xb1] sm:$0xff]  ;;  %104 = vst.msk [vmem:[#allocation2 + $0x21] sm:$0xff] %vm44_vm0, %v87_v26  ;;  %v91_v8 = vld [vmem:[%s12728_s0 + $0x28] sm:$0xff] }
  0x33   :  { %182 = vst.msk [vmem:[#allocation3 + $0xf0] sm:$0xff] %vm44_vm0, %v7900_v11  ;;  %v7907_v13 = vld [vmem:[#allocation2 + $0xd1] sm:$0xff]  ;;  %v7922_v16 = vld [vmem:[#allocation2 + $0xc2] sm:$0xff] }
  0x34   :  { %v7916_v15 = vld [vmem:[#allocation2 + $0xd0] sm:$0xff]  ;;  %v7924_v17 = vld [vmem:[#allocation2 + $0xe1] sm:$0xff]  ;;  %118 = vst.msk [vmem:[#allocation2 + $0x121] sm:$0xff] %vm44_vm0, %v101_v31 }
  0x35   :  { %183 = vst.msk [vmem:[#allocation3 + $0x108] sm:$0xff] %vm44_vm0, %v7916_v15  ;;  %v7934_v19 = vld [vmem:[#allocation2 + $0xe0] sm:$0xff]  ;;  %v7940_v20 = vld [vmem:[#allocation2 + $0xd2] sm:$0xff] }
  0x36   :  { %184 = vst.msk [vmem:[#allocation3 + $0x120] sm:$0xff] %vm44_vm0, %v7934_v19  ;;  %v7942_v21 = vld [vmem:[#allocation2 + $0xf1] sm:$0xff]  ;;  %v7954_v23 = vld [vmem:[#allocation2 + $0xe2] sm:$0xff] }
  0x37   :  { %v7948_v22 = vld [vmem:[#allocation2 + $0xf0] sm:$0xff]  ;;  %v7956_v24 = vld [vmem:[#allocation2 + $0x101] sm:$0xff]  ;;  %105 = vst.msk [vmem:[#allocation2 + $0x31] sm:$0xff] %vm44_vm0, %v88_v36 }
  0x38   :  { %185 = vst.msk [vmem:[#allocation3 + $0x138] sm:$0xff] %vm44_vm0, %v7948_v22  ;;  %v7969_v27 = vld [vmem:[#allocation2 + $0x100] sm:$0xff]  ;;  %v7976_v28 = vld [vmem:[#allocation2 + $0xf2] sm:$0xff] }
  0x39   :  { %238 = vrot.lane.b32.xlu1 %v197_v12, %s7758_s25  ;;  %186 = vst.msk [vmem:[#allocation3 + $0x150] sm:$0xff] %vm44_vm0, %v7969_v27  ;;  %v7978_v29 = vld [vmem:[#allocation2 + $0x111] sm:$0xff]  ;;  %v7980_v30 = vld [vmem:[#allocation2 + $0x20] sm:$0xff] }
  0x3a   :  { %432 = vrot.lane.b32.xlu2 %v7900_v11, %s7760_s20  ;;  %242 = vrot.lane.b32.xlu0 %v7907_v13, %s7758_s25  ;;  %174 = vst.msk [vmem:[#allocation3 + $0x30] sm:$0xff] %vm44_vm0, %v7980_v30  ;;  %v7993_v32 = vld [vmem:[#allocation2 + $0x110] sm:$0xff]  ;;  %v7999_v34 = vld [vmem:[#allocation2 + $0x102] sm:$0xff] }
  0x3b   :  { %v189_v33 = vld [vmem:[#allocation2 + $0x11] sm:$0xff]  ;;  %187 = vst.msk [vmem:[#allocation3 + $0x168] sm:$0xff] %vm44_vm0, %v7993_v32  ;;  %v8008_v37 = vld [vmem:[#allocation2 + $0x22] sm:$0xff] }
  0x3c   :  { %495 = vst.msk [vmem:[#allocation3 + $0x8] sm:$0xff] %vm44_vm0, %v189_v33  ;;  %v8014_v38 = vld [vmem:[#allocation2 + $0x112] sm:$0xff]  ;;  %v8016_v39 = vld [vmem:[#allocation2 + $0x120] sm:$0xff] }
  0x3d   :  { %816 = vst.msk [vmem:[#allocation3 + $0x10] sm:$0xff] %vm44_vm0, %v8008_v37  ;;  %v511_v40 = vld [vmem:[#allocation2 + $0x12] sm:$0xff]  ;;  %v190_v43 = vld [vmem:[#allocation2 + $0x21] sm:$0xff] }
  0x3e   :  { %v8018_v41 = vld [vmem:[#allocation2 + $0x30] sm:$0xff]  ;;  %496 = vst.msk [vmem:[#allocation3 + $0x20] sm:$0xff] %vm44_vm0, %v190_v43  ;;  %v119_v12 = vld [vmem:[%s12729_s1] sm:$0xff] }
  0x3f   :  { %v382_v42 = vld [vmem:[#allocation2 + $0x10] sm:$0xff]  ;;  %175 = vst.msk [vmem:[#allocation3 + $0x48] sm:$0xff] %vm44_vm0, %v8018_v41  ;;  %7590 = vmatpush.msra.mxu1 %v119_v12  ;;  %946 = vmatpush.msra.mxu0 %v119_v12  ;;  %v147_v36 = vld [vmem:[%s12729_s1 + $0xe0] sm:$0xff] }
  0x40   :  { %173 = vst.msk [vmem:[#allocation3 + $0x18] sm:$0xff] %vm44_vm0, %v382_v42  ;;  %v8040_v48 = vld [vmem:[#allocation2 + $0x32] sm:$0xff] }
  0x41   :  { %337 = vrot.lane.b32.xlu1 %v7922_v16, %s7759_s26  ;;  %106 = vst.msk [vmem:[#allocation2 + $0x41] sm:$0xff] %vm44_vm0, %v89_v45  ;;  %v191_v53 = vld [vmem:[#allocation2 + $0x31] sm:$0xff]  ;;  %996 = vmatpush.msrb.mxu1 %v150_v18 }
  0x42   :  { %434 = vrot.lane.b32.xlu2 %v7916_v15, %s7760_s20  ;;  %244 = vrot.lane.b32.xlu0 %v7924_v17, %s7758_s25  ;;  %817 = vst.msk [vmem:[#allocation3 + $0x28] sm:$0xff] %vm44_vm0, %v8040_v48  ;;  %v149_v26 = vld [vmem:[%s12729_s1 + $0xf0] sm:$0xff] }
  0x43   :  { %497 = vst.msk [vmem:[#allocation3 + $0x38] sm:$0xff] %vm44_vm0, %v191_v53  ;;  %997 = vmatpush.msrb.mxu1 %v149_v26  ;;  %v145_v45 = vld [vmem:[%s12729_s1 + $0xd0] sm:$0xff]  ;;  %v154_v26 = vld [vmem:[%s12729_s1 + $0x118] sm:$0xff] }
  0x44   :  { %107 = vst.msk [vmem:[#allocation2 + $0x51] sm:$0xff] %vm44_vm0, %v90_v56  ;;  %1073 = vmatpush.msra.mxu2 %v154_v26  ;;  %7591 = vmatpush.msra.mxu3 %v154_v26 }
  0x45   :  { %180 = vst.msk [vmem:[#allocation3 + $0xc0] sm:$0xff] %vm44_vm0, %v164_v58 }
  0x46   :  { %108 = vst.msk [vmem:[#allocation2 + $0x61] sm:$0xff] %vm44_vm0, %v91_v8 }
  0x47   :  { %110 = vst.msk [vmem:[#allocation2 + $0x81] sm:$0xff] %vm44_vm0, %v93_v54 }
  0x48   :  { %v8049_v50 = vld [vmem:[#allocation2 + $0x40] sm:$0xff]  ;;  %172 = vst.msk [vmem:[#allocation3] sm:$0xff] %vm44_vm0, %v156_v5 }
  0x49   :  { %339 = vrot.lane.b32.xlu1 %v7940_v20, %s7759_s26  ;;  %176 = vst.msk [vmem:[#allocation3 + $0x60] sm:$0xff] %vm44_vm0, %v8049_v50  ;;  %v8090_v62 = vld [vmem:[#allocation2 + $0x42] sm:$0xff] }
  0x4a   :  { %436 = vrot.lane.b32.xlu2 %v7934_v19, %s7760_s20  ;;  %246 = vrot.lane.b32.xlu0 %v7942_v21, %s7758_s25  ;;  %818 = vst.msk [vmem:[#allocation3 + $0x40] sm:$0xff] %vm44_vm0, %v8090_v62  ;;  %v192_v6 = vld [vmem:[#allocation2 + $0x41] sm:$0xff] }
  0x4b   :  { %v8097_v0 = vld [vmem:[#allocation2 + $0x50] sm:$0xff]  ;;  %498 = vst.msk [vmem:[#allocation3 + $0x50] sm:$0xff] %vm44_vm0, %v192_v6  ;;  %v837_v54 = vld [vmem:[#allocation3 + $0x28] sm:$0xff] }
  0x4c   :  { %177 = vst.msk [vmem:[#allocation3 + $0x78] sm:$0xff] %vm44_vm0, %v8097_v0  ;;  %v8137_v25 = vld [vmem:[#allocation2 + $0x52] sm:$0xff] }
  0x4d   :  { %819 = vst.msk [vmem:[#allocation3 + $0x58] sm:$0xff] %vm44_vm0, %v8137_v25 }
  0x4e   :  { %v518_v18 = vld [vmem:[#allocation2 + $0x82] sm:$0xff] }
  0x4f   :  { %822 = vst.msk [vmem:[#allocation3 + $0xa0] sm:$0xff] %vm44_vm0, %v518_v18 }
  0x51   :  { %341 = vrot.lane.b32.xlu1 %v7954_v23, %s7759_s26 }
  0x52   :  { %438 = vrot.lane.b32.xlu2 %v7948_v22, %s7760_s20  ;;  %248 = vrot.lane.b32.xlu0 %v7956_v24, %s7758_s25 }
  0x54   :  { %v843_v5 = vld [vmem:[#allocation3 + $0x58] sm:$0xff] }
  0x59   :  { %343 = vrot.lane.b32.xlu1 %v7976_v28, %s7759_s26 }
  0x5a   :  { %440 = vrot.lane.b32.xlu2 %v7969_v27, %s7760_s20  ;;  %250 = vrot.lane.b32.xlu0 %v7978_v29, %s7758_s25 }
  0x61   :  { %345 = vrot.lane.b32.xlu1 %v7999_v34, %s7759_s26 }
  0x62   :  { %442 = vrot.lane.b32.xlu2 %v7993_v32, %s7760_s20  ;;  %220 = vrot.lane.b32.xlu0 %v188_v35, %s7758_s25  ;;  %v193_v35 = vld [vmem:[#allocation2 + $0x51] sm:$0xff] }
  0x63   :  { %499 = vst.msk [vmem:[#allocation3 + $0x68] sm:$0xff] %vm44_vm0, %v193_v35 }
  0x69   :  { %347 = vrot.lane.b32.xlu1 %v8014_v38, %s7759_s26 }
  0x6a   :  { %444 = vrot.lane.b32.xlu2 %v8016_v39, %s7760_s20  ;;  %543 = vrot.lane.b32.xlu0 %v511_v40, %s7758_s25 }
  0x71   :  { %317 = vrot.lane.b32.xlu1 %v285_v44, %s7759_s26  ;;  %v8174_v44 = vld [vmem:[#allocation2 + $0x62] sm:$0xff] }
  0x72   :  { %414 = vrot.lane.b32.xlu2 %v382_v42, %s7760_s20  ;;  %222 = vrot.lane.b32.xlu0 %v189_v33, %s7758_s25  ;;  %v148_v33 = vld [vmem:[%s12729_s1 + $0xe8] sm:$0xff]  ;;  %820 = vst.msk [vmem:[#allocation3 + $0x70] sm:$0xff] %vm44_vm0, %v8174_v44 }
  0x73   :  { %998 = vmatpush.msrb.mxu1 %v148_v33  ;;  %v153_v33 = vld [vmem:[%s12729_s1 + $0x110] sm:$0xff] }
  0x74   :  { %1074 = vmatpush.msra.mxu2 %v153_v33  ;;  %7592 = vmatpush.msra.mxu3 %v153_v33  ;;  %v623_v33 = vld [vmem:[#allocation2 + $0x130] sm:$0xff] }
  0x75   :  { %999 = vmatpush.msrb.mxu1 %v147_v36 }
  0x79   :  { %640 = vrot.lane.b32.xlu1 %v7980_v30, %s7759_s26 }
  0x7a   :  { %736 = vrot.lane.b32.xlu2 %v190_v43, %s7760_s20  ;;  %545 = vrot.lane.b32.xlu0 %v8008_v37, %s7758_s25 }
  0x7c   :  { %v237_v57 = vpop.permute.xlu0 %236 }
  0x7d   :  { %277 = vst.msk [vmem:[#allocation3 + $0xc0] sm:$0xff] %vm268_vm2, %v237_v57 }
  0x81   :  { %319 = vrot.lane.b32.xlu1 %v511_v40, %s7759_s26 }
  0x82   :  { %416 = vrot.lane.b32.xlu2 %v7980_v30, %s7760_s20  ;;  %224 = vrot.lane.b32.xlu0 %v190_v43, %s7758_s25  ;;  %v8144_v30 = vld [vmem:[#allocation2 + $0x60] sm:$0xff]  ;;  %v146_v43 = vld [vmem:[%s12729_s1 + $0xd8] sm:$0xff] }
  0x83   :  { %178 = vst.msk [vmem:[#allocation3 + $0x90] sm:$0xff] %vm44_vm0, %v8144_v30  ;;  %1000 = vmatpush.msrb.mxu1 %v146_v43  ;;  %v834_v43 = vld [vmem:[#allocation3 + $0x10] sm:$0xff] }
  0x84   :  { %v334_v1 = vpop.permute.xlu0 %333 }
  0x85   :  { %374 = vst.msk [vmem:[#allocation3 + $0xc0] sm:$0xff] %vm365_vm3, %v334_v1  ;;  %1001 = vmatpush.msrb.mxu1 %v145_v45  ;;  %v710_v45 = vld [vmem:[#allocation2 + $0x81] sm:$0xff] }
  0x86   :  { %502 = vst.msk [vmem:[#allocation3 + $0xb0] sm:$0xff] %vm44_vm0, %v710_v45 }
  0x87   :  { %1002 = vmatpush.msrb.mxu1 %v144_v51 }
  0x89   :  { %642 = vrot.lane.b32.xlu1 %v8018_v41, %s7759_s26  ;;  %1003 = vmatpush.msrb.mxu1 %v143_v52 }
  0x8a   :  { %738 = vrot.lane.b32.xlu2 %v191_v53, %s7760_s20  ;;  %547 = vrot.lane.b32.xlu0 %v8040_v48, %s7758_s25 }
  0x8b   :  { %1004 = vmatpush.msrb.mxu1 %v142_v59  ;;  %v8311_v59 = vld [vmem:[#allocation2 + $0x90] sm:$0xff] }
  0x8c   :  { %v8110_v3 = vpop.permute.xlu2 %335 }
  0x8d   :  { %1005 = vmatpush.msrb.mxu1 %v141_v61  ;;  %v8314_v61 = vld [vmem:[#allocation2 + $0x91] sm:$0xff] }
  0x8f   :  { %1006 = vmatpush.msrb.mxu1 %v140_v2 }
  0x91   :  { %321 = vrot.lane.b32.xlu1 %v8008_v37, %s7759_s26  ;;  %v92_v37 = vld [vmem:[%s12728_s0 + $0x30] sm:$0xff]  ;;  %1007 = vmatpush.msrb.mxu1 %v139_v4 }
  0x92   :  { %418 = vrot.lane.b32.xlu2 %v8018_v41, %s7760_s20  ;;  %226 = vrot.lane.b32.xlu0 %v191_v53, %s7758_s25  ;;  %109 = vst.msk [vmem:[#allocation2 + $0x71] sm:$0xff] %vm44_vm0, %v92_v37  ;;  %v194_v53 = vld [vmem:[#allocation2 + $0x61] sm:$0xff] }
  0x93   :  { %500 = vst.msk [vmem:[#allocation3 + $0x80] sm:$0xff] %vm44_vm0, %v194_v53  ;;  %v136_v37 = vld [vmem:[%s12729_s1 + $0x88] sm:$0xff] }
  0x94   :  { %v433_v14 = vpop.permute.xlu2 %432 }
  0x99   :  { %644 = vrot.lane.b32.xlu1 %v8049_v50, %s7759_s26  ;;  %v8181_v46 = vld [vmem:[#allocation2 + $0x70] sm:$0xff] }
  0x9a   :  { %740 = vrot.lane.b32.xlu2 %v192_v6, %s7760_s20  ;;  %549 = vrot.lane.b32.xlu0 %v8090_v62, %s7758_s25  ;;  %179 = vst.msk [vmem:[#allocation3 + $0xa8] sm:$0xff] %vm44_vm0, %v8181_v46  ;;  %v8217_v60 = vld [vmem:[#allocation2 + $0x72] sm:$0xff] }
  0x9b   :  { %821 = vst.msk [vmem:[#allocation3 + $0x88] sm:$0xff] %vm44_vm0, %v8217_v60 }
  0x9c   :  { %v435_v31 = vpop.permute.xlu2 %434 }
  0xa1   :  { %323 = vrot.lane.b32.xlu1 %v8040_v48, %s7759_s26 }
  0xa2   :  { %420 = vrot.lane.b32.xlu2 %v8049_v50, %s7760_s20  ;;  %228 = vrot.lane.b32.xlu0 %v192_v6, %s7758_s25  ;;  %v849_v26 = vld [vmem:[#allocation3 + $0x88] sm:$0xff] }
  0xa3   :  { %v431_v40 = vpop.permute.xlu1 %430 }
  0xa4   :  { %v437_v41 = vpop.permute.xlu2 %436  ;;  %471 = vst.msk [vmem:[#allocation3 + $0xc0] sm:$0xff] %vm462_vm4, %v431_v40  ;;  %v241_v42 = vpop.permute.xlu0 %240  ;;  %v152_v40 = vld [vmem:[%s12729_s1 + $0x108] sm:$0xff] }
  0xa5   :  { %279 = vst.msk [vmem:[#allocation3 + $0xf0] sm:$0xff] %vm268_vm2, %v241_v42  ;;  %1075 = vmatpush.msra.mxu2 %v152_v40  ;;  %v135_v42 = vld [vmem:[%s12729_s1 + $0x80] sm:$0xff]  ;;  %7593 = vmatpush.msra.mxu3 %v152_v40 }
  0xa9   :  { %646 = vrot.lane.b32.xlu1 %v8097_v0, %s7759_s26 }
  0xaa   :  { %742 = vrot.lane.b32.xlu2 %v193_v35, %s7760_s20  ;;  %551 = vrot.lane.b32.xlu0 %v8137_v25, %s7758_s25 }
  0xab   :  { %v239_v47 = vpop.permute.xlu1 %238  ;;  %v856_v48 = vld [vmem:[#allocation3 + $0xc0] sm:$0xff] }
  0xac   :  { %v439_v49 = vpop.permute.xlu2 %438  ;;  %278 = vst.msk [vmem:[#allocation3 + $0xd8] sm:$0xff] %vm268_vm2, %v239_v47  ;;  %971 = vmatmul.f32.vlgmr.msra.gmra.mxu1 %v856_v48  ;;  %v243_v50 = vpop.permute.xlu0 %242 }
  0xad   :  { %375 = vst.msk [vmem:[#allocation3 + $0xd8] sm:$0xff] %vm365_vm3, %v8110_v3  ;;  %v195_v3 = vld [vmem:[#allocation2 + $0x71] sm:$0xff] }
  0xae   :  { %472 = vst.msk [vmem:[#allocation3 + $0xd8] sm:$0xff] %vm462_vm4, %v433_v14  ;;  %v138_v14 = vld [vmem:[%s12729_s1 + $0x98] sm:$0xff] }
  0xaf   :  { %280 = vst.msk [vmem:[#allocation3 + $0x108] sm:$0xff] %vm268_vm2, %v243_v50  ;;  %1008 = vmatpush.msrb.mxu1 %v138_v14 }
  0xb0   :  { %501 = vst.msk [vmem:[#allocation3 + $0x98] sm:$0xff] %vm44_vm0, %v195_v3 }
  0xb1   :  { %325 = vrot.lane.b32.xlu1 %v8090_v62, %s7759_s26 }
  0xb2   :  { %422 = vrot.lane.b32.xlu2 %v8097_v0, %s7760_s20  ;;  %230 = vrot.lane.b32.xlu0 %v193_v35, %s7758_s25 }
  0xb3   :  { %v338_v55 = vpop.permute.xlu1 %337 }
  0xb4   :  { %v441_v56 = vpop.permute.xlu2 %440  ;;  %376 = vst.msk [vmem:[#allocation3 + $0xf0] sm:$0xff] %vm365_vm3, %v338_v55  ;;  %v245_v57 = vpop.permute.xlu0 %244 }
  0xb5   :  { %473 = vst.msk [vmem:[#allocation3 + $0xf0] sm:$0xff] %vm462_vm4, %v435_v31  ;;  %v859_v58 = vld [vmem:[#allocation3 + $0xd8] sm:$0xff] }
  0xb6   :  { %974 = vmatmul.f32.gmra.mxu1 %v859_v58  ;;  %281 = vst.msk [vmem:[#allocation3 + $0x120] sm:$0xff] %vm268_vm2, %v245_v57 }
  0xb9   :  { %648 = vrot.lane.b32.xlu1 %v8144_v30, %s7759_s26 }
  0xba   :  { %744 = vrot.lane.b32.xlu2 %v194_v53, %s7760_s20  ;;  %553 = vrot.lane.b32.xlu0 %v8174_v44, %s7758_s25 }
  0xbb   :  { %v340_v62 = vpop.permute.xlu1 %339 }
  0xbc   :  { %v8229_v63 = vpop.permute.xlu2 %442  ;;  %377 = vst.msk [vmem:[#allocation3 + $0x108] sm:$0xff] %vm365_vm3, %v340_v62  ;;  %v247_v0 = vpop.permute.xlu0 %246  ;;  %v862_v1 = vld [vmem:[#allocation3 + $0xf0] sm:$0xff] }
  0xbd   :  { %474 = vst.msk [vmem:[#allocation3 + $0x108] sm:$0xff] %vm462_vm4, %v437_v41  ;;  %v151_v41 = vld [vmem:[%s12729_s1 + $0x100] sm:$0xff] }
  0xbe   :  { %977 = vmatmul.f32.gmra.mxu1 %v862_v1  ;;  %282 = vst.msk [vmem:[#allocation3 + $0x138] sm:$0xff] %vm268_vm2, %v247_v0  ;;  %1076 = vmatpush.msra.mxu2 %v151_v41  ;;  %v840_v0 = vld [vmem:[#allocation3 + $0x40] sm:$0xff] }
  0xbf   :  { %7337 = vmatmul.msk.f32.vlgmr.msra.gmra.mxu2 %vm44_vm0, %v834_v43  ;;  %7594 = vmatpush.msra.mxu3 %v151_v41 }
  0xc1   :  { %327 = vrot.lane.b32.xlu1 %v8137_v25, %s7759_s26  ;;  %v137_v25 = vld [vmem:[%s12729_s1 + $0x90] sm:$0xff] }
  0xc2   :  { %424 = vrot.lane.b32.xlu2 %v8144_v30, %s7760_s20  ;;  %232 = vrot.lane.b32.xlu0 %v194_v53, %s7758_s25 }
  0xc3   :  { %v342_v6 = vpop.permute.xlu1 %341  ;;  %1009 = vmatpush.msrb.mxu1 %v137_v25 }
  0xc4   :  { %v8247_v7 = vpop.permute.xlu2 %444  ;;  %378 = vst.msk [vmem:[#allocation3 + $0x120] sm:$0xff] %vm365_vm3, %v342_v6  ;;  %v249_v8 = vpop.permute.xlu0 %248  ;;  %v865_v12 = vld [vmem:[#allocation3 + $0x108] sm:$0xff] }
  0xc5   :  { %475 = vst.msk [vmem:[#allocation3 + $0x120] sm:$0xff] %vm462_vm4, %v439_v49  ;;  %1010 = vmatpush.msrb.mxu1 %v136_v37 }
  0xc6   :  { %980 = vmatmul.f32.gmra.mxu1 %v865_v12  ;;  %283 = vst.msk [vmem:[#allocation3 + $0x150] sm:$0xff] %vm268_vm2, %v249_v8  ;;  %v846_v12 = vld [vmem:[#allocation3 + $0x70] sm:$0xff] }
  0xc7   :  { %1011 = vmatpush.msrb.mxu1 %v135_v42  ;;  %7338 = vmatmul.msk.f32.gmra.mxu2 %vm44_vm0, %v837_v54  ;;  %v852_v42 = vld [vmem:[#allocation3 + $0xa0] sm:$0xff] }
  0xc9   :  { %650 = vrot.lane.b32.xlu1 %v8181_v46, %s7759_s26 }
  0xca   :  { %746 = vrot.lane.b32.xlu2 %v195_v3, %s7760_s20  ;;  %555 = vrot.lane.b32.xlu0 %v8217_v60, %s7758_s25 }
  0xcb   :  { %v344_v30 = vpop.permute.xlu1 %343 }
  0xcc   :  { %v415_v31 = vpop.permute.xlu2 %414  ;;  %379 = vst.msk [vmem:[#allocation3 + $0x138] sm:$0xff] %vm365_vm3, %v344_v30  ;;  %v251_v35 = vpop.permute.xlu0 %250  ;;  %v868_v36 = vld [vmem:[#allocation3 + $0x120] sm:$0xff] }
  0xcd   :  { %476 = vst.msk [vmem:[#allocation3 + $0x138] sm:$0xff] %vm462_vm4, %v441_v56 }
  0xce   :  { %983 = vmatmul.f32.gmra.mxu1 %v868_v36  ;;  %284 = vst.msk [vmem:[#allocation3 + $0x168] sm:$0xff] %vm268_vm2, %v251_v35  ;;  %v719_v35 = vld [vmem:[#allocation2 + $0x131] sm:$0xff] }
  0xcf   :  { %7339 = vmatmul.msk.f32.gmra.mxu2 %vm44_vm0, %v840_v0 }
  0xd1   :  { %329 = vrot.lane.b32.xlu1 %v8174_v44, %s7759_s26 }
  0xd2   :  { %426 = vrot.lane.b32.xlu2 %v8181_v46, %s7760_s20  ;;  %234 = vrot.lane.b32.xlu0 %v195_v3, %s7758_s25  ;;  %v614_v46 = vld [vmem:[#allocation2 + $0x80] sm:$0xff] }
  0xd3   :  { %v346_v47 = vpop.permute.xlu1 %345 }
  0xd4   :  { %v737_v48 = vpop.permute.xlu2 %736  ;;  %380 = vst.msk [vmem:[#allocation3 + $0x150] sm:$0xff] %vm365_vm3, %v346_v47  ;;  %v221_v49 = vpop.permute.xlu0 %220  ;;  %v871_v44 = vld [vmem:[#allocation3 + $0x138] sm:$0xff] }
  0xd5   :  { %477 = vst.msk [vmem:[#allocation3 + $0x150] sm:$0xff] %vm462_vm4, %v8229_v63 }
  0xd6   :  { %986 = vmatmul.f32.gmra.mxu1 %v871_v44  ;;  %269 = vst.msk [vmem:[#allocation3] sm:$0xff] %vm268_vm2, %v221_v49  ;;  %v8405_v44 = vld [vmem:[#allocation2 + $0x92] sm:$0xff] }
  0xd7   :  { %7340 = vmatmul.msk.f32.gmra.mxu2 %vm44_vm0, %v843_v5  ;;  %823 = vst.msk [vmem:[#allocation3 + $0xb8] sm:$0xff] %vm44_vm0, %v8405_v44  ;;  %v489_v5 = vld [vmem:[#allocation2 + $0xd1] sm:$0xff] }
  0xd8   :  { %505 = vst.msk [vmem:[#allocation3 + $0xf8] sm:$0xff] %vm44_vm0, %v489_v5 }
  0xd9   :  { %652 = vrot.lane.b32.xlu1 %v614_v46, %s7759_s26 }
  0xda   :  { %748 = vrot.lane.b32.xlu2 %v710_v45, %s7760_s20  ;;  %557 = vrot.lane.b32.xlu0 %v518_v18, %s7758_s25  ;;  %v718_v18 = vld [vmem:[#allocation2 + $0x121] sm:$0xff] }
  0xdb   :  { %v348_v50 = vpop.permute.xlu1 %347  ;;  %510 = vst.msk [vmem:[#allocation3 + $0x170] sm:$0xff] %vm44_vm0, %v718_v18 }
  0xdc   :  { %v417_v51 = vpop.permute.xlu2 %416  ;;  %381 = vst.msk [vmem:[#allocation3 + $0x168] sm:$0xff] %vm365_vm3, %v348_v50  ;;  %v544_v52 = vpop.permute.xlu0 %543  ;;  %v874_v53 = vld [vmem:[#allocation3 + $0x150] sm:$0xff] }
  0xdd   :  { %478 = vst.msk [vmem:[#allocation3 + $0x168] sm:$0xff] %vm462_vm4, %v8247_v7  ;;  %v526_v7 = vld [vmem:[#allocation2 + $0x122] sm:$0xff] }
  0xde   :  { %989 = vmatmul.f32.gmra.mxu1 %v874_v53  ;;  %591 = vst.msk [vmem:[#allocation3 + $0x8] sm:$0xff] %vm268_vm2, %v544_v52  ;;  %v487_v53 = vld [vmem:[#allocation2 + $0xb1] sm:$0xff] }
  0xdf   :  { %830 = vst.msk [vmem:[#allocation3 + $0x160] sm:$0xff] %vm44_vm0, %v526_v7  ;;  %7341 = vmatmul.msk.f32.gmra.mxu2 %vm44_vm0, %v846_v12 }
  0xe0   :  { %503 = vst.msk [vmem:[#allocation3 + $0xc8] sm:$0xff] %vm44_vm0, %v487_v53 }
  0xe1   :  { %331 = vrot.lane.b32.xlu1 %v8217_v60, %s7759_s26 }
  0xe2   :  { %428 = vrot.lane.b32.xlu2 %v614_v46, %s7760_s20  ;;  %559 = vrot.lane.b32.xlu0 %v7892_v9, %s7758_s25 }
  0xe3   :  { %v318_v55 = vpop.permute.xlu1 %317 }
  0xe4   :  { %v739_v56 = vpop.permute.xlu2 %738  ;;  %366 = vst.msk [vmem:[#allocation3] sm:$0xff] %vm365_vm3, %v318_v55  ;;  %v223_v57 = vpop.permute.xlu0 %222  ;;  %v877_v58 = vld [vmem:[#allocation3 + $0x168] sm:$0xff]  ;;  %v855_v55 = vld [vmem:[#allocation3 + $0xb8] sm:$0xff] }
  0xe5   :  { %463 = vst.msk [vmem:[#allocation3] sm:$0xff] %vm462_vm4, %v415_v31 }
  0xe6   :  { %992 = vmatmul.f32.gmra.mxu1 %v877_v58  ;;  %270 = vst.msk [vmem:[#allocation3 + $0x18] sm:$0xff] %vm268_vm2, %v223_v57 }
  0xe7   :  { %7342 = vmatmul.msk.f32.gmra.mxu2 %vm44_vm0, %v849_v26  ;;  %1858 = vst.msk [vmem:[#allocation3 + $0xb8] sm:$0xff] %vm44_vm0, %v8405_v44 }
  0xe9   :  { %654 = vrot.lane.b32.xlu1 %v8311_v59, %s7759_s26 }
  0xea   :  { %750 = vrot.lane.b32.xlu2 %v8314_v61, %s7760_s20  ;;  %561 = vrot.lane.b32.xlu0 %v7922_v16, %s7758_s25 }
  0xeb   :  { %v641_v9 = vpop.permute.xlu1 %640 }
  0xec   :  { %v419_v60 = vpop.permute.xlu2 %418  ;;  %688 = vst.msk [vmem:[#allocation3 + $0x8] sm:$0xff] %vm365_vm3, %v641_v9  ;;  %v832_v62 = vld [vmem:[#allocation3] sm:$0xff]  ;;  %v546_v63 = vpop.permute.xlu0 %545 }
  0xed   :  { %784 = vst.msk [vmem:[#allocation3 + $0x8] sm:$0xff] %vm462_vm4, %v737_v48  ;;  %947 = vmatmul.f32.vlgmr.msra.gmra.mxu0 %v832_v62  ;;  %v1323_v62 = vld [vmem:[#allocation2 + $0x2] sm:$0xff] }
  0xee   :  { %592 = vst.msk [vmem:[#allocation3 + $0x20] sm:$0xff] %vm268_vm2, %v546_v63  ;;  %v809_v63 = vld [vmem:[#allocation2 + $0xd2] sm:$0xff] }
  0xef   :  { %7343 = vmatmul.msk.f32.gmra.mxu2 %vm44_vm0, %v852_v42  ;;  %825 = vst.msk [vmem:[#allocation3 + $0xe8] sm:$0xff] %vm44_vm0, %v809_v63  ;;  %v815_v63 = vld [vmem:[#allocation2 + $0x132] sm:$0xff] }
  0xf0   :  { %831 = vst.msk [vmem:[#allocation3 + $0x178] sm:$0xff] %vm44_vm0, %v815_v63 }
  0xf1   :  { %656 = vrot.lane.b32.xlu1 %v7900_v11, %s7759_s26 }
  0xf2   :  { %752 = vrot.lane.b32.xlu2 %v7896_v10, %s7760_s20  ;;  %563 = vrot.lane.b32.xlu0 %v7940_v20, %s7758_s25 }
  0xf3   :  { %v320_v16 = vpop.permute.xlu1 %319 }
  0xf4   :  { %v741_v1 = vpop.permute.xlu2 %740  ;;  %367 = vst.msk [vmem:[#allocation3 + $0x18] sm:$0xff] %vm365_vm3, %v320_v16  ;;  %v833_v2 = vld [vmem:[#allocation3 + $0x8] sm:$0xff]  ;;  %v225_v3 = vpop.permute.xlu0 %224 }
  0xf5   :  { %464 = vst.msk [vmem:[#allocation3 + $0x18] sm:$0xff] %vm462_vm4, %v417_v51  ;;  %1012 = vmatmul.f32.vlgmr.msrb.gmra.mxu1 %v833_v2 }
  0xf6   :  { %271 = vst.msk [vmem:[#allocation3 + $0x30] sm:$0xff] %vm268_vm2, %v225_v3 }
  0xf7   :  { %7344 = vmatmul.msk.f32.gmra.mxu2 %vm44_vm0, %v855_v55 }
  0xf9   :  { %658 = vrot.lane.b32.xlu1 %v7916_v15, %s7759_s26 }
  0xfa   :  { %754 = vrot.lane.b32.xlu2 %v7907_v13, %s7760_s20  ;;  %565 = vrot.lane.b32.xlu0 %v7954_v23, %s7758_s25 }
  0xfb   :  { %v643_v10 = vpop.permute.xlu1 %642 }
  0xfc   :  { %v421_v11 = vpop.permute.xlu2 %420  ;;  %689 = vst.msk [vmem:[#allocation3 + $0x20] sm:$0xff] %vm365_vm3, %v643_v10  ;;  %v835_v20 = vld [vmem:[#allocation3 + $0x18] sm:$0xff]  ;;  %v548_v4 = vpop.permute.xlu0 %547 }
  0xfd   :  { %785 = vst.msk [vmem:[#allocation3 + $0x20] sm:$0xff] %vm462_vm4, %v739_v56  ;;  %950 = vmatmul.f32.gmra.mxu0 %v835_v20  ;;  %v808_v56 = vld [vmem:[#allocation2 + $0xc2] sm:$0xff] }
  0xfe   :  { %593 = vst.msk [vmem:[#allocation3 + $0x38] sm:$0xff] %vm268_vm2, %v548_v4  ;;  %v861_v20 = vld [vmem:[#allocation3 + $0xe8] sm:$0xff] }
  0xff   :  { %824 = vst.msk [vmem:[#allocation3 + $0xd0] sm:$0xff] %vm44_vm0, %v808_v56  ;;  %v810_v4 = vld [vmem:[#allocation2 + $0xe2] sm:$0xff]  ;;  %v1192_v56 = vld [vmem:[%s12731_s3 + $0x110] sm:$0xff] }
 0x100   :  { %826 = vst.msk [vmem:[#allocation3 + $0x100] sm:$0xff] %vm44_vm0, %v810_v4 }
 0x101   :  { %660 = vrot.lane.b32.xlu1 %v7934_v19, %s7759_s26 }
 0x102   :  { %756 = vrot.lane.b32.xlu2 %v7924_v17, %s7760_s20  ;;  %567 = vrot.lane.b32.xlu0 %v7976_v28, %s7758_s25 }
 0x103   :  { %v322_v13 = vpop.permute.xlu1 %321 }
 0x104   :  { %v743_v15 = vpop.permute.xlu2 %742  ;;  %368 = vst.msk [vmem:[#allocation3 + $0x30] sm:$0xff] %vm365_vm3, %v322_v13  ;;  %v836_v23 = vld [vmem:[#allocation3 + $0x20] sm:$0xff]  ;;  %v227_v6 = vpop.permute.xlu0 %226 }
 0x105   :  { %465 = vst.msk [vmem:[#allocation3 + $0x30] sm:$0xff] %vm462_vm4, %v419_v60  ;;  %1015 = vmatmul.f32.gmra.mxu1 %v836_v23  ;;  %v1227_v60 = vld [vmem:[#allocation2 + $0x1] sm:$0xff] }
 0x106   :  { %272 = vst.msk [vmem:[#allocation3 + $0x48] sm:$0xff] %vm268_vm2, %v227_v6  ;;  %v858_v16 = vld [vmem:[#allocation3 + $0xd0] sm:$0xff] }
 0x107   :  { %7345 = vmatmul.msk.f32.gmra.mxu2 %vm44_vm0, %v858_v16 }
 0x109   :  { %662 = vrot.lane.b32.xlu1 %v7948_v22, %s7759_s26 }
 0x10a   :  { %758 = vrot.lane.b32.xlu2 %v7942_v21, %s7760_s20  ;;  %569 = vrot.lane.b32.xlu0 %v7999_v34, %s7758_s25 }
 0x10b   :  { %v645_v17 = vpop.permute.xlu1 %644 }
 0x10c   :  { %v423_v19 = vpop.permute.xlu2 %422  ;;  %690 = vst.msk [vmem:[#allocation3 + $0x38] sm:$0xff] %vm365_vm3, %v645_v17  ;;  %v838_v28 = vld [vmem:[#allocation3 + $0x30] sm:$0xff]  ;;  %v550_v8 = vpop.permute.xlu0 %549  ;;  %v1331_v17 = vld [vmem:[#allocation2 + $0xa2] sm:$0xff] }
 0x10d   :  { %786 = vst.msk [vmem:[#allocation3 + $0x38] sm:$0xff] %vm462_vm4, %v741_v1  ;;  %953 = vmatmul.f32.gmra.mxu0 %v838_v28  ;;  %v488_v1 = vld [vmem:[#allocation2 + $0xc1] sm:$0xff] }
 0x10e   :  { %594 = vst.msk [vmem:[#allocation3 + $0x50] sm:$0xff] %vm268_vm2, %v550_v8  ;;  %v490_v28 = vld [vmem:[#allocation2 + $0xe1] sm:$0xff]  ;;  %v811_v8 = vld [vmem:[#allocation2 + $0xf2] sm:$0xff] }
 0x10f   :  { %504 = vst.msk [vmem:[#allocation3 + $0xe0] sm:$0xff] %vm44_vm0, %v488_v1  ;;  %7346 = vmatmul.msk.f32.gmra.mxu2 %vm44_vm0, %v861_v20 }
 0x110   :  { %506 = vst.msk [vmem:[#allocation3 + $0x110] sm:$0xff] %vm44_vm0, %v490_v28 }
 0x111   :  { %664 = vrot.lane.b32.xlu1 %v7969_v27, %s7759_s26  ;;  %827 = vst.msk [vmem:[#allocation3 + $0x118] sm:$0xff] %vm44_vm0, %v811_v8 }
 0x112   :  { %760 = vrot.lane.b32.xlu2 %v7956_v24, %s7760_s20  ;;  %571 = vrot.lane.b32.xlu0 %v8014_v38, %s7758_s25 }
 0x113   :  { %v324_v21 = vpop.permute.xlu1 %323 }
 0x114   :  { %v745_v22 = vpop.permute.xlu2 %744  ;;  %369 = vst.msk [vmem:[#allocation3 + $0x48] sm:$0xff] %vm365_vm3, %v324_v21  ;;  %v839_v34 = vld [vmem:[#allocation3 + $0x38] sm:$0xff]  ;;  %v229_v14 = vpop.permute.xlu0 %228 }
 0x115   :  { %466 = vst.msk [vmem:[#allocation3 + $0x48] sm:$0xff] %vm462_vm4, %v421_v11  ;;  %1018 = vmatmul.f32.gmra.mxu1 %v839_v34 }
 0x116   :  { %273 = vst.msk [vmem:[#allocation3 + $0x60] sm:$0xff] %vm268_vm2, %v229_v14 }
 0x119   :  { %666 = vrot.lane.b32.xlu1 %v7993_v32, %s7759_s26 }
 0x11a   :  { %762 = vrot.lane.b32.xlu2 %v7978_v29, %s7760_s20  ;;  %573 = vrot.lane.b32.xlu0 %v526_v7, %s7758_s25 }
 0x11b   :  { %v647_v24 = vpop.permute.xlu1 %646 }
 0x11c   :  { %v425_v27 = vpop.permute.xlu2 %424  ;;  %691 = vst.msk [vmem:[#allocation3 + $0x50] sm:$0xff] %vm365_vm3, %v647_v24  ;;  %v841_v38 = vld [vmem:[#allocation3 + $0x48] sm:$0xff]  ;;  %v552_v25 = vpop.permute.xlu0 %551  ;;  %v867_v24 = vld [vmem:[#allocation3 + $0x118] sm:$0xff] }
 0x11d   :  { %787 = vst.msk [vmem:[#allocation3 + $0x50] sm:$0xff] %vm462_vm4, %v743_v15  ;;  %956 = vmatmul.f32.gmra.mxu0 %v841_v38 }
 0x11e   :  { %595 = vst.msk [vmem:[#allocation3 + $0x68] sm:$0xff] %vm268_vm2, %v552_v25 }
 0x121   :  { %668 = vrot.lane.b32.xlu1 %v8016_v39, %s7759_s26 }
 0x122   :  { %764 = vrot.lane.b32.xlu2 %v718_v18, %s7760_s20  ;;  %1259 = vrot.lane.b32.xlu0 %v1227_v60, %s7758_s25  ;;  %v812_v18 = vld [vmem:[#allocation2 + $0x102] sm:$0xff] }
 0x123   :  { %v326_v29 = vpop.permute.xlu1 %325  ;;  %828 = vst.msk [vmem:[#allocation3 + $0x130] sm:$0xff] %vm44_vm0, %v812_v18  ;;  %v1190_v60 = vld [vmem:[%s12731_s3 + $0x100] sm:$0xff] }
 0x124   :  { %v747_v32 = vpop.permute.xlu2 %746  ;;  %370 = vst.msk [vmem:[#allocation3 + $0x60] sm:$0xff] %vm365_vm3, %v326_v29  ;;  %v842_v30 = vld [vmem:[#allocation3 + $0x50] sm:$0xff]  ;;  %v231_v31 = vpop.permute.xlu0 %230 }
 0x125   :  { %467 = vst.msk [vmem:[#allocation3 + $0x60] sm:$0xff] %vm462_vm4, %v423_v19  ;;  %1021 = vmatmul.f32.gmra.mxu1 %v842_v30  ;;  %v1235_v19 = vld [vmem:[#allocation2 + $0xa1] sm:$0xff] }
 0x126   :  { %274 = vst.msk [vmem:[#allocation3 + $0x78] sm:$0xff] %vm268_vm2, %v231_v31  ;;  %v492_v31 = vld [vmem:[#allocation2 + $0x101] sm:$0xff] }
 0x127   :  { %508 = vst.msk [vmem:[#allocation3 + $0x140] sm:$0xff] %vm44_vm0, %v492_v31 }
 0x129   :  { %670 = vrot.lane.b32.xlu1 %v623_v33, %s7759_s26  ;;  %v8391_v36 = vpop.f32.mrf.mxu1  ;;  %v813_v33 = vld [vmem:[#allocation2 + $0x112] sm:$0xff] }
 0x12a   :  { %766 = vrot.lane.b32.xlu2 %v719_v35, %s7760_s20  ;;  %1275 = vrot.lane.b32.xlu0 %v1235_v19, %s7758_s25  ;;  %v870_v30 = vld [vmem:[#allocation3 + $0x130] sm:$0xff]  ;;  %829 = vst.msk [vmem:[#allocation3 + $0x148] sm:$0xff] %vm44_vm0, %v813_v33 }
 0x12b   :  { %v649_v39 = vpop.permute.xlu1 %648 }
 0x12c   :  { %v427_v37 = vpop.permute.xlu2 %426  ;;  %692 = vst.msk [vmem:[#allocation3 + $0x68] sm:$0xff] %vm365_vm3, %v649_v39  ;;  %v844_v40 = vld [vmem:[#allocation3 + $0x60] sm:$0xff]  ;;  %v554_v41 = vpop.permute.xlu0 %553 }
 0x12d   :  { %788 = vst.msk [vmem:[#allocation3 + $0x68] sm:$0xff] %vm462_vm4, %v745_v22  ;;  %959 = vmatmul.f32.gmra.mxu0 %v844_v40 }
 0x12e   :  { %596 = vst.msk [vmem:[#allocation3 + $0x80] sm:$0xff] %vm268_vm2, %v554_v41  ;;  %v8471_v41 = vld [vmem:[%s12730_s2] ss:$0 sm:$0xff] }
 0x131   :  { %1355 = vrot.lane.b32.xlu1 %v1323_v62, %s7759_s26  ;;  %v876_v62 = vld [vmem:[#allocation3 + $0x160] sm:$0xff] }
 0x132   :  { %1785 = vrot.lane.b32.xlu2 %v8314_v61, %s7760_s20 }
 0x133   :  { %v328_v43 = vpop.permute.xlu1 %327  ;;  %v8400_v45 = vpop.f32.mrf.mxu1 }
 0x134   :  { %371 = vst.msk [vmem:[#allocation3 + $0x78] sm:$0xff] %vm365_vm3, %v328_v43  ;;  %v845_v47 = vld [vmem:[#allocation3 + $0x68] sm:$0xff]  ;;  %v233_v48 = vpop.permute.xlu0 %232  ;;  %v749_v49 = vpop.permute.xlu2 %748 }
 0x135   :  { %468 = vst.msk [vmem:[#allocation3 + $0x78] sm:$0xff] %vm462_vm4, %v425_v27  ;;  %1024 = vmatmul.f32.gmra.mxu1 %v845_v47  ;;  %v491_v27 = vld [vmem:[#allocation2 + $0xf1] sm:$0xff] }
 0x136   :  { %275 = vst.msk [vmem:[#allocation3 + $0x90] sm:$0xff] %vm268_vm2, %v233_v48 }
 0x137   :  { %507 = vst.msk [vmem:[#allocation3 + $0x128] sm:$0xff] %vm44_vm0, %v491_v27 }
 0x139   :  { %1689 = vrot.lane.b32.xlu1 %v8311_v59, %s7759_s26  ;;  %v864_v59 = vld [vmem:[#allocation3 + $0x100] sm:$0xff] }
 0x13a   :  { %7347 = vmatmul.msk.f32.vlgmr.msra.gmra.mxu3 %vm44_vm0, %v864_v59 }
 0x13b   :  { %v651_v46 = vpop.permute.xlu1 %650  ;;  %v8409_v50 = vpop.f32.mrf.mxu1 }
 0x13c   :  { %693 = vst.msk [vmem:[#allocation3 + $0x80] sm:$0xff] %vm365_vm3, %v651_v46  ;;  %v847_v51 = vld [vmem:[#allocation3 + $0x78] sm:$0xff]  ;;  %v556_v52 = vpop.permute.xlu0 %555  ;;  %v429_v54 = vpop.permute.xlu2 %428 }
 0x13d   :  { %789 = vst.msk [vmem:[#allocation3 + $0x80] sm:$0xff] %vm462_vm4, %v747_v32  ;;  %962 = vmatmul.f32.gmra.mxu0 %v847_v51  ;;  %v1193_v46 = vld [vmem:[%s12731_s3 + $0x118] sm:$0xff] }
 0x13e   :  { %597 = vst.msk [vmem:[#allocation3 + $0x98] sm:$0xff] %vm268_vm2, %v556_v52  ;;  %v493_v51 = vld [vmem:[#allocation2 + $0x111] sm:$0xff]  ;;  %2108 = vmatpush.msrb.mxu0 %v1193_v46 }
 0x13f   :  { %509 = vst.msk [vmem:[#allocation3 + $0x158] sm:$0xff] %vm44_vm0, %v493_v51 }
 0x140   :  { %2109 = vmatpush.msrb.mxu0 %v1192_v56 }
 0x141   :  { %1371 = vrot.lane.b32.xlu1 %v1331_v17, %s7759_s26 }
 0x142   :  { %7348 = vmatmul.msk.f32.gmra.mxu3 %vm44_vm0, %v867_v24  ;;  %v1078_v43 = vpop.f32.mrf.mxu2 }
 0x143   :  { %v330_v57 = vpop.permute.xlu1 %329  ;;  %v8419_v58 = vpop.f32.mrf.mxu1 }
 0x144   :  { %372 = vst.msk [vmem:[#allocation3 + $0x90] sm:$0xff] %vm365_vm3, %v330_v57  ;;  %v848_v61 = vld [vmem:[#allocation3 + $0x80] sm:$0xff]  ;;  %v235_v9 = vpop.permute.xlu0 %234  ;;  %v751_v0 = vpop.permute.xlu2 %750 }
 0x145   :  { %469 = vst.msk [vmem:[#allocation3 + $0x90] sm:$0xff] %vm462_vm4, %v427_v37  ;;  %1027 = vmatmul.f32.gmra.mxu1 %v848_v61  ;;  %v1191_v61 = vld [vmem:[%s12731_s3 + $0x108] sm:$0xff] }
 0x146   :  { %276 = vst.msk [vmem:[#allocation3 + $0xa8] sm:$0xff] %vm268_vm2, %v235_v9  ;;  %2110 = vmatpush.msrb.mxu0 %v1191_v61 }
 0x148   :  { %2111 = vmatpush.msrb.mxu0 %v1190_v60  ;;  %v1173_v60 = vld [vmem:[%s12731_s3 + $0x78] sm:$0xff] }
 0x149   :  { %1966 = vmatpush.msrb.mxu3 %v1173_v60 }
 0x14a   :  { %7349 = vmatmul.msk.f32.gmra.mxu3 %vm44_vm0, %v870_v30 }
 0x14b   :  { %v653_v2 = vpop.permute.xlu1 %652  ;;  %v8429_v3 = vpop.f32.mrf.mxu1 }
 0x14c   :  { %694 = vst.msk [vmem:[#allocation3 + $0x98] sm:$0xff] %vm365_vm3, %v653_v2  ;;  %v850_v10 = vld [vmem:[#allocation3 + $0x90] sm:$0xff]  ;;  %v558_v11 = vpop.permute.xlu0 %557  ;;  %v753_v15 = vpop.permute.xlu2 %752 }
 0x14d   :  { %790 = vst.msk [vmem:[#allocation3 + $0x98] sm:$0xff] %vm462_vm4, %v749_v49  ;;  %965 = vmatmul.f32.gmra.mxu0 %v850_v10  ;;  %v873_v49 = vld [vmem:[#allocation3 + $0x148] sm:$0xff] }
 0x14e   :  { %598 = vst.msk [vmem:[#allocation3 + $0xb0] sm:$0xff] %vm268_vm2, %v558_v11 }
 0x152   :  { %7350 = vmatmul.msk.f32.gmra.mxu3 %vm44_vm0, %v873_v49 }
 0x153   :  { %v332_v13 = vpop.permute.xlu1 %331  ;;  %v8440_v6 = vpop.f32.mrf.mxu1 }
 0x154   :  { %373 = vst.msk [vmem:[#allocation3 + $0xa8] sm:$0xff] %vm365_vm3, %v332_v13  ;;  %v851_v23 = vld [vmem:[#allocation3 + $0x98] sm:$0xff]  ;;  %v560_v7 = vpop.permute.xlu0 %559  ;;  %v755_v14 = vpop.permute.xlu2 %754 }
 0x155   :  { %470 = vst.msk [vmem:[#allocation3 + $0xa8] sm:$0xff] %vm462_vm4, %v429_v54  ;;  %1030 = vmatmul.f32.gmra.mxu1 %v851_v23  ;;  %v879_v13 = vld [vmem:[#allocation3 + $0x178] sm:$0xff]  ;;  %v1081_v23 = vpop.f32.mrf.mxu2 }
 0x156   :  { %599 = vst.msk [vmem:[#allocation3 + $0xc8] sm:$0xff] %vm268_vm2, %v560_v7 }
 0x157   :  { %1866 = vst.msk [vmem:[#allocation3 + $0x178] sm:$0xff] %vm44_vm0, %v815_v63  ;;  %v1172_v63 = vld [vmem:[%s12731_s3 + $0x70] sm:$0xff] }
 0x158   :  { %1967 = vmatpush.msrb.mxu3 %v1172_v63  ;;  %v1189_v63 = vld [vmem:[%s12731_s3 + $0xf8] sm:$0xff] }
 0x159   :  { %2031 = vmatpush.msrb.mxu2 %v1189_v63 }
 0x15a   :  { %7351 = vmatmul.msk.f32.gmra.mxu3 %vm44_vm0, %v876_v62 }
 0x15b   :  { %v655_v12 = vpop.permute.xlu1 %654  ;;  %v8451_v34 = vpop.f32.mrf.mxu1 }
 0x15c   :  { %695 = vst.msk [vmem:[#allocation3 + $0xb0] sm:$0xff] %vm365_vm3, %v655_v12  ;;  %v853_v21 = vld [vmem:[#allocation3 + $0xa8] sm:$0xff]  ;;  %v562_v22 = vpop.permute.xlu0 %561  ;;  %v757_v32 = vpop.permute.xlu2 %756 }
 0x15d   :  { %791 = vst.msk [vmem:[#allocation3 + $0xb0] sm:$0xff] %vm462_vm4, %v751_v0  ;;  %968 = vmatmul.f32.gmra.mxu0 %v853_v21  ;;  %v1084_v30 = vpop.f32.mrf.mxu2 }
 0x15e   :  { %600 = vst.msk [vmem:[#allocation3 + $0xe0] sm:$0xff] %vm268_vm2, %v562_v22 }
 0x162   :  { %7352 = vmatmul.msk.f32.gmra.mxu3 %vm44_vm0, %v879_v13 }
 0x163   :  { %v657_v38 = vpop.permute.xlu1 %656  ;;  %v8460_v29 = vpop.f32.mrf.mxu1 }
 0x164   :  { %696 = vst.msk [vmem:[#allocation3 + $0xc8] sm:$0xff] %vm365_vm3, %v657_v38  ;;  %v854_v25 = vld [vmem:[#allocation3 + $0xb0] sm:$0xff]  ;;  %v564_v26 = vpop.permute.xlu0 %563  ;;  %v759_v48 = vpop.permute.xlu2 %758 }
 0x165   :  { %792 = vst.msk [vmem:[#allocation3 + $0xc8] sm:$0xff] %vm462_vm4, %v753_v15  ;;  %1033 = vmatmul.f32.gmra.mxu1 %v854_v25 }
 0x166   :  { %601 = vst.msk [vmem:[#allocation3 + $0xf8] sm:$0xff] %vm268_vm2, %v564_v26 }
 0x16a   :  { %v948_v40 = vpop.f32.mrf.mxu0 }
 0x16b   :  { %v659_v35 = vpop.permute.xlu1 %658  ;;  %v949_v42 = vadd.f32 %v8471_v41, %v948_v40 }
 0x16c   :  { %697 = vst.msk [vmem:[#allocation3 + $0xe0] sm:$0xff] %vm365_vm3, %v659_v35  ;;  %v857_v39 = vld [vmem:[#allocation3 + $0xc8] sm:$0xff]  ;;  %v566_v37 = vpop.permute.xlu0 %565  ;;  %v761_v1 = vpop.permute.xlu2 %760 }
 0x16d   :  { %793 = vst.msk [vmem:[#allocation3 + $0xe0] sm:$0xff] %vm462_vm4, %v755_v14  ;;  %1036 = vmatmul.f32.gmra.mxu1 %v857_v39 }
 0x16e   :  { %602 = vst.msk [vmem:[#allocation3 + $0x110] sm:$0xff] %vm268_vm2, %v566_v37 }
 0x172   :  { %v1013_v47 = vpop.f32.mrf.mxu1 }
 0x173   :  { %v1014_v52 = vadd.f32 %v1013_v47, %v949_v42  ;;  %v661_v53 = vpop.permute.xlu1 %660 }
 0x174   :  { %698 = vst.msk [vmem:[#allocation3 + $0xf8] sm:$0xff] %vm365_vm3, %v661_v53  ;;  %v860_v54 = vld [vmem:[#allocation3 + $0xe0] sm:$0xff]  ;;  %v568_v55 = vpop.permute.xlu0 %567  ;;  %v763_v8 = vpop.permute.xlu2 %762 }
 0x175   :  { %v8483_v57 = vadd.f32 %v1078_v43, %v1014_v52  ;;  %794 = vst.msk [vmem:[#allocation3 + $0xf8] sm:$0xff] %vm462_vm4, %v757_v32  ;;  %1039 = vmatmul.f32.gmra.mxu1 %v860_v54  ;;  %v1087_v54 = vpop.f32.mrf.mxu2 }
 0x176   :  { %603 = vst.msk [vmem:[#allocation3 + $0x128] sm:$0xff] %vm268_vm2, %v568_v55 }
 0x177   :  { %v12757_v9 = vmax.f32 %v8483_v57, 0.0 }
 0x179   :  { %1142 = vst.msk [vmem:[#allocation2 + $0x11] sm:$0xff] %vm44_vm0, %v12757_v9 }
 0x17a   :  { %v951_v10 = vpop.f32.mrf.mxu0 }
 0x17b   :  { %v663_v0 = vpop.permute.xlu1 %662  ;;  %v952_v5 = vadd.f32 %v8471_v41, %v951_v10 }
 0x17c   :  { %699 = vst.msk [vmem:[#allocation3 + $0x110] sm:$0xff] %vm365_vm3, %v663_v0  ;;  %v863_v16 = vld [vmem:[#allocation3 + $0xf8] sm:$0xff]  ;;  %v570_v2 = vpop.permute.xlu0 %569  ;;  %v765_v25 = vpop.permute.xlu2 %764 }
 0x17d   :  { %795 = vst.msk [vmem:[#allocation3 + $0x110] sm:$0xff] %vm462_vm4, %v759_v48  ;;  %1042 = vmatmul.f32.gmra.mxu1 %v863_v16  ;;  %v1171_v16 = vld [vmem:[%s12731_s3 + $0x68] sm:$0xff] }
 0x17e   :  { %604 = vst.msk [vmem:[#allocation3 + $0x140] sm:$0xff] %vm268_vm2, %v570_v2  ;;  %1968 = vmatpush.msrb.mxu3 %v1171_v16  ;;  %v1169_v2 = vld [vmem:[%s12731_s3 + $0x58] sm:$0xff] }
 0x180   :  { %v1547_v11 = vld [vmem:[#allocation2 + $0x12] sm:$0xff] }
 0x181   :  { %v1419_v20 = vld [vmem:[#allocation2 + $0x10] sm:$0xff]  ;;  %1579 = vrot.lane.b32.xlu0 %v1547_v11, %s7758_s25  ;;  %1357 = vrot.lane.b32.xlu1 %v1547_v11, %s7759_s26 }
 0x182   :  { %v1228_v4 = vld [vmem:[#allocation2 + $0x11] sm:$0xff]  ;;  %1451 = vrot.lane.b32.xlu2 %v1419_v20, %s7760_s20  ;;  %v1016_v15 = vpop.f32.mrf.mxu1  ;;  %1212 = vst.msk [vmem:[#allocation3 + $0x18] sm:$0xff] %vm44_vm0, %v1419_v20  ;;  %v1167_v20 = vld [vmem:[%s12731_s3 + $0x48] sm:$0xff] }
 0x183   :  { %1531 = vst.msk [vmem:[#allocation3 + $0x8] sm:$0xff] %vm44_vm0, %v1228_v4  ;;  %v1017_v7 = vadd.f32 %v1016_v15, %v952_v5  ;;  %v665_v59 = vpop.permute.xlu1 %664  ;;  %v1168_v11 = vld [vmem:[%s12731_s3 + $0x50] sm:$0xff] }
 0x184   :  { %700 = vst.msk [vmem:[#allocation3 + $0x128] sm:$0xff] %vm365_vm3, %v665_v59  ;;  %v866_v17 = vld [vmem:[#allocation3 + $0x110] sm:$0xff]  ;;  %v572_v19 = vpop.permute.xlu0 %571  ;;  %v767_v42 = vpop.permute.xlu2 %766 }
 0x185   :  { %v8511_v28 = vadd.f32 %v1081_v23, %v1017_v7  ;;  %796 = vst.msk [vmem:[#allocation3 + $0x128] sm:$0xff] %vm462_vm4, %v761_v1  ;;  %1045 = vmatmul.f32.gmra.mxu1 %v866_v17  ;;  %v1170_v1 = vld [vmem:[%s12731_s3 + $0x60] sm:$0xff]  ;;  %v1090_v7 = vpop.f32.mrf.mxu2 }
 0x186   :  { %605 = vst.msk [vmem:[#allocation3 + $0x158] sm:$0xff] %vm268_vm2, %v572_v19  ;;  %1969 = vmatpush.msrb.mxu3 %v1170_v1  ;;  %v1166_v17 = vld [vmem:[%s12731_s3 + $0x40] sm:$0xff] }
 0x187   :  { %v12756_v12 = vmax.f32 %v8511_v28, 0.0 }
 0x188   :  { %1970 = vmatpush.msrb.mxu3 %v1169_v2 }
 0x189   :  { %1143 = vst.msk [vmem:[#allocation2 + $0x21] sm:$0xff] %vm44_vm0, %v12756_v12  ;;  %1261 = vrot.lane.b32.xlu0 %v1228_v4, %s7758_s25 }
 0x18a   :  { %v954_v18 = vpop.f32.mrf.mxu0  ;;  %1971 = vmatpush.msrb.mxu3 %v1168_v11  ;;  %v1188_v11 = vld [vmem:[%s12731_s3 + $0xf0] sm:$0xff] }
 0x18b   :  { %v667_v21 = vpop.permute.xlu1 %666  ;;  %v955_v26 = vadd.f32 %v8471_v41, %v954_v18  ;;  %v1195_v18 = vld [vmem:[#allocation2] sm:$0xff]  ;;  %2032 = vmatpush.msrb.mxu2 %v1188_v11 }
 0x18c   :  { %701 = vst.msk [vmem:[#allocation3 + $0x140] sm:$0xff] %vm365_vm3, %v667_v21  ;;  %v869_v22 = vld [vmem:[#allocation3 + $0x128] sm:$0xff]  ;;  %v574_v14 = vpop.permute.xlu0 %573  ;;  %1972 = vmatpush.msrb.mxu3 %v1167_v20  ;;  %v1174_v11 = vld [vmem:[%s12731_s3 + $0x80] sm:$0xff] }
 0x18d   :  { %797 = vst.msk [vmem:[#allocation3 + $0x140] sm:$0xff] %vm462_vm4, %v763_v8  ;;  %1048 = vmatmul.f32.gmra.mxu1 %v869_v22  ;;  %v1165_v8 = vld [vmem:[%s12731_s3 + $0x38] sm:$0xff] }
 0x18e   :  { %606 = vst.msk [vmem:[#allocation3 + $0x170] sm:$0xff] %vm268_vm2, %v574_v14  ;;  %1973 = vmatpush.msrb.mxu3 %v1166_v17  ;;  %v1164_v14 = vld [vmem:[%s12731_s3 + $0x30] sm:$0xff]  ;;  %v1185_v17 = vld [vmem:[%s12731_s3 + $0xd8] sm:$0xff] }
 0x18f   :  { %1211 = vst.msk [vmem:[#allocation3] sm:$0xff] %vm44_vm0, %v1195_v18 }
 0x190   :  { %v1739_v24 = vld [vmem:[#allocation2 + $0x21] sm:$0xff]  ;;  %1974 = vmatpush.msrb.mxu3 %v1165_v8  ;;  %v1184_v8 = vld [vmem:[%s12731_s3 + $0xd0] sm:$0xff] }
 0x191   :  { %v1643_v27 = vld [vmem:[#allocation2 + $0x20] sm:$0xff]  ;;  %1771 = vrot.lane.b32.xlu2 %v1739_v24, %s7760_s20  ;;  %1532 = vst.msk [vmem:[#allocation3 + $0x20] sm:$0xff] %vm44_vm0, %v1739_v24 }
 0x192   :  { %v1548_v38 = vld [vmem:[#allocation2 + $0x22] sm:$0xff]  ;;  %1675 = vrot.lane.b32.xlu1 %v1643_v27, %s7759_s26  ;;  %v1019_v32 = vpop.f32.mrf.mxu1  ;;  %1213 = vst.msk [vmem:[#allocation3 + $0x30] sm:$0xff] %vm44_vm0, %v1643_v27  ;;  %1975 = vmatpush.msrb.mxu3 %v1164_v14 }
 0x193   :  { %1851 = vst.msk [vmem:[#allocation3 + $0x10] sm:$0xff] %vm44_vm0, %v1548_v38  ;;  %1581 = vrot.lane.b32.xlu0 %v1548_v38, %s7758_s25  ;;  %v1020_v31 = vadd.f32 %v1019_v32, %v955_v26  ;;  %v669_v33 = vpop.permute.xlu1 %668  ;;  %v1161_v32 = vld [vmem:[%s12731_s3 + $0x18] sm:$0xff]  ;;  %v1183_v14 = vld [vmem:[%s12731_s3 + $0xc8] sm:$0xff] }
 0x194   :  { %702 = vst.msk [vmem:[#allocation3 + $0x158] sm:$0xff] %vm365_vm3, %v669_v33  ;;  %v872_v35 = vld [vmem:[#allocation3 + $0x140] sm:$0xff] }
 0x195   :  { %v8531_v39 = vadd.f32 %v1084_v30, %v1020_v31  ;;  %798 = vst.msk [vmem:[#allocation3 + $0x158] sm:$0xff] %vm462_vm4, %v765_v25  ;;  %1051 = vmatmul.f32.gmra.mxu1 %v872_v35  ;;  %v1162_v25 = vld [vmem:[%s12731_s3 + $0x20] sm:$0xff]  ;;  %v1160_v30 = vld [vmem:[%s12731_s3 + $0x10] sm:$0xff] }
 0x197   :  { %v12755_v37 = vmax.f32 %v8531_v39, 0.0 }
 0x199   :  { %1144 = vst.msk [vmem:[#allocation2 + $0x31] sm:$0xff] %vm44_vm0, %v12755_v37  ;;  %1453 = vrot.lane.b32.xlu2 %v1643_v27, %s7760_s20  ;;  %v1163_v27 = vld [vmem:[%s12731_s3 + $0x28] sm:$0xff] }
 0x19a   :  { %v1869_v40 = vld [vmem:[#allocation3 + $0x10] sm:$0xff]  ;;  %1359 = vrot.lane.b32.xlu1 %v1548_v38, %s7759_s26  ;;  %v957_v48 = vpop.f32.mrf.mxu0  ;;  %1976 = vmatpush.msrb.mxu3 %v1163_v27  ;;  %v1182_v27 = vld [vmem:[%s12731_s3 + $0xc0] sm:$0xff] }
 0x19b   :  { %7353 = vmatmul.msk.f32.vlgmr.msrb.gmra.mxu0 %vm44_vm0, %v1869_v40  ;;  %1263 = vrot.lane.b32.xlu0 %v1739_v24, %s7758_s25  ;;  %v671_v43 = vpop.permute.xlu1 %670  ;;  %v958_v52 = vadd.f32 %v8471_v41, %v957_v48  ;;  %v1260_v24 = vpop.permute.xlu0 %1259 }
 0x19c   :  { %703 = vst.msk [vmem:[#allocation3 + $0x170] sm:$0xff] %vm365_vm3, %v671_v43  ;;  %v875_v47 = vld [vmem:[#allocation3 + $0x158] sm:$0xff]  ;;  %1977 = vmatpush.msrb.mxu3 %v1162_v25  ;;  %v1093_v43 = vpop.f32.mrf.mxu2 }
 0x19d   :  { %799 = vst.msk [vmem:[#allocation3 + $0x170] sm:$0xff] %vm462_vm4, %v767_v42  ;;  %1054 = vmatmul.f32.gmra.mxu1 %v875_v47  ;;  %v1159_v47 = vld [vmem:[%s12731_s3 + $0x8] sm:$0xff] }
 0x19e   :  { %1307 = vst.msk [vmem:[#allocation3] sm:$0xff] %vm268_vm2, %v1260_v24  ;;  %1978 = vmatpush.msrb.mxu3 %v1161_v32 }
 0x1a0   :  { %v1740_v49 = vld [vmem:[#allocation2 + $0x31] sm:$0xff]  ;;  %1979 = vmatpush.msrb.mxu3 %v1160_v30 }
 0x1a1   :  { %v1644_v46 = vld [vmem:[#allocation2 + $0x30] sm:$0xff]  ;;  %1773 = vrot.lane.b32.xlu2 %v1740_v49, %s7760_s20  ;;  %1533 = vst.msk [vmem:[#allocation3 + $0x38] sm:$0xff] %vm44_vm0, %v1740_v49 }
 0x1a2   :  { %v1549_v51 = vld [vmem:[#allocation2 + $0x32] sm:$0xff]  ;;  %1677 = vrot.lane.b32.xlu1 %v1644_v46, %s7759_s26  ;;  %v1022_v53 = vpop.f32.mrf.mxu1  ;;  %1214 = vst.msk [vmem:[#allocation3 + $0x48] sm:$0xff] %vm44_vm0, %v1644_v46  ;;  %1980 = vmatpush.msrb.mxu3 %v1159_v47 }
 0x1a3   :  { %1852 = vst.msk [vmem:[#allocation3 + $0x28] sm:$0xff] %vm44_vm0, %v1549_v51  ;;  %1583 = vrot.lane.b32.xlu0 %v1549_v51, %s7758_s25  ;;  %v1023_v55 = vadd.f32 %v1022_v53, %v958_v52  ;;  %v1356_v38 = vpop.permute.xlu1 %1355 }
 0x1a4   :  { %v878_v56 = vld [vmem:[#allocation3 + $0x170] sm:$0xff]  ;;  %1403 = vst.msk [vmem:[#allocation3] sm:$0xff] %vm365_vm3, %v1356_v38  ;;  %v1181_v38 = vld [vmem:[%s12731_s3 + $0xb8] sm:$0xff] }
 0x1a5   :  { %v8551_v61 = vadd.f32 %v1087_v54, %v1023_v55  ;;  %1057 = vmatmul.f32.gmra.mxu1 %v878_v56  ;;  %v1203_v54 = vld [vmem:[#allocation2 + $0xa0] sm:$0xff]  ;;  %v1276_v55 = vpop.permute.xlu0 %1275 }
 0x1a6   :  { %1219 = vst.msk [vmem:[#allocation3 + $0xc0] sm:$0xff] %vm44_vm0, %v1203_v54  ;;  %v973_v54 = vadd.f32 %v8471_v41, %v8391_v36  ;;  %v1176_v36 = vld [vmem:[%s12731_s3 + $0x90] sm:$0xff] }
 0x1a7   :  { %v12754_v62 = vmax.f32 %v8551_v61, 0.0  ;;  %1315 = vst.msk [vmem:[#allocation3 + $0xc0] sm:$0xff] %vm268_vm2, %v1276_v55 }
 0x1a9   :  { %1145 = vst.msk [vmem:[#allocation2 + $0x41] sm:$0xff] %vm44_vm0, %v12754_v62  ;;  %1455 = vrot.lane.b32.xlu2 %v1644_v46, %s7760_s20  ;;  %v1158_v46 = vld [vmem:[%s12731_s3] sm:$0xff] }
 0x1aa   :  { %v1872_v0 = vld [vmem:[#allocation3 + $0x28] sm:$0xff]  ;;  %1361 = vrot.lane.b32.xlu1 %v1549_v51, %s7759_s26  ;;  %v960_v10 = vpop.f32.mrf.mxu0  ;;  %1981 = vmatpush.msrb.mxu3 %v1158_v46 }
 0x1ab   :  { %7354 = vmatmul.msk.f32.gmra.mxu0 %vm44_vm0, %v1872_v0  ;;  %1265 = vrot.lane.b32.xlu0 %v1740_v49, %s7758_s25  ;;  %v961_v15 = vadd.f32 %v8471_v41, %v960_v10  ;;  %v8632_v49 = vpop.permute.xlu1 %1689  ;;  %v8656_v10 = vpop.permute.xlu2 %1785 }
 0x1b0   :  { %v1741_v4 = vld [vmem:[#allocation2 + $0x41] sm:$0xff] }
 0x1b1   :  { %v1645_v5 = vld [vmem:[#allocation2 + $0x40] sm:$0xff]  ;;  %1775 = vrot.lane.b32.xlu2 %v1741_v4, %s7760_s20  ;;  %1534 = vst.msk [vmem:[#allocation3 + $0x50] sm:$0xff] %vm44_vm0, %v1741_v4 }
 0x1b2   :  { %v1550_v13 = vld [vmem:[#allocation2 + $0x42] sm:$0xff]  ;;  %1679 = vrot.lane.b32.xlu1 %v1645_v5, %s7759_s26  ;;  %v1025_v23 = vpop.f32.mrf.mxu1  ;;  %1215 = vst.msk [vmem:[#allocation3 + $0x60] sm:$0xff] %vm44_vm0, %v1645_v5 }
 0x1b3   :  { %1853 = vst.msk [vmem:[#allocation3 + $0x40] sm:$0xff] %vm44_vm0, %v1550_v13  ;;  %1585 = vrot.lane.b32.xlu0 %v1550_v13, %s7758_s25  ;;  %v1026_v59 = vadd.f32 %v1025_v23, %v961_v15  ;;  %v1372_v56 = vpop.permute.xlu1 %1371  ;;  %v1186_v15 = vld [vmem:[%s12731_s3 + $0xe0] sm:$0xff] }
 0x1b4   :  { %1411 = vst.msk [vmem:[#allocation3 + $0xc0] sm:$0xff] %vm365_vm3, %v1372_v56  ;;  %v1177_v56 = vld [vmem:[%s12731_s3 + $0x98] sm:$0xff] }
 0x1b5   :  { %v8592_v19 = vadd.f32 %v1090_v7, %v1026_v59 }
 0x1b7   :  { %v12753_v21 = vmax.f32 %v8592_v19, 0.0 }
 0x1b9   :  { %1146 = vst.msk [vmem:[#allocation2 + $0x51] sm:$0xff] %vm44_vm0, %v12753_v21  ;;  %1457 = vrot.lane.b32.xlu2 %v1645_v5, %s7760_s20  ;;  %v1187_v5 = vld [vmem:[%s12731_s3 + $0xe8] sm:$0xff] }
 0x1ba   :  { %v1875_v22 = vld [vmem:[#allocation3 + $0x40] sm:$0xff]  ;;  %1363 = vrot.lane.b32.xlu1 %v1550_v13, %s7759_s26  ;;  %v963_v26 = vpop.f32.mrf.mxu0  ;;  %2033 = vmatpush.msrb.mxu2 %v1187_v5 }
 0x1bb   :  { %7355 = vmatmul.msk.f32.gmra.mxu0 %vm44_vm0, %v1875_v22  ;;  %1267 = vrot.lane.b32.xlu0 %v1741_v4, %s7758_s25  ;;  %v964_v40 = vadd.f32 %v8471_v41, %v963_v26  ;;  %v1096_v4 = vpop.f32.mrf.mxu2 }
 0x1bc   :  { %2034 = vmatpush.msrb.mxu2 %v1186_v15 }
 0x1be   :  { %2035 = vmatpush.msrb.mxu2 %v1185_v17 }
 0x1c0   :  { %v1742_v31 = vld [vmem:[#allocation2 + $0x51] sm:$0xff]  ;;  %2036 = vmatpush.msrb.mxu2 %v1184_v8 }
 0x1c1   :  { %v1646_v33 = vld [vmem:[#allocation2 + $0x50] sm:$0xff]  ;;  %1777 = vrot.lane.b32.xlu2 %v1742_v31, %s7760_s20  ;;  %1535 = vst.msk [vmem:[#allocation3 + $0x68] sm:$0xff] %vm44_vm0, %v1742_v31 }
 0x1c2   :  { %v1551_v35 = vld [vmem:[#allocation2 + $0x52] sm:$0xff]  ;;  %1681 = vrot.lane.b32.xlu1 %v1646_v33, %s7759_s26  ;;  %v1028_v42 = vpop.f32.mrf.mxu1  ;;  %1216 = vst.msk [vmem:[#allocation3 + $0x78] sm:$0xff] %vm44_vm0, %v1646_v33  ;;  %2037 = vmatpush.msrb.mxu2 %v1183_v14 }
 0x1c3   :  { %1854 = vst.msk [vmem:[#allocation3 + $0x58] sm:$0xff] %vm44_vm0, %v1551_v35  ;;  %1587 = vrot.lane.b32.xlu0 %v1551_v35, %s7758_s25  ;;  %v1029_v48 = vadd.f32 %v1028_v42, %v964_v40  ;;  %v1099_v24 = vpop.f32.mrf.mxu2 }
 0x1c4   :  { %2038 = vmatpush.msrb.mxu2 %v1182_v27 }
 0x1c5   :  { %v8638_v51 = vadd.f32 %v1093_v43, %v1029_v48  ;;  %v1179_v43 = vld [vmem:[%s12731_s3 + $0xa8] sm:$0xff] }
 0x1c6   :  { %2039 = vmatpush.msrb.mxu2 %v1181_v38  ;;  %v979_v38 = vadd.f32 %v8471_v41, %v8409_v50 }
 0x1c7   :  { %v12752_v52 = vmax.f32 %v8638_v51, 0.0 }
 0x1c9   :  { %1147 = vst.msk [vmem:[#allocation2 + $0x61] sm:$0xff] %vm44_vm0, %v12752_v52  ;;  %1459 = vrot.lane.b32.xlu2 %v1646_v33, %s7760_s20 }
 0x1ca   :  { %v1878_v53 = vld [vmem:[#allocation3 + $0x58] sm:$0xff]  ;;  %1365 = vrot.lane.b32.xlu1 %v1551_v35, %s7759_s26  ;;  %v966_v60 = vpop.f32.mrf.mxu0  ;;  %v1180_v35 = vld [vmem:[%s12731_s3 + $0xb0] sm:$0xff] }
 0x1cb   :  { %7356 = vmatmul.msk.f32.gmra.mxu0 %vm44_vm0, %v1878_v53  ;;  %1269 = vrot.lane.b32.xlu0 %v1742_v31, %s7758_s25  ;;  %v967_v2 = vadd.f32 %v8471_v41, %v966_v60  ;;  %v8701_v31 = vld [vmem:[#allocation3 + $0xb8] sm:$0xff]  ;;  %v1178_v53 = vld [vmem:[%s12731_s3 + $0xa0] sm:$0xff] }
 0x1cc   :  { %3137 = vst.msk [vmem:[#allocation3 + $0xb8] sm:$0xff] %vm44_vm0, %v8405_v44  ;;  %2040 = vmatpush.msrb.mxu2 %v1180_v35  ;;  %v1102_v44 = vpop.f32.mrf.mxu2 }
 0x1ce   :  { %2041 = vmatpush.msrb.mxu2 %v1179_v43 }
 0x1d0   :  { %v1743_v0 = vld [vmem:[#allocation2 + $0x61] sm:$0xff]  ;;  %2042 = vmatpush.msrb.mxu2 %v1178_v53  ;;  %v982_v53 = vadd.f32 %v8471_v41, %v8419_v58 }
 0x1d1   :  { %v1647_v16 = vld [vmem:[#allocation2 + $0x60] sm:$0xff]  ;;  %1779 = vrot.lane.b32.xlu2 %v1743_v0, %s7760_s20  ;;  %1536 = vst.msk [vmem:[#allocation3 + $0x80] sm:$0xff] %vm44_vm0, %v1743_v0 }
 0x1d2   :  { %v1552_v1 = vld [vmem:[#allocation2 + $0x62] sm:$0xff]  ;;  %1683 = vrot.lane.b32.xlu1 %v1647_v16, %s7759_s26  ;;  %v1031_v20 = vpop.f32.mrf.mxu1  ;;  %1217 = vst.msk [vmem:[#allocation3 + $0x90] sm:$0xff] %vm44_vm0, %v1647_v16  ;;  %2043 = vmatpush.msrb.mxu2 %v1177_v56 }
 0x1d3   :  { %1855 = vst.msk [vmem:[#allocation3 + $0x70] sm:$0xff] %vm44_vm0, %v1552_v1  ;;  %1589 = vrot.lane.b32.xlu0 %v1552_v1, %s7758_s25  ;;  %v1032_v13 = vadd.f32 %v1031_v20, %v967_v2  ;;  %v1108_v2 = vpop.f32.mrf.mxu3 }
 0x1d4   :  { %2044 = vmatpush.msrb.mxu2 %v1176_v36 }
 0x1d5   :  { %v8672_v23 = vadd.f32 %v1096_v4, %v1032_v13  ;;  %v976_v13 = vadd.f32 %v8471_v41, %v8400_v45 }
 0x1d7   :  { %v12751_v7 = vmax.f32 %v8672_v23, 0.0 }
 0x1d9   :  { %1148 = vst.msk [vmem:[#allocation2 + $0x71] sm:$0xff] %vm44_vm0, %v12751_v7  ;;  %1461 = vrot.lane.b32.xlu2 %v1647_v16, %s7760_s20  ;;  %v1175_v16 = vld [vmem:[%s12731_s3 + $0x88] sm:$0xff] }
 0x1da   :  { %v1881_v59 = vld [vmem:[#allocation3 + $0x70] sm:$0xff]  ;;  %1367 = vrot.lane.b32.xlu1 %v1552_v1, %s7759_s26  ;;  %v969_v18 = vpop.f32.mrf.mxu0  ;;  %2045 = vmatpush.msrb.mxu2 %v1175_v16 }
 0x1db   :  { %7357 = vmatmul.msk.f32.gmra.mxu0 %vm44_vm0, %v1881_v59  ;;  %1271 = vrot.lane.b32.xlu0 %v1743_v0, %s7758_s25  ;;  %v970_v30 = vadd.f32 %v8471_v41, %v969_v18  ;;  %v1105_v59 = vpop.f32.mrf.mxu2 }
 0x1dc   :  { %v1452_v22 = vpop.permute.xlu2 %1451  ;;  %2046 = vmatpush.msrb.mxu2 %v1174_v11 }
 0x1dd   :  { %1499 = vst.msk [vmem:[#allocation3] sm:$0xff] %vm462_vm4, %v1452_v22 }
 0x1e0   :  { %v1744_v25 = vld [vmem:[#allocation2 + $0x71] sm:$0xff] }
 0x1e1   :  { %v1648_v26 = vld [vmem:[#allocation2 + $0x70] sm:$0xff]  ;;  %1781 = vrot.lane.b32.xlu2 %v1744_v25, %s7760_s20  ;;  %1537 = vst.msk [vmem:[#allocation3 + $0x98] sm:$0xff] %vm44_vm0, %v1744_v25 }
 0x1e2   :  { %v1553_v32 = vld [vmem:[#allocation2 + $0x72] sm:$0xff]  ;;  %1685 = vrot.lane.b32.xlu1 %v1648_v26, %s7759_s26  ;;  %v1034_v33 = vpop.f32.mrf.mxu1  ;;  %1218 = vst.msk [vmem:[#allocation3 + $0xa8] sm:$0xff] %vm44_vm0, %v1648_v26 }
 0x1e3   :  { %1856 = vst.msk [vmem:[#allocation3 + $0x88] sm:$0xff] %vm44_vm0, %v1553_v32  ;;  %1591 = vrot.lane.b32.xlu0 %v1553_v32, %s7758_s25  ;;  %v1035_v40 = vadd.f32 %v1034_v33, %v970_v30 }
 0x1e4   :  { %v1867_v42 = vld [vmem:[#allocation3] sm:$0xff] }
 0x1e5   :  { %1982 = vmatmul.f32.vlgmr.msrb.gmra.mxu3 %v1867_v42  ;;  %v8715_v47 = vadd.f32 %v1099_v24, %v1035_v40 }
 0x1e7   :  { %v12750_v48 = vmax.f32 %v8715_v47, 0.0 }
 0x1e9   :  { %1149 = vst.msk [vmem:[#allocation2 + $0x81] sm:$0xff] %vm44_vm0, %v12750_v48  ;;  %1463 = vrot.lane.b32.xlu2 %v1648_v26, %s7760_s20  ;;  %v1111_v26 = vpop.f32.mrf.mxu3 }
 0x1ea   :  { %v1884_v46 = vld [vmem:[#allocation3 + $0x88] sm:$0xff]  ;;  %1369 = vrot.lane.b32.xlu1 %v1553_v32, %s7759_s26  ;;  %v1037_v55 = vpop.f32.mrf.mxu1 }
 0x1eb   :  { %7358 = vmatmul.msk.f32.gmra.mxu0 %vm44_vm0, %v1884_v46  ;;  %1273 = vrot.lane.b32.xlu0 %v1744_v25, %s7758_s25  ;;  %v1038_v60 = vadd.f32 %v1037_v55, %v973_v54  ;;  %v8733_v63 = vpop.permute.xlu2 %1771 }
 0x1ed   :  { %v8738_v0 = vadd.f32 %v1102_v44, %v1038_v60 }
 0x1ef   :  { %v12749_v1 = vmax.f32 %v8738_v0, 0.0 }
 0x1f0   :  { %v1745_v20 = vld [vmem:[#allocation2 + $0x81] sm:$0xff] }
 0x1f1   :  { %v1649_v4 = vld [vmem:[#allocation2 + $0x80] sm:$0xff]  ;;  %1150 = vst.msk [vmem:[#allocation2 + $0xb1] sm:$0xff] %vm44_vm0, %v12749_v1  ;;  %1783 = vrot.lane.b32.xlu2 %v1745_v20, %s7760_s20  ;;  %v1114_v36 = vpop.f32.mrf.mxu3 }
 0x1f2   :  { %v1554_v5 = vld [vmem:[#allocation2 + $0x82] sm:$0xff]  ;;  %1687 = vrot.lane.b32.xlu1 %v1649_v4, %s7759_s26  ;;  %v1040_v15 = vpop.f32.mrf.mxu1  ;;  %1538 = vst.msk [vmem:[#allocation3 + $0xb0] sm:$0xff] %vm44_vm0, %v1745_v20 }
 0x1f3   :  { %1593 = vrot.lane.b32.xlu0 %v1554_v5, %s7758_s25  ;;  %1857 = vst.msk [vmem:[#allocation3 + $0xa0] sm:$0xff] %vm44_vm0, %v1554_v5  ;;  %v1041_v17 = vadd.f32 %v1040_v15, %v976_v13  ;;  %v1580_v8 = vpop.permute.xlu0 %1579  ;;  %v1454_v22 = vpop.permute.xlu2 %1453 }
 0x1f4   :  { %1627 = vst.msk [vmem:[#allocation3 + $0x8] sm:$0xff] %vm268_vm2, %v1580_v8  ;;  %v1358_v32 = vpop.permute.xlu1 %1357 }
 0x1f5   :  { %v8758_v45 = vadd.f32 %v1105_v59, %v1041_v17 }
 0x1f7   :  { %v12748_v14 = vmax.f32 %v8758_v45, 0.0 }
 0x1f8   :  { %v1332_v18 = vld [vmem:[#allocation2 + $0xb2] sm:$0xff] }
 0x1f9   :  { %v1427_v24 = vld [vmem:[#allocation2 + $0xb0] sm:$0xff]  ;;  %1151 = vst.msk [vmem:[#allocation2 + $0xc1] sm:$0xff] %vm44_vm0, %v12748_v14  ;;  %1465 = vrot.lane.b32.xlu2 %v1649_v4, %s7760_s20  ;;  %v985_v4 = vadd.f32 %v8471_v41, %v8429_v3 }
 0x1fa   :  { %v1236_v27 = vld [vmem:[#allocation2 + $0xb1] sm:$0xff]  ;;  %v1887_v25 = vld [vmem:[#allocation3 + $0xa0] sm:$0xff]  ;;  %1373 = vrot.lane.b32.xlu1 %v1332_v18, %s7759_s26  ;;  %v1043_v30 = vpop.f32.mrf.mxu1  ;;  %1220 = vst.msk [vmem:[#allocation3 + $0xd8] sm:$0xff] %vm44_vm0, %v1427_v24 }
 0x1fb   :  { %7359 = vmatmul.msk.f32.gmra.mxu0 %vm44_vm0, %v1887_v25  ;;  %1539 = vst.msk [vmem:[#allocation3 + $0xc8] sm:$0xff] %vm44_vm0, %v1236_v27  ;;  %1595 = vrot.lane.b32.xlu0 %v1332_v18, %s7758_s25  ;;  %v1044_v33 = vadd.f32 %v1043_v30, %v979_v38  ;;  %v1262_v50 = vpop.permute.xlu0 %1261  ;;  %v8771_v35 = vpop.permute.xlu2 %1773  ;;  %v988_v25 = vadd.f32 %v8471_v41, %v8440_v6 }
 0x1fc   :  { %1308 = vst.msk [vmem:[#allocation3 + $0x18] sm:$0xff] %vm268_vm2, %v1262_v50  ;;  %v1117_v18 = vpop.f32.mrf.mxu3 }
 0x1fd   :  { %1404 = vst.msk [vmem:[#allocation3 + $0x18] sm:$0xff] %vm365_vm3, %v1358_v32  ;;  %v8776_v40 = vadd.f32 %v1108_v2, %v1044_v33 }
 0x1fe   :  { %1500 = vst.msk [vmem:[#allocation3 + $0x18] sm:$0xff] %vm462_vm4, %v1454_v22 }
 0x1ff   :  { %v12747_v42 = vmax.f32 %v8776_v40, 0.0 }
 0x200   :  { %v1651_v43 = vld [vmem:[#allocation2 + $0xc0] sm:$0xff] }
 0x201   :  { %v1843_v46 = vld [vmem:[#allocation2 + $0xc2] sm:$0xff]  ;;  %1152 = vst.msk [vmem:[#allocation2 + $0xd1] sm:$0xff] %vm44_vm0, %v12747_v42  ;;  %1467 = vrot.lane.b32.xlu2 %v1427_v24, %s7760_s20 }
 0x202   :  { %v1747_v44 = vld [vmem:[#allocation2 + $0xc1] sm:$0xff]  ;;  %1691 = vrot.lane.b32.xlu1 %v1651_v43, %s7759_s26  ;;  %v1046_v54 = vpop.f32.mrf.mxu1  ;;  %1859 = vst.msk [vmem:[#allocation3 + $0xd0] sm:$0xff] %vm44_vm0, %v1843_v46 }
 0x203   :  { %7360 = vmatmul.msk.f32.gmra.mxu0 %vm44_vm0, %v8701_v31  ;;  %1277 = vrot.lane.b32.xlu0 %v1236_v27, %s7758_s25  ;;  %v1047_v55 = vadd.f32 %v1046_v54, %v982_v53  ;;  %v1456_v60 = vpop.permute.xlu2 %1455  ;;  %1540 = vst.msk [vmem:[#allocation3 + $0xe0] sm:$0xff] %vm44_vm0, %v1747_v44 }
 0x204   :  { %v1676_v56 = vpop.permute.xlu1 %1675  ;;  %1221 = vst.msk [vmem:[#allocation3 + $0xf0] sm:$0xff] %vm44_vm0, %v1651_v43  ;;  %v1120_v54 = vpop.f32.mrf.mxu3 }
 0x205   :  { %1723 = vst.msk [vmem:[#allocation3 + $0x8] sm:$0xff] %vm365_vm3, %v1676_v56  ;;  %v1582_v58 = vpop.permute.xlu0 %1581  ;;  %v8795_v31 = vadd.f32 %v1111_v26, %v1047_v55  ;;  %v1870_v16 = vld [vmem:[#allocation3 + $0x18] sm:$0xff] }
 0x206   :  { %1819 = vst.msk [vmem:[#allocation3 + $0x8] sm:$0xff] %vm462_vm4, %v8733_v63  ;;  %1985 = vmatmul.f32.gmra.mxu3 %v1870_v16 }
 0x207   :  { %1628 = vst.msk [vmem:[#allocation3 + $0x20] sm:$0xff] %vm268_vm2, %v1582_v58  ;;  %v12746_v2 = vmax.f32 %v8795_v31, 0.0 }
 0x208   :  { %v8800_v11 = vld [vmem:[#allocation2 + $0xd2] sm:$0xff] }
 0x209   :  { %v8802_v20 = vld [vmem:[#allocation2 + $0xd1] sm:$0xff]  ;;  %1153 = vst.msk [vmem:[#allocation2 + $0xe1] sm:$0xff] %vm44_vm0, %v12746_v2  ;;  %1787 = vrot.lane.b32.xlu2 %v1747_v44, %s7760_s20 }
 0x20a   :  { %v1893_v63 = vld [vmem:[#allocation3 + $0xd0] sm:$0xff]  ;;  %1375 = vrot.lane.b32.xlu1 %v1843_v46, %s7759_s26  ;;  %v1049_v13 = vpop.f32.mrf.mxu1  ;;  %1860 = vst.msk [vmem:[#allocation3 + $0xe8] sm:$0xff] %vm44_vm0, %v8800_v11 }
 0x20b   :  { %v8810_v5 = vld [vmem:[#allocation2 + $0xd0] sm:$0xff]  ;;  %7361 = vmatmul.msk.f32.gmra.mxu0 %vm44_vm0, %v1893_v63  ;;  %1597 = vrot.lane.b32.xlu0 %v1843_v46, %s7758_s25  ;;  %v1050_v3 = vadd.f32 %v1049_v13, %v985_v4  ;;  %v8817_v15 = vpop.permute.xlu2 %1775  ;;  %1541 = vst.msk [vmem:[#allocation3 + $0xf8] sm:$0xff] %vm44_vm0, %v8802_v20 }
 0x20c   :  { %v1360_v59 = vpop.permute.xlu1 %1359  ;;  %1222 = vst.msk [vmem:[#allocation3 + $0x108] sm:$0xff] %vm44_vm0, %v8810_v5 }
 0x20d   :  { %v1264_v17 = vpop.permute.xlu0 %1263  ;;  %v1868_v8 = vld [vmem:[#allocation3 + $0x8] sm:$0xff]  ;;  %v8824_v22 = vadd.f32 %v1114_v36, %v1050_v3 }
 0x20e   :  { %1309 = vst.msk [vmem:[#allocation3 + $0x30] sm:$0xff] %vm268_vm2, %v1264_v17  ;;  %2047 = vmatmul.f32.vlgmr.msrb.gmra.mxu2 %v1868_v8 }
 0x20f   :  { %12763 = vst [vmem:[#allocation4_spill] sm:$0xff] %v8824_v22  ;;  %v12745_v24 = vmax.f32 %v8824_v22, 0.0 }
 0x210   :  { %1405 = vst.msk [vmem:[#allocation3 + $0x30] sm:$0xff] %vm365_vm3, %v1360_v59  ;;  %v8829_v27 = vld [vmem:[#allocation2 + $0xe2] sm:$0xff] }
 0x211   :  { %1501 = vst.msk [vmem:[#allocation3 + $0x30] sm:$0xff] %vm462_vm4, %v1456_v60  ;;  %v8831_v38 = vld [vmem:[#allocation2 + $0xe1] sm:$0xff]  ;;  %1469 = vrot.lane.b32.xlu2 %v1651_v43, %s7760_s20  ;;  %v991_v60 = vadd.f32 %v8471_v41, %v8451_v34 }
 0x212   :  { %1154 = vst.msk [vmem:[#allocation2 + $0xf1] sm:$0xff] %vm44_vm0, %v12745_v24  ;;  %v1896_v26 = vld [vmem:[#allocation3 + $0xe8] sm:$0xff]  ;;  %v8839_v32 = vld [vmem:[#allocation2 + $0xe0] sm:$0xff]  ;;  %1693 = vrot.lane.b32.xlu1 %v8810_v5, %s7759_s26  ;;  %v1052_v30 = vpop.f32.mrf.mxu1 }
 0x213   :  { %7362 = vmatmul.msk.f32.gmra.mxu0 %vm44_vm0, %v1896_v26  ;;  %1861 = vst.msk [vmem:[#allocation3 + $0x100] sm:$0xff] %vm44_vm0, %v8829_v27  ;;  %1279 = vrot.lane.b32.xlu0 %v1747_v44, %s7758_s25  ;;  %v1053_v6 = vadd.f32 %v1052_v30, %v988_v25  ;;  %v1458_v33 = vpop.permute.xlu2 %1457 }
 0x214   :  { %1542 = vst.msk [vmem:[#allocation3 + $0x110] sm:$0xff] %vm44_vm0, %v8831_v38  ;;  %v1678_v50 = vpop.permute.xlu1 %1677 }
 0x215   :  { %v1584_v43 = vpop.permute.xlu0 %1583  ;;  %1223 = vst.msk [vmem:[#allocation3 + $0x120] sm:$0xff] %vm44_vm0, %v8839_v32  ;;  %v8852_v46 = vadd.f32 %v1117_v18, %v1053_v6  ;;  %v994_v18 = vadd.f32 %v8471_v41, %v8460_v29  ;;  %v1123_v6 = vpop.f32.mrf.mxu3 }
 0x216   :  { %1724 = vst.msk [vmem:[#allocation3 + $0x20] sm:$0xff] %vm365_vm3, %v1678_v50 }
 0x217   :  { %12764 = vst [vmem:[#allocation5_spill] sm:$0xff] %v8852_v46  ;;  %v12744_v44 = vmax.f32 %v8852_v46, 0.0 }
 0x218   :  { %1820 = vst.msk [vmem:[#allocation3 + $0x20] sm:$0xff] %vm462_vm4, %v8771_v35  ;;  %v1873_v53 = vld [vmem:[#allocation3 + $0x30] sm:$0xff] }
 0x219   :  { %1629 = vst.msk [vmem:[#allocation3 + $0x38] sm:$0xff] %vm268_vm2, %v1584_v43  ;;  %1988 = vmatmul.f32.gmra.mxu3 %v1873_v53  ;;  %v8858_v55 = vld [vmem:[#allocation2 + $0xf2] sm:$0xff]  ;;  %1789 = vrot.lane.b32.xlu2 %v8802_v20, %s7760_s20 }
 0x21a   :  { %v8860_v56 = vld [vmem:[#allocation2 + $0xf1] sm:$0xff]  ;;  %1155 = vst.msk [vmem:[#allocation2 + $0x101] sm:$0xff] %vm44_vm0, %v12744_v44  ;;  %v1899_v58 = vld [vmem:[#allocation3 + $0x100] sm:$0xff]  ;;  %1695 = vrot.lane.b32.xlu1 %v8839_v32, %s7759_s26  ;;  %v1055_v36 = vpop.f32.mrf.mxu1 }
 0x21b   :  { %v8869_v35 = vld [vmem:[#allocation2 + $0xf0] sm:$0xff]  ;;  %7363 = vmatmul.msk.f32.gmra.mxu0 %vm44_vm0, %v1899_v58  ;;  %1862 = vst.msk [vmem:[#allocation3 + $0x118] sm:$0xff] %vm44_vm0, %v8858_v55  ;;  %1599 = vrot.lane.b32.xlu0 %v8800_v11, %s7758_s25  ;;  %v1056_v34 = vadd.f32 %v1055_v36, %v991_v60  ;;  %v8878_v16 = vpop.permute.xlu2 %1777  ;;  %v9092_v44 = vld [vmem:[%s12732_s4] ss:$0 sm:$0xff] }
 0x21c   :  { %1543 = vst.msk [vmem:[#allocation3 + $0x128] sm:$0xff] %vm44_vm0, %v8860_v56  ;;  %v1362_v4 = vpop.permute.xlu1 %1361 }
 0x21d   :  { %v1266_v63 = vpop.permute.xlu0 %1265  ;;  %1224 = vst.msk [vmem:[#allocation3 + $0x138] sm:$0xff] %vm44_vm0, %v8869_v35  ;;  %v8885_v13 = vadd.f32 %v1120_v54, %v1056_v34 }
 0x21e   :  { %1310 = vst.msk [vmem:[#allocation3 + $0x48] sm:$0xff] %vm268_vm2, %v1266_v63 }
 0x21f   :  { %12765 = vst [vmem:[#allocation6_spill] sm:$0xff] %v8885_v13  ;;  %v1871_v3 = vld [vmem:[#allocation3 + $0x20] sm:$0xff]  ;;  %v12743_v59 = vmax.f32 %v8885_v13, 0.0 }
 0x220   :  { %1406 = vst.msk [vmem:[#allocation3 + $0x48] sm:$0xff] %vm365_vm3, %v1362_v4  ;;  %2050 = vmatmul.f32.gmra.mxu2 %v1871_v3 }
 0x221   :  { %1502 = vst.msk [vmem:[#allocation3 + $0x48] sm:$0xff] %vm462_vm4, %v1458_v33  ;;  %v8890_v17 = vld [vmem:[#allocation2 + $0x102] sm:$0xff]  ;;  %1471 = vrot.lane.b32.xlu2 %v8810_v5, %s7760_s20 }
 0x222   :  { %v8892_v8 = vld [vmem:[#allocation2 + $0x101] sm:$0xff]  ;;  %1156 = vst.msk [vmem:[#allocation2 + $0x111] sm:$0xff] %vm44_vm0, %v12743_v59  ;;  %v1902_v25 = vld [vmem:[#allocation3 + $0x118] sm:$0xff]  ;;  %1377 = vrot.lane.b32.xlu1 %v8800_v11, %s7759_s26  ;;  %v1058_v30 = vpop.f32.mrf.mxu1 }
 0x223   :  { %v8901_v26 = vld [vmem:[#allocation2 + $0x100] sm:$0xff]  ;;  %7364 = vmatmul.msk.f32.gmra.mxu0 %vm44_vm0, %v1902_v25  ;;  %1863 = vst.msk [vmem:[#allocation3 + $0x130] sm:$0xff] %vm44_vm0, %v8890_v17  ;;  %1281 = vrot.lane.b32.xlu0 %v8802_v20, %s7758_s25  ;;  %v1059_v29 = vadd.f32 %v1058_v30, %v994_v18  ;;  %v1460_v41 = vpop.permute.xlu2 %1459 }
 0x224   :  { %1544 = vst.msk [vmem:[#allocation3 + $0x140] sm:$0xff] %vm44_vm0, %v8892_v8  ;;  %v1680_v5 = vpop.permute.xlu1 %1679 }
 0x225   :  { %v1586_v33 = vpop.permute.xlu0 %1585  ;;  %1225 = vst.msk [vmem:[#allocation3 + $0x150] sm:$0xff] %vm44_vm0, %v8901_v26  ;;  %v8915_v11 = vadd.f32 %v1123_v6, %v1059_v29 }
 0x226   :  { %1725 = vst.msk [vmem:[#allocation3 + $0x38] sm:$0xff] %vm365_vm3, %v1680_v5 }
 0x227   :  { %12766 = vst [vmem:[#allocation7_spill] sm:$0xff] %v8915_v11  ;;  %v12742_v20 = vmax.f32 %v8915_v11, 0.0 }
 0x228   :  { %1821 = vst.msk [vmem:[#allocation3 + $0x38] sm:$0xff] %vm462_vm4, %v8817_v15  ;;  %v1876_v50 = vld [vmem:[#allocation3 + $0x48] sm:$0xff] }
 0x229   :  { %1630 = vst.msk [vmem:[#allocation3 + $0x50] sm:$0xff] %vm268_vm2, %v1586_v33  ;;  %1991 = vmatmul.f32.gmra.mxu3 %v1876_v50  ;;  %v8921_v43 = vld [vmem:[#allocation2 + $0x112] sm:$0xff]  ;;  %1791 = vrot.lane.b32.xlu2 %v8831_v38, %s7760_s20 }
 0x22a   :  { %v8923_v53 = vld [vmem:[#allocation2 + $0x111] sm:$0xff]  ;;  %1157 = vst.msk [vmem:[#allocation2 + $0x121] sm:$0xff] %vm44_vm0, %v12742_v20  ;;  %1697 = vrot.lane.b32.xlu1 %v8869_v35, %s7759_s26 }
 0x22b   :  { %v1905_v54 = vld [vmem:[#allocation3 + $0x130] sm:$0xff]  ;;  %1864 = vst.msk [vmem:[#allocation3 + $0x148] sm:$0xff] %vm44_vm0, %v8921_v43  ;;  %1601 = vrot.lane.b32.xlu0 %v8829_v27, %s7758_s25  ;;  %v1780_v15 = vpop.permute.xlu2 %1779 }
 0x22c   :  { %v8930_v60 = vld [vmem:[#allocation2 + $0x110] sm:$0xff]  ;;  %7365 = vmatmul.msk.f32.gmra.mxu0 %vm44_vm0, %v1905_v54  ;;  %1545 = vst.msk [vmem:[#allocation3 + $0x158] sm:$0xff] %vm44_vm0, %v8923_v53  ;;  %v1364_v58 = vpop.permute.xlu1 %1363 }
 0x22d   :  { %v1268_v36 = vpop.permute.xlu0 %1267  ;;  %1226 = vst.msk [vmem:[#allocation3 + $0x168] sm:$0xff] %vm44_vm0, %v8930_v60 }
 0x22e   :  { %1311 = vst.msk [vmem:[#allocation3 + $0x60] sm:$0xff] %vm268_vm2, %v1268_v36 }
 0x22f   :  { %v1874_v34 = vld [vmem:[#allocation3 + $0x38] sm:$0xff]  ;;  %1407 = vst.msk [vmem:[#allocation3 + $0x60] sm:$0xff] %vm365_vm3, %v1364_v58 }
 0x230   :  { %2053 = vmatmul.f32.gmra.mxu2 %v1874_v34  ;;  %1503 = vst.msk [vmem:[#allocation3 + $0x60] sm:$0xff] %vm462_vm4, %v1460_v41 }
 0x231   :  { %v8946_v4 = vld [vmem:[#allocation2 + $0x122] sm:$0xff]  ;;  %1473 = vrot.lane.b32.xlu2 %v8839_v32, %s7760_s20 }
 0x232   :  { %v8948_v63 = vld [vmem:[#allocation2 + $0x121] sm:$0xff]  ;;  %1865 = vst.msk [vmem:[#allocation3 + $0x160] sm:$0xff] %vm44_vm0, %v8946_v4  ;;  %1379 = vrot.lane.b32.xlu1 %v8829_v27, %s7759_s26 }
 0x233   :  { %v1908_v3 = vld [vmem:[#allocation3 + $0x148] sm:$0xff]  ;;  %1546 = vst.msk [vmem:[#allocation3 + $0x170] sm:$0xff] %vm44_vm0, %v8948_v63  ;;  %1283 = vrot.lane.b32.xlu0 %v8831_v38, %s7758_s25  ;;  %v1462_v18 = vpop.permute.xlu2 %1461 }
 0x234   :  { %7366 = vmatmul.msk.f32.gmra.mxu0 %vm44_vm0, %v1908_v3  ;;  %v1682_v25 = vpop.permute.xlu1 %1681 }
 0x235   :  { %v1588_v30 = vpop.permute.xlu0 %1587  ;;  %1726 = vst.msk [vmem:[#allocation3 + $0x50] sm:$0xff] %vm365_vm3, %v1682_v25 }
 0x236   :  { %1822 = vst.msk [vmem:[#allocation3 + $0x50] sm:$0xff] %vm462_vm4, %v8878_v16 }
 0x237   :  { %v1879_v32 = vld [vmem:[#allocation3 + $0x60] sm:$0xff]  ;;  %1631 = vst.msk [vmem:[#allocation3 + $0x68] sm:$0xff] %vm268_vm2, %v1588_v30 }
 0x238   :  { %1994 = vmatmul.f32.gmra.mxu3 %v1879_v32 }
 0x239   :  { %v1911_v6 = vld [vmem:[#allocation3 + $0x160] sm:$0xff]  ;;  %1793 = vrot.lane.b32.xlu2 %v8860_v56, %s7760_s20 }
 0x23a   :  { %1699 = vrot.lane.b32.xlu1 %v8901_v26, %s7759_s26 }
 0x23b   :  { %1603 = vrot.lane.b32.xlu0 %v8858_v55, %s7758_s25  ;;  %v1782_v27 = vpop.permute.xlu2 %1781 }
 0x23c   :  { %7367 = vmatmul.msk.f32.gmra.mxu0 %vm44_vm0, %v1911_v6  ;;  %v1366_v38 = vpop.permute.xlu1 %1365 }
 0x23d   :  { %v1270_v29 = vpop.permute.xlu0 %1269  ;;  %v1877_v16 = vld [vmem:[#allocation3 + $0x50] sm:$0xff] }
 0x23e   :  { %1312 = vst.msk [vmem:[#allocation3 + $0x78] sm:$0xff] %vm268_vm2, %v1270_v29  ;;  %2056 = vmatmul.f32.gmra.mxu2 %v1877_v16 }
 0x23f   :  { %1408 = vst.msk [vmem:[#allocation3 + $0x78] sm:$0xff] %vm365_vm3, %v1366_v38 }
 0x240   :  { %1504 = vst.msk [vmem:[#allocation3 + $0x78] sm:$0xff] %vm462_vm4, %v1462_v18 }
 0x241   :  { %1475 = vrot.lane.b32.xlu2 %v8869_v35, %s7760_s20 }
 0x242   :  { %1381 = vrot.lane.b32.xlu1 %v8858_v55, %s7759_s26 }
 0x243   :  { %1285 = vrot.lane.b32.xlu0 %v8860_v56, %s7758_s25  ;;  %v1464_v41 = vpop.permute.xlu2 %1463 }
 0x244   :  { %v1684_v5 = vpop.permute.xlu1 %1683 }
 0x245   :  { %v1590_v33 = vpop.permute.xlu0 %1589  ;;  %1727 = vst.msk [vmem:[#allocation3 + $0x68] sm:$0xff] %vm365_vm3, %v1684_v5 }
 0x246   :  { %1823 = vst.msk [vmem:[#allocation3 + $0x68] sm:$0xff] %vm462_vm4, %v1780_v15 }
 0x247   :  { %v1882_v50 = vld [vmem:[#allocation3 + $0x78] sm:$0xff]  ;;  %1632 = vst.msk [vmem:[#allocation3 + $0x80] sm:$0xff] %vm268_vm2, %v1590_v33 }
 0x248   :  { %1997 = vmatmul.f32.gmra.mxu3 %v1882_v50 }
 0x249   :  { %1795 = vrot.lane.b32.xlu2 %v8892_v8, %s7760_s20 }
 0x24a   :  { %1701 = vrot.lane.b32.xlu1 %v8930_v60, %s7759_s26 }
 0x24b   :  { %1605 = vrot.lane.b32.xlu0 %v8890_v17, %s7758_s25  ;;  %v1784_v55 = vpop.permute.xlu2 %1783 }
 0x24c   :  { %v1368_v56 = vpop.permute.xlu1 %1367 }
 0x24d   :  { %v1272_v35 = vpop.permute.xlu0 %1271  ;;  %v1880_v54 = vld [vmem:[#allocation3 + $0x68] sm:$0xff] }
 0x24e   :  { %1313 = vst.msk [vmem:[#allocation3 + $0x90] sm:$0xff] %vm268_vm2, %v1272_v35  ;;  %2059 = vmatmul.f32.gmra.mxu2 %v1880_v54 }
 0x24f   :  { %1409 = vst.msk [vmem:[#allocation3 + $0x90] sm:$0xff] %vm365_vm3, %v1368_v56 }
 0x250   :  { %1505 = vst.msk [vmem:[#allocation3 + $0x90] sm:$0xff] %vm462_vm4, %v1464_v41 }
 0x251   :  { %1477 = vrot.lane.b32.xlu2 %v8901_v26, %s7760_s20  ;;  %v1657_v26 = vld [vmem:[#allocation2 + $0x120] sm:$0xff] }
 0x252   :  { %1383 = vrot.lane.b32.xlu1 %v8890_v17, %s7759_s26 }
 0x253   :  { %1287 = vrot.lane.b32.xlu0 %v8892_v8, %s7758_s25  ;;  %v1466_v15 = vpop.permute.xlu2 %1465 }
 0x254   :  { %v1686_v58 = vpop.permute.xlu1 %1685 }
 0x255   :  { %v1592_v36 = vpop.permute.xlu0 %1591  ;;  %1728 = vst.msk [vmem:[#allocation3 + $0x80] sm:$0xff] %vm365_vm3, %v1686_v58 }
 0x256   :  { %1824 = vst.msk [vmem:[#allocation3 + $0x80] sm:$0xff] %vm462_vm4, %v1782_v27  ;;  %v1658_v27 = vld [vmem:[#allocation2 + $0x130] sm:$0xff] }
 0x257   :  { %v1885_v34 = vld [vmem:[#allocation3 + $0x90] sm:$0xff]  ;;  %1633 = vst.msk [vmem:[#allocation3 + $0x98] sm:$0xff] %vm268_vm2, %v1592_v36 }
 0x258   :  { %2000 = vmatmul.f32.gmra.mxu3 %v1885_v34 }
 0x259   :  { %1797 = vrot.lane.b32.xlu2 %v8923_v53, %s7760_s20 }
 0x25a   :  { %1703 = vrot.lane.b32.xlu1 %v1657_v26, %s7759_s26 }
 0x25b   :  { %1607 = vrot.lane.b32.xlu0 %v8921_v43, %s7758_s25  ;;  %v1468_v17 = vpop.permute.xlu2 %1467 }
 0x25c   :  { %1507 = vst.msk [vmem:[#allocation3 + $0xc0] sm:$0xff] %vm462_vm4, %v1468_v17  ;;  %v1370_v8 = vpop.permute.xlu1 %1369 }
 0x25d   :  { %v1274_v3 = vpop.permute.xlu0 %1273  ;;  %v1883_v18 = vld [vmem:[#allocation3 + $0x80] sm:$0xff] }
 0x25e   :  { %1314 = vst.msk [vmem:[#allocation3 + $0xa8] sm:$0xff] %vm268_vm2, %v1274_v3  ;;  %2062 = vmatmul.f32.gmra.mxu2 %v1883_v18 }
 0x25f   :  { %1410 = vst.msk [vmem:[#allocation3 + $0xa8] sm:$0xff] %vm365_vm3, %v1370_v8 }
 0x260   :  { %1506 = vst.msk [vmem:[#allocation3 + $0xa8] sm:$0xff] %vm462_vm4, %v1466_v15 }
 0x261   :  { %1479 = vrot.lane.b32.xlu2 %v8930_v60, %s7760_s20 }
 0x262   :  { %1385 = vrot.lane.b32.xlu1 %v8921_v43, %s7759_s26 }
 0x263   :  { %1289 = vrot.lane.b32.xlu0 %v8923_v53, %s7758_s25  ;;  %v1788_v25 = vpop.permute.xlu2 %1787  ;;  %v1891_v29 = vld [vmem:[#allocation3 + $0xc0] sm:$0xff] }
 0x264   :  { %v1688_v30 = vpop.permute.xlu1 %1687 }
 0x265   :  { %v1594_v32 = vpop.permute.xlu0 %1593  ;;  %1729 = vst.msk [vmem:[#allocation3 + $0x98] sm:$0xff] %vm365_vm3, %v1688_v30 }
 0x266   :  { %1825 = vst.msk [vmem:[#allocation3 + $0x98] sm:$0xff] %vm462_vm4, %v1784_v55 }
 0x267   :  { %v1888_v6 = vld [vmem:[#allocation3 + $0xa8] sm:$0xff]  ;;  %1634 = vst.msk [vmem:[#allocation3 + $0xb0] sm:$0xff] %vm268_vm2, %v1594_v32 }
 0x268   :  { %2003 = vmatmul.f32.gmra.mxu3 %v1888_v6  ;;  %1730 = vst.msk [vmem:[#allocation3 + $0xb0] sm:$0xff] %vm365_vm3, %v8632_v49 }
 0x269   :  { %1826 = vst.msk [vmem:[#allocation3 + $0xb0] sm:$0xff] %vm462_vm4, %v8656_v10  ;;  %1799 = vrot.lane.b32.xlu2 %v8948_v63, %s7760_s20 }
 0x26a   :  { %1705 = vrot.lane.b32.xlu1 %v1658_v27, %s7759_s26 }
 0x26b   :  { %1609 = vrot.lane.b32.xlu0 %v8946_v4, %s7758_s25  ;;  %v1470_v43 = vpop.permute.xlu2 %1469  ;;  %v9033_v4 = vld [vmem:[#allocation2 + $0x131] sm:$0xff] }
 0x26c   :  { %v1374_v53 = vpop.permute.xlu1 %1373 }
 0x26d   :  { %v1596_v60 = vpop.permute.xlu0 %1595  ;;  %v1886_v38 = vld [vmem:[#allocation3 + $0x98] sm:$0xff] }
 0x26e   :  { %1635 = vst.msk [vmem:[#allocation3 + $0xc8] sm:$0xff] %vm268_vm2, %v1596_v60  ;;  %2065 = vmatmul.f32.gmra.mxu2 %v1886_v38 }
 0x270   :  { %2006 = vmatmul.f32.gmra.mxu3 %v1891_v29  ;;  %v1889_v16 = vld [vmem:[#allocation3 + $0xb0] sm:$0xff] }
 0x271   :  { %1481 = vrot.lane.b32.xlu2 %v1657_v26, %s7760_s20 }
 0x273   :  { %v1790_v49 = vpop.permute.xlu2 %1789 }
 0x274   :  { %v1692_v10 = vpop.permute.xlu1 %1691 }
 0x275   :  { %1731 = vst.msk [vmem:[#allocation3 + $0xc8] sm:$0xff] %vm365_vm3, %v1692_v10  ;;  %v1278_v63 = vpop.permute.xlu0 %1277 }
 0x276   :  { %1827 = vst.msk [vmem:[#allocation3 + $0xc8] sm:$0xff] %vm462_vm4, %v1788_v25  ;;  %2068 = vmatmul.f32.gmra.mxu2 %v1889_v16 }
 0x277   :  { %1316 = vst.msk [vmem:[#allocation3 + $0xd8] sm:$0xff] %vm268_vm2, %v1278_v63 }
 0x278   :  { %1412 = vst.msk [vmem:[#allocation3 + $0xd8] sm:$0xff] %vm365_vm3, %v1374_v53 }
 0x279   :  { %1508 = vst.msk [vmem:[#allocation3 + $0xd8] sm:$0xff] %vm462_vm4, %v1470_v43  ;;  %1801 = vrot.lane.b32.xlu2 %v9033_v4, %s7760_s20 }
 0x27b   :  { %v1472_v41 = vpop.permute.xlu2 %1471 }
 0x27c   :  { %v1376_v5 = vpop.permute.xlu1 %1375 }
 0x27d   :  { %v1598_v33 = vpop.permute.xlu0 %1597  ;;  %v1892_v50 = vld [vmem:[#allocation3 + $0xc8] sm:$0xff] }
 0x27e   :  { %1636 = vst.msk [vmem:[#allocation3 + $0xe0] sm:$0xff] %vm268_vm2, %v1598_v33  ;;  %2071 = vmatmul.f32.gmra.mxu2 %v1892_v50 }
 0x280   :  { %v1894_v55 = vld [vmem:[#allocation3 + $0xd8] sm:$0xff] }
 0x281   :  { %2009 = vmatmul.f32.gmra.mxu3 %v1894_v55 }
 0x283   :  { %v1792_v56 = vpop.permute.xlu2 %1791 }
 0x284   :  { %v1694_v35 = vpop.permute.xlu1 %1693 }
 0x285   :  { %1732 = vst.msk [vmem:[#allocation3 + $0xe0] sm:$0xff] %vm365_vm3, %v1694_v35  ;;  %v1280_v54 = vpop.permute.xlu0 %1279 }
 0x286   :  { %1828 = vst.msk [vmem:[#allocation3 + $0xe0] sm:$0xff] %vm462_vm4, %v1790_v49 }
 0x287   :  { %1317 = vst.msk [vmem:[#allocation3 + $0xf0] sm:$0xff] %vm268_vm2, %v1280_v54 }
 0x288   :  { %1413 = vst.msk [vmem:[#allocation3 + $0xf0] sm:$0xff] %vm365_vm3, %v1376_v5 }
 0x289   :  { %1509 = vst.msk [vmem:[#allocation3 + $0xf0] sm:$0xff] %vm462_vm4, %v1472_v41 }
 0x28b   :  { %v1474_v15 = vpop.permute.xlu2 %1473 }
 0x28c   :  { %v1696_v58 = vpop.permute.xlu1 %1695 }
 0x28d   :  { %v1600_v36 = vpop.permute.xlu0 %1599  ;;  %v1895_v34 = vld [vmem:[#allocation3 + $0xe0] sm:$0xff] }
 0x28e   :  { %1637 = vst.msk [vmem:[#allocation3 + $0xf8] sm:$0xff] %vm268_vm2, %v1600_v36  ;;  %2074 = vmatmul.f32.gmra.mxu2 %v1895_v34  ;;  %v1914_v36 = vld [vmem:[#allocation3 + $0x178] sm:$0xff] }
 0x28f   :  { %1733 = vst.msk [vmem:[#allocation3 + $0xf8] sm:$0xff] %vm365_vm3, %v1696_v58  ;;  %v3129_v34 = vld [vmem:[#allocation2 + $0x132] sm:$0xff]  ;;  %7368 = vmatmul.msk.f32.gmra.mxu0 %vm44_vm0, %v1914_v36 }
 0x290   :  { %1829 = vst.msk [vmem:[#allocation3 + $0xf8] sm:$0xff] %vm462_vm4, %v1792_v56  ;;  %v1897_v26 = vld [vmem:[#allocation3 + $0xf0] sm:$0xff] }
 0x291   :  { %2012 = vmatmul.f32.gmra.mxu3 %v1897_v26  ;;  %3145 = vst.msk [vmem:[#allocation3 + $0x178] sm:$0xff] %vm44_vm0, %v3129_v34 }
 0x293   :  { %v1794_v17 = vpop.permute.xlu2 %1793 }
 0x294   :  { %v1378_v8 = vpop.permute.xlu1 %1377 }
 0x295   :  { %v1282_v3 = vpop.permute.xlu0 %1281 }
 0x296   :  { %1318 = vst.msk [vmem:[#allocation3 + $0x108] sm:$0xff] %vm268_vm2, %v1282_v3 }
 0x297   :  { %1414 = vst.msk [vmem:[#allocation3 + $0x108] sm:$0xff] %vm365_vm3, %v1378_v8  ;;  %v1898_v18 = vld [vmem:[#allocation3 + $0xf8] sm:$0xff] }
 0x298   :  { %1510 = vst.msk [vmem:[#allocation3 + $0x108] sm:$0xff] %vm462_vm4, %v1474_v15  ;;  %2077 = vmatmul.f32.gmra.mxu2 %v1898_v18 }
 0x29b   :  { %v1476_v25 = vpop.permute.xlu2 %1475 }
 0x29c   :  { %v1698_v30 = vpop.permute.xlu1 %1697 }
 0x29d   :  { %v1602_v32 = vpop.permute.xlu0 %1601 }
 0x29e   :  { %1638 = vst.msk [vmem:[#allocation3 + $0x110] sm:$0xff] %vm268_vm2, %v1602_v32 }
 0x29f   :  { %1734 = vst.msk [vmem:[#allocation3 + $0x110] sm:$0xff] %vm365_vm3, %v1698_v30  ;;  %v1900_v6 = vld [vmem:[#allocation3 + $0x108] sm:$0xff] }
 0x2a0   :  { %1830 = vst.msk [vmem:[#allocation3 + $0x110] sm:$0xff] %vm462_vm4, %v1794_v17  ;;  %2015 = vmatmul.f32.gmra.mxu3 %v1900_v6 }
 0x2a3   :  { %v1796_v27 = vpop.permute.xlu2 %1795 }
 0x2a4   :  { %v1380_v43 = vpop.permute.xlu1 %1379 }
 0x2a5   :  { %v1284_v53 = vpop.permute.xlu0 %1283 }
 0x2a6   :  { %1319 = vst.msk [vmem:[#allocation3 + $0x120] sm:$0xff] %vm268_vm2, %v1284_v53  ;;  %v2113_v53 = vpop.f32.mrf.mxu0 }
 0x2a7   :  { %1415 = vst.msk [vmem:[#allocation3 + $0x120] sm:$0xff] %vm365_vm3, %v1380_v43  ;;  %v1901_v60 = vld [vmem:[#allocation3 + $0x110] sm:$0xff] }
 0x2a8   :  { %1511 = vst.msk [vmem:[#allocation3 + $0x120] sm:$0xff] %vm462_vm4, %v1476_v25  ;;  %2080 = vmatmul.f32.gmra.mxu2 %v1901_v60 }
 0x2ab   :  { %v1478_v29 = vpop.permute.xlu2 %1477 }
 0x2ac   :  { %v1700_v38 = vpop.permute.xlu1 %1699 }
 0x2ad   :  { %v1604_v49 = vpop.permute.xlu0 %1603 }
 0x2ae   :  { %1639 = vst.msk [vmem:[#allocation3 + $0x128] sm:$0xff] %vm268_vm2, %v1604_v49  ;;  %v1983_v49 = vpop.f32.mrf.mxu3 }
 0x2af   :  { %1735 = vst.msk [vmem:[#allocation3 + $0x128] sm:$0xff] %vm365_vm3, %v1700_v38  ;;  %v1903_v10 = vld [vmem:[#allocation3 + $0x120] sm:$0xff]  ;;  %v2048_v38 = vpop.f32.mrf.mxu2  ;;  %v1984_v14 = vadd.f32 %v9092_v44, %v1983_v49 }
 0x2b0   :  { %1831 = vst.msk [vmem:[#allocation3 + $0x128] sm:$0xff] %vm462_vm4, %v1796_v27  ;;  %2018 = vmatmul.f32.gmra.mxu3 %v1903_v10 }
 0x2b1   :  { %v2049_v52 = vadd.f32 %v2048_v38, %v1984_v14 }
 0x2b3   :  { %v1798_v41 = vpop.permute.xlu2 %1797  ;;  %v9105_v11 = vadd.f32 %v2113_v53, %v2049_v52 }
 0x2b4   :  { %v1382_v63 = vpop.permute.xlu1 %1381 }
 0x2b5   :  { %v1286_v16 = vpop.permute.xlu0 %1285 }
 0x2b6   :  { %1320 = vst.msk [vmem:[#allocation3 + $0x138] sm:$0xff] %vm268_vm2, %v1286_v16  ;;  %v1986_v16 = vpop.f32.mrf.mxu3 }
 0x2b7   :  { %1416 = vst.msk [vmem:[#allocation3 + $0x138] sm:$0xff] %vm365_vm3, %v1382_v63  ;;  %v1904_v5 = vld [vmem:[#allocation3 + $0x128] sm:$0xff]  ;;  %v2051_v10 = vpop.f32.mrf.mxu2  ;;  %v1987_v42 = vadd.f32 %v9092_v44, %v1986_v16 }
 0x2b8   :  { %1512 = vst.msk [vmem:[#allocation3 + $0x138] sm:$0xff] %vm462_vm4, %v1478_v29  ;;  %2083 = vmatmul.f32.gmra.mxu2 %v1904_v5  ;;  %v2116_v29 = vpop.f32.mrf.mxu0 }
 0x2b9   :  { %v2052_v7 = vadd.f32 %v2051_v10, %v1987_v42 }
 0x2bb   :  { %v1480_v56 = vpop.permute.xlu2 %1479  ;;  %v9102_v37 = vadd.f32 %v2116_v29, %v2052_v7 }
 0x2bc   :  { %v1702_v33 = vpop.permute.xlu1 %1701 }
 0x2bd   :  { %v1606_v50 = vpop.permute.xlu0 %1605  ;;  %v2202_v7 = vmul.f32 %v9102_v37, %v9102_v37 }
 0x2be   :  { %1640 = vst.msk [vmem:[#allocation3 + $0x140] sm:$0xff] %vm268_vm2, %v1606_v50 }
 0x2bf   :  { %1736 = vst.msk [vmem:[#allocation3 + $0x140] sm:$0xff] %vm365_vm3, %v1702_v33  ;;  %v1906_v55 = vld [vmem:[#allocation3 + $0x138] sm:$0xff]  ;;  %v1989_v33 = vpop.f32.mrf.mxu3 }
 0x2c0   :  { %1832 = vst.msk [vmem:[#allocation3 + $0x140] sm:$0xff] %vm462_vm4, %v1798_v41  ;;  %2021 = vmatmul.f32.gmra.mxu3 %v1906_v55  ;;  %v2119_v63 = vpop.f32.mrf.mxu0  ;;  %v2054_v41 = vpop.f32.mrf.mxu2  ;;  %v1990_v48 = vadd.f32 %v9092_v44, %v1989_v33 }
 0x2c2   :  { %v2055_v62 = vadd.f32 %v2054_v41, %v1990_v48  ;;  %v2163_v41 = vsel %vm44_vm0, %v9105_v11, 0.0 }
 0x2c3   :  { %v1800_v58 = vpop.permute.xlu2 %1799 }
 0x2c4   :  { %v1384_v35 = vpop.permute.xlu1 %1383  ;;  %v9108_v49 = vadd.f32 %v2119_v63, %v2055_v62 }
 0x2c5   :  { %v1288_v54 = vpop.permute.xlu0 %1287 }
 0x2c6   :  { %1321 = vst.msk [vmem:[#allocation3 + $0x150] sm:$0xff] %vm268_vm2, %v1288_v54  ;;  %v2203_v62 = vmul.f32 %v9108_v49, %v9108_v49  ;;  %v2166_v33 = vsel %vm44_vm0, %v9108_v49, 0.0 }
 0x2c7   :  { %1417 = vst.msk [vmem:[#allocation3 + $0x150] sm:$0xff] %vm365_vm3, %v1384_v35  ;;  %v1907_v15 = vld [vmem:[#allocation3 + $0x140] sm:$0xff] }
 0x2c8   :  { %1513 = vst.msk [vmem:[#allocation3 + $0x150] sm:$0xff] %vm462_vm4, %v1480_v56  ;;  %2086 = vmatmul.f32.gmra.mxu2 %v1907_v15  ;;  %v2122_v5 = vpop.f32.mrf.mxu0  ;;  %v2057_v50 = vpop.f32.mrf.mxu2 }
 0x2c9   :  { %v1992_v56 = vpop.f32.mrf.mxu3 }
 0x2ca   :  { %v1993_v21 = vadd.f32 %v9092_v44, %v1992_v56 }
 0x2cb   :  { %v1482_v18 = vpop.permute.xlu2 %1481 }
 0x2cc   :  { %v1704_v26 = vpop.permute.xlu1 %1703  ;;  %v2058_v9 = vadd.f32 %v2057_v50, %v1993_v21  ;;  %v2201_v21 = vmul.f32 %v9105_v11, %v9105_v11 }
 0x2cd   :  { %v1608_v17 = vpop.permute.xlu0 %1607 }
 0x2ce   :  { %1641 = vst.msk [vmem:[#allocation3 + $0x158] sm:$0xff] %vm268_vm2, %v1608_v17  ;;  %v9115_v48 = vadd.f32 %v2122_v5, %v2058_v9  ;;  %v2218_v5 = vsel %vm44_vm0, %v2202_v7, 0.0  ;;  %v2217_v56 = vsel %vm44_vm0, %v2201_v21, 0.0 }
 0x2cf   :  { %1737 = vst.msk [vmem:[#allocation3 + $0x158] sm:$0xff] %vm365_vm3, %v1704_v26  ;;  %v1909_v8 = vld [vmem:[#allocation3 + $0x150] sm:$0xff] }
 0x2d0   :  { %1833 = vst.msk [vmem:[#allocation3 + $0x158] sm:$0xff] %vm462_vm4, %v1800_v58  ;;  %2024 = vmatmul.f32.gmra.mxu3 %v1909_v8  ;;  %v2125_v55 = vpop.f32.mrf.mxu0  ;;  %v2204_v50 = vmul.f32 %v9115_v48, %v9115_v48 }
 0x2d1   :  { %v2060_v35 = vpop.f32.mrf.mxu2  ;;  %v1995_v15 = vpop.f32.mrf.mxu3 }
 0x2d2   :  { %v1996_v12 = vadd.f32 %v9092_v44, %v1995_v15  ;;  %v2220_v15 = vsel %vm44_vm0, %v2203_v62, 0.0 }
 0x2d3   :  { %v1802_v27 = vpop.permute.xlu2 %1801 }
 0x2d4   :  { %v1386_v3 = vpop.permute.xlu1 %1385  ;;  %v2061_v46 = vadd.f32 %v2060_v35, %v1996_v12  ;;  %v2164_v12 = vsel %vm44_vm0, %v9102_v37, 0.0 }
 0x2d5   :  { %v1290_v25 = vpop.permute.xlu0 %1289 }
 0x2d6   :  { %1322 = vst.msk [vmem:[#allocation3 + $0x168] sm:$0xff] %vm268_vm2, %v1290_v25  ;;  %v9124_v29 = vadd.f32 %v2125_v55, %v2061_v46  ;;  %v2165_v46 = vadd.f32 %v2164_v12, %v2163_v41 }
 0x2d7   :  { %1418 = vst.msk [vmem:[#allocation3 + $0x168] sm:$0xff] %vm365_vm3, %v1386_v3  ;;  %v1910_v30 = vld [vmem:[#allocation3 + $0x158] sm:$0xff] }
 0x2d8   :  { %1514 = vst.msk [vmem:[#allocation3 + $0x168] sm:$0xff] %vm462_vm4, %v1482_v18  ;;  %2089 = vmatmul.f32.gmra.mxu2 %v1910_v30  ;;  %v2128_v54 = vpop.f32.mrf.mxu0 }
 0x2d9   :  { %v1998_v34 = vpop.f32.mrf.mxu3 }
 0x2da   :  { %v1999_v16 = vadd.f32 %v9092_v44, %v1998_v34  ;;  %v2205_v34 = vmul.f32 %v9124_v29, %v9124_v29 }
 0x2dc   :  { %v1706_v32 = vpop.permute.xlu1 %1705 }
 0x2dd   :  { %v1610_v6 = vpop.permute.xlu0 %1609 }
 0x2de   :  { %1642 = vst.msk [vmem:[#allocation3 + $0x170] sm:$0xff] %vm268_vm2, %v1610_v6 }
 0x2df   :  { %1738 = vst.msk [vmem:[#allocation3 + $0x170] sm:$0xff] %vm365_vm3, %v1706_v32  ;;  %v1912_v43 = vld [vmem:[#allocation3 + $0x168] sm:$0xff] }
 0x2e0   :  { %1834 = vst.msk [vmem:[#allocation3 + $0x170] sm:$0xff] %vm462_vm4, %v1802_v27  ;;  %2027 = vmatmul.f32.gmra.mxu3 %v1912_v43  ;;  %v2131_v36 = vpop.f32.mrf.mxu0 }
 0x2e1   :  { %v2063_v58 = vpop.f32.mrf.mxu2  ;;  %v2001_v17 = vpop.f32.mrf.mxu3 }
 0x2e2   :  { %v2002_v14 = vadd.f32 %v9092_v44, %v2001_v17  ;;  %v2064_v42 = vadd.f32 %v2063_v58, %v1999_v16  ;;  %v2168_v58 = vsel %vm44_vm0, %v9115_v48, 0.0  ;;  %v2219_v17 = vadd.f32 %v2218_v5, %v2217_v56 }
 0x2e3   :  { %v2170_v16 = vsel %vm44_vm0, %v9124_v29, 0.0 }
 0x2e4   :  { %v9126_v10 = vadd.f32 %v2128_v54, %v2064_v42  ;;  %v2221_v21 = vadd.f32 %v2220_v15, %v2219_v17 }
 0x2e6   :  { %v2172_v12 = vsel %vm44_vm0, %v9126_v10, 0.0 }
 0x2e7   :  { %v1913_v60 = vld [vmem:[#allocation3 + $0x170] sm:$0xff] }
 0x2e8   :  { %2092 = vmatmul.f32.gmra.mxu2 %v1913_v60  ;;  %v2134_v8 = vpop.f32.mrf.mxu0 }
 0x2eb   :  { %v2004_v3 = vpop.f32.mrf.mxu3 }
 0x2ec   :  { %v2005_v52 = vadd.f32 %v9092_v44, %v2004_v3  ;;  %v2167_v3 = vadd.f32 %v2166_v33, %v2165_v46 }
 0x2f0   :  { %v9081_v25 = vpop.f32.mrf.mxu0 }
 0x2f1   :  { %v2066_v26 = vpop.f32.mrf.mxu2 }
 0x2f2   :  { %v2067_v53 = vadd.f32 %v2066_v26, %v2002_v14 }
 0x2f3   :  { %v2007_v30 = vpop.f32.mrf.mxu3 }
 0x2f4   :  { %v2008_v63 = vadd.f32 %v9092_v44, %v2007_v30  ;;  %v9137_v55 = vadd.f32 %v2131_v36, %v2067_v53 }
 0x2f8   :  { %v9083_v6 = vpop.f32.mrf.mxu0 }
 0x2f9   :  { %v2069_v18 = vpop.f32.mrf.mxu2 }
 0x2fa   :  { %v2070_v9 = vadd.f32 %v2069_v18, %v2005_v52  ;;  %v2206_v18 = vmul.f32 %v9126_v10, %v9126_v10  ;;  %v2169_v52 = vadd.f32 %v2168_v58, %v2167_v3 }
 0x2fc   :  { %v9147_v30 = vadd.f32 %v2134_v8, %v2070_v9  ;;  %v2224_v8 = vsel %vm44_vm0, %v2205_v34, 0.0  ;;  %v2226_v9 = vsel %vm44_vm0, %v2206_v18, 0.0 }
 0x2fe   :  { %v2208_v41 = vmul.f32 %v9147_v30, %v9147_v30  ;;  %v2176_v15 = vsel %vm44_vm0, %v9147_v30, 0.0 }
 0x300   :  { %v9085_v60 = vpop.f32.mrf.mxu0 }
 0x301   :  { %v2072_v32 = vpop.f32.mrf.mxu2 }
 0x302   :  { %v2073_v35 = vadd.f32 %v2072_v32, %v2008_v63  ;;  %v2222_v32 = vsel %vm44_vm0, %v2204_v50, 0.0 }
 0x303   :  { %v2223_v63 = vadd.f32 %v2222_v32, %v2221_v21 }
 0x304   :  { %v2010_v27 = vpop.f32.mrf.mxu3  ;;  %v9156_v53 = vadd.f32 %v9081_v25, %v2073_v35  ;;  %v2174_v25 = vsel %vm44_vm0, %v9137_v55, 0.0 }
 0x305   :  { %v2011_v26 = vadd.f32 %v9092_v44, %v2010_v27  ;;  %v2207_v27 = vmul.f32 %v9137_v55, %v9137_v55 }
 0x306   :  { %v2209_v46 = vmul.f32 %v9156_v53, %v9156_v53  ;;  %v2178_v17 = vsel %vm44_vm0, %v9156_v53, 0.0 }
 0x308   :  { %v9094_v24 = vpop.f32.mrf.mxu0 }
 0x310   :  { %v9110_v22 = vpop.f32.mrf.mxu0 }
 0x311   :  { %v2075_v43 = vpop.f32.mrf.mxu2 }
 0x312   :  { %v2076_v14 = vadd.f32 %v2075_v43, %v2011_v26 }
 0x314   :  { %v2013_v20 = vpop.f32.mrf.mxu3  ;;  %v9169_v5 = vadd.f32 %v9083_v6, %v2076_v14 }
 0x315   :  { %v2014_v42 = vadd.f32 %v9092_v44, %v2013_v20  ;;  %v2171_v20 = vadd.f32 %v2170_v16, %v2169_v52 }
 0x316   :  { %v2210_v18 = vmul.f32 %v9169_v5, %v9169_v5 }
 0x317   :  { %v2173_v56 = vadd.f32 %v2172_v12, %v2171_v20 }
 0x318   :  { %v2152_v7 = vpop.f32.mrf.mxu0 }
 0x319   :  { %v2175_v26 = vadd.f32 %v2174_v25, %v2173_v56 }
 0x31b   :  { %v9087_v59 = vpop.f32.mrf.mxu2  ;;  %v2177_v14 = vadd.f32 %v2176_v15, %v2175_v26 }
 0x31c   :  { %v2079_v62 = vadd.f32 %v9087_v59, %v2014_v42  ;;  %v2225_v59 = vadd.f32 %v2224_v8, %v2223_v63  ;;  %v2180_v42 = vsel %vm44_vm0, %v9169_v5, 0.0 }
 0x31d   :  { %v2179_v12 = vadd.f32 %v2178_v17, %v2177_v14 }
 0x31e   :  { %v9179_v58 = vadd.f32 %v9085_v60, %v2079_v62 }
 0x320   :  { %v2211_v21 = vmul.f32 %v9179_v58, %v9179_v58  ;;  %v2155_v8 = vpop.f32.mrf.mxu0  ;;  %v2182_v62 = vsel %vm44_vm0, %v9179_v58, 0.0 }
 0x323   :  { %v2016_v2 = vpop.f32.mrf.mxu3 }
 0x324   :  { %v2017_v43 = vadd.f32 %v9092_v44, %v2016_v2  ;;  %v2228_v2 = vsel %vm44_vm0, %v2207_v27, 0.0 }
 0x32b   :  { %v9098_v1 = vpop.f32.mrf.mxu2 }
 0x32c   :  { %v2082_v33 = vadd.f32 %v9098_v1, %v2017_v43  ;;  %v2227_v1 = vadd.f32 %v2226_v9, %v2225_v59  ;;  %v2181_v9 = vadd.f32 %v2180_v42, %v2179_v12 }
 0x32e   :  { %v9188_v32 = vadd.f32 %v9094_v24, %v2082_v33  ;;  %v2183_v59 = vadd.f32 %v2182_v62, %v2181_v9 }
 0x330   :  { %v2212_v43 = vmul.f32 %v9188_v32, %v9188_v32 }
 0x333   :  { %v2019_v13 = vpop.f32.mrf.mxu3 }
 0x334   :  { %v2020_v50 = vadd.f32 %v9092_v44, %v2019_v13  ;;  %v2230_v13 = vsel %vm44_vm0, %v2208_v41, 0.0  ;;  %v2236_v41 = vsel %vm44_vm0, %v2211_v21, 0.0 }
 0x33b   :  { %v2084_v38 = vpop.f32.mrf.mxu2 }
 0x33c   :  { %v2085_v6 = vadd.f32 %v2084_v38, %v2020_v50  ;;  %v2229_v38 = vadd.f32 %v2228_v2, %v2227_v1  ;;  %v2238_v2 = vsel %vm44_vm0, %v2212_v43, 0.0 }
 0x33e   :  { %v9197_v52 = vadd.f32 %v9110_v22, %v2085_v6  ;;  %v2231_v24 = vadd.f32 %v2230_v13, %v2229_v38  ;;  %v2184_v22 = vsel %vm44_vm0, %v9188_v32, 0.0 }
 0x33f   :  { %v2185_v15 = vadd.f32 %v2184_v22, %v2183_v59 }
 0x340   :  { %v2213_v25 = vmul.f32 %v9197_v52, %v9197_v52 }
 0x342   :  { %v2240_v6 = vsel %vm44_vm0, %v2213_v25, 0.0 }
 0x343   :  { %v2022_v54 = vpop.f32.mrf.mxu3 }
 0x344   :  { %v2023_v34 = vadd.f32 %v9092_v44, %v2022_v54  ;;  %v2232_v54 = vsel %vm44_vm0, %v2209_v46, 0.0 }
 0x345   :  { %v2233_v20 = vadd.f32 %v2232_v54, %v2231_v24 }
 0x34b   :  { %v2087_v36 = vpop.f32.mrf.mxu2 }
 0x34c   :  { %v2088_v16 = vadd.f32 %v2087_v36, %v2023_v34  ;;  %v2234_v36 = vsel %vm44_vm0, %v2210_v18, 0.0  ;;  %v2158_v18 = vpop.f32.mrf.mxu0 }
 0x34d   :  { %v2235_v50 = vadd.f32 %v2234_v36, %v2233_v20 }
 0x34e   :  { %v9204_v63 = vadd.f32 %v2152_v7, %v2088_v16  ;;  %v2186_v7 = vsel %vm44_vm0, %v9197_v52, 0.0 }
 0x34f   :  { %v2187_v17 = vadd.f32 %v2186_v7, %v2185_v15 }
 0x350   :  { %v2214_v46 = vmul.f32 %v9204_v63, %v9204_v63  ;;  %v2188_v34 = vsel %vm44_vm0, %v9204_v63, 0.0 }
 0x351   :  { %v2189_v54 = vadd.f32 %v2188_v34, %v2187_v17 }
 0x352   :  { %v2242_v16 = vsel %vm44_vm0, %v2214_v46, 0.0 }
 0x353   :  { %v2025_v35 = vpop.f32.mrf.mxu3 }
 0x354   :  { %v2026_v60 = vadd.f32 %v9092_v44, %v2025_v35  ;;  %v2237_v35 = vadd.f32 %v2236_v41, %v2235_v50 }
 0x356   :  { %v2239_v13 = vadd.f32 %v2238_v2, %v2237_v35 }
 0x358   :  { %v2241_v14 = vadd.f32 %v2240_v6, %v2239_v13 }
 0x35b   :  { %v2090_v3 = vpop.f32.mrf.mxu2 }
 0x35c   :  { %v2091_v27 = vadd.f32 %v2090_v3, %v2026_v60 }
 0x35e   :  { %v9211_v33 = vadd.f32 %v2155_v8, %v2091_v27  ;;  %v2243_v27 = vadd.f32 %v2242_v16, %v2241_v14 }
 0x360   :  { %v2215_v1 = vmul.f32 %v9211_v33, %v9211_v33  ;;  %v2190_v60 = vsel %vm44_vm0, %v9211_v33, 0.0 }
 0x361   :  { %v2191_v8 = vadd.f32 %v2190_v60, %v2189_v54 }
 0x362   :  { %v2244_v42 = vsel %vm44_vm0, %v2215_v1, 0.0 }
 0x363   :  { %v2028_v56 = vpop.f32.mrf.mxu3  ;;  %v2245_v36 = vadd.f32 %v2244_v42, %v2243_v27  ;;  %v2929_v27 = vld [vmem:[#allocation2 + $0x90] sm:$0xff] }
 0x364   :  { %v2029_v26 = vadd.f32 %v9092_v44, %v2028_v56 }
 0x36b   :  { %v2093_v3 = vpop.f32.mrf.mxu2 }
 0x36c   :  { %v2094_v38 = vadd.f32 %v2093_v3, %v2029_v26 }
 0x36e   :  { %v9228_v21 = vadd.f32 %v2158_v18, %v2094_v38  ;;  %v2602_v18 = vld [vmem:[#allocation2 + $0x2] sm:$0xff]  ;;  %v2161_v38 = vld [vmem:[%s12733_s5] sm:$0x1] }
 0x36f   :  { %2634 = vrot.lane.b32.xlu1 %v2602_v18, %s7759_s26 }
 0x370   :  { %v2192_v44 = vsel %vm44_vm0, %v9228_v21, 0.0  ;;  %v2216_v24 = vmul.f32 %v9228_v21, %v9228_v21 }
 0x371   :  { %v2193_v12 = vadd.f32 %v2192_v44, %v2191_v8  ;;  %v2162_v8 = vld [vmem:[%s12734_s6] sm:$0x1] }
 0x372   :  { %v2246_v62 = vsel %vm44_vm0, %v2216_v24, 0.0 }
 0x373   :  { %v2194_v43 = vrot.slane %v2193_v12, 4  ;;  %v2247_v20 = vadd.f32 %v2246_v62, %v2245_v36  ;;  %v2506_v36 = vld [vmem:[#allocation2 + $0x1] sm:$0xff] }
 0x374   :  { %2538 = vrot.lane.b32.xlu0 %v2506_v36, %s7758_s25 }
 0x375   :  { %v2195_v9 = vadd.f32 %v2194_v43, %v2193_v12  ;;  %v2248_v41 = vrot.slane %v2247_v20, 4  ;;  %v3025_v43 = vld [vmem:[#allocation2 + $0x91] sm:$0xff] }
 0x376   :  { %3064 = vrot.lane.b32.xlu2 %v3025_v43, %s7760_s20 }
 0x377   :  { %v2196_v22 = vrot.slane %v2195_v9, 2  ;;  %v2249_v25 = vadd.f32 %v2248_v41, %v2247_v20  ;;  %2968 = vrot.lane.b32.xlu1 %v2929_v27, %s7759_s26  ;;  %v2610_v20 = vld [vmem:[#allocation2 + $0xa2] sm:$0xff] }
 0x379   :  { %v2197_v50 = vadd.f32 %v2196_v22, %v2195_v9  ;;  %v2250_v59 = vrot.slane %v2249_v25, 2 }
 0x37b   :  { %v2198_v56 = vrot.slane %v2197_v50, 1  ;;  %v2251_v2 = vadd.f32 %v2250_v59, %v2249_v25 }
 0x37d   :  { %v2199_v7 = vadd.f32 %v2198_v56, %v2197_v50  ;;  %v2252_v46 = vrot.slane %v2251_v2, 1 }
 0x37e   :  { %3080 = vrot.lane.b32.xlu2 %v9033_v4, %s7760_s20 }
 0x37f   :  { %v2200_v35 = vmul.f32 0.0078125, %v2199_v7  ;;  %v2253_v15 = vadd.f32 %v2252_v46, %v2251_v2  ;;  %2650 = vrot.lane.b32.xlu1 %v2610_v20, %s7759_s26 }
 0x381   :  { %v2254_v6 = vmul.f32 0.0078125, %v2253_v15  ;;  %v2255_v34 = vmul.f32 %v2200_v35, %v2200_v35 }
 0x383   :  { %v2256_v1 = vsub.f32 %v2254_v6, %v2255_v34 }
 0x385   :  { %v2257_v26 = vadd.f32 1e-05, %v2256_v1 }
 0x387   :  { %7621 = vrsqrt.f32 %v2257_v26  ;;  %vm2264_vm6 = vweird.f32 %v2257_v26 }
 0x38d   :  { %v7622_v13 = vpop.eup %7621 }
 0x38e   :  { %v2259_v17 = vmul.f32 %v7622_v13, %v2257_v26  ;;  %vm2265_vm5 = vweird.f32 %v7622_v13 }
 0x38f   :  { %vm2266_vm7 = vmor %vm2264_vm6, %vm2265_vm5 }
 0x390   :  { %v2260_v3 = vmul.f32 %v7622_v13, %v2259_v17 }
 0x392   :  { %v2261_v16 = vmul.f32 0.5, %v2260_v3 }
 0x394   :  { %v2262_v60 = vsub.f32 1.5, %v2261_v16  ;;  %v2937_v16 = vld [vmem:[#allocation2 + $0x130] sm:$0xff] }
 0x395   :  { %2984 = vrot.lane.b32.xlu1 %v2937_v16, %s7759_s26 }
 0x396   :  { %v2263_v14 = vmul.f32 %v7622_v13, %v2262_v60 }
 0x398   :  { %v2267_v54 = vsel %vm2266_vm7, %v7622_v13, %v2263_v14 }
 0x399   :  { %v2268_v42 = vmul.f32 %v2267_v54, %v2161_v38 }
 0x39b   :  { %v2269_v44 = vmul.f32 %v2268_v42, %v2200_v35  ;;  %v2272_v12 = vperm.slane %v2268_v42, 0 }
 0x39d   :  { %v2270_v24 = vsub.f32 %v2162_v8, %v2269_v44  ;;  %v2275_v9 = vmul.f32 %v2272_v12, %v9102_v37  ;;  %v2276_v41 = vmul.f32 %v2272_v12, %v9108_v49  ;;  %v2277_v22 = vmul.f32 %v2272_v12, %v9115_v48 }
 0x39e   :  { %v2278_v25 = vmul.f32 %v2272_v12, %v9124_v29  ;;  %v2279_v50 = vmul.f32 %v2272_v12, %v9126_v10  ;;  %v2280_v37 = vmul.f32 %v2272_v12, %v9137_v55  ;;  %v2281_v49 = vmul.f32 %v2272_v12, %v9147_v30 }
 0x39f   :  { %v9244_v62 = vperm.slane %v2270_v24, 0  ;;  %v2283_v29 = vmul.f32 %v2272_v12, %v9169_v5  ;;  %v2284_v10 = vmul.f32 %v2272_v12, %v9179_v58  ;;  %v2285_v7 = vmul.f32 %v2272_v12, %v9188_v32 }
 0x3a0   :  { %v2286_v35 = vmul.f32 %v2272_v12, %v9197_v52  ;;  %v2287_v15 = vmul.f32 %v2272_v12, %v9204_v63  ;;  %v2288_v55 = vmul.f32 %v2272_v12, %v9211_v33  ;;  %v2289_v34 = vmul.f32 %v2272_v12, %v9228_v21 }
 0x3a1   :  { %v9254_v59 = vadd.f32 %v9244_v62, %v2275_v9  ;;  %v9257_v56 = vadd.f32 %v9244_v62, %v2276_v41  ;;  %v9260_v2 = vadd.f32 %v9244_v62, %v2277_v22  ;;  %v9265_v48 = vadd.f32 %v9244_v62, %v2278_v25 }
 0x3a2   :  { %v9271_v46 = vadd.f32 %v9244_v62, %v2279_v50  ;;  %v9277_v30 = vadd.f32 %v9244_v62, %v2280_v37  ;;  %v9280_v6 = vadd.f32 %v9244_v62, %v2281_v49  ;;  %v9287_v52 = vadd.f32 %v9244_v62, %v2283_v29 }
 0x3a3   :  { %v2327_v5 = vmul.f32 1.442695, %v9254_v59  ;;  %v2329_v58 = vmul.f32 1.442695, %v9257_v56  ;;  %v2331_v32 = vmul.f32 1.442695, %v9260_v2  ;;  %v2274_v33 = vmul.f32 %v2272_v12, %v9105_v11 }
 0x3a4   :  { %v2333_v63 = vmul.f32 1.442695, %v9265_v48  ;;  %v9294_v1 = vadd.f32 %v9244_v62, %v2284_v10  ;;  %v2335_v26 = vmul.f32 1.442695, %v9271_v46  ;;  %v2282_v13 = vmul.f32 %v2272_v12, %v9156_v53  ;;  %v2514_v53 = vld [vmem:[#allocation2 + $0xa1] sm:$0xff] }
 0x3a5   :  { %7623 = vpow2.f32 %v2327_v5  ;;  %v9299_v21 = vadd.f32 %v9244_v62, %v2285_v7  ;;  %v9302_v17 = vadd.f32 %v9244_v62, %v2286_v35  ;;  %v2337_v3 = vmul.f32 1.442695, %v9277_v30  ;;  %2554 = vrot.lane.b32.xlu0 %v2514_v53, %s7758_s25 }
 0x3a6   :  { %7625 = vpow2.f32 %v2329_v58  ;;  %v9306_v4 = vadd.f32 %v9244_v62, %v2287_v15  ;;  %v9309_v11 = vadd.f32 %v9244_v62, %v2288_v55  ;;  %v2339_v18 = vmul.f32 1.442695, %v9280_v6 }
 0x3a7   :  { %7627 = vpow2.f32 %v2331_v32  ;;  %v9313_v60 = vadd.f32 %v9244_v62, %v2289_v34  ;;  %vm2310_vm8 = vcmp.gt.f32.partialorder %v9254_v59, 0.0  ;;  %v2343_v38 = vmul.f32 1.442695, %v9287_v52 }
 0x3a8   :  { %7629 = vpow2.f32 %v2333_v63  ;;  %vm2311_vm9 = vcmp.gt.f32.partialorder %v9257_v56, 0.0  ;;  %vm2312_vm10 = vcmp.gt.f32.partialorder %v9260_v2, 0.0  ;;  %v2345_v14 = vmul.f32 1.442695, %v9294_v1 }
 0x3a9   :  { %7631 = vpow2.f32 %v2335_v26  ;;  %vm2313_vm11 = vcmp.gt.f32.partialorder %v9265_v48, 0.0  ;;  %v2347_v54 = vmul.f32 1.442695, %v9299_v21  ;;  %v9325_v42 = vadd.f32 %v9244_v62, %v2274_v33 }
 0x3aa   :  { %7633 = vpow2.f32 %v2337_v3  ;;  %vm2314_vm12 = vcmp.gt.f32.partialorder %v9271_v46, 0.0  ;;  %v2349_v8 = vmul.f32 1.442695, %v9302_v17  ;;  %v9330_v44 = vadd.f32 %v9244_v62, %v2282_v13  ;;  %v2471_v3 = vld [vmem:[%s12735_s7 + $0x110] sm:$0xff] }
 0x3ab   :  { %v7624_v27 = vpop.eup %7623  ;;  %7635 = vpow2.f32 %v2339_v18  ;;  %vm2315_vm13 = vcmp.gt.f32.partialorder %v9277_v30, 0.0  ;;  %v2351_v12 = vmul.f32 1.442695, %v9306_v4  ;;  %vm2316_vm14 = vcmp.gt.f32.partialorder %v9280_v6, 0.0 }
 0x3ac   :  { %v7626_v24 = vpop.eup %7625  ;;  %7637 = vpow2.f32 %v2343_v38  ;;  %v7370_v36 = vadd.f32 -1.0, %v7624_v27  ;;  %v2353_v20 = vmul.f32 1.442695, %v9309_v11  ;;  %v2355_v9 = vmul.f32 1.442695, %v9313_v60 }
 0x3ad   :  { %v7628_v43 = vpop.eup %7627  ;;  %7639 = vpow2.f32 %v2345_v14  ;;  %v7371_v41 = vadd.f32 -1.0, %v7626_v24  ;;  %vm2318_vm15 = vcmp.gt.f32.partialorder %v9287_v52, 0.0  ;;  %v9339_v50 = vmul.f32 1.442695, %v9325_v42 }
 0x3ae   :  { %v7630_v22 = vpop.eup %7629  ;;  %7641 = vpow2.f32 %v2347_v54  ;;  %v7372_v62 = vadd.f32 -1.0, %v7628_v43  ;;  %v2374_v25 = vmul.f32 1.6732632, %v7370_v36  ;;  %vm2319_vm1 = vcmp.gt.f32.partialorder %v9294_v1, 0.0 }
 0x3af   :  { %v7632_v37 = vpop.eup %7631  ;;  %7643 = vpow2.f32 %v2349_v8  ;;  %v7373_v49 = vadd.f32 -1.0, %v7630_v22  ;;  %v2375_v29 = vmul.f32 1.6732632, %v7371_v41  ;;  %v9343_v10 = vmul.f32 1.442695, %v9330_v44 }
 0x3b0   :  { %v7634_v7 = vpop.eup %7633  ;;  %vm2320_vm5 = vcmp.gt.f32.partialorder %v9299_v21, 0.0  ;;  %7645 = vpow2.f32 %v2351_v12  ;;  %v7374_v35 = vadd.f32 -1.0, %v7632_v37  ;;  %v2376_v15 = vmul.f32 1.6732632, %v7372_v62  ;;  %v2469_v12 = vld [vmem:[%s12735_s7 + $0x100] sm:$0xff] }
 0x3b1   :  { %v2390_v55 = vsel %vm2310_vm8, %v9254_v59, %v2374_v25  ;;  %v7636_v5 = vpop.eup %7635  ;;  %vm2321_vm6 = vcmp.gt.f32.partialorder %v9302_v17, 0.0  ;;  %7647 = vpow2.f32 %v2353_v20  ;;  %v7375_v58 = vadd.f32 -1.0, %v7634_v7  ;;  %v2472_v59 = vld [vmem:[%s12735_s7 + $0x118] sm:$0xff] }
 0x3b2   :  { %v2377_v32 = vmul.f32 1.6732632, %v7373_v49  ;;  %v2391_v34 = vsel %vm2311_vm9, %v9257_v56, %v2375_v29  ;;  %v7638_v63 = vpop.eup %7637  ;;  %7649 = vpow2.f32 %v2355_v9  ;;  %v7376_v33 = vadd.f32 -1.0, %v7636_v5  ;;  %3387 = vmatpush.msra.mxu2 %v2472_v59 }
 0x3b3   :  { %v2378_v26 = vmul.f32 1.6732632, %v7374_v35  ;;  %v2392_v13 = vsel %vm2312_vm10, %v9260_v2, %v2376_v15  ;;  %v7640_v18 = vpop.eup %7639  ;;  %v7378_v16 = vadd.f32 -1.0, %v7638_v63  ;;  %v2379_v53 = vmul.f32 1.6732632, %v7375_v58  ;;  %v2470_v2 = vld [vmem:[%s12735_s7 + $0x108] sm:$0xff] }
 0x3b4   :  { %v2393_v56 = vsel %vm2313_vm11, %v9265_v48, %v2377_v32  ;;  %v2406_v38 = vmul.f32 1.050701, %v2390_v55  ;;  %v7642_v14 = vpop.eup %7641  ;;  %v7379_v54 = vadd.f32 -1.0, %v7640_v18  ;;  %v2380_v27 = vmul.f32 1.6732632, %v7376_v33  ;;  %3388 = vmatpush.msra.mxu2 %v2471_v3 }
 0x3b5   :  { %v2394_v8 = vsel %vm2314_vm12, %v9271_v46, %v2378_v26  ;;  %v2407_v24 = vmul.f32 1.050701, %v2391_v34  ;;  %v7644_v36 = vpop.eup %7643  ;;  %v7380_v48 = vadd.f32 -1.0, %v7642_v14  ;;  %v2382_v43 = vmul.f32 1.6732632, %v7378_v16 }
 0x3b6   :  { %v2395_v20 = vsel %vm2315_vm13, %v9277_v30, %v2379_v53  ;;  %v2408_v9 = vmul.f32 1.050701, %v2392_v13  ;;  %2422 = vst.msk [vmem:[#allocation2 + $0x21] sm:$0xff] %vm44_vm0, %v2406_v38  ;;  %v7646_v41 = vpop.eup %7645  ;;  %v7381_v22 = vadd.f32 -1.0, %v7644_v36  ;;  %v2383_v62 = vmul.f32 1.6732632, %v7379_v54  ;;  %3389 = vmatpush.msra.mxu2 %v2470_v2 }
 0x3b7   :  { %v2396_v46 = vsel %vm2316_vm14, %v9280_v6, %v2380_v27  ;;  %v2409_v25 = vmul.f32 1.050701, %v2393_v56  ;;  %2423 = vst.msk [vmem:[#allocation2 + $0x31] sm:$0xff] %vm44_vm0, %v2407_v24  ;;  %v7648_v37 = vpop.eup %7647  ;;  %v7382_v49 = vadd.f32 -1.0, %v7646_v41  ;;  %v2384_v29 = vmul.f32 1.6732632, %v7380_v48 }
 0x3b8   :  { %v2398_v30 = vsel %vm2318_vm15, %v9287_v52, %v2382_v43  ;;  %v2410_v7 = vmul.f32 1.050701, %v2394_v8  ;;  %2424 = vst.msk [vmem:[#allocation2 + $0x41] sm:$0xff] %vm44_vm0, %v2408_v9  ;;  %v7650_v35 = vpop.eup %7649  ;;  %v7383_v15 = vadd.f32 -1.0, %v7648_v37  ;;  %v2385_v55 = vmul.f32 1.6732632, %v7381_v22  ;;  %3390 = vmatpush.msra.mxu2 %v2469_v12 }
 0x3b9   :  { %v2399_v6 = vsel %vm2319_vm1, %v9294_v1, %v2383_v62  ;;  %v2411_v5 = vmul.f32 1.050701, %v2395_v20  ;;  %2425 = vst.msk [vmem:[#allocation2 + $0x51] sm:$0xff] %vm44_vm0, %v2409_v25  ;;  %v7384_v58 = vadd.f32 -1.0, %v7650_v35  ;;  %v2386_v32 = vmul.f32 1.6732632, %v7382_v49 }
 0x3ba   :  { %v2400_v52 = vsel %vm2320_vm5, %v9299_v21, %v2384_v29  ;;  %v2412_v34 = vmul.f32 1.050701, %v2396_v46  ;;  %2426 = vst.msk [vmem:[#allocation2 + $0x61] sm:$0xff] %vm44_vm0, %v2410_v7  ;;  %vm2322_vm7 = vcmp.gt.f32.partialorder %v9306_v4, 0.0  ;;  %v2387_v63 = vmul.f32 1.6732632, %v7383_v15 }
 0x3bb   :  { %v2401_v1 = vsel %vm2321_vm6, %v9302_v17, %v2385_v55  ;;  %v2414_v33 = vmul.f32 1.050701, %v2398_v30  ;;  %vm2323_vm8 = vcmp.gt.f32.partialorder %v9309_v11, 0.0  ;;  %v2388_v26 = vmul.f32 1.6732632, %v7384_v58  ;;  %2427 = vst.msk [vmem:[#allocation2 + $0x71] sm:$0xff] %vm44_vm0, %v2411_v5 }
 0x3bc   :  { %v2402_v13 = vsel %vm2322_vm7, %v9306_v4, %v2386_v32  ;;  %v2415_v59 = vmul.f32 1.050701, %v2399_v6  ;;  %vm2324_vm9 = vcmp.gt.f32.partialorder %v9313_v60, 0.0  ;;  %v2403_v21 = vsel %vm2323_vm8, %v9309_v11, %v2387_v63  ;;  %2428 = vst.msk [vmem:[#allocation2 + $0x81] sm:$0xff] %vm44_vm0, %v2412_v34 }
 0x3bd   :  { %v2416_v3 = vmul.f32 1.050701, %v2400_v52  ;;  %v9403_v18 = vld [vmem:[#allocation2 + $0x21] sm:$0xff]  ;;  %7651 = vpow2.f32 %v9339_v50  ;;  %v2404_v17 = vsel %vm2324_vm9, %v9313_v60, %v2388_v26  ;;  %v2417_v53 = vmul.f32 1.050701, %v2401_v1  ;;  %2430 = vst.msk [vmem:[#allocation2 + $0xc1] sm:$0xff] %vm44_vm0, %v2414_v33 }
 0x3be   :  { %v9405_v16 = vld [vmem:[#allocation2 + $0x20] sm:$0xff]  ;;  %3050 = vrot.lane.b32.xlu2 %v9403_v18, %s7760_s20  ;;  %7653 = vpow2.f32 %v9343_v10  ;;  %v2418_v4 = vmul.f32 1.050701, %v2402_v13  ;;  %v2419_v11 = vmul.f32 1.050701, %v2403_v21  ;;  %2431 = vst.msk [vmem:[#allocation2 + $0xd1] sm:$0xff] %vm44_vm0, %v2415_v59 }
 0x3bf   :  { %2954 = vrot.lane.b32.xlu1 %v9405_v16, %s7759_s26  ;;  %v2420_v50 = vmul.f32 1.050701, %v2404_v17  ;;  %2432 = vst.msk [vmem:[#allocation2 + $0xe1] sm:$0xff] %vm44_vm0, %v2416_v3  ;;  %v9420_v56 = vld [vmem:[#allocation2 + $0x22] sm:$0xff]  ;;  %v9423_v2 = vld [vmem:[#allocation2 + $0x32] sm:$0xff]  ;;  %vm2309_vm10 = vcmp.gt.f32.partialorder %v9325_v42, 0.0 }
 0x3c0   :  { %2433 = vst.msk [vmem:[#allocation2 + $0xf1] sm:$0xff] %vm44_vm0, %v2417_v53  ;;  %v9426_v14 = vld [vmem:[#allocation2 + $0x30] sm:$0xff]  ;;  %v9428_v54 = vld [vmem:[#allocation2 + $0x42] sm:$0xff]  ;;  %vm2317_vm11 = vcmp.gt.f32.partialorder %v9330_v44, 0.0 }
 0x3c1   :  { %2434 = vst.msk [vmem:[#allocation2 + $0x101] sm:$0xff] %vm44_vm0, %v2418_v4  ;;  %v9434_v8 = vld [vmem:[#allocation2 + $0x52] sm:$0xff]  ;;  %v9439_v24 = vld [vmem:[#allocation2 + $0x62] sm:$0xff] }
 0x3c2   :  { %2435 = vst.msk [vmem:[#allocation2 + $0x111] sm:$0xff] %vm44_vm0, %v2419_v11  ;;  %v9446_v43 = vld [vmem:[#allocation2 + $0x72] sm:$0xff]  ;;  %v9498_v6 = vld [vmem:[#allocation2 + $0x41] sm:$0xff] }
 0x3c3   :  { %v7652_v60 = vpop.eup %7651  ;;  %2436 = vst.msk [vmem:[#allocation2 + $0x121] sm:$0xff] %vm44_vm0, %v2420_v50  ;;  %v9450_v20 = vld [vmem:[#allocation2 + $0x82] sm:$0xff]  ;;  %v9493_v55 = vld [vmem:[#allocation2 + $0x31] sm:$0xff] }
 0x3c4   :  { %v7654_v38 = vpop.eup %7653  ;;  %v7369_v10 = vadd.f32 -1.0, %v7652_v60  ;;  %3130 = vst.msk [vmem:[#allocation3 + $0x10] sm:$0xff] %vm44_vm0, %v9420_v56  ;;  %v9453_v9 = vld [vmem:[#allocation2 + $0xc2] sm:$0xff]  ;;  %v9503_v5 = vld [vmem:[#allocation2 + $0x51] sm:$0xff] }
 0x3c5   :  { %3131 = vst.msk [vmem:[#allocation3 + $0x28] sm:$0xff] %vm44_vm0, %v9423_v2  ;;  %v7377_v12 = vadd.f32 -1.0, %v7654_v38  ;;  %v9511_v58 = vld [vmem:[#allocation2 + $0x40] sm:$0xff]  ;;  %v9521_v34 = vld [vmem:[#allocation2 + $0x50] sm:$0xff]  ;;  %v3169_v50 = vld [vmem:[#allocation3 + $0xb8] sm:$0xff] }
 0x3c6   :  { %v2373_v27 = vmul.f32 1.6732632, %v7369_v10  ;;  %3132 = vst.msk [vmem:[#allocation3 + $0x40] sm:$0xff] %vm44_vm0, %v9428_v54  ;;  %v9461_v62 = vld [vmem:[#allocation2 + $0xe2] sm:$0xff]  ;;  %v9526_v63 = vld [vmem:[#allocation2 + $0x71] sm:$0xff] }
 0x3c7   :  { %2956 = vrot.lane.b32.xlu1 %v9426_v14, %s7759_s26  ;;  %3133 = vst.msk [vmem:[#allocation3 + $0x58] sm:$0xff] %vm44_vm0, %v9434_v8  ;;  %v2381_v41 = vmul.f32 1.6732632, %v7377_v12  ;;  %v9466_v46 = vld [vmem:[#allocation2 + $0xf2] sm:$0xff]  ;;  %v9517_v32 = vld [vmem:[#allocation2 + $0x61] sm:$0xff] }
 0x3c8   :  { %v2389_v36 = vsel %vm2309_vm10, %v9325_v42, %v2373_v27  ;;  %3134 = vst.msk [vmem:[#allocation3 + $0x70] sm:$0xff] %vm44_vm0, %v9439_v24  ;;  %v9457_v42 = vld [vmem:[#allocation2 + $0xd2] sm:$0xff]  ;;  %v9471_v25 = vld [vmem:[#allocation2 + $0x102] sm:$0xff] }
 0x3c9   :  { %v2405_v48 = vmul.f32 1.050701, %v2389_v36  ;;  %3135 = vst.msk [vmem:[#allocation3 + $0x88] sm:$0xff] %vm44_vm0, %v9446_v43  ;;  %v2397_v37 = vsel %vm2317_vm11, %v9330_v44, %v2381_v41  ;;  %v9476_v49 = vld [vmem:[#allocation2 + $0x112] sm:$0xff]  ;;  %v9530_v1 = vld [vmem:[#allocation2 + $0x60] sm:$0xff] }
 0x3ca   :  { %3136 = vst.msk [vmem:[#allocation3 + $0xa0] sm:$0xff] %vm44_vm0, %v9450_v20  ;;  %v9480_v29 = vld [vmem:[#allocation2 + $0x122] sm:$0xff]  ;;  %v2413_v15 = vmul.f32 1.050701, %v2397_v37  ;;  %v9538_v26 = vld [vmem:[#allocation2 + $0x70] sm:$0xff] }
 0x3cb   :  { %2421 = vst.msk [vmem:[#allocation2 + $0x11] sm:$0xff] %vm44_vm0, %v2405_v48  ;;  %v3148_v22 = vld [vmem:[#allocation3 + $0x10] sm:$0xff]  ;;  %v9534_v33 = vld [vmem:[#allocation2 + $0x81] sm:$0xff] }
 0x3cc   :  { %7385 = vmatmul.msk.f32.vlgmr.msra.gmra.mxu2 %vm44_vm0, %v3148_v22  ;;  %3138 = vst.msk [vmem:[#allocation3 + $0xd0] sm:$0xff] %vm44_vm0, %v9453_v9  ;;  %v3151_v44 = vld [vmem:[#allocation3 + $0x28] sm:$0xff]  ;;  %v9559_v17 = vld [vmem:[#allocation2 + $0xd1] sm:$0xff]  ;;  %v9604_v36 = vld [vmem:[#allocation2 + $0x100] sm:$0xff] }
 0x3cd   :  { %3139 = vst.msk [vmem:[#allocation3 + $0xe8] sm:$0xff] %vm44_vm0, %v9457_v42  ;;  %v3154_v52 = vld [vmem:[#allocation3 + $0x40] sm:$0xff]  ;;  %v9572_v4 = vld [vmem:[#allocation2 + $0xd0] sm:$0xff]  ;;  %v2450_v37 = vld [vmem:[%s12735_s7 + $0x68] sm:$0xff] }
 0x3ce   :  { %3140 = vst.msk [vmem:[#allocation3 + $0x100] sm:$0xff] %vm44_vm0, %v9461_v62  ;;  %v9549_v59 = vld [vmem:[#allocation2 + $0xc1] sm:$0xff]  ;;  %v3157_v3 = vld [vmem:[#allocation3 + $0x58] sm:$0xff]  ;;  %v9595_v27 = vld [vmem:[#allocation2 + $0xf0] sm:$0xff] }
 0x3cf   :  { %3141 = vst.msk [vmem:[#allocation3 + $0x118] sm:$0xff] %vm44_vm0, %v9466_v46  ;;  %v9568_v53 = vld [vmem:[#allocation2 + $0xe1] sm:$0xff]  ;;  %v9578_v11 = vld [vmem:[#allocation2 + $0xf1] sm:$0xff] }
 0x3d0   :  { %3142 = vst.msk [vmem:[#allocation3 + $0x130] sm:$0xff] %vm44_vm0, %v9471_v25  ;;  %v4418_v60 = vld [vmem:[#allocation2 + $0x92] sm:$0xff]  ;;  %v9593_v38 = vld [vmem:[#allocation2 + $0x101] sm:$0xff] }
 0x3d1   :  { %3143 = vst.msk [vmem:[#allocation3 + $0x148] sm:$0xff] %vm44_vm0, %v9476_v49  ;;  %v3160_v10 = vld [vmem:[#allocation3 + $0x70] sm:$0xff]  ;;  %v9608_v48 = vld [vmem:[#allocation2 + $0x121] sm:$0xff] }
 0x3d2   :  { %v2826_v30 = vld [vmem:[#allocation2 + $0x12] sm:$0xff]  ;;  %3144 = vst.msk [vmem:[#allocation3 + $0x160] sm:$0xff] %vm44_vm0, %v9480_v29  ;;  %v3163_v22 = vld [vmem:[#allocation3 + $0x88] sm:$0xff] }
 0x3d3   :  { %v2698_v7 = vld [vmem:[#allocation2 + $0x10] sm:$0xff]  ;;  %2858 = vrot.lane.b32.xlu0 %v2826_v30, %s7758_s25  ;;  %2636 = vrot.lane.b32.xlu1 %v2826_v30, %s7759_s26  ;;  %2429 = vst.msk [vmem:[#allocation2 + $0xb1] sm:$0xff] %vm44_vm0, %v2413_v15  ;;  %v2449_v30 = vld [vmem:[%s12735_s7 + $0x60] sm:$0xff]  ;;  %v2446_v15 = vld [vmem:[%s12735_s7 + $0x48] sm:$0xff] }
 0x3d4   :  { %v2507_v35 = vld [vmem:[#allocation2 + $0x11] sm:$0xff]  ;;  %2730 = vrot.lane.b32.xlu2 %v2698_v7, %s7760_s20  ;;  %7386 = vmatmul.msk.f32.gmra.mxu2 %vm44_vm0, %v3151_v44  ;;  %2811 = vst.msk [vmem:[#allocation3 + $0x20] sm:$0xff] %vm44_vm0, %v9403_v18 }
 0x3d5   :  { %2810 = vst.msk [vmem:[#allocation3 + $0x8] sm:$0xff] %vm44_vm0, %v2507_v35  ;;  %v9600_v12 = vld [vmem:[#allocation2 + $0x111] sm:$0xff] }
 0x3d6   :  { %2491 = vst.msk [vmem:[#allocation3 + $0x18] sm:$0xff] %vm44_vm0, %v2698_v7  ;;  %v9612_v41 = vld [vmem:[#allocation2 + $0x110] sm:$0xff]  ;;  %v2448_v7 = vld [vmem:[%s12735_s7 + $0x58] sm:$0xff] }
 0x3d7   :  { %2812 = vst.msk [vmem:[#allocation3 + $0x38] sm:$0xff] %vm44_vm0, %v9493_v55 }
 0x3d8   :  { %2492 = vst.msk [vmem:[#allocation3 + $0x30] sm:$0xff] %vm44_vm0, %v9405_v16 }
 0x3d9   :  { %2813 = vst.msk [vmem:[#allocation3 + $0x50] sm:$0xff] %vm44_vm0, %v9498_v6 }
 0x3da   :  { %2493 = vst.msk [vmem:[#allocation3 + $0x48] sm:$0xff] %vm44_vm0, %v9426_v14  ;;  %v9542_v13 = vld [vmem:[#allocation2 + $0xb1] sm:$0xff] }
 0x3db   :  { %2860 = vrot.lane.b32.xlu0 %v9420_v56, %s7758_s25  ;;  %2958 = vrot.lane.b32.xlu1 %v9511_v58, %s7759_s26  ;;  %2814 = vst.msk [vmem:[#allocation3 + $0x68] sm:$0xff] %vm44_vm0, %v9503_v5  ;;  %v9555_v21 = vld [vmem:[#allocation2 + $0xb0] sm:$0xff] }
 0x3dc   :  { %3052 = vrot.lane.b32.xlu2 %v9493_v55, %s7760_s20  ;;  %7387 = vmatmul.msk.f32.gmra.mxu2 %vm44_vm0, %v3154_v52  ;;  %2494 = vst.msk [vmem:[#allocation3 + $0x60] sm:$0xff] %vm44_vm0, %v9511_v58  ;;  %v2468_v52 = vld [vmem:[%s12735_s7 + $0xf8] sm:$0xff] }
 0x3dd   :  { %2815 = vst.msk [vmem:[#allocation3 + $0x80] sm:$0xff] %vm44_vm0, %v9517_v32  ;;  %3310 = vmatpush.msra.mxu3 %v2468_v52  ;;  %v2482_v52 = vld [vmem:[#allocation2 + $0xa0] sm:$0xff] }
 0x3de   :  { %2495 = vst.msk [vmem:[#allocation3 + $0x78] sm:$0xff] %vm44_vm0, %v9521_v34 }
 0x3df   :  { %2816 = vst.msk [vmem:[#allocation3 + $0x98] sm:$0xff] %vm44_vm0, %v9526_v63 }
 0x3e0   :  { %2496 = vst.msk [vmem:[#allocation3 + $0x90] sm:$0xff] %vm44_vm0, %v9530_v1 }
 0x3e1   :  { %2817 = vst.msk [vmem:[#allocation3 + $0xb0] sm:$0xff] %vm44_vm0, %v9534_v33  ;;  %v2635_v44 = vpop.permute.xlu1 %2634 }
 0x3e2   :  { %2497 = vst.msk [vmem:[#allocation3 + $0xa8] sm:$0xff] %vm44_vm0, %v9538_v26 }
 0x3e3   :  { %2540 = vrot.lane.b32.xlu0 %v2507_v35, %s7758_s25  ;;  %2638 = vrot.lane.b32.xlu1 %v9420_v56, %s7759_s26  ;;  %2818 = vst.msk [vmem:[#allocation3 + $0xc8] sm:$0xff] %vm44_vm0, %v9542_v13  ;;  %v9586_v56 = vld [vmem:[#allocation2 + $0xe0] sm:$0xff]  ;;  %v2447_v35 = vld [vmem:[%s12735_s7 + $0x50] sm:$0xff] }
 0x3e4   :  { %2732 = vrot.lane.b32.xlu2 %v9405_v16, %s7760_s20  ;;  %7388 = vmatmul.msk.f32.gmra.mxu2 %vm44_vm0, %v3157_v3  ;;  %v9564_v16 = vld [vmem:[#allocation2 + $0xc0] sm:$0xff]  ;;  %2819 = vst.msk [vmem:[#allocation3 + $0xe0] sm:$0xff] %vm44_vm0, %v9549_v59  ;;  %v3172_v3 = vld [vmem:[#allocation3 + $0xd0] sm:$0xff] }
 0x3e5   :  { %2499 = vst.msk [vmem:[#allocation3 + $0xd8] sm:$0xff] %vm44_vm0, %v9555_v21 }
 0x3e6   :  { %2820 = vst.msk [vmem:[#allocation3 + $0xf8] sm:$0xff] %vm44_vm0, %v9559_v17 }
 0x3e7   :  { %2500 = vst.msk [vmem:[#allocation3 + $0xf0] sm:$0xff] %vm44_vm0, %v9564_v16 }
 0x3e8   :  { %2821 = vst.msk [vmem:[#allocation3 + $0x110] sm:$0xff] %vm44_vm0, %v9568_v53 }
 0x3e9   :  { %2501 = vst.msk [vmem:[#allocation3 + $0x108] sm:$0xff] %vm44_vm0, %v9572_v4 }
 0x3ea   :  { %4434 = vst.msk [vmem:[#allocation3 + $0xb8] sm:$0xff] %vm44_vm0, %v4418_v60  ;;  %v2467_v60 = vld [vmem:[%s12735_s7 + $0xf0] sm:$0xff] }
 0x3eb   :  { %2862 = vrot.lane.b32.xlu0 %v9423_v2, %s7758_s25  ;;  %2960 = vrot.lane.b32.xlu1 %v9521_v34, %s7759_s26  ;;  %2822 = vst.msk [vmem:[#allocation3 + $0x128] sm:$0xff] %vm44_vm0, %v9578_v11 }
 0x3ec   :  { %3054 = vrot.lane.b32.xlu2 %v9498_v6, %s7760_s20  ;;  %7389 = vmatmul.msk.f32.gmra.mxu2 %vm44_vm0, %v3160_v10  ;;  %2502 = vst.msk [vmem:[#allocation3 + $0x120] sm:$0xff] %vm44_vm0, %v9586_v56  ;;  %v2539_v10 = vpop.permute.xlu0 %2538 }
 0x3ed   :  { %2823 = vst.msk [vmem:[#allocation3 + $0x140] sm:$0xff] %vm44_vm0, %v9593_v38  ;;  %3311 = vmatpush.msra.mxu3 %v2467_v60 }
 0x3ee   :  { %2503 = vst.msk [vmem:[#allocation3 + $0x138] sm:$0xff] %vm44_vm0, %v9595_v27 }
 0x3ef   :  { %2824 = vst.msk [vmem:[#allocation3 + $0x158] sm:$0xff] %vm44_vm0, %v9600_v12 }
 0x3f0   :  { %2504 = vst.msk [vmem:[#allocation3 + $0x150] sm:$0xff] %vm44_vm0, %v9604_v36 }
 0x3f1   :  { %2825 = vst.msk [vmem:[#allocation3 + $0x170] sm:$0xff] %vm44_vm0, %v9608_v48 }
 0x3f2   :  { %2505 = vst.msk [vmem:[#allocation3 + $0x168] sm:$0xff] %vm44_vm0, %v9612_v41 }
 0x3f3   :  { %2542 = vrot.lane.b32.xlu0 %v9403_v18, %s7758_s25  ;;  %2640 = vrot.lane.b32.xlu1 %v9423_v2, %s7759_s26  ;;  %v2452_v18 = vld [vmem:[%s12735_s7 + $0x78] sm:$0xff]  ;;  %v2451_v2 = vld [vmem:[%s12735_s7 + $0x70] sm:$0xff]  ;;  %2498 = vst.msk [vmem:[#allocation3 + $0xc0] sm:$0xff] %vm44_vm0, %v2482_v52 }
 0x3f4   :  { %2734 = vrot.lane.b32.xlu2 %v9426_v14, %s7760_s20  ;;  %7390 = vmatmul.msk.f32.gmra.mxu2 %vm44_vm0, %v3163_v22  ;;  %v3166_v14 = vld [vmem:[#allocation3 + $0xa0] sm:$0xff]  ;;  %v9688_v22 = vpop.permute.xlu2 %3064 }
 0x3f5   :  { %3245 = vmatpush.msra.mxu1 %v2452_v18  ;;  %v2442_v18 = vld [vmem:[%s12735_s7 + $0x28] sm:$0xff] }
 0x3f7   :  { %3246 = vmatpush.msra.mxu1 %v2451_v2  ;;  %v9698_v2 = vpop.permute.xlu1 %2968 }
 0x3f9   :  { %3247 = vmatpush.msra.mxu1 %v2450_v37  ;;  %v2466_v37 = vld [vmem:[%s12735_s7 + $0xe8] sm:$0xff] }
 0x3fa   :  { %3312 = vmatpush.msra.mxu3 %v2466_v37 }
 0x3fb   :  { %2864 = vrot.lane.b32.xlu0 %v9428_v54, %s7758_s25  ;;  %2962 = vrot.lane.b32.xlu1 %v9530_v1, %s7759_s26 }
 0x3fc   :  { %3056 = vrot.lane.b32.xlu2 %v9503_v5, %s7760_s20  ;;  %7391 = vmatmul.msk.f32.gmra.mxu2 %vm44_vm0, %v3166_v14  ;;  %v2441_v14 = vld [vmem:[%s12735_s7 + $0x20] sm:$0xff] }
 0x3fd   :  { %3248 = vmatpush.msra.mxu1 %v2449_v30  ;;  %v3175_v30 = vld [vmem:[#allocation3 + $0xe8] sm:$0xff] }
 0x3ff   :  { %3249 = vmatpush.msra.mxu1 %v2448_v7  ;;  %v2439_v7 = vld [vmem:[%s12735_s7 + $0x10] sm:$0xff]  ;;  %v2651_v60 = vpop.permute.xlu1 %2650 }
 0x401   :  { %3250 = vmatpush.msra.mxu1 %v2447_v35  ;;  %v2438_v35 = vld [vmem:[%s12735_s7 + $0x8] sm:$0xff] }
 0x403   :  { %2544 = vrot.lane.b32.xlu0 %v9493_v55, %s7758_s25  ;;  %2642 = vrot.lane.b32.xlu1 %v9428_v54, %s7759_s26  ;;  %v2445_v54 = vld [vmem:[%s12735_s7 + $0x40] sm:$0xff]  ;;  %v2444_v55 = vld [vmem:[%s12735_s7 + $0x38] sm:$0xff] }
 0x404   :  { %2736 = vrot.lane.b32.xlu2 %v9511_v58, %s7760_s20  ;;  %7392 = vmatmul.msk.f32.gmra.mxu2 %vm44_vm0, %v3169_v50  ;;  %v2474_v58 = vld [vmem:[#allocation2] sm:$0xff]  ;;  %v2443_v50 = vld [vmem:[%s12735_s7 + $0x30] sm:$0xff] }
 0x405   :  { %3251 = vmatpush.msra.mxu1 %v2446_v15  ;;  %2490 = vst.msk [vmem:[#allocation3] sm:$0xff] %vm44_vm0, %v2474_v58  ;;  %v9724_v15 = vpop.permute.xlu2 %3080  ;;  %v2462_v58 = vld [vmem:[%s12735_s7 + $0xc8] sm:$0xff] }
 0x406   :  { %2586 = vst.msk [vmem:[#allocation3] sm:$0xff] %vm268_vm2, %v2539_v10  ;;  %v2461_v10 = vld [vmem:[%s12735_s7 + $0xc0] sm:$0xff] }
 0x407   :  { %3252 = vmatpush.msra.mxu1 %v2445_v54  ;;  %2682 = vst.msk [vmem:[#allocation3] sm:$0xff] %vm365_vm3, %v2635_v44  ;;  %v2463_v44 = vld [vmem:[%s12735_s7 + $0xd0] sm:$0xff]  ;;  %v2928_v54 = vld [vmem:[#allocation2 + $0x80] sm:$0xff] }
 0x409   :  { %3253 = vmatpush.msra.mxu1 %v2444_v55  ;;  %v2437_v55 = vld [vmem:[%s12735_s7] sm:$0xff] }
 0x40b   :  { %2866 = vrot.lane.b32.xlu0 %v9434_v8, %s7758_s25  ;;  %2964 = vrot.lane.b32.xlu1 %v9538_v26, %s7759_s26 }
 0x40c   :  { %3058 = vrot.lane.b32.xlu2 %v9517_v32, %s7760_s20  ;;  %7393 = vmatmul.msk.f32.gmra.mxu2 %vm44_vm0, %v3172_v3 }
 0x40d   :  { %3254 = vmatpush.msra.mxu1 %v2443_v50  ;;  %v3178_v50 = vld [vmem:[#allocation3 + $0x100] sm:$0xff] }
 0x40f   :  { %3255 = vmatpush.msra.mxu1 %v2442_v18  ;;  %v2460_v18 = vld [vmem:[%s12735_s7 + $0xb8] sm:$0xff] }
 0x411   :  { %3256 = vmatpush.msra.mxu1 %v2441_v14  ;;  %v2459_v14 = vld [vmem:[%s12735_s7 + $0xb0] sm:$0xff] }
 0x413   :  { %2546 = vrot.lane.b32.xlu0 %v9498_v6, %s7758_s25  ;;  %2644 = vrot.lane.b32.xlu1 %v9434_v8, %s7759_s26  ;;  %v2440_v6 = vld [vmem:[%s12735_s7 + $0x18] sm:$0xff] }
 0x414   :  { %2738 = vrot.lane.b32.xlu2 %v9521_v34, %s7760_s20  ;;  %v2465_v34 = vld [vmem:[%s12735_s7 + $0xe0] sm:$0xff]  ;;  %7394 = vmatmul.msk.f32.gmra.mxu2 %vm44_vm0, %v3175_v30  ;;  %v2464_v8 = vld [vmem:[%s12735_s7 + $0xd8] sm:$0xff]  ;;  %v9766_v30 = vpop.permute.xlu1 %2984 }
 0x415   :  { %3257 = vmatpush.msra.mxu1 %v2440_v6  ;;  %3313 = vmatpush.msra.mxu3 %v2465_v34  ;;  %v2458_v6 = vld [vmem:[%s12735_s7 + $0xa8] sm:$0xff]  ;;  %v3181_v34 = vld [vmem:[#allocation3 + $0x118] sm:$0xff] }
 0x417   :  { %3258 = vmatpush.msra.mxu1 %v2439_v7  ;;  %3314 = vmatpush.msra.mxu3 %v2464_v8  ;;  %v2555_v3 = vpop.permute.xlu0 %2554  ;;  %v2454_v7 = vld [vmem:[%s12735_s7 + $0x88] sm:$0xff] }
 0x418   :  { %2594 = vst.msk [vmem:[#allocation3 + $0xc0] sm:$0xff] %vm268_vm2, %v2555_v3  ;;  %v3051_v37 = vpop.permute.xlu2 %3050  ;;  %v2834_v3 = vld [vmem:[#allocation2 + $0xb2] sm:$0xff] }
 0x419   :  { %3259 = vmatpush.msra.mxu1 %v2438_v35  ;;  %3315 = vmatpush.msra.mxu3 %v2463_v44  ;;  %2690 = vst.msk [vmem:[#allocation3 + $0xc0] sm:$0xff] %vm365_vm3, %v2651_v60  ;;  %v3184_v35 = vld [vmem:[#allocation3 + $0x130] sm:$0xff]  ;;  %v2453_v44 = vld [vmem:[%s12735_s7 + $0x80] sm:$0xff] }
 0x41b   :  { %2868 = vrot.lane.b32.xlu0 %v9439_v24, %s7758_s25  ;;  %2966 = vrot.lane.b32.xlu1 %v2928_v54, %s7759_s26 }
 0x41c   :  { %3060 = vrot.lane.b32.xlu2 %v9526_v63, %s7760_s20  ;;  %3260 = vmatpush.msra.mxu1 %v2437_v55 }
 0x41d   :  { %7395 = vmatmul.msk.f32.gmra.mxu2 %vm44_vm0, %v3178_v50  ;;  %3316 = vmatpush.msra.mxu3 %v2462_v58  ;;  %v3187_v58 = vld [vmem:[#allocation3 + $0x148] sm:$0xff] }
 0x41f   :  { %3317 = vmatpush.msra.mxu3 %v2461_v10 }
 0x421   :  { %3318 = vmatpush.msra.mxu3 %v2460_v18 }
 0x423   :  { %2548 = vrot.lane.b32.xlu0 %v9503_v5, %s7758_s25  ;;  %2646 = vrot.lane.b32.xlu1 %v9439_v24, %s7759_s26  ;;  %v2457_v5 = vld [vmem:[%s12735_s7 + $0xa0] sm:$0xff]  ;;  %v2455_v24 = vld [vmem:[%s12735_s7 + $0x90] sm:$0xff] }
 0x424   :  { %2740 = vrot.lane.b32.xlu2 %v9530_v1, %s7760_s20  ;;  %3319 = vmatpush.msra.mxu3 %v2459_v14  ;;  %v2456_v1 = vld [vmem:[%s12735_s7 + $0x98] sm:$0xff] }
 0x425   :  { %7396 = vmatmul.msk.f32.gmra.mxu2 %vm44_vm0, %v3181_v34 }
 0x426   :  { %3320 = vmatpush.msra.mxu3 %v2458_v6 }
 0x428   :  { %3321 = vmatpush.msra.mxu3 %v2457_v5 }
 0x42a   :  { %3322 = vmatpush.msra.mxu3 %v2456_v1 }
 0x42b   :  { %2870 = vrot.lane.b32.xlu0 %v9446_v43, %s7758_s25  ;;  %2648 = vrot.lane.b32.xlu1 %v9446_v43, %s7759_s26 }
 0x42c   :  { %3062 = vrot.lane.b32.xlu2 %v9534_v33, %s7760_s20  ;;  %3323 = vmatpush.msra.mxu3 %v2455_v24 }
 0x42d   :  { %7397 = vmatmul.msk.f32.gmra.mxu2 %vm44_vm0, %v3184_v35 }
 0x42e   :  { %v2731_v8 = vpop.permute.xlu2 %2730  ;;  %3324 = vmatpush.msra.mxu3 %v2454_v7 }
 0x42f   :  { %2778 = vst.msk [vmem:[#allocation3] sm:$0xff] %vm462_vm4, %v2731_v8 }
 0x430   :  { %3325 = vmatpush.msra.mxu3 %v2453_v44 }
 0x431   :  { %v2955_v33 = vpop.permute.xlu1 %2954 }
 0x433   :  { %2550 = vrot.lane.b32.xlu0 %v9517_v32, %s7758_s25  ;;  %2970 = vrot.lane.b32.xlu1 %v9564_v16, %s7759_s26 }
 0x434   :  { %2742 = vrot.lane.b32.xlu2 %v9538_v26, %s7760_s20  ;;  %v3190_v26 = vld [vmem:[#allocation3 + $0x160] sm:$0xff] }
 0x435   :  { %7398 = vmatmul.msk.f32.gmra.mxu2 %vm44_vm0, %v3187_v58 }
 0x436   :  { %v3053_v43 = vpop.permute.xlu2 %3052  ;;  %v3146_v55 = vld [vmem:[#allocation3] sm:$0xff] }
 0x437   :  { %3261 = vmatmul.f32.vlgmr.msra.gmra.mxu1 %v3146_v55 }
 0x439   :  { %v2957_v32 = vpop.permute.xlu1 %2956 }
 0x43b   :  { %2872 = vrot.lane.b32.xlu0 %v9450_v20, %s7758_s25  ;;  %2972 = vrot.lane.b32.xlu1 %v9572_v4, %s7759_s26 }
 0x43c   :  { %2744 = vrot.lane.b32.xlu2 %v2928_v54, %s7760_s20 }
 0x43d   :  { %7399 = vmatmul.msk.f32.gmra.mxu2 %vm44_vm0, %v3190_v26 }
 0x43e   :  { %v2733_v52 = vpop.permute.xlu2 %2732 }
 0x443   :  { %2552 = vrot.lane.b32.xlu0 %v9526_v63, %s7758_s25  ;;  %2652 = vrot.lane.b32.xlu1 %v2834_v3, %s7759_s26 }
 0x444   :  { %3066 = vrot.lane.b32.xlu2 %v9549_v59, %s7760_s20 }
 0x445   :  { %v2859_v20 = vpop.permute.xlu0 %2858  ;;  %v2637_v54 = vpop.permute.xlu1 %2636 }
 0x446   :  { %v3055_v50 = vpop.permute.xlu2 %3054  ;;  %2906 = vst.msk [vmem:[#allocation3 + $0x8] sm:$0xff] %vm268_vm2, %v2859_v20 }
 0x447   :  { %3002 = vst.msk [vmem:[#allocation3 + $0x8] sm:$0xff] %vm365_vm3, %v2955_v33 }
 0x448   :  { %3098 = vst.msk [vmem:[#allocation3 + $0x8] sm:$0xff] %vm462_vm4, %v3051_v37 }
 0x44b   :  { %2874 = vrot.lane.b32.xlu0 %v2834_v3, %s7758_s25  ;;  %2974 = vrot.lane.b32.xlu1 %v9586_v56, %s7759_s26  ;;  %v2936_v3 = vld [vmem:[#allocation2 + $0x120] sm:$0xff] }
 0x44c   :  { %2746 = vrot.lane.b32.xlu2 %v9555_v21, %s7760_s20 }
 0x44d   :  { %v2861_v63 = vpop.permute.xlu0 %2860  ;;  %v2959_v10 = vpop.permute.xlu1 %2958 }
 0x44e   :  { %v2735_v60 = vpop.permute.xlu2 %2734  ;;  %2907 = vst.msk [vmem:[#allocation3 + $0x20] sm:$0xff] %vm268_vm2, %v2861_v63 }
 0x44f   :  { %3003 = vst.msk [vmem:[#allocation3 + $0x20] sm:$0xff] %vm365_vm3, %v2957_v32  ;;  %v3147_v18 = vld [vmem:[#allocation3 + $0x8] sm:$0xff] }
 0x450   :  { %3099 = vst.msk [vmem:[#allocation3 + $0x20] sm:$0xff] %vm462_vm4, %v3053_v43  ;;  %3326 = vmatmul.f32.vlgmr.msra.gmra.mxu3 %v3147_v18 }
 0x453   :  { %2876 = vrot.lane.b32.xlu0 %v9453_v9, %s7758_s25  ;;  %2654 = vrot.lane.b32.xlu1 %v9453_v9, %s7759_s26 }
 0x454   :  { %3068 = vrot.lane.b32.xlu2 %v9559_v17, %s7760_s20 }
 0x455   :  { %v2541_v21 = vpop.permute.xlu0 %2540  ;;  %v2639_v37 = vpop.permute.xlu1 %2638 }
 0x456   :  { %v3057_v14 = vpop.permute.xlu2 %3056  ;;  %2587 = vst.msk [vmem:[#allocation3 + $0x18] sm:$0xff] %vm268_vm2, %v2541_v21 }
 0x457   :  { %2683 = vst.msk [vmem:[#allocation3 + $0x18] sm:$0xff] %vm365_vm3, %v2637_v54  ;;  %v3150_v6 = vld [vmem:[#allocation3 + $0x20] sm:$0xff] }
 0x458   :  { %2779 = vst.msk [vmem:[#allocation3 + $0x18] sm:$0xff] %vm462_vm4, %v2733_v52  ;;  %3329 = vmatmul.f32.gmra.mxu3 %v3150_v6 }
 0x45b   :  { %2556 = vrot.lane.b32.xlu0 %v9542_v13, %s7758_s25  ;;  %2976 = vrot.lane.b32.xlu1 %v9595_v27, %s7759_s26 }
 0x45c   :  { %2748 = vrot.lane.b32.xlu2 %v9564_v16, %s7760_s20 }
 0x45d   :  { %v2863_v9 = vpop.permute.xlu0 %2862  ;;  %v2961_v5 = vpop.permute.xlu1 %2960 }
 0x45e   :  { %v2737_v34 = vpop.permute.xlu2 %2736  ;;  %2908 = vst.msk [vmem:[#allocation3 + $0x38] sm:$0xff] %vm268_vm2, %v2863_v9 }
 0x45f   :  { %3004 = vst.msk [vmem:[#allocation3 + $0x38] sm:$0xff] %vm365_vm3, %v2959_v10  ;;  %v3149_v1 = vld [vmem:[#allocation3 + $0x18] sm:$0xff] }
 0x460   :  { %3100 = vst.msk [vmem:[#allocation3 + $0x38] sm:$0xff] %vm462_vm4, %v3055_v50  ;;  %3264 = vmatmul.f32.gmra.mxu1 %v3149_v1 }
 0x463   :  { %2878 = vrot.lane.b32.xlu0 %v9457_v42, %s7758_s25  ;;  %2656 = vrot.lane.b32.xlu1 %v9457_v42, %s7759_s26 }
 0x464   :  { %3070 = vrot.lane.b32.xlu2 %v9568_v53, %s7760_s20 }
 0x465   :  { %v2543_v13 = vpop.permute.xlu0 %2542  ;;  %v2641_v24 = vpop.permute.xlu1 %2640 }
 0x466   :  { %v3059_v16 = vpop.permute.xlu2 %3058  ;;  %2588 = vst.msk [vmem:[#allocation3 + $0x30] sm:$0xff] %vm268_vm2, %v2543_v13 }
 0x467   :  { %2684 = vst.msk [vmem:[#allocation3 + $0x30] sm:$0xff] %vm365_vm3, %v2639_v37  ;;  %v3153_v7 = vld [vmem:[#allocation3 + $0x38] sm:$0xff] }
 0x468   :  { %2780 = vst.msk [vmem:[#allocation3 + $0x30] sm:$0xff] %vm462_vm4, %v2735_v60  ;;  %3332 = vmatmul.f32.gmra.mxu3 %v3153_v7 }
 0x46b   :  { %2558 = vrot.lane.b32.xlu0 %v9549_v59, %s7758_s25  ;;  %2978 = vrot.lane.b32.xlu1 %v9604_v36, %s7759_s26 }
 0x46c   :  { %2750 = vrot.lane.b32.xlu2 %v9572_v4, %s7760_s20 }
 0x46d   :  { %v2865_v42 = vpop.permute.xlu0 %2864  ;;  %v2963_v35 = vpop.permute.xlu1 %2962 }
 0x46e   :  { %v2739_v8 = vpop.permute.xlu2 %2738  ;;  %2909 = vst.msk [vmem:[#allocation3 + $0x50] sm:$0xff] %vm268_vm2, %v2865_v42 }
 0x46f   :  { %3005 = vst.msk [vmem:[#allocation3 + $0x50] sm:$0xff] %vm365_vm3, %v2961_v5  ;;  %v3152_v44 = vld [vmem:[#allocation3 + $0x30] sm:$0xff] }
 0x470   :  { %3101 = vst.msk [vmem:[#allocation3 + $0x50] sm:$0xff] %vm462_vm4, %v3057_v14  ;;  %3267 = vmatmul.f32.gmra.mxu1 %v3152_v44 }
 0x473   :  { %2880 = vrot.lane.b32.xlu0 %v9461_v62, %s7758_s25  ;;  %2658 = vrot.lane.b32.xlu1 %v9461_v62, %s7759_s26 }
 0x474   :  { %3072 = vrot.lane.b32.xlu2 %v9578_v11, %s7760_s20 }
 0x475   :  { %v2545_v59 = vpop.permute.xlu0 %2544  ;;  %v2643_v33 = vpop.permute.xlu1 %2642 }
 0x476   :  { %v3061_v4 = vpop.permute.xlu2 %3060  ;;  %2589 = vst.msk [vmem:[#allocation3 + $0x48] sm:$0xff] %vm268_vm2, %v2545_v59 }
 0x477   :  { %2685 = vst.msk [vmem:[#allocation3 + $0x48] sm:$0xff] %vm365_vm3, %v2641_v24  ;;  %v3156_v43 = vld [vmem:[#allocation3 + $0x50] sm:$0xff] }
 0x478   :  { %2781 = vst.msk [vmem:[#allocation3 + $0x48] sm:$0xff] %vm462_vm4, %v2737_v34  ;;  %3335 = vmatmul.f32.gmra.mxu3 %v3156_v43 }
 0x47b   :  { %2560 = vrot.lane.b32.xlu0 %v9559_v17, %s7758_s25  ;;  %2980 = vrot.lane.b32.xlu1 %v9612_v41, %s7759_s26 }
 0x47c   :  { %2752 = vrot.lane.b32.xlu2 %v9586_v56, %s7760_s20 }
 0x47d   :  { %v2867_v62 = vpop.permute.xlu0 %2866  ;;  %v2965_v58 = vpop.permute.xlu1 %2964 }
 0x47e   :  { %v2741_v55 = vpop.permute.xlu2 %2740  ;;  %2910 = vst.msk [vmem:[#allocation3 + $0x68] sm:$0xff] %vm268_vm2, %v2867_v62 }
 0x47f   :  { %3006 = vst.msk [vmem:[#allocation3 + $0x68] sm:$0xff] %vm365_vm3, %v2963_v35  ;;  %v3155_v32 = vld [vmem:[#allocation3 + $0x48] sm:$0xff] }
 0x480   :  { %3102 = vst.msk [vmem:[#allocation3 + $0x68] sm:$0xff] %vm462_vm4, %v3059_v16  ;;  %3270 = vmatmul.f32.gmra.mxu1 %v3155_v32 }
 0x483   :  { %2882 = vrot.lane.b32.xlu0 %v9466_v46, %s7758_s25  ;;  %2660 = vrot.lane.b32.xlu1 %v9466_v46, %s7759_s26 }
 0x484   :  { %3074 = vrot.lane.b32.xlu2 %v9593_v38, %s7760_s20 }
 0x485   :  { %v2547_v17 = vpop.permute.xlu0 %2546  ;;  %v2645_v52 = vpop.permute.xlu1 %2644 }
 0x486   :  { %v3063_v56 = vpop.permute.xlu2 %3062  ;;  %2590 = vst.msk [vmem:[#allocation3 + $0x60] sm:$0xff] %vm268_vm2, %v2547_v17 }
 0x487   :  { %2686 = vst.msk [vmem:[#allocation3 + $0x60] sm:$0xff] %vm365_vm3, %v2643_v33  ;;  %v3159_v26 = vld [vmem:[#allocation3 + $0x68] sm:$0xff] }
 0x488   :  { %2782 = vst.msk [vmem:[#allocation3 + $0x60] sm:$0xff] %vm462_vm4, %v2739_v8  ;;  %3338 = vmatmul.f32.gmra.mxu3 %v3159_v26 }
 0x48b   :  { %2562 = vrot.lane.b32.xlu0 %v9568_v53, %s7758_s25  ;;  %2982 = vrot.lane.b32.xlu1 %v2936_v3, %s7759_s26 }
 0x48c   :  { %2754 = vrot.lane.b32.xlu2 %v9595_v27, %s7760_s20 }
 0x48d   :  { %v2869_v46 = vpop.permute.xlu0 %2868  ;;  %v2967_v50 = vpop.permute.xlu1 %2966 }
 0x48e   :  { %v2743_v20 = vpop.permute.xlu2 %2742  ;;  %2911 = vst.msk [vmem:[#allocation3 + $0x80] sm:$0xff] %vm268_vm2, %v2869_v46 }
 0x48f   :  { %3007 = vst.msk [vmem:[#allocation3 + $0x80] sm:$0xff] %vm365_vm3, %v2965_v58  ;;  %v3158_v54 = vld [vmem:[#allocation3 + $0x60] sm:$0xff] }
 0x490   :  { %3103 = vst.msk [vmem:[#allocation3 + $0x80] sm:$0xff] %vm462_vm4, %v3061_v4  ;;  %3273 = vmatmul.f32.gmra.mxu1 %v3158_v54 }
 0x493   :  { %2884 = vrot.lane.b32.xlu0 %v9471_v25, %s7758_s25  ;;  %2662 = vrot.lane.b32.xlu1 %v9471_v25, %s7759_s26 }
 0x494   :  { %3076 = vrot.lane.b32.xlu2 %v9600_v12, %s7760_s20 }
 0x495   :  { %v2549_v53 = vpop.permute.xlu0 %2548  ;;  %v2647_v63 = vpop.permute.xlu1 %2646 }
 0x496   :  { %v2745_v27 = vpop.permute.xlu2 %2744  ;;  %2591 = vst.msk [vmem:[#allocation3 + $0x78] sm:$0xff] %vm268_vm2, %v2549_v53 }
 0x497   :  { %2687 = vst.msk [vmem:[#allocation3 + $0x78] sm:$0xff] %vm365_vm3, %v2645_v52  ;;  %v3162_v60 = vld [vmem:[#allocation3 + $0x80] sm:$0xff] }
 0x498   :  { %2783 = vst.msk [vmem:[#allocation3 + $0x78] sm:$0xff] %vm462_vm4, %v2741_v55  ;;  %3341 = vmatmul.f32.gmra.mxu3 %v3162_v60 }
 0x49b   :  { %2564 = vrot.lane.b32.xlu0 %v9578_v11, %s7758_s25  ;;  %2664 = vrot.lane.b32.xlu1 %v9476_v49, %s7759_s26 }
 0x49c   :  { %2756 = vrot.lane.b32.xlu2 %v9604_v36, %s7760_s20 }
 0x49d   :  { %v2871_v25 = vpop.permute.xlu0 %2870  ;;  %v2649_v18 = vpop.permute.xlu1 %2648 }
 0x49e   :  { %v3067_v10 = vpop.permute.xlu2 %3066  ;;  %2912 = vst.msk [vmem:[#allocation3 + $0x98] sm:$0xff] %vm268_vm2, %v2871_v25 }
 0x49f   :  { %3008 = vst.msk [vmem:[#allocation3 + $0x98] sm:$0xff] %vm365_vm3, %v2967_v50  ;;  %v3161_v21 = vld [vmem:[#allocation3 + $0x78] sm:$0xff] }
 0x4a0   :  { %3104 = vst.msk [vmem:[#allocation3 + $0x98] sm:$0xff] %vm462_vm4, %v3063_v56  ;;  %3276 = vmatmul.f32.gmra.mxu1 %v3161_v21 }
 0x4a3   :  { %2886 = vrot.lane.b32.xlu0 %v9476_v49, %s7758_s25 }
 0x4a4   :  { %3078 = vrot.lane.b32.xlu2 %v9608_v48, %s7760_s20 }
 0x4a5   :  { %v2551_v11 = vpop.permute.xlu0 %2550  ;;  %v2971_v14 = vpop.permute.xlu1 %2970 }
 0x4a6   :  { %2592 = vst.msk [vmem:[#allocation3 + $0x90] sm:$0xff] %vm268_vm2, %v2551_v11  ;;  %v2747_v36 = vpop.permute.xlu2 %2746 }
 0x4a7   :  { %2688 = vst.msk [vmem:[#allocation3 + $0x90] sm:$0xff] %vm365_vm3, %v2647_v63  ;;  %v3165_v37 = vld [vmem:[#allocation3 + $0x98] sm:$0xff] }
 0x4a8   :  { %2784 = vst.msk [vmem:[#allocation3 + $0x90] sm:$0xff] %vm462_vm4, %v2743_v20  ;;  %3344 = vmatmul.f32.gmra.mxu3 %v3165_v37 }
 0x4a9   :  { %2786 = vst.msk [vmem:[#allocation3 + $0xc0] sm:$0xff] %vm462_vm4, %v2747_v36 }
 0x4ab   :  { %2566 = vrot.lane.b32.xlu0 %v9593_v38, %s7758_s25 }
 0x4ac   :  { %2758 = vrot.lane.b32.xlu2 %v9612_v41, %s7760_s20 }
 0x4ad   :  { %v2873_v49 = vpop.permute.xlu0 %2872  ;;  %v2973_v6 = vpop.permute.xlu1 %2972 }
 0x4ae   :  { %2913 = vst.msk [vmem:[#allocation3 + $0xb0] sm:$0xff] %vm268_vm2, %v2873_v49  ;;  %v3069_v9 = vpop.permute.xlu2 %3068 }
 0x4af   :  { %3009 = vst.msk [vmem:[#allocation3 + $0xb0] sm:$0xff] %vm365_vm3, %v9698_v2  ;;  %v3164_v48 = vld [vmem:[#allocation3 + $0x90] sm:$0xff] }
 0x4b0   :  { %3105 = vst.msk [vmem:[#allocation3 + $0xb0] sm:$0xff] %vm462_vm4, %v9688_v22  ;;  %3279 = vmatmul.f32.gmra.mxu1 %v3164_v48  ;;  %v3170_v16 = vld [vmem:[#allocation3 + $0xc0] sm:$0xff]  ;;  %v3193_v48 = vld [vmem:[#allocation3 + $0x178] sm:$0xff] }
 0x4b1   :  { %7400 = vmatmul.msk.f32.gmra.mxu2 %vm44_vm0, %v3193_v48 }
 0x4b3   :  { %2888 = vrot.lane.b32.xlu0 %v9480_v29, %s7758_s25 }
 0x4b4   :  { %2760 = vrot.lane.b32.xlu2 %v2936_v3, %s7760_s20 }
 0x4b5   :  { %v2553_v38 = vpop.permute.xlu0 %2552  ;;  %v2653_v2 = vpop.permute.xlu1 %2652 }
 0x4b6   :  { %2593 = vst.msk [vmem:[#allocation3 + $0xa8] sm:$0xff] %vm268_vm2, %v2553_v38  ;;  %v2749_v22 = vpop.permute.xlu2 %2748 }
 0x4b7   :  { %2689 = vst.msk [vmem:[#allocation3 + $0xa8] sm:$0xff] %vm365_vm3, %v2649_v18  ;;  %v3168_v41 = vld [vmem:[#allocation3 + $0xb0] sm:$0xff] }
 0x4b8   :  { %2785 = vst.msk [vmem:[#allocation3 + $0xa8] sm:$0xff] %vm462_vm4, %v2745_v27  ;;  %3347 = vmatmul.f32.gmra.mxu3 %v3168_v41 }
 0x4bb   :  { %2568 = vrot.lane.b32.xlu0 %v9600_v12, %s7758_s25 }
 0x4bd   :  { %v2875_v34 = vpop.permute.xlu0 %2874  ;;  %v2975_v5 = vpop.permute.xlu1 %2974 }
 0x4be   :  { %2914 = vst.msk [vmem:[#allocation3 + $0xc8] sm:$0xff] %vm268_vm2, %v2875_v34  ;;  %v3071_v1 = vpop.permute.xlu2 %3070 }
 0x4bf   :  { %3010 = vst.msk [vmem:[#allocation3 + $0xc8] sm:$0xff] %vm365_vm3, %v2971_v14  ;;  %v3167_v29 = vld [vmem:[#allocation3 + $0xa8] sm:$0xff] }
 0x4c0   :  { %3106 = vst.msk [vmem:[#allocation3 + $0xc8] sm:$0xff] %vm462_vm4, %v3067_v10  ;;  %3282 = vmatmul.f32.gmra.mxu1 %v3167_v29 }
 0x4c5   :  { %v2877_v13 = vpop.permute.xlu0 %2876  ;;  %v2655_v7 = vpop.permute.xlu1 %2654 }
 0x4c6   :  { %2915 = vst.msk [vmem:[#allocation3 + $0xe0] sm:$0xff] %vm268_vm2, %v2877_v13  ;;  %v2751_v42 = vpop.permute.xlu2 %2750 }
 0x4c7   :  { %3011 = vst.msk [vmem:[#allocation3 + $0xe0] sm:$0xff] %vm365_vm3, %v2973_v6  ;;  %v3171_v24 = vld [vmem:[#allocation3 + $0xc8] sm:$0xff]  ;;  %v4426_v6 = vld [vmem:[#allocation2 + $0x132] sm:$0xff] }
 0x4c8   :  { %3107 = vst.msk [vmem:[#allocation3 + $0xe0] sm:$0xff] %vm462_vm4, %v3069_v9  ;;  %3285 = vmatmul.f32.gmra.mxu1 %v3170_v16  ;;  %3350 = vmatmul.f32.gmra.mxu3 %v3171_v24 }
 0x4c9   :  { %4442 = vst.msk [vmem:[#allocation3 + $0x178] sm:$0xff] %vm44_vm0, %v4426_v6 }
 0x4cd   :  { %v2557_v12 = vpop.permute.xlu0 %2556  ;;  %v2977_v59 = vpop.permute.xlu1 %2976 }
 0x4ce   :  { %2595 = vst.msk [vmem:[#allocation3 + $0xd8] sm:$0xff] %vm268_vm2, %v2557_v12  ;;  %v3073_v4 = vpop.permute.xlu2 %3072  ;;  %v3262_v12 = vpop.f32.mrf.mxu1 }
 0x4cf   :  { %2691 = vst.msk [vmem:[#allocation3 + $0xd8] sm:$0xff] %vm365_vm3, %v2653_v2  ;;  %v3174_v8 = vld [vmem:[#allocation3 + $0xe0] sm:$0xff] }
 0x4d0   :  { %2787 = vst.msk [vmem:[#allocation3 + $0xd8] sm:$0xff] %vm462_vm4, %v2749_v22  ;;  %3353 = vmatmul.f32.gmra.mxu3 %v3174_v8  ;;  %v9972_v22 = vpop.f32.mrf.mxu2 }
 0x4d5   :  { %v2879_v35 = vpop.permute.xlu0 %2878  ;;  %v2657_v62 = vpop.permute.xlu1 %2656 }
 0x4d6   :  { %2916 = vst.msk [vmem:[#allocation3 + $0xf8] sm:$0xff] %vm268_vm2, %v2879_v35  ;;  %v2753_v55 = vpop.permute.xlu2 %2752 }
 0x4d7   :  { %3012 = vst.msk [vmem:[#allocation3 + $0xf8] sm:$0xff] %vm365_vm3, %v2975_v5  ;;  %v3173_v44 = vld [vmem:[#allocation3 + $0xd8] sm:$0xff] }
 0x4d8   :  { %3108 = vst.msk [vmem:[#allocation3 + $0xf8] sm:$0xff] %vm462_vm4, %v3071_v1  ;;  %3288 = vmatmul.f32.gmra.mxu1 %v3173_v44  ;;  %v3395_v5 = vpop.f32.mrf.mxu2 }
 0x4dd   :  { %v2559_v33 = vpop.permute.xlu0 %2558  ;;  %v2979_v17 = vpop.permute.xlu1 %2978 }
 0x4de   :  { %2596 = vst.msk [vmem:[#allocation3 + $0xf0] sm:$0xff] %vm268_vm2, %v2559_v33  ;;  %v3075_v56 = vpop.permute.xlu2 %3074  ;;  %v3265_v8 = vpop.f32.mrf.mxu1 }
 0x4df   :  { %2692 = vst.msk [vmem:[#allocation3 + $0xf0] sm:$0xff] %vm365_vm3, %v2655_v7  ;;  %v3177_v43 = vld [vmem:[#allocation3 + $0xf8] sm:$0xff] }
 0x4e0   :  { %2788 = vst.msk [vmem:[#allocation3 + $0xf0] sm:$0xff] %vm462_vm4, %v2751_v42  ;;  %3356 = vmatmul.f32.gmra.mxu3 %v3177_v43  ;;  %v3398_v7 = vpop.f32.mrf.mxu2  ;;  %v3327_v42 = vpop.f32.mrf.mxu3 }
 0x4e5   :  { %v2881_v58 = vpop.permute.xlu0 %2880  ;;  %v2659_v46 = vpop.permute.xlu1 %2658 }
 0x4e6   :  { %2917 = vst.msk [vmem:[#allocation3 + $0x110] sm:$0xff] %vm268_vm2, %v2881_v58  ;;  %v2755_v20 = vpop.permute.xlu2 %2754 }
 0x4e7   :  { %3013 = vst.msk [vmem:[#allocation3 + $0x110] sm:$0xff] %vm365_vm3, %v2977_v59  ;;  %v3176_v32 = vld [vmem:[#allocation3 + $0xf0] sm:$0xff] }
 0x4e8   :  { %3109 = vst.msk [vmem:[#allocation3 + $0x110] sm:$0xff] %vm462_vm4, %v3073_v4  ;;  %3291 = vmatmul.f32.gmra.mxu1 %v3176_v32  ;;  %v3330_v35 = vpop.f32.mrf.mxu3 }
 0x4ed   :  { %v2561_v52 = vpop.permute.xlu0 %2560  ;;  %v2981_v27 = vpop.permute.xlu1 %2980 }
 0x4ee   :  { %2597 = vst.msk [vmem:[#allocation3 + $0x108] sm:$0xff] %vm268_vm2, %v2561_v52  ;;  %v3077_v63 = vpop.permute.xlu2 %3076  ;;  %v3268_v44 = vpop.f32.mrf.mxu1 }
 0x4ef   :  { %2693 = vst.msk [vmem:[#allocation3 + $0x108] sm:$0xff] %vm365_vm3, %v2657_v62  ;;  %v3180_v26 = vld [vmem:[#allocation3 + $0x110] sm:$0xff] }
 0x4f0   :  { %2789 = vst.msk [vmem:[#allocation3 + $0x108] sm:$0xff] %vm462_vm4, %v2753_v55  ;;  %3359 = vmatmul.f32.gmra.mxu3 %v3180_v26  ;;  %v3333_v4 = vpop.f32.mrf.mxu3 }
 0x4f5   :  { %v2883_v3 = vpop.permute.xlu0 %2882  ;;  %v2661_v10 = vpop.permute.xlu1 %2660 }
 0x4f6   :  { %2918 = vst.msk [vmem:[#allocation3 + $0x128] sm:$0xff] %vm268_vm2, %v2883_v3  ;;  %v2757_v18 = vpop.permute.xlu2 %2756 }
 0x4f7   :  { %3014 = vst.msk [vmem:[#allocation3 + $0x128] sm:$0xff] %vm365_vm3, %v2979_v17  ;;  %v3179_v50 = vld [vmem:[#allocation3 + $0x108] sm:$0xff] }
 0x4f8   :  { %3110 = vst.msk [vmem:[#allocation3 + $0x128] sm:$0xff] %vm462_vm4, %v3075_v56  ;;  %3294 = vmatmul.f32.gmra.mxu1 %v3179_v50 }
 0x4fb   :  { %v3336_v43 = vpop.f32.mrf.mxu3 }
 0x4fd   :  { %v2563_v54 = vpop.permute.xlu0 %2562  ;;  %v2983_v36 = vpop.permute.xlu1 %2982 }
 0x4fe   :  { %2598 = vst.msk [vmem:[#allocation3 + $0x120] sm:$0xff] %vm268_vm2, %v2563_v54  ;;  %v3079_v14 = vpop.permute.xlu2 %3078  ;;  %v3271_v33 = vpop.f32.mrf.mxu1 }
 0x4ff   :  { %2694 = vst.msk [vmem:[#allocation3 + $0x120] sm:$0xff] %vm365_vm3, %v2659_v46  ;;  %v3183_v53 = vld [vmem:[#allocation3 + $0x128] sm:$0xff] }
 0x500   :  { %2790 = vst.msk [vmem:[#allocation3 + $0x120] sm:$0xff] %vm462_vm4, %v2755_v20  ;;  %3362 = vmatmul.f32.gmra.mxu3 %v3183_v53 }
 0x505   :  { %v2885_v60 = vpop.permute.xlu0 %2884  ;;  %v2663_v38 = vpop.permute.xlu1 %2662 }
 0x506   :  { %2919 = vst.msk [vmem:[#allocation3 + $0x140] sm:$0xff] %vm268_vm2, %v2885_v60  ;;  %v2759_v41 = vpop.permute.xlu2 %2758 }
 0x507   :  { %3015 = vst.msk [vmem:[#allocation3 + $0x140] sm:$0xff] %vm365_vm3, %v2981_v27  ;;  %v3182_v25 = vld [vmem:[#allocation3 + $0x120] sm:$0xff] }
 0x508   :  { %3111 = vst.msk [vmem:[#allocation3 + $0x140] sm:$0xff] %vm462_vm4, %v3077_v63  ;;  %3297 = vmatmul.f32.gmra.mxu1 %v3182_v25 }
 0x50b   :  { %v3339_v58 = vpop.f32.mrf.mxu3 }
 0x50d   :  { %v2565_v21 = vpop.permute.xlu0 %2564  ;;  %v2665_v13 = vpop.permute.xlu1 %2664 }
 0x50e   :  { %2599 = vst.msk [vmem:[#allocation3 + $0x138] sm:$0xff] %vm268_vm2, %v2565_v21  ;;  %v2761_v16 = vpop.permute.xlu2 %2760  ;;  %v3274_v55 = vpop.f32.mrf.mxu1  ;;  %v9995_v21 = vld [vmem:[%s12736_s8] ss:$0 sm:$0xff] }
 0x50f   :  { %2695 = vst.msk [vmem:[#allocation3 + $0x138] sm:$0xff] %vm365_vm3, %v2661_v10  ;;  %v3186_v11 = vld [vmem:[#allocation3 + $0x140] sm:$0xff]  ;;  %v3272_v6 = vadd.f32 %v9995_v21, %v3271_v33 }
 0x510   :  { %2791 = vst.msk [vmem:[#allocation3 + $0x138] sm:$0xff] %vm462_vm4, %v2757_v18  ;;  %3365 = vmatmul.f32.gmra.mxu3 %v3186_v11 }
 0x515   :  { %v2887_v37 = vpop.permute.xlu0 %2886 }
 0x516   :  { %2920 = vst.msk [vmem:[#allocation3 + $0x158] sm:$0xff] %vm268_vm2, %v2887_v37  ;;  %v3269_v37 = vadd.f32 %v9995_v21, %v3268_v44 }
 0x517   :  { %3016 = vst.msk [vmem:[#allocation3 + $0x158] sm:$0xff] %vm365_vm3, %v2983_v36  ;;  %v3185_v49 = vld [vmem:[#allocation3 + $0x138] sm:$0xff]  ;;  %v3266_v36 = vadd.f32 %v9995_v21, %v3265_v8 }
 0x518   :  { %3112 = vst.msk [vmem:[#allocation3 + $0x158] sm:$0xff] %vm462_vm4, %v3079_v14  ;;  %3300 = vmatmul.f32.gmra.mxu1 %v3185_v49  ;;  %v3263_v49 = vadd.f32 %v9995_v21, %v3262_v12 }
 0x519   :  { %v3331_v48 = vadd.f32 %v3330_v35, %v3266_v36 }
 0x51b   :  { %v3342_v56 = vpop.f32.mrf.mxu3 }
 0x51d   :  { %v2567_v9 = vpop.permute.xlu0 %2566  ;;  %v3277_v32 = vpop.f32.mrf.mxu1 }
 0x51e   :  { %2600 = vst.msk [vmem:[#allocation3 + $0x150] sm:$0xff] %vm268_vm2, %v2567_v9  ;;  %v3328_v9 = vadd.f32 %v3327_v42, %v3263_v49 }
 0x51f   :  { %2696 = vst.msk [vmem:[#allocation3 + $0x150] sm:$0xff] %vm365_vm3, %v2663_v38  ;;  %v3189_v2 = vld [vmem:[#allocation3 + $0x158] sm:$0xff] }
 0x520   :  { %2792 = vst.msk [vmem:[#allocation3 + $0x150] sm:$0xff] %vm462_vm4, %v2759_v41  ;;  %3368 = vmatmul.f32.gmra.mxu3 %v3189_v2  ;;  %v3334_v41 = vadd.f32 %v3333_v4, %v3269_v37  ;;  %v3275_v2 = vadd.f32 %v9995_v21, %v3274_v55 }
 0x522   :  { %v10013_v12 = vadd.f32 %v3398_v7, %v3334_v41 }
 0x525   :  { %v2889_v34 = vpop.permute.xlu0 %2888 }
 0x526   :  { %2921 = vst.msk [vmem:[#allocation3 + $0x170] sm:$0xff] %vm268_vm2, %v2889_v34  ;;  %v3278_v34 = vadd.f32 %v9995_v21, %v3277_v32 }
 0x527   :  { %3017 = vst.msk [vmem:[#allocation3 + $0x170] sm:$0xff] %vm365_vm3, %v9766_v30  ;;  %v3188_v29 = vld [vmem:[#allocation3 + $0x150] sm:$0xff] }
 0x528   :  { %3113 = vst.msk [vmem:[#allocation3 + $0x170] sm:$0xff] %vm462_vm4, %v9724_v15  ;;  %3303 = vmatmul.f32.gmra.mxu1 %v3188_v29  ;;  %v3401_v15 = vpop.f32.mrf.mxu2  ;;  %v3343_v8 = vadd.f32 %v3342_v56, %v3278_v34 }
 0x52b   :  { %v3345_v3 = vpop.f32.mrf.mxu3 }
 0x52d   :  { %v2569_v1 = vpop.permute.xlu0 %2568  ;;  %v3280_v52 = vpop.f32.mrf.mxu1 }
 0x52e   :  { %2601 = vst.msk [vmem:[#allocation3 + $0x168] sm:$0xff] %vm268_vm2, %v2569_v1  ;;  %v10007_v1 = vadd.f32 %v3395_v5, %v3331_v48 }
 0x52f   :  { %2697 = vst.msk [vmem:[#allocation3 + $0x168] sm:$0xff] %vm365_vm3, %v2665_v13  ;;  %v3192_v24 = vld [vmem:[#allocation3 + $0x170] sm:$0xff]  ;;  %v3337_v13 = vadd.f32 %v3336_v43, %v3272_v6  ;;  %v3482_v43 = vmul.f32 %v10013_v12, %v10013_v12 }
 0x530   :  { %2793 = vst.msk [vmem:[#allocation3 + $0x168] sm:$0xff] %vm462_vm4, %v2761_v16  ;;  %3371 = vmatmul.f32.gmra.mxu3 %v3192_v24  ;;  %v3404_v59 = vpop.f32.mrf.mxu2  ;;  %v10010_v16 = vadd.f32 %v9972_v22, %v3328_v9  ;;  %v3281_v24 = vadd.f32 %v9995_v21, %v3280_v52  ;;  %v3481_v44 = vmul.f32 %v10007_v1, %v10007_v1  ;;  %v3443_v7 = vsel %vm44_vm0, %v10007_v1, 0.0 }
 0x531   :  { %v10020_v4 = vadd.f32 %v3401_v15, %v3337_v13 }
 0x532   :  { %v3480_v5 = vmul.f32 %v10010_v16, %v10010_v16  ;;  %v3346_v22 = vadd.f32 %v3345_v3, %v3281_v24  ;;  %v3497_v3 = vsel %vm44_vm0, %v3481_v44, 0.0 }
 0x533   :  { %v3483_v36 = vmul.f32 %v10020_v4, %v10020_v4 }
 0x534   :  { %v3496_v37 = vsel %vm44_vm0, %v3480_v5, 0.0 }
 0x535   :  { %v3498_v41 = vadd.f32 %v3497_v3, %v3496_v37 }
 0x537   :  { %v3191_v30 = vld [vmem:[#allocation3 + $0x168] sm:$0xff] }
 0x538   :  { %3306 = vmatmul.f32.gmra.mxu1 %v3191_v30  ;;  %v3407_v62 = vpop.f32.mrf.mxu2  ;;  %v3340_v30 = vadd.f32 %v3339_v58, %v3275_v2  ;;  %v3442_v58 = vsel %vm44_vm0, %v10010_v16, 0.0 }
 0x539   :  { %v10032_v32 = vadd.f32 %v3407_v62, %v3343_v8  ;;  %v3444_v49 = vadd.f32 %v3443_v7, %v3442_v58 }
 0x53a   :  { %v10028_v55 = vadd.f32 %v3404_v59, %v3340_v30 }
 0x53b   :  { %v3348_v50 = vpop.f32.mrf.mxu3 }
 0x53c   :  { %v3484_v6 = vmul.f32 %v10028_v55, %v10028_v55 }
 0x53d   :  { %v3283_v46 = vpop.f32.mrf.mxu1 }
 0x53e   :  { %v3284_v35 = vadd.f32 %v9995_v21, %v3283_v46  ;;  %v3445_v46 = vsel %vm44_vm0, %v10013_v12, 0.0 }
 0x53f   :  { %v3446_v2 = vadd.f32 %v3445_v46, %v3444_v49 }
 0x540   :  { %v3410_v17 = vpop.f32.mrf.mxu2  ;;  %v3349_v15 = vadd.f32 %v3348_v50, %v3284_v35  ;;  %v3499_v50 = vsel %vm44_vm0, %v3482_v43, 0.0 }
 0x541   :  { %v10042_v48 = vadd.f32 %v3410_v17, %v3346_v22  ;;  %v3501_v17 = vsel %vm44_vm0, %v3483_v36, 0.0  ;;  %v3500_v8 = vadd.f32 %v3499_v50, %v3498_v41  ;;  %v3451_v22 = vsel %vm44_vm0, %v10032_v32, 0.0 }
 0x545   :  { %v3286_v54 = vpop.f32.mrf.mxu1 }
 0x546   :  { %v3287_v56 = vadd.f32 %v9995_v21, %v3286_v54  ;;  %v3447_v54 = vsel %vm44_vm0, %v10020_v4, 0.0 }
 0x547   :  { %v3448_v35 = vadd.f32 %v3447_v54, %v3446_v2 }
 0x548   :  { %v9982_v26 = vpop.f32.mrf.mxu2 }
 0x549   :  { %v10053_v34 = vadd.f32 %v9982_v26, %v3349_v15  ;;  %v3503_v26 = vsel %vm44_vm0, %v3484_v6, 0.0 }
 0x54b   :  { %v3351_v53 = vpop.f32.mrf.mxu3  ;;  %v3487_v15 = vmul.f32 %v10053_v34, %v10053_v34  ;;  %v3455_v49 = vsel %vm44_vm0, %v10053_v34, 0.0 }
 0x54c   :  { %v3352_v62 = vadd.f32 %v3351_v53, %v3287_v56  ;;  %v3449_v53 = vsel %vm44_vm0, %v10028_v55, 0.0 }
 0x54d   :  { %v3450_v43 = vadd.f32 %v3449_v53, %v3448_v35 }
 0x550   :  { %v9984_v20 = vpop.f32.mrf.mxu2 }
 0x551   :  { %v10062_v44 = vadd.f32 %v9984_v20, %v3352_v62  ;;  %v3453_v20 = vsel %vm44_vm0, %v10042_v48, 0.0 }
 0x553   :  { %v3354_v60 = vpop.f32.mrf.mxu3  ;;  %v3488_v37 = vmul.f32 %v10062_v44, %v10062_v44  ;;  %v3457_v6 = vsel %vm44_vm0, %v10062_v44, 0.0 }
 0x555   :  { %v3289_v63 = vpop.f32.mrf.mxu1 }
 0x556   :  { %v3290_v59 = vadd.f32 %v9995_v21, %v3289_v63  ;;  %v3485_v63 = vmul.f32 %v10032_v32, %v10032_v32 }
 0x558   :  { %v9986_v27 = vpop.f32.mrf.mxu2  ;;  %v3355_v13 = vadd.f32 %v3354_v60, %v3290_v59  ;;  %v3505_v58 = vsel %vm44_vm0, %v3485_v63, 0.0 }
 0x55a   :  { %v10075_v3 = vadd.f32 %v9986_v27, %v3355_v13 }
 0x55c   :  { %v3459_v53 = vsel %vm44_vm0, %v10075_v3, 0.0 }
 0x560   :  { %v9988_v25 = vpop.f32.mrf.mxu2 }
 0x563   :  { %v9990_v18 = vpop.f32.mrf.mxu3 }
 0x565   :  { %v3292_v10 = vpop.f32.mrf.mxu1 }
 0x566   :  { %v3293_v9 = vadd.f32 %v9995_v21, %v3292_v10  ;;  %v3486_v10 = vmul.f32 %v10042_v48, %v10042_v48 }
 0x568   :  { %v9998_v14 = vpop.f32.mrf.mxu2  ;;  %v3358_v7 = vadd.f32 %v9990_v18, %v3293_v9  ;;  %v3507_v59 = vsel %vm44_vm0, %v3486_v10, 0.0  ;;  %v3489_v9 = vmul.f32 %v10075_v3, %v10075_v3 }
 0x56a   :  { %v10085_v62 = vadd.f32 %v9988_v25, %v3358_v7 }
 0x56c   :  { %v3490_v13 = vmul.f32 %v10085_v62, %v10085_v62 }
 0x570   :  { %v10015_v42 = vpop.f32.mrf.mxu2 }
 0x573   :  { %v10003_v38 = vpop.f32.mrf.mxu3 }
 0x575   :  { %v3295_v11 = vpop.f32.mrf.mxu1 }
 0x576   :  { %v3296_v24 = vadd.f32 %v9995_v21, %v3295_v11  ;;  %v3502_v11 = vadd.f32 %v3501_v17, %v3500_v8 }
 0x578   :  { %v3431_v30 = vpop.f32.mrf.mxu2  ;;  %v3361_v46 = vadd.f32 %v10003_v38, %v3296_v24  ;;  %v3504_v36 = vadd.f32 %v3503_v26, %v3502_v11  ;;  %v3461_v26 = vsel %vm44_vm0, %v10085_v62, 0.0 }
 0x57a   :  { %v3506_v54 = vadd.f32 %v3505_v58, %v3504_v36  ;;  %v10094_v41 = vadd.f32 %v9998_v14, %v3361_v46 }
 0x57c   :  { %v3508_v63 = vadd.f32 %v3507_v59, %v3506_v54 }
 0x580   :  { %v3434_v35 = vpop.f32.mrf.mxu2 }
 0x583   :  { %v3363_v33 = vpop.f32.mrf.mxu3 }
 0x585   :  { %v3298_v29 = vpop.f32.mrf.mxu1 }
 0x586   :  { %v3299_v60 = vadd.f32 %v9995_v21, %v3298_v29  ;;  %v3452_v29 = vadd.f32 %v3451_v22, %v3450_v43  ;;  %v3491_v22 = vmul.f32 %v10094_v41, %v10094_v41  ;;  %v3515_v43 = vsel %vm44_vm0, %v3490_v13, 0.0 }
 0x588   :  { %v3364_v50 = vadd.f32 %v3363_v33, %v3299_v60  ;;  %v3454_v38 = vadd.f32 %v3453_v20, %v3452_v29  ;;  %v3511_v33 = vsel %vm44_vm0, %v3488_v37, 0.0  ;;  %v3517_v46 = vsel %vm44_vm0, %v3491_v22, 0.0 }
 0x58a   :  { %v3456_v25 = vadd.f32 %v3455_v49, %v3454_v38  ;;  %v10102_v24 = vadd.f32 %v10015_v42, %v3364_v50  ;;  %v3463_v42 = vsel %vm44_vm0, %v10094_v41, 0.0 }
 0x58c   :  { %v3458_v10 = vadd.f32 %v3457_v6, %v3456_v25  ;;  %v3492_v58 = vmul.f32 %v10102_v24, %v10102_v24  ;;  %v3437_v6 = vpop.f32.mrf.mxu2 }
 0x58e   :  { %v3460_v11 = vadd.f32 %v3459_v53, %v3458_v10  ;;  %v3519_v37 = vsel %vm44_vm0, %v3492_v58, 0.0 }
 0x590   :  { %v3462_v20 = vadd.f32 %v3461_v26, %v3460_v11 }
 0x592   :  { %v3464_v29 = vadd.f32 %v3463_v42, %v3462_v20 }
 0x593   :  { %v3366_v5 = vpop.f32.mrf.mxu3 }
 0x595   :  { %v3301_v52 = vpop.f32.mrf.mxu1 }
 0x596   :  { %v3302_v18 = vadd.f32 %v9995_v21, %v3301_v52  ;;  %v3509_v52 = vsel %vm44_vm0, %v3487_v15, 0.0 }
 0x597   :  { %v3510_v14 = vadd.f32 %v3509_v52, %v3508_v63 }
 0x598   :  { %v3367_v2 = vadd.f32 %v3366_v5, %v3302_v18  ;;  %v3513_v5 = vsel %vm44_vm0, %v3489_v9, 0.0 }
 0x599   :  { %v3512_v60 = vadd.f32 %v3511_v33, %v3510_v14 }
 0x59a   :  { %v10109_v7 = vadd.f32 %v3431_v30, %v3367_v2  ;;  %v3465_v30 = vsel %vm44_vm0, %v10102_v24, 0.0 }
 0x59b   :  { %v3466_v38 = vadd.f32 %v3465_v30, %v3464_v29 }
 0x59c   :  { %v3493_v18 = vmul.f32 %v10109_v7, %v10109_v7  ;;  %v3467_v49 = vsel %vm44_vm0, %v10109_v7, 0.0 }
 0x59d   :  { %v3468_v33 = vadd.f32 %v3467_v49, %v3466_v38 }
 0x59e   :  { %v3521_v9 = vsel %vm44_vm0, %v3493_v18, 0.0 }
 0x5a3   :  { %v3369_v17 = vpop.f32.mrf.mxu3 }
 0x5a5   :  { %v3304_v56 = vpop.f32.mrf.mxu1 }
 0x5a6   :  { %v3305_v27 = vadd.f32 %v9995_v21, %v3304_v56  ;;  %v3514_v56 = vadd.f32 %v3513_v5, %v3512_v60 }
 0x5a8   :  { %v3370_v8 = vadd.f32 %v3369_v17, %v3305_v27  ;;  %v3516_v36 = vadd.f32 %v3515_v43, %v3514_v56 }
 0x5aa   :  { %v10116_v15 = vadd.f32 %v3434_v35, %v3370_v8  ;;  %v3518_v54 = vadd.f32 %v3517_v46, %v3516_v36 }
 0x5ac   :  { %v3494_v50 = vmul.f32 %v10116_v15, %v10116_v15  ;;  %v3469_v63 = vsel %vm44_vm0, %v10116_v15, 0.0  ;;  %v3520_v25 = vadd.f32 %v3519_v37, %v3518_v54 }
 0x5ad   :  { %v3470_v13 = vadd.f32 %v3469_v63, %v3468_v33 }
 0x5ae   :  { %v3523_v53 = vsel %vm44_vm0, %v3494_v50, 0.0  ;;  %v3522_v8 = vadd.f32 %v3521_v9, %v3520_v25  ;;  %v3440_v9 = vld [vmem:[%s12737_s9] sm:$0x1] }
 0x5b0   :  { %v3524_v14 = vadd.f32 %v3523_v53, %v3522_v8  ;;  %v3441_v53 = vld [vmem:[%s12738_s10] sm:$0x1] }
 0x5b3   :  { %v3372_v52 = vpop.f32.mrf.mxu3 }
 0x5b5   :  { %v3307_v59 = vpop.f32.mrf.mxu1 }
 0x5b6   :  { %v3308_v27 = vadd.f32 %v9995_v21, %v3307_v59 }
 0x5b8   :  { %v3373_v2 = vadd.f32 %v3372_v52, %v3308_v27 }
 0x5ba   :  { %v10132_v17 = vadd.f32 %v3437_v6, %v3373_v2 }
 0x5bc   :  { %v3471_v21 = vsel %vm44_vm0, %v10132_v17, 0.0  ;;  %v3495_v35 = vmul.f32 %v10132_v17, %v10132_v17 }
 0x5bd   :  { %v3472_v10 = vadd.f32 %v3471_v21, %v3470_v13 }
 0x5be   :  { %v3525_v5 = vsel %vm44_vm0, %v3495_v35, 0.0 }
 0x5bf   :  { %v3473_v26 = vrot.slane %v3472_v10, 4  ;;  %v3526_v22 = vadd.f32 %v3525_v5, %v3524_v14  ;;  %v3899_v5 = vld [vmem:[#allocation2 + $0x2] sm:$0xff] }
 0x5c0   :  { %3931 = vrot.lane.b32.xlu1 %v3899_v5, %s7759_s26 }
 0x5c1   :  { %v3474_v60 = vadd.f32 %v3473_v26, %v3472_v10  ;;  %v3527_v11 = vrot.slane %v3526_v22, 4 }
 0x5c3   :  { %v3475_v43 = vrot.slane %v3474_v60, 2  ;;  %v3528_v42 = vadd.f32 %v3527_v11, %v3526_v22 }
 0x5c5   :  { %v3476_v58 = vadd.f32 %v3475_v43, %v3474_v60  ;;  %v3529_v56 = vrot.slane %v3528_v42, 2 }
 0x5c7   :  { %v3477_v20 = vrot.slane %v3476_v58, 1  ;;  %v3530_v46 = vadd.f32 %v3529_v56, %v3528_v42 }
 0x5c9   :  { %v3478_v30 = vadd.f32 %v3477_v20, %v3476_v58  ;;  %v3531_v18 = vrot.slane %v3530_v46, 1 }
 0x5cb   :  { %v3479_v36 = vmul.f32 0.0078125, %v3478_v30  ;;  %v3532_v29 = vadd.f32 %v3531_v18, %v3530_v46 }
 0x5cd   :  { %v3533_v59 = vmul.f32 0.0078125, %v3532_v29  ;;  %v3534_v37 = vmul.f32 %v3479_v36, %v3479_v36 }
 0x5cf   :  { %v3535_v49 = vsub.f32 %v3533_v59, %v3534_v37 }
 0x5d1   :  { %v3536_v50 = vadd.f32 1e-05, %v3535_v49 }
 0x5d3   :  { %7655 = vrsqrt.f32 %v3536_v50  ;;  %vm3543_vm13 = vweird.f32 %v3536_v50 }
 0x5d9   :  { %v7656_v27 = vpop.eup %7655 }
 0x5da   :  { %v3538_v54 = vmul.f32 %v7656_v27, %v3536_v50  ;;  %vm3544_vm12 = vweird.f32 %v7656_v27 }
 0x5db   :  { %vm3545_vm14 = vmor %vm3543_vm13, %vm3544_vm12 }
 0x5dc   :  { %v3539_v38 = vmul.f32 %v7656_v27, %v3538_v54 }
 0x5de   :  { %v3540_v52 = vmul.f32 0.5, %v3539_v38 }
 0x5e0   :  { %v3541_v6 = vsub.f32 1.5, %v3540_v52 }
 0x5e2   :  { %v3542_v2 = vmul.f32 %v7656_v27, %v3541_v6 }
 0x5e4   :  { %v3546_v63 = vsel %vm3545_vm14, %v7656_v27, %v3542_v2  ;;  %v3803_v27 = vld [vmem:[#allocation2 + $0x1] sm:$0xff] }
 0x5e5   :  { %v3547_v25 = vmul.f32 %v3546_v63, %v3440_v9  ;;  %3835 = vrot.lane.b32.xlu0 %v3803_v27, %s7758_s25 }
 0x5e7   :  { %v3548_v33 = vmul.f32 %v3547_v25, %v3479_v36  ;;  %v3551_v8 = vperm.slane %v3547_v25, 0 }
 0x5e9   :  { %v3549_v13 = vsub.f32 %v3441_v53, %v3548_v33  ;;  %v3553_v35 = vmul.f32 %v3551_v8, %v10010_v16  ;;  %v3554_v10 = vmul.f32 %v3551_v8, %v10007_v1  ;;  %v3555_v14 = vmul.f32 %v3551_v8, %v10013_v12 }
 0x5ea   :  { %v3556_v26 = vmul.f32 %v3551_v8, %v10020_v4  ;;  %v3557_v22 = vmul.f32 %v3551_v8, %v10028_v55  ;;  %v3558_v42 = vmul.f32 %v3551_v8, %v10032_v32  ;;  %v3559_v58 = vmul.f32 %v3551_v8, %v10042_v48 }
 0x5eb   :  { %v3570_v21 = vperm.slane %v3549_v13, 0  ;;  %v3560_v16 = vmul.f32 %v3551_v8, %v10053_v34  ;;  %v3561_v1 = vmul.f32 %v3551_v8, %v10062_v44  ;;  %v3562_v12 = vmul.f32 %v3551_v8, %v10075_v3 }
 0x5ec   :  { %v3563_v4 = vmul.f32 %v3551_v8, %v10085_v62  ;;  %v3564_v46 = vmul.f32 %v3551_v8, %v10094_v41  ;;  %v3565_v55 = vmul.f32 %v3551_v8, %v10102_v24  ;;  %v12767_v32 = vmax.f32 %v8483_v57, 0.0 }
 0x5ed   :  { %v3572_v60 = vadd.f32 %v3570_v21, %v3553_v35  ;;  %v3573_v11 = vadd.f32 %v3570_v21, %v3554_v10  ;;  %v3574_v43 = vadd.f32 %v3570_v21, %v3555_v14  ;;  %v3575_v56 = vadd.f32 %v3570_v21, %v3556_v26 }
 0x5ee   :  { %v3576_v20 = vadd.f32 %v3570_v21, %v3557_v22  ;;  %v3577_v30 = vadd.f32 %v3570_v21, %v3558_v42  ;;  %v3578_v18 = vadd.f32 %v3570_v21, %v3559_v58  ;;  %v12768_v48 = vmax.f32 %v8511_v28, 0.0 }
 0x5ef   :  { %v10162_v36 = vadd.f32 %v3572_v60, %v12767_v32  ;;  %v12769_v44 = vmax.f32 %v8531_v39, 0.0  ;;  %v3566_v62 = vmul.f32 %v3551_v8, %v10109_v7  ;;  %v3567_v41 = vmul.f32 %v3551_v8, %v10116_v15  ;;  %v4226_v39 = vld [vmem:[#allocation2 + $0x90] sm:$0xff]  ;;  %v12779_v60 = vld [vmem:[#allocation4_spill] sm:$0xff] }
 0x5f0   :  { %v10166_v34 = vadd.f32 %v3573_v11, %v12768_v48  ;;  %v3579_v29 = vadd.f32 %v3570_v21, %v3560_v16  ;;  %v12770_v24 = vmax.f32 %v8551_v61, 0.0  ;;  %v3568_v57 = vmul.f32 %v3551_v8, %v10132_v17  ;;  %4265 = vrot.lane.b32.xlu1 %v4226_v39, %s7759_s26 }
 0x5f1   :  { %v10170_v3 = vadd.f32 %v3574_v43, %v12769_v44  ;;  %v3580_v37 = vadd.f32 %v3570_v21, %v3561_v1  ;;  %v3581_v49 = vadd.f32 %v3570_v21, %v3562_v12  ;;  %v12771_v28 = vmax.f32 %v8592_v19, 0.0  ;;  %v12781_v43 = vld [vmem:[#allocation5_spill] sm:$0xff]  ;;  %v4322_v1 = vld [vmem:[#allocation2 + $0x91] sm:$0xff] }
 0x5f2   :  { %v10176_v59 = vadd.f32 %v3575_v56, %v12770_v24  ;;  %v3582_v54 = vadd.f32 %v3570_v21, %v3563_v4  ;;  %v3583_v38 = vadd.f32 %v3570_v21, %v3564_v46  ;;  %v12772_v7 = vmax.f32 %v8638_v51, 0.0  ;;  %v3907_v12 = vld [vmem:[#allocation2 + $0xa2] sm:$0xff]  ;;  %v12785_v4 = vld [vmem:[#allocation7_spill] sm:$0xff]  ;;  %4361 = vrot.lane.b32.xlu2 %v4322_v1, %s7760_s20 }
 0x5f3   :  { %v10181_v50 = vadd.f32 %v3576_v20, %v12771_v28  ;;  %v12773_v61 = vmax.f32 %v8672_v23, 0.0  ;;  %v3620_v19 = vmul.f32 1.442695, %v10162_v36  ;;  %v3622_v52 = vmul.f32 1.442695, %v10166_v34  ;;  %v3811_v20 = vld [vmem:[#allocation2 + $0xa1] sm:$0xff] }
 0x5f4   :  { %v10185_v15 = vadd.f32 %v3577_v30, %v12772_v7  ;;  %v3624_v6 = vmul.f32 1.442695, %v10170_v3  ;;  %v3584_v9 = vadd.f32 %v3570_v21, %v3565_v55  ;;  %v3585_v2 = vadd.f32 %v3570_v21, %v3566_v62  ;;  %3851 = vrot.lane.b32.xlu0 %v3811_v20, %s7758_s25 }
 0x5f5   :  { %v10191_v17 = vadd.f32 %v3578_v18, %v12773_v61  ;;  %v12774_v51 = vmax.f32 %v8715_v47, 0.0  ;;  %v3626_v25 = vmul.f32 1.442695, %v10176_v59  ;;  %v3586_v33 = vadd.f32 %v3570_v21, %v3567_v41 }
 0x5f6   :  { %v12775_v53 = vmax.f32 %v8738_v0, 0.0  ;;  %7657 = vpow2.f32 %v3620_v19  ;;  %v3628_v13 = vmul.f32 1.442695, %v10181_v50  ;;  %v3587_v8 = vadd.f32 %v3570_v21, %v3568_v57 }
 0x5f7   :  { %v10198_v63 = vadd.f32 %v3579_v29, %v12774_v51  ;;  %v12776_v35 = vmax.f32 %v8758_v45, 0.0  ;;  %7659 = vpow2.f32 %v3622_v52  ;;  %v3630_v47 = vmul.f32 1.442695, %v10185_v15 }
 0x5f8   :  { %v10203_v23 = vadd.f32 %v3580_v37, %v12775_v53  ;;  %v12777_v14 = vmax.f32 %v8776_v40, 0.0  ;;  %7661 = vpow2.f32 %v3624_v6  ;;  %v3632_v0 = vmul.f32 1.442695, %v10191_v17  ;;  %v12783_v40 = vld [vmem:[#allocation6_spill] sm:$0xff]  ;;  %3947 = vrot.lane.b32.xlu1 %v3907_v12, %s7759_s26 }
 0x5f9   :  { %v10208_v10 = vadd.f32 %v3581_v49, %v12776_v35  ;;  %v12778_v26 = vmax.f32 %v8795_v31, 0.0  ;;  %v12780_v21 = vmax.f32 %v12779_v60, 0.0  ;;  %7663 = vpow2.f32 %v3626_v25 }
 0x5fa   :  { %v10213_v5 = vadd.f32 %v3582_v54, %v12777_v14  ;;  %v3634_v45 = vmul.f32 1.442695, %v10198_v63  ;;  %v12782_v42 = vmax.f32 %v12781_v43, 0.0  ;;  %v12784_v56 = vmax.f32 %v12783_v40, 0.0 }
 0x5fb   :  { %v10218_v22 = vadd.f32 %v3583_v38, %v12778_v26  ;;  %v10222_v11 = vadd.f32 %v3584_v9, %v12780_v21  ;;  %7665 = vpow2.f32 %v3628_v13  ;;  %v3636_v31 = vmul.f32 1.442695, %v10203_v23 }
 0x5fc   :  { %v10227_v58 = vadd.f32 %v3585_v2, %v12782_v42  ;;  %v10231_v16 = vadd.f32 %v3586_v33, %v12784_v56  ;;  %v12786_v46 = vmax.f32 %v12785_v4, 0.0  ;;  %vm3604_vm15 = vcmp.gt.f32.partialorder %v10162_v36, 0.0  ;;  %v7658_v18 = vpop.eup %7657 }
 0x5fd   :  { %7667 = vpow2.f32 %v3630_v47  ;;  %v3638_v30 = vmul.f32 1.442695, %v10208_v10  ;;  %vm3605_vm1 = vcmp.gt.f32.partialorder %v10166_v34, 0.0  ;;  %vm3606_vm5 = vcmp.gt.f32.partialorder %v10170_v3, 0.0  ;;  %v7660_v48 = vpop.eup %7659 }
 0x5fe   :  { %v10236_v55 = vadd.f32 %v3587_v8, %v12786_v46  ;;  %7669 = vpow2.f32 %v3632_v0  ;;  %v3640_v32 = vmul.f32 1.442695, %v10213_v5  ;;  %vm3607_vm6 = vcmp.gt.f32.partialorder %v10176_v59, 0.0  ;;  %v7662_v41 = vpop.eup %7661 }
 0x5ff   :  { %7671 = vpow2.f32 %v3634_v45  ;;  %v3642_v44 = vmul.f32 1.442695, %v10218_v22  ;;  %v7401_v62 = vadd.f32 -1.0, %v7658_v18  ;;  %vm3608_vm7 = vcmp.gt.f32.partialorder %v10181_v50, 0.0  ;;  %v7664_v57 = vpop.eup %7663 }
 0x600   :  { %7673 = vpow2.f32 %v3636_v31  ;;  %v3644_v29 = vmul.f32 1.442695, %v10222_v11  ;;  %v7402_v24 = vadd.f32 -1.0, %v7660_v48  ;;  %v3646_v37 = vmul.f32 1.442695, %v10227_v58 }
 0x601   :  { %7675 = vpow2.f32 %v3638_v30  ;;  %v7403_v49 = vadd.f32 -1.0, %v7662_v41  ;;  %v3668_v28 = vmul.f32 1.6732632, %v7401_v62  ;;  %v7666_v39 = vpop.eup %7665  ;;  %vm3609_vm8 = vcmp.gt.f32.partialorder %v10185_v15, 0.0 }
 0x602   :  { %7677 = vpow2.f32 %v3640_v32  ;;  %v3648_v27 = vmul.f32 1.442695, %v10231_v16  ;;  %v7404_v54 = vadd.f32 -1.0, %v7664_v57  ;;  %v3669_v38 = vmul.f32 1.6732632, %v7402_v24 }
 0x603   :  { %v7668_v7 = vpop.eup %7667  ;;  %vm3610_vm9 = vcmp.gt.f32.partialorder %v10191_v17, 0.0  ;;  %7679 = vpow2.f32 %v3642_v44  ;;  %v3650_v61 = vmul.f32 1.442695, %v10236_v55  ;;  %v7405_v19 = vadd.f32 -1.0, %v7666_v39 }
 0x604   :  { %v3670_v52 = vmul.f32 1.6732632, %v7403_v49  ;;  %v7670_v6 = vpop.eup %7669  ;;  %vm3611_vm10 = vcmp.gt.f32.partialorder %v10198_v63, 0.0  ;;  %7681 = vpow2.f32 %v3644_v29  ;;  %v7406_v9 = vadd.f32 -1.0, %v7668_v7 }
 0x605   :  { %v3671_v2 = vmul.f32 1.6732632, %v7404_v54  ;;  %v7672_v51 = vpop.eup %7671  ;;  %7683 = vpow2.f32 %v3646_v37  ;;  %v7407_v25 = vadd.f32 -1.0, %v7670_v6  ;;  %v3672_v33 = vmul.f32 1.6732632, %v7405_v19 }
 0x606   :  { %v3684_v53 = vsel %vm3604_vm15, %v10162_v36, %v3668_v28  ;;  %v7674_v13 = vpop.eup %7673  ;;  %vm3612_vm11 = vcmp.gt.f32.partialorder %v10203_v23, 0.0  ;;  %7685 = vpow2.f32 %v3648_v27  ;;  %v7408_v8 = vadd.f32 -1.0, %v7672_v51 }
 0x607   :  { %v3685_v35 = vsel %vm3605_vm1, %v10166_v34, %v3669_v38  ;;  %v7676_v47 = vpop.eup %7675  ;;  %7687 = vpow2.f32 %v3650_v61  ;;  %v7409_v14 = vadd.f32 -1.0, %v7674_v13  ;;  %v3673_v0 = vmul.f32 1.6732632, %v7406_v9 }
 0x608   :  { %v3686_v26 = vsel %vm3606_vm5, %v10170_v3, %v3670_v52  ;;  %v7678_v60 = vpop.eup %7677  ;;  %v7410_v21 = vadd.f32 -1.0, %v7676_v47  ;;  %v3674_v36 = vmul.f32 1.6732632, %v7407_v25  ;;  %v3687_v45 = vsel %vm3607_vm6, %v10176_v59, %v3671_v2 }
 0x609   :  { %v10269_v43 = vmul.f32 1.050701, %v3684_v53  ;;  %v7680_v42 = vpop.eup %7679  ;;  %v7411_v40 = vadd.f32 -1.0, %v7678_v60  ;;  %v3675_v34 = vmul.f32 1.6732632, %v7408_v8  ;;  %v3688_v56 = vsel %vm3608_vm7, %v10181_v50, %v3672_v33 }
 0x60a   :  { %v10274_v31 = vmul.f32 1.050701, %v3685_v35  ;;  %v7682_v1 = vpop.eup %7681  ;;  %v7412_v3 = vadd.f32 -1.0, %v7680_v42  ;;  %v3676_v12 = vmul.f32 1.6732632, %v7409_v14  ;;  %v3689_v30 = vsel %vm3609_vm8, %v10185_v15, %v3673_v0 }
 0x60b   :  { %v10276_v20 = vmul.f32 1.050701, %v3686_v26  ;;  %3716 = vst.msk [vmem:[#allocation2 + $0x11] sm:$0xff] %vm44_vm0, %v10269_v43  ;;  %v7684_v59 = vpop.eup %7683  ;;  %v7413_v4 = vadd.f32 -1.0, %v7682_v1  ;;  %v3677_v46 = vmul.f32 1.6732632, %v7410_v21  ;;  %v3690_v44 = vsel %vm3610_vm9, %v10191_v17, %v3674_v36 }
 0x60c   :  { %v10283_v18 = vmul.f32 1.050701, %v3687_v45  ;;  %3717 = vst.msk [vmem:[#allocation2 + $0x21] sm:$0xff] %vm44_vm0, %v10274_v31  ;;  %v7686_v50 = vpop.eup %7685  ;;  %v7414_v32 = vadd.f32 -1.0, %v7684_v59  ;;  %v3678_v48 = vmul.f32 1.6732632, %v7411_v40  ;;  %v3691_v24 = vsel %vm3611_vm10, %v10198_v63, %v3675_v34 }
 0x60d   :  { %v10290_v62 = vmul.f32 1.050701, %v3688_v56  ;;  %3718 = vst.msk [vmem:[#allocation2 + $0x31] sm:$0xff] %vm44_vm0, %v10276_v20  ;;  %v7688_v41 = vpop.eup %7687  ;;  %vm3613_vm12 = vcmp.gt.f32.partialorder %v10208_v10, 0.0  ;;  %v7415_v15 = vadd.f32 -1.0, %v7686_v50  ;;  %v3692_v17 = vsel %vm3612_vm11, %v10203_v23, %v3676_v12 }
 0x60e   :  { %v3679_v29 = vmul.f32 1.6732632, %v7412_v3  ;;  %3719 = vst.msk [vmem:[#allocation2 + $0x41] sm:$0xff] %vm44_vm0, %v10283_v18  ;;  %v7416_v57 = vadd.f32 -1.0, %v7688_v41  ;;  %v3680_v37 = vmul.f32 1.6732632, %v7413_v4  ;;  %v3693_v39 = vsel %vm3613_vm12, %v10208_v10, %v3677_v46 }
 0x60f   :  { %v10303_v49 = vmul.f32 1.050701, %v3689_v30  ;;  %3720 = vst.msk [vmem:[#allocation2 + $0x51] sm:$0xff] %vm44_vm0, %v10290_v62  ;;  %vm3614_vm13 = vcmp.gt.f32.partialorder %v10213_v5, 0.0  ;;  %v3681_v28 = vmul.f32 1.6732632, %v7414_v32 }
 0x610   :  { %v10309_v63 = vmul.f32 1.050701, %v3690_v44  ;;  %vm3615_vm14 = vcmp.gt.f32.partialorder %v10218_v22, 0.0  ;;  %v3682_v27 = vmul.f32 1.6732632, %v7415_v15  ;;  %v3694_v54 = vsel %vm3614_vm13, %v10213_v5, %v3678_v48 }
 0x611   :  { %v10313_v38 = vmul.f32 1.050701, %v3691_v24  ;;  %vm3616_vm15 = vcmp.gt.f32.partialorder %v10222_v11, 0.0  ;;  %v3683_v23 = vmul.f32 1.6732632, %v7416_v57  ;;  %v3695_v7 = vsel %vm3615_vm14, %v10218_v22, %v3679_v29  ;;  %3721 = vst.msk [vmem:[#allocation2 + $0x61] sm:$0xff] %vm44_vm0, %v10303_v49 }
 0x612   :  { %v10317_v61 = vmul.f32 1.050701, %v3692_v17  ;;  %vm3617_vm1 = vcmp.gt.f32.partialorder %v10227_v58, 0.0  ;;  %v3696_v10 = vsel %vm3616_vm15, %v10222_v11, %v3680_v37  ;;  %v10321_v19 = vmul.f32 1.050701, %v3693_v39  ;;  %3722 = vst.msk [vmem:[#allocation2 + $0x71] sm:$0xff] %vm44_vm0, %v10309_v63 }
 0x613   :  { %vm3618_vm5 = vcmp.gt.f32.partialorder %v10231_v16, 0.0  ;;  %v3697_v5 = vsel %vm3617_vm1, %v10227_v58, %v3681_v28  ;;  %v10327_v52 = vmul.f32 1.050701, %v3694_v54  ;;  %vm3619_vm6 = vcmp.gt.f32.partialorder %v10236_v55, 0.0  ;;  %3723 = vst.msk [vmem:[#allocation2 + $0x81] sm:$0xff] %vm44_vm0, %v10313_v38  ;;  %v10362_v51 = vld [vmem:[#allocation2 + $0x21] sm:$0xff] }
 0x614   :  { %v3698_v22 = vsel %vm3618_vm5, %v10231_v16, %v3682_v27  ;;  %v10333_v6 = vmul.f32 1.050701, %v3695_v7  ;;  %v3699_v11 = vsel %vm3619_vm6, %v10236_v55, %v3683_v23  ;;  %v10338_v9 = vmul.f32 1.050701, %v3696_v10  ;;  %3724 = vst.msk [vmem:[#allocation2 + $0xb1] sm:$0xff] %vm44_vm0, %v10317_v61  ;;  %v10358_v55 = vld [vmem:[#allocation2 + $0x11] sm:$0xff] }
 0x615   :  { %v10342_v58 = vmul.f32 1.050701, %v3697_v5  ;;  %3725 = vst.msk [vmem:[#allocation2 + $0xc1] sm:$0xff] %vm44_vm0, %v10321_v19  ;;  %v10346_v2 = vmul.f32 1.050701, %v3698_v22  ;;  %v10366_v25 = vld [vmem:[#allocation2 + $0x22] sm:$0xff] }
 0x616   :  { %3726 = vst.msk [vmem:[#allocation2 + $0xd1] sm:$0xff] %vm44_vm0, %v10327_v52  ;;  %v10350_v16 = vmul.f32 1.050701, %v3699_v11  ;;  %v3995_v33 = vld [vmem:[#allocation2 + $0x10] sm:$0xff]  ;;  %v10379_v8 = vld [vmem:[#allocation2 + $0x20] sm:$0xff]  ;;  %v7432_v11 = vld [vmem:[%s12731_s3 + $0x198] sm:$0xff] }
 0x617   :  { %3727 = vst.msk [vmem:[#allocation2 + $0xe1] sm:$0xff] %vm44_vm0, %v10333_v6  ;;  %v10370_v53 = vld [vmem:[#allocation2 + $0x32] sm:$0xff]  ;;  %v10381_v35 = vld [vmem:[#allocation2 + $0x42] sm:$0xff]  ;;  %4542 = vmatpush.msra.mxu0 %v7432_v11  ;;  %7595 = vmatpush.msrb.mxu3 %v7432_v11 }
 0x618   :  { %12787 = vst [vmem:[#allocation4_spill] sm:$0xff] %v10350_v16  ;;  %v10374_v13 = vld [vmem:[#allocation2 + $0x31] sm:$0xff]  ;;  %v10405_v21 = vld [vmem:[#allocation2 + $0x41] sm:$0xff] }
 0x619   :  { %3728 = vst.msk [vmem:[#allocation2 + $0xf1] sm:$0xff] %vm44_vm0, %v10338_v9  ;;  %v10399_v60 = vld [vmem:[#allocation2 + $0x52] sm:$0xff]  ;;  %v10409_v36 = vld [vmem:[#allocation2 + $0x62] sm:$0xff] }
 0x61a   :  { %3729 = vst.msk [vmem:[#allocation2 + $0x101] sm:$0xff] %vm44_vm0, %v10342_v58  ;;  %v10413_v45 = vld [vmem:[#allocation2 + $0x30] sm:$0xff]  ;;  %v10425_v34 = vld [vmem:[#allocation2 + $0x82] sm:$0xff]  ;;  %v7448_v11 = vld [vmem:[%s12731_s3 + $0x218] sm:$0xff] }
 0x61b   :  { %3730 = vst.msk [vmem:[#allocation2 + $0x111] sm:$0xff] %vm44_vm0, %v10346_v2  ;;  %v10417_v42 = vld [vmem:[#allocation2 + $0x72] sm:$0xff]  ;;  %v10429_v1 = vld [vmem:[#allocation2 + $0x40] sm:$0xff]  ;;  %4607 = vmatpush.msrb.mxu1 %v7448_v11 }
 0x61c   :  { %3731 = vst.msk [vmem:[#allocation2 + $0x121] sm:$0xff] %vm44_vm0, %v10350_v16  ;;  %v10421_v40 = vld [vmem:[#allocation2 + $0x51] sm:$0xff]  ;;  %v10436_v3 = vld [vmem:[#allocation2 + $0x61] sm:$0xff] }
 0x61d   :  { %4107 = vst.msk [vmem:[#allocation3 + $0x8] sm:$0xff] %vm44_vm0, %v10358_v55  ;;  %v4123_v56 = vld [vmem:[#allocation2 + $0x12] sm:$0xff]  ;;  %v10442_v12 = vld [vmem:[#allocation2 + $0xc2] sm:$0xff] }
 0x61e   :  { %4108 = vst.msk [vmem:[#allocation3 + $0x20] sm:$0xff] %vm44_vm0, %v10362_v51  ;;  %v10446_v59 = vld [vmem:[#allocation2 + $0x50] sm:$0xff]  ;;  %v10458_v30 = vld [vmem:[#allocation2 + $0xe2] sm:$0xff] }
 0x61f   :  { %4427 = vst.msk [vmem:[#allocation3 + $0x10] sm:$0xff] %vm44_vm0, %v10366_v25  ;;  %v10450_v4 = vld [vmem:[#allocation2 + $0xd2] sm:$0xff]  ;;  %v10462_v50 = vld [vmem:[#allocation2 + $0x60] sm:$0xff] }
 0x620   :  { %3788 = vst.msk [vmem:[#allocation3 + $0x18] sm:$0xff] %vm44_vm0, %v3995_v33  ;;  %v10454_v46 = vld [vmem:[#allocation2 + $0x71] sm:$0xff]  ;;  %v10474_v48 = vld [vmem:[#allocation2 + $0x81] sm:$0xff] }
 0x621   :  { %4428 = vst.msk [vmem:[#allocation3 + $0x28] sm:$0xff] %vm44_vm0, %v10370_v53  ;;  %v10466_v32 = vld [vmem:[#allocation2 + $0xf2] sm:$0xff]  ;;  %v10479_v44 = vld [vmem:[#allocation2 + $0x102] sm:$0xff] }
 0x622   :  { %v10385_v47 = vld [vmem:[#allocation2 + $0x112] sm:$0xff]  ;;  %4109 = vst.msk [vmem:[#allocation3 + $0x38] sm:$0xff] %vm44_vm0, %v10374_v13  ;;  %v10497_v24 = vld [vmem:[#allocation2 + $0xc1] sm:$0xff] }
 0x623   :  { %v10387_v14 = vld [vmem:[#allocation2 + $0x111] sm:$0xff]  ;;  %v10393_v26 = vld [vmem:[#allocation2 + $0x120] sm:$0xff]  ;;  %3961 = vrot.lane.b32.xlu1 %v10385_v47, %s7759_s26  ;;  %4429 = vst.msk [vmem:[#allocation3 + $0x40] sm:$0xff] %vm44_vm0, %v10381_v35 }
 0x624   :  { %v10389_v0 = vld [vmem:[#allocation2 + $0x110] sm:$0xff]  ;;  %3865 = vrot.lane.b32.xlu0 %v10387_v14, %s7758_s25  ;;  %4057 = vrot.lane.b32.xlu2 %v10393_v26, %s7760_s20  ;;  %3789 = vst.msk [vmem:[#allocation3 + $0x30] sm:$0xff] %vm44_vm0, %v10379_v8  ;;  %v10493_v29 = vld [vmem:[#allocation2 + $0x122] sm:$0xff] }
 0x625   :  { %3802 = vst.msk [vmem:[#allocation3 + $0x168] sm:$0xff] %vm44_vm0, %v10389_v0  ;;  %v10483_v41 = vld [vmem:[#allocation2 + $0x70] sm:$0xff]  ;;  %v10514_v17 = vld [vmem:[#allocation2 + $0xc0] sm:$0xff] }
 0x626   :  { %4430 = vst.msk [vmem:[#allocation3 + $0x58] sm:$0xff] %vm44_vm0, %v10399_v60  ;;  %v10489_v15 = vld [vmem:[#allocation2 + $0xb1] sm:$0xff]  ;;  %v10518_v28 = vld [vmem:[#allocation2 + $0xe1] sm:$0xff] }
 0x627   :  { %4110 = vst.msk [vmem:[#allocation3 + $0x50] sm:$0xff] %vm44_vm0, %v10405_v21  ;;  %v10501_v57 = vld [vmem:[#allocation2 + $0xb0] sm:$0xff]  ;;  %v10530_v54 = vld [vmem:[#allocation2 + $0xe0] sm:$0xff] }
 0x628   :  { %4431 = vst.msk [vmem:[#allocation3 + $0x70] sm:$0xff] %vm44_vm0, %v10409_v36  ;;  %v10508_v37 = vld [vmem:[#allocation2 + $0xd1] sm:$0xff]  ;;  %v10534_v23 = vld [vmem:[#allocation2 + $0x101] sm:$0xff] }
 0x629   :  { %3790 = vst.msk [vmem:[#allocation3 + $0x48] sm:$0xff] %vm44_vm0, %v10413_v45  ;;  %v10522_v39 = vld [vmem:[#allocation2 + $0xd0] sm:$0xff]  ;;  %v10550_v5 = vld [vmem:[#allocation2 + $0x100] sm:$0xff] }
 0x62a   :  { %4432 = vst.msk [vmem:[#allocation3 + $0x88] sm:$0xff] %vm44_vm0, %v10417_v42  ;;  %v10526_v27 = vld [vmem:[#allocation2 + $0xf1] sm:$0xff]  ;;  %v10554_v22 = vld [vmem:[#allocation2 + $0x121] sm:$0xff] }
 0x62b   :  { %4251 = vrot.lane.b32.xlu1 %v10379_v8, %s7759_s26  ;;  %4111 = vst.msk [vmem:[#allocation3 + $0x68] sm:$0xff] %vm44_vm0, %v10421_v40  ;;  %v10538_v7 = vld [vmem:[#allocation2 + $0xf0] sm:$0xff] }
 0x62c   :  { %4155 = vrot.lane.b32.xlu0 %v4123_v56, %s7758_s25  ;;  %4347 = vrot.lane.b32.xlu2 %v10362_v51, %s7760_s20  ;;  %4433 = vst.msk [vmem:[#allocation3 + $0xa0] sm:$0xff] %vm44_vm0, %v10425_v34  ;;  %v4105_v10 = vld [vmem:[#allocation2 + $0x111] sm:$0xff] }
 0x62d   :  { %3791 = vst.msk [vmem:[#allocation3 + $0x60] sm:$0xff] %vm44_vm0, %v10429_v1 }
 0x62e   :  { %4112 = vst.msk [vmem:[#allocation3 + $0x80] sm:$0xff] %vm44_vm0, %v10436_v3 }
 0x62f   :  { %4435 = vst.msk [vmem:[#allocation3 + $0xd0] sm:$0xff] %vm44_vm0, %v10442_v12 }
 0x630   :  { %3792 = vst.msk [vmem:[#allocation3 + $0x78] sm:$0xff] %vm44_vm0, %v10446_v59 }
 0x631   :  { %4436 = vst.msk [vmem:[#allocation3 + $0xe8] sm:$0xff] %vm44_vm0, %v10450_v4 }
 0x632   :  { %4113 = vst.msk [vmem:[#allocation3 + $0x98] sm:$0xff] %vm44_vm0, %v10454_v46 }
 0x633   :  { %4253 = vrot.lane.b32.xlu1 %v10413_v45, %s7759_s26  ;;  %4437 = vst.msk [vmem:[#allocation3 + $0x100] sm:$0xff] %vm44_vm0, %v10458_v30 }
 0x634   :  { %4157 = vrot.lane.b32.xlu0 %v10366_v25, %s7758_s25  ;;  %4027 = vrot.lane.b32.xlu2 %v3995_v33, %s7760_s20  ;;  %3793 = vst.msk [vmem:[#allocation3 + $0x90] sm:$0xff] %vm44_vm0, %v10462_v50  ;;  %v7428_v33 = vld [vmem:[%s12731_s3 + $0x178] sm:$0xff] }
 0x635   :  { %4438 = vst.msk [vmem:[#allocation3 + $0x118] sm:$0xff] %vm44_vm0, %v10466_v32 }
 0x636   :  { %4114 = vst.msk [vmem:[#allocation3 + $0xb0] sm:$0xff] %vm44_vm0, %v10474_v48 }
 0x637   :  { %4439 = vst.msk [vmem:[#allocation3 + $0x130] sm:$0xff] %vm44_vm0, %v10479_v44 }
 0x638   :  { %3794 = vst.msk [vmem:[#allocation3 + $0xa8] sm:$0xff] %vm44_vm0, %v10483_v41 }
 0x639   :  { %4440 = vst.msk [vmem:[#allocation3 + $0x148] sm:$0xff] %vm44_vm0, %v10385_v47 }
 0x63a   :  { %4115 = vst.msk [vmem:[#allocation3 + $0xc8] sm:$0xff] %vm44_vm0, %v10489_v15 }
 0x63b   :  { %3933 = vrot.lane.b32.xlu1 %v4123_v56, %s7759_s26  ;;  %4441 = vst.msk [vmem:[#allocation3 + $0x160] sm:$0xff] %vm44_vm0, %v10493_v29  ;;  %v3771_v56 = vld [vmem:[#allocation2] sm:$0xff] }
 0x63c   :  { %3837 = vrot.lane.b32.xlu0 %v10358_v55, %s7758_s25  ;;  %4349 = vrot.lane.b32.xlu2 %v10374_v13, %s7760_s20  ;;  %4116 = vst.msk [vmem:[#allocation3 + $0xe0] sm:$0xff] %vm44_vm0, %v10497_v24  ;;  %v7431_v55 = vld [vmem:[%s12731_s3 + $0x190] sm:$0xff] }
 0x63d   :  { %3796 = vst.msk [vmem:[#allocation3 + $0xd8] sm:$0xff] %vm44_vm0, %v10501_v57  ;;  %4543 = vmatpush.msra.mxu0 %v7431_v55  ;;  %7596 = vmatpush.msrb.mxu3 %v7431_v55 }
 0x63e   :  { %4117 = vst.msk [vmem:[#allocation3 + $0xf8] sm:$0xff] %vm44_vm0, %v10508_v37 }
 0x63f   :  { %3797 = vst.msk [vmem:[#allocation3 + $0xf0] sm:$0xff] %vm44_vm0, %v10514_v17 }
 0x640   :  { %4118 = vst.msk [vmem:[#allocation3 + $0x110] sm:$0xff] %vm44_vm0, %v10518_v28 }
 0x641   :  { %3798 = vst.msk [vmem:[#allocation3 + $0x108] sm:$0xff] %vm44_vm0, %v10522_v39 }
 0x642   :  { %4119 = vst.msk [vmem:[#allocation3 + $0x128] sm:$0xff] %vm44_vm0, %v10526_v27 }
 0x643   :  { %4255 = vrot.lane.b32.xlu1 %v10429_v1, %s7759_s26  ;;  %3799 = vst.msk [vmem:[#allocation3 + $0x120] sm:$0xff] %vm44_vm0, %v10530_v54 }
 0x644   :  { %4159 = vrot.lane.b32.xlu0 %v10370_v53, %s7758_s25  ;;  %4029 = vrot.lane.b32.xlu2 %v10379_v8, %s7760_s20  ;;  %4120 = vst.msk [vmem:[#allocation3 + $0x140] sm:$0xff] %vm44_vm0, %v10534_v23  ;;  %v3932_v8 = vpop.permute.xlu1 %3931 }
 0x645   :  { %3800 = vst.msk [vmem:[#allocation3 + $0x138] sm:$0xff] %vm44_vm0, %v10538_v7 }
 0x646   :  { %4121 = vst.msk [vmem:[#allocation3 + $0x158] sm:$0xff] %vm44_vm0, %v4105_v10  ;;  %v7424_v10 = vld [vmem:[%s12731_s3 + $0x158] sm:$0xff] }
 0x647   :  { %3801 = vst.msk [vmem:[#allocation3 + $0x150] sm:$0xff] %vm44_vm0, %v10550_v5 }
 0x648   :  { %4122 = vst.msk [vmem:[#allocation3 + $0x170] sm:$0xff] %vm44_vm0, %v10554_v22 }
 0x649   :  { %3787 = vst.msk [vmem:[#allocation3] sm:$0xff] %vm44_vm0, %v3771_v56 }
 0x64b   :  { %3935 = vrot.lane.b32.xlu1 %v10366_v25, %s7759_s26  ;;  %v7429_v25 = vld [vmem:[%s12731_s3 + $0x180] sm:$0xff] }
 0x64c   :  { %3839 = vrot.lane.b32.xlu0 %v10362_v51, %s7758_s25  ;;  %4351 = vrot.lane.b32.xlu2 %v10405_v21, %s7760_s20  ;;  %v7430_v51 = vld [vmem:[%s12731_s3 + $0x188] sm:$0xff] }
 0x64d   :  { %4544 = vmatpush.msra.mxu0 %v7430_v51  ;;  %7597 = vmatpush.msrb.mxu3 %v7430_v51  ;;  %v7423_v51 = vld [vmem:[%s12731_s3 + $0x150] sm:$0xff] }
 0x64f   :  { %4545 = vmatpush.msra.mxu0 %v7429_v25  ;;  %7598 = vmatpush.msrb.mxu3 %v7429_v25  ;;  %v7447_v25 = vld [vmem:[%s12731_s3 + $0x210] sm:$0xff] }
 0x650   :  { %4608 = vmatpush.msrb.mxu1 %v7447_v25  ;;  %v10670_v25 = vpop.permute.xlu2 %4361 }
 0x651   :  { %4546 = vmatpush.msra.mxu0 %v7428_v33  ;;  %7599 = vmatpush.msrb.mxu3 %v7428_v33  ;;  %v7422_v33 = vld [vmem:[%s12731_s3 + $0x148] sm:$0xff] }
 0x653   :  { %4257 = vrot.lane.b32.xlu1 %v10446_v59, %s7759_s26 }
 0x654   :  { %4161 = vrot.lane.b32.xlu0 %v10381_v35, %s7758_s25  ;;  %4031 = vrot.lane.b32.xlu2 %v10413_v45, %s7760_s20  ;;  %v7425_v45 = vld [vmem:[%s12731_s3 + $0x160] sm:$0xff] }
 0x65b   :  { %3937 = vrot.lane.b32.xlu1 %v10370_v53, %s7759_s26  ;;  %v7427_v53 = vld [vmem:[%s12731_s3 + $0x170] sm:$0xff] }
 0x65c   :  { %3841 = vrot.lane.b32.xlu0 %v10374_v13, %s7758_s25  ;;  %4353 = vrot.lane.b32.xlu2 %v10421_v40, %s7760_s20  ;;  %v7426_v13 = vld [vmem:[%s12731_s3 + $0x168] sm:$0xff] }
 0x65d   :  { %4547 = vmatpush.msra.mxu0 %v7427_v53  ;;  %7600 = vmatpush.msrb.mxu3 %v7427_v53  ;;  %v7421_v53 = vld [vmem:[%s12731_s3 + $0x140] sm:$0xff] }
 0x65f   :  { %4548 = vmatpush.msra.mxu0 %v7426_v13  ;;  %7601 = vmatpush.msrb.mxu3 %v7426_v13  ;;  %v3779_v13 = vld [vmem:[#allocation2 + $0xa0] sm:$0xff] }
 0x660   :  { %3795 = vst.msk [vmem:[#allocation3 + $0xc0] sm:$0xff] %vm44_vm0, %v3779_v13  ;;  %v7439_v13 = vld [vmem:[%s12731_s3 + $0x1d0] sm:$0xff] }
 0x661   :  { %4549 = vmatpush.msra.mxu0 %v7425_v45  ;;  %7602 = vmatpush.msrb.mxu3 %v7425_v45  ;;  %v7419_v45 = vld [vmem:[%s12731_s3 + $0x130] sm:$0xff] }
 0x662   :  { %v10618_v55 = vpop.permute.xlu1 %4265 }
 0x663   :  { %4259 = vrot.lane.b32.xlu1 %v10462_v50, %s7759_s26  ;;  %4550 = vmatpush.msra.mxu0 %v7424_v10 }
 0x664   :  { %4163 = vrot.lane.b32.xlu0 %v10399_v60, %s7758_s25  ;;  %4033 = vrot.lane.b32.xlu2 %v10429_v1, %s7760_s20  ;;  %v3836_v1 = vpop.permute.xlu0 %3835 }
 0x665   :  { %3883 = vst.msk [vmem:[#allocation3] sm:$0xff] %vm268_vm2, %v3836_v1  ;;  %7603 = vmatpush.msrb.mxu3 %v7424_v10  ;;  %4551 = vmatpush.msra.mxu0 %v7423_v51  ;;  %v7444_v10 = vld [vmem:[%s12731_s3 + $0x1f8] sm:$0xff]  ;;  %v7418_v1 = vld [vmem:[%s12731_s3 + $0x128] sm:$0xff] }
 0x666   :  { %3979 = vst.msk [vmem:[#allocation3] sm:$0xff] %vm365_vm3, %v3932_v8  ;;  %v7446_v8 = vld [vmem:[%s12731_s3 + $0x208] sm:$0xff] }
 0x667   :  { %4552 = vmatpush.msra.mxu0 %v7422_v33  ;;  %4609 = vmatpush.msrb.mxu1 %v7446_v8  ;;  %v7440_v8 = vld [vmem:[%s12731_s3 + $0x1d8] sm:$0xff] }
 0x668   :  { %7604 = vmatpush.msrb.mxu3 %v7423_v51  ;;  %v7443_v51 = vld [vmem:[%s12731_s3 + $0x1f0] sm:$0xff] }
 0x669   :  { %4553 = vmatpush.msra.mxu0 %v7421_v53 }
 0x66a   :  { %7605 = vmatpush.msrb.mxu3 %v7422_v33  ;;  %v3948_v11 = vpop.permute.xlu1 %3947  ;;  %v7417_v33 = vld [vmem:[%s12731_s3 + $0x120] sm:$0xff] }
 0x66b   :  { %3939 = vrot.lane.b32.xlu1 %v10381_v35, %s7759_s26  ;;  %v7420_v35 = vld [vmem:[%s12731_s3 + $0x138] sm:$0xff] }
 0x66c   :  { %3843 = vrot.lane.b32.xlu0 %v10405_v21, %s7758_s25  ;;  %4355 = vrot.lane.b32.xlu2 %v10436_v3, %s7760_s20  ;;  %v7445_v21 = vld [vmem:[%s12731_s3 + $0x200] sm:$0xff]  ;;  %v3852_v56 = vpop.permute.xlu0 %3851 }
 0x66d   :  { %4554 = vmatpush.msra.mxu0 %v7420_v35  ;;  %4610 = vmatpush.msrb.mxu1 %v7445_v21  ;;  %3891 = vst.msk [vmem:[#allocation3 + $0xc0] sm:$0xff] %vm268_vm2, %v3852_v56  ;;  %v4225_v56 = vld [vmem:[#allocation2 + $0x80] sm:$0xff] }
 0x66e   :  { %7606 = vmatpush.msrb.mxu3 %v7421_v53  ;;  %3987 = vst.msk [vmem:[#allocation3 + $0xc0] sm:$0xff] %vm365_vm3, %v3948_v11  ;;  %v7442_v53 = vld [vmem:[%s12731_s3 + $0x1e8] sm:$0xff]  ;;  %v7435_v11 = vld [vmem:[%s12731_s3 + $0x1b0] sm:$0xff] }
 0x66f   :  { %4555 = vmatpush.msra.mxu0 %v7419_v45  ;;  %4611 = vmatpush.msrb.mxu1 %v7444_v10  ;;  %v7451_v10 = vld [vmem:[%s12731_s3 + $0x230] sm:$0xff] }
 0x670   :  { %7607 = vmatpush.msrb.mxu3 %v7420_v35  ;;  %v7438_v35 = vld [vmem:[%s12731_s3 + $0x1c8] sm:$0xff] }
 0x671   :  { %4556 = vmatpush.msra.mxu0 %v7418_v1  ;;  %4612 = vmatpush.msrb.mxu1 %v7443_v51  ;;  %v7434_v51 = vld [vmem:[%s12731_s3 + $0x1a8] sm:$0xff] }
 0x672   :  { %7608 = vmatpush.msrb.mxu3 %v7419_v45  ;;  %v7436_v45 = vld [vmem:[%s12731_s3 + $0x1b8] sm:$0xff] }
 0x673   :  { %4261 = vrot.lane.b32.xlu1 %v10483_v41, %s7759_s26  ;;  %4557 = vmatpush.msra.mxu0 %v7417_v33 }
 0x674   :  { %4165 = vrot.lane.b32.xlu0 %v10409_v36, %s7758_s25  ;;  %4035 = vrot.lane.b32.xlu2 %v10446_v59, %s7760_s20  ;;  %v7441_v59 = vld [vmem:[%s12731_s3 + $0x1e0] sm:$0xff] }
 0x675   :  { %4613 = vmatpush.msrb.mxu1 %v7442_v53  ;;  %7609 = vmatpush.msrb.mxu3 %v7418_v1  ;;  %v7450_v1 = vld [vmem:[%s12731_s3 + $0x228] sm:$0xff]  ;;  %v7433_v53 = vld [vmem:[%s12731_s3 + $0x1a0] sm:$0xff] }
 0x677   :  { %4614 = vmatpush.msrb.mxu1 %v7441_v59  ;;  %7610 = vmatpush.msrb.mxu3 %v7417_v33 }
 0x679   :  { %4615 = vmatpush.msrb.mxu1 %v7440_v8 }
 0x67b   :  { %3941 = vrot.lane.b32.xlu1 %v10399_v60, %s7759_s26  ;;  %4616 = vmatpush.msrb.mxu1 %v7439_v13  ;;  %v7437_v60 = vld [vmem:[%s12731_s3 + $0x1c0] sm:$0xff] }
 0x67c   :  { %3845 = vrot.lane.b32.xlu0 %v10421_v40, %s7758_s25  ;;  %4357 = vrot.lane.b32.xlu2 %v10454_v46, %s7760_s20  ;;  %v7452_v40 = vld [vmem:[%s12731_s3 + $0x238] sm:$0xff] }
 0x67d   :  { %4617 = vmatpush.msrb.mxu1 %v7438_v35  ;;  %4684 = vmatpush.msra.mxu3 %v7452_v40  ;;  %v4131_v35 = vld [vmem:[#allocation2 + $0xb2] sm:$0xff] }
 0x67e   :  { %v4058_v21 = vpop.permute.xlu2 %4057 }
 0x67f   :  { %4618 = vmatpush.msrb.mxu1 %v7437_v60  ;;  %4685 = vmatpush.msra.mxu3 %v7451_v10 }
 0x681   :  { %4619 = vmatpush.msrb.mxu1 %v7436_v45  ;;  %4686 = vmatpush.msra.mxu3 %v7450_v1  ;;  %v4445_v45 = vld [vmem:[#allocation3 + $0x10] sm:$0xff] }
 0x683   :  { %4263 = vrot.lane.b32.xlu1 %v4225_v56, %s7759_s26  ;;  %4620 = vmatpush.msrb.mxu1 %v7435_v11 }
 0x684   :  { %4167 = vrot.lane.b32.xlu0 %v10417_v42, %s7758_s25  ;;  %4037 = vrot.lane.b32.xlu2 %v10462_v50, %s7760_s20  ;;  %v7449_v50 = vld [vmem:[%s12731_s3 + $0x220] sm:$0xff] }
 0x685   :  { %4621 = vmatpush.msrb.mxu1 %v7434_v51  ;;  %4687 = vmatpush.msra.mxu3 %v7449_v50  ;;  %v4448_v51 = vld [vmem:[#allocation3 + $0x28] sm:$0xff] }
 0x686   :  { %v4348_v33 = vpop.permute.xlu2 %4347 }
 0x687   :  { %4622 = vmatpush.msrb.mxu1 %v7433_v53 }
 0x68b   :  { %3943 = vrot.lane.b32.xlu1 %v10409_v36, %s7759_s26 }
 0x68c   :  { %3847 = vrot.lane.b32.xlu0 %v10436_v3, %s7758_s25  ;;  %4359 = vrot.lane.b32.xlu2 %v10474_v48, %s7760_s20 }
 0x68e   :  { %v4028_v59 = vpop.permute.xlu2 %4027 }
 0x68f   :  { %4075 = vst.msk [vmem:[#allocation3] sm:$0xff] %vm462_vm4, %v4028_v59  ;;  %v4451_v59 = vld [vmem:[#allocation3 + $0x40] sm:$0xff] }
 0x693   :  { %3945 = vrot.lane.b32.xlu1 %v10417_v42, %s7759_s26 }
 0x694   :  { %4169 = vrot.lane.b32.xlu0 %v10425_v34, %s7758_s25  ;;  %4039 = vrot.lane.b32.xlu2 %v10483_v41, %s7760_s20 }
 0x695   :  { %v3962_v8 = vpop.permute.xlu1 %3961 }
 0x696   :  { %v3866_v36 = vpop.permute.xlu0 %3865  ;;  %v4350_v3 = vpop.permute.xlu2 %4349  ;;  %v4443_v13 = vld [vmem:[#allocation3] sm:$0xff] }
 0x697   :  { %3898 = vst.msk [vmem:[#allocation3 + $0x168] sm:$0xff] %vm268_vm2, %v3866_v36  ;;  %4558 = vmatmul.f32.vlgmr.msra.gmra.mxu0 %v4443_v13  ;;  %v4454_v13 = vld [vmem:[#allocation3 + $0x58] sm:$0xff] }
 0x698   :  { %3994 = vst.msk [vmem:[#allocation3 + $0x168] sm:$0xff] %vm365_vm3, %v3962_v8 }
 0x699   :  { %4090 = vst.msk [vmem:[#allocation3 + $0x168] sm:$0xff] %vm462_vm4, %v4058_v21 }
 0x69b   :  { %4267 = vrot.lane.b32.xlu1 %v10514_v17, %s7759_s26 }
 0x69c   :  { %3849 = vrot.lane.b32.xlu0 %v10454_v46, %s7758_s25  ;;  %4041 = vrot.lane.b32.xlu2 %v4225_v56, %s7760_s20 }
 0x69d   :  { %v4252_v42 = vpop.permute.xlu1 %4251 }
 0x69e   :  { %v4156_v34 = vpop.permute.xlu0 %4155  ;;  %v4030_v48 = vpop.permute.xlu2 %4029 }
 0x69f   :  { %4203 = vst.msk [vmem:[#allocation3 + $0x8] sm:$0xff] %vm268_vm2, %v4156_v34 }
 0x6a0   :  { %4299 = vst.msk [vmem:[#allocation3 + $0x8] sm:$0xff] %vm365_vm3, %v4252_v42  ;;  %v4488_v41 = vld [vmem:[#allocation3 + $0x168] sm:$0xff]  ;;  %v5701_v42 = vld [vmem:[#allocation2 + $0x92] sm:$0xff] }
 0x6a1   :  { %4395 = vst.msk [vmem:[#allocation3 + $0x8] sm:$0xff] %vm462_vm4, %v4348_v33  ;;  %4603 = vmatmul.f32.vlgmr.msrb.gmra.mxu3 %v4488_v41 }
 0x6a3   :  { %4269 = vrot.lane.b32.xlu1 %v10522_v39, %s7759_s26 }
 0x6a4   :  { %4171 = vrot.lane.b32.xlu0 %v4131_v35, %s7758_s25  ;;  %4363 = vrot.lane.b32.xlu2 %v10497_v24, %s7760_s20 }
 0x6a5   :  { %v4254_v46 = vpop.permute.xlu1 %4253 }
 0x6a6   :  { %v4158_v21 = vpop.permute.xlu0 %4157  ;;  %v4352_v60 = vpop.permute.xlu2 %4351 }
 0x6a7   :  { %4204 = vst.msk [vmem:[#allocation3 + $0x20] sm:$0xff] %vm268_vm2, %v4158_v21 }
 0x6a8   :  { %4300 = vst.msk [vmem:[#allocation3 + $0x20] sm:$0xff] %vm365_vm3, %v4254_v46  ;;  %v4444_v40 = vld [vmem:[#allocation3 + $0x8] sm:$0xff] }
 0x6a9   :  { %4396 = vst.msk [vmem:[#allocation3 + $0x20] sm:$0xff] %vm462_vm4, %v4350_v3  ;;  %4623 = vmatmul.f32.vlgmr.msrb.gmra.mxu1 %v4444_v40  ;;  %7454 = vmatmul.msk.f32.vlgmr.msra.gmra.mxu3 %vm44_vm0, %v4445_v45  ;;  %v4460_v40 = vld [vmem:[#allocation3 + $0x88] sm:$0xff] }
 0x6ab   :  { %3949 = vrot.lane.b32.xlu1 %v4131_v35, %s7759_s26  ;;  %v4457_v35 = vld [vmem:[#allocation3 + $0x70] sm:$0xff] }
 0x6ac   :  { %4173 = vrot.lane.b32.xlu0 %v10442_v12, %s7758_s25  ;;  %4043 = vrot.lane.b32.xlu2 %v10501_v57, %s7760_s20 }
 0x6ad   :  { %v3934_v56 = vpop.permute.xlu1 %3933 }
 0x6ae   :  { %v3838_v10 = vpop.permute.xlu0 %3837  ;;  %v4032_v11 = vpop.permute.xlu2 %4031 }
 0x6af   :  { %3884 = vst.msk [vmem:[#allocation3 + $0x18] sm:$0xff] %vm268_vm2, %v3838_v10  ;;  %v4463_v10 = vld [vmem:[#allocation3 + $0xa0] sm:$0xff] }
 0x6b0   :  { %3980 = vst.msk [vmem:[#allocation3 + $0x18] sm:$0xff] %vm365_vm3, %v3934_v56  ;;  %v4447_v1 = vld [vmem:[#allocation3 + $0x20] sm:$0xff] }
 0x6b1   :  { %4076 = vst.msk [vmem:[#allocation3 + $0x18] sm:$0xff] %vm462_vm4, %v4030_v48  ;;  %4626 = vmatmul.f32.gmra.mxu1 %v4447_v1  ;;  %7455 = vmatmul.msk.f32.gmra.mxu3 %vm44_vm0, %v4448_v51 }
 0x6b3   :  { %4271 = vrot.lane.b32.xlu1 %v10530_v54, %s7759_s26 }
 0x6b4   :  { %3853 = vrot.lane.b32.xlu0 %v10489_v15, %s7758_s25  ;;  %4365 = vrot.lane.b32.xlu2 %v10508_v37, %s7760_s20 }
 0x6b5   :  { %v4256_v57 = vpop.permute.xlu1 %4255 }
 0x6b6   :  { %v4160_v33 = vpop.permute.xlu0 %4159  ;;  %v4354_v53 = vpop.permute.xlu2 %4353 }
 0x6b7   :  { %4205 = vst.msk [vmem:[#allocation3 + $0x38] sm:$0xff] %vm268_vm2, %v4160_v33 }
 0x6b8   :  { %4301 = vst.msk [vmem:[#allocation3 + $0x38] sm:$0xff] %vm365_vm3, %v4256_v57  ;;  %v4446_v50 = vld [vmem:[#allocation3 + $0x18] sm:$0xff] }
 0x6b9   :  { %4397 = vst.msk [vmem:[#allocation3 + $0x38] sm:$0xff] %vm462_vm4, %v4352_v60  ;;  %4561 = vmatmul.f32.gmra.mxu0 %v4446_v50  ;;  %7456 = vmatmul.msk.f32.gmra.mxu3 %vm44_vm0, %v4451_v59 }
 0x6bb   :  { %3951 = vrot.lane.b32.xlu1 %v10442_v12, %s7759_s26  ;;  %v4466_v12 = vld [vmem:[#allocation3 + $0xb8] sm:$0xff] }
 0x6bc   :  { %4175 = vrot.lane.b32.xlu0 %v10450_v4, %s7758_s25  ;;  %4045 = vrot.lane.b32.xlu2 %v10514_v17, %s7760_s20  ;;  %5717 = vst.msk [vmem:[#allocation3 + $0xb8] sm:$0xff] %vm44_vm0, %v5701_v42  ;;  %v4478_v42 = vld [vmem:[#allocation3 + $0x118] sm:$0xff] }
 0x6bd   :  { %v3936_v15 = vpop.permute.xlu1 %3935 }
 0x6be   :  { %v3840_v8 = vpop.permute.xlu0 %3839  ;;  %v4034_v36 = vpop.permute.xlu2 %4033 }
 0x6bf   :  { %3885 = vst.msk [vmem:[#allocation3 + $0x30] sm:$0xff] %vm268_vm2, %v3840_v8  ;;  %v4472_v8 = vld [vmem:[#allocation3 + $0xe8] sm:$0xff] }
 0x6c0   :  { %3981 = vst.msk [vmem:[#allocation3 + $0x30] sm:$0xff] %vm365_vm3, %v3936_v15  ;;  %v4450_v3 = vld [vmem:[#allocation3 + $0x38] sm:$0xff] }
 0x6c1   :  { %4077 = vst.msk [vmem:[#allocation3 + $0x30] sm:$0xff] %vm462_vm4, %v4032_v11  ;;  %4629 = vmatmul.f32.gmra.mxu1 %v4450_v3  ;;  %7457 = vmatmul.msk.f32.gmra.mxu3 %vm44_vm0, %v4454_v13  ;;  %v4475_v13 = vld [vmem:[#allocation3 + $0x100] sm:$0xff] }
 0x6c3   :  { %4273 = vrot.lane.b32.xlu1 %v10538_v7, %s7759_s26 }
 0x6c4   :  { %3855 = vrot.lane.b32.xlu0 %v10497_v24, %s7758_s25  ;;  %4367 = vrot.lane.b32.xlu2 %v10518_v28, %s7760_s20 }
 0x6c5   :  { %v4258_v17 = vpop.permute.xlu1 %4257 }
 0x6c6   :  { %v4162_v34 = vpop.permute.xlu0 %4161  ;;  %v4356_v48 = vpop.permute.xlu2 %4355 }
 0x6c7   :  { %4206 = vst.msk [vmem:[#allocation3 + $0x50] sm:$0xff] %vm268_vm2, %v4162_v34 }
 0x6c8   :  { %4302 = vst.msk [vmem:[#allocation3 + $0x50] sm:$0xff] %vm365_vm3, %v4258_v17  ;;  %v4449_v41 = vld [vmem:[#allocation3 + $0x30] sm:$0xff] }
 0x6c9   :  { %4398 = vst.msk [vmem:[#allocation3 + $0x50] sm:$0xff] %vm462_vm4, %v4354_v53  ;;  %4564 = vmatmul.f32.gmra.mxu0 %v4449_v41  ;;  %7458 = vmatmul.msk.f32.gmra.mxu3 %vm44_vm0, %v4457_v35  ;;  %v4469_v53 = vld [vmem:[#allocation3 + $0xd0] sm:$0xff] }
 0x6cb   :  { %3953 = vrot.lane.b32.xlu1 %v10450_v4, %s7759_s26 }
 0x6cc   :  { %4177 = vrot.lane.b32.xlu0 %v10458_v30, %s7758_s25  ;;  %4047 = vrot.lane.b32.xlu2 %v10522_v39, %s7760_s20 }
 0x6cd   :  { %v3938_v24 = vpop.permute.xlu1 %3937 }
 0x6ce   :  { %v3842_v46 = vpop.permute.xlu0 %3841  ;;  %v4036_v21 = vpop.permute.xlu2 %4035 }
 0x6cf   :  { %3886 = vst.msk [vmem:[#allocation3 + $0x48] sm:$0xff] %vm268_vm2, %v3842_v46 }
 0x6d0   :  { %3982 = vst.msk [vmem:[#allocation3 + $0x48] sm:$0xff] %vm365_vm3, %v3938_v24  ;;  %v4453_v60 = vld [vmem:[#allocation3 + $0x50] sm:$0xff] }
 0x6d1   :  { %4078 = vst.msk [vmem:[#allocation3 + $0x48] sm:$0xff] %vm462_vm4, %v4034_v36  ;;  %4632 = vmatmul.f32.gmra.mxu1 %v4453_v60  ;;  %7459 = vmatmul.msk.f32.gmra.mxu3 %vm44_vm0, %v4460_v40 }
 0x6d3   :  { %4275 = vrot.lane.b32.xlu1 %v10550_v5, %s7759_s26 }
 0x6d4   :  { %3857 = vrot.lane.b32.xlu0 %v10508_v37, %s7758_s25  ;;  %4369 = vrot.lane.b32.xlu2 %v10526_v27, %s7760_s20 }
 0x6d5   :  { %v4260_v4 = vpop.permute.xlu1 %4259 }
 0x6d6   :  { %v4164_v39 = vpop.permute.xlu0 %4163  ;;  %v4358_v45 = vpop.permute.xlu2 %4357 }
 0x6d7   :  { %4207 = vst.msk [vmem:[#allocation3 + $0x68] sm:$0xff] %vm268_vm2, %v4164_v39 }
 0x6d8   :  { %4303 = vst.msk [vmem:[#allocation3 + $0x68] sm:$0xff] %vm365_vm3, %v4260_v4  ;;  %v4452_v56 = vld [vmem:[#allocation3 + $0x48] sm:$0xff] }
 0x6d9   :  { %4399 = vst.msk [vmem:[#allocation3 + $0x68] sm:$0xff] %vm462_vm4, %v4356_v48  ;;  %4567 = vmatmul.f32.gmra.mxu0 %v4452_v56  ;;  %7460 = vmatmul.msk.f32.gmra.mxu3 %vm44_vm0, %v4463_v10  ;;  %v4481_v48 = vld [vmem:[#allocation3 + $0x130] sm:$0xff] }
 0x6db   :  { %3955 = vrot.lane.b32.xlu1 %v10458_v30, %s7759_s26 }
 0x6dc   :  { %4179 = vrot.lane.b32.xlu0 %v10466_v32, %s7758_s25  ;;  %4049 = vrot.lane.b32.xlu2 %v10530_v54, %s7760_s20 }
 0x6dd   :  { %v3940_v37 = vpop.permute.xlu1 %3939 }
 0x6de   :  { %v3844_v11 = vpop.permute.xlu0 %3843  ;;  %v4038_v1 = vpop.permute.xlu2 %4037 }
 0x6df   :  { %3887 = vst.msk [vmem:[#allocation3 + $0x60] sm:$0xff] %vm268_vm2, %v3844_v11 }
 0x6e0   :  { %3983 = vst.msk [vmem:[#allocation3 + $0x60] sm:$0xff] %vm365_vm3, %v3940_v37  ;;  %v4456_v51 = vld [vmem:[#allocation3 + $0x68] sm:$0xff] }
 0x6e1   :  { %4079 = vst.msk [vmem:[#allocation3 + $0x60] sm:$0xff] %vm462_vm4, %v4036_v21  ;;  %4635 = vmatmul.f32.gmra.mxu1 %v4456_v51  ;;  %7461 = vmatmul.msk.f32.gmra.mxu3 %vm44_vm0, %v4466_v12  ;;  %v4487_v21 = vld [vmem:[#allocation3 + $0x160] sm:$0xff] }
 0x6e3   :  { %4277 = vrot.lane.b32.xlu1 %v10389_v0, %s7759_s26 }
 0x6e4   :  { %3859 = vrot.lane.b32.xlu0 %v10518_v28, %s7758_s25  ;;  %4371 = vrot.lane.b32.xlu2 %v10534_v23, %s7760_s20 }
 0x6e5   :  { %v4262_v30 = vpop.permute.xlu1 %4261 }
 0x6e6   :  { %v4166_v54 = vpop.permute.xlu0 %4165  ;;  %v4360_v57 = vpop.permute.xlu2 %4359 }
 0x6e7   :  { %4208 = vst.msk [vmem:[#allocation3 + $0x80] sm:$0xff] %vm268_vm2, %v4166_v54 }
 0x6e8   :  { %4304 = vst.msk [vmem:[#allocation3 + $0x80] sm:$0xff] %vm365_vm3, %v4262_v30  ;;  %v4455_v33 = vld [vmem:[#allocation3 + $0x60] sm:$0xff] }
 0x6e9   :  { %4400 = vst.msk [vmem:[#allocation3 + $0x80] sm:$0xff] %vm462_vm4, %v4358_v45  ;;  %4570 = vmatmul.f32.gmra.mxu0 %v4455_v33  ;;  %7462 = vmatmul.msk.f32.gmra.mxu3 %vm44_vm0, %v4469_v53 }
 0x6eb   :  { %3957 = vrot.lane.b32.xlu1 %v10466_v32, %s7759_s26 }
 0x6ec   :  { %4181 = vrot.lane.b32.xlu0 %v10479_v44, %s7758_s25  ;;  %4051 = vrot.lane.b32.xlu2 %v10538_v7, %s7760_s20 }
 0x6ed   :  { %v3942_v28 = vpop.permute.xlu1 %3941 }
 0x6ee   :  { %v3846_v50 = vpop.permute.xlu0 %3845  ;;  %v4040_v59 = vpop.permute.xlu2 %4039 }
 0x6ef   :  { %3888 = vst.msk [vmem:[#allocation3 + $0x78] sm:$0xff] %vm268_vm2, %v3846_v50 }
 0x6f0   :  { %3984 = vst.msk [vmem:[#allocation3 + $0x78] sm:$0xff] %vm365_vm3, %v3942_v28  ;;  %v4459_v15 = vld [vmem:[#allocation3 + $0x80] sm:$0xff] }
 0x6f1   :  { %4080 = vst.msk [vmem:[#allocation3 + $0x78] sm:$0xff] %vm462_vm4, %v4038_v1  ;;  %4638 = vmatmul.f32.gmra.mxu1 %v4459_v15  ;;  %7463 = vmatmul.msk.f32.gmra.mxu3 %vm44_vm0, %v4472_v8 }
 0x6f3   :  { %4279 = vrot.lane.b32.xlu1 %v10393_v26, %s7759_s26 }
 0x6f4   :  { %3861 = vrot.lane.b32.xlu0 %v10526_v27, %s7758_s25  ;;  %4373 = vrot.lane.b32.xlu2 %v10387_v14, %s7760_s20 }
 0x6f5   :  { %v4264_v32 = vpop.permute.xlu1 %4263 }
 0x6f6   :  { %v4168_v7 = vpop.permute.xlu0 %4167  ;;  %v4042_v36 = vpop.permute.xlu2 %4041 }
 0x6f7   :  { %4209 = vst.msk [vmem:[#allocation3 + $0x98] sm:$0xff] %vm268_vm2, %v4168_v7 }
 0x6f8   :  { %4305 = vst.msk [vmem:[#allocation3 + $0x98] sm:$0xff] %vm365_vm3, %v4264_v32  ;;  %v4458_v3 = vld [vmem:[#allocation3 + $0x78] sm:$0xff] }
 0x6f9   :  { %4401 = vst.msk [vmem:[#allocation3 + $0x98] sm:$0xff] %vm462_vm4, %v4360_v57  ;;  %4573 = vmatmul.f32.gmra.mxu0 %v4458_v3  ;;  %7464 = vmatmul.msk.f32.gmra.mxu3 %vm44_vm0, %v4475_v13 }
 0x6fb   :  { %3959 = vrot.lane.b32.xlu1 %v10479_v44, %s7759_s26  ;;  %v4234_v44 = vld [vmem:[#allocation2 + $0x130] sm:$0xff] }
 0x6fc   :  { %4183 = vrot.lane.b32.xlu0 %v10385_v47, %s7758_s25  ;;  %4053 = vrot.lane.b32.xlu2 %v10550_v5, %s7760_s20 }
 0x6fd   :  { %v3944_v14 = vpop.permute.xlu1 %3943 }
 0x6fe   :  { %v3848_v26 = vpop.permute.xlu0 %3847  ;;  %v4364_v27 = vpop.permute.xlu2 %4363 }
 0x6ff   :  { %3889 = vst.msk [vmem:[#allocation3 + $0x90] sm:$0xff] %vm268_vm2, %v3848_v26 }
 0x700   :  { %3985 = vst.msk [vmem:[#allocation3 + $0x90] sm:$0xff] %vm365_vm3, %v3944_v14  ;;  %v4462_v12 = vld [vmem:[#allocation3 + $0x98] sm:$0xff] }
 0x701   :  { %4081 = vst.msk [vmem:[#allocation3 + $0x90] sm:$0xff] %vm462_vm4, %v4040_v59  ;;  %4641 = vmatmul.f32.gmra.mxu1 %v4462_v12  ;;  %7465 = vmatmul.msk.f32.gmra.mxu3 %vm44_vm0, %v4478_v42 }
 0x703   :  { %4281 = vrot.lane.b32.xlu1 %v4234_v44, %s7759_s26 }
 0x704   :  { %3863 = vrot.lane.b32.xlu0 %v10534_v23, %s7758_s25  ;;  %4375 = vrot.lane.b32.xlu2 %v10554_v22, %s7760_s20 }
 0x705   :  { %v3946_v47 = vpop.permute.xlu1 %3945 }
 0x706   :  { %v4170_v5 = vpop.permute.xlu0 %4169  ;;  %v4044_v17 = vpop.permute.xlu2 %4043 }
 0x707   :  { %4210 = vst.msk [vmem:[#allocation3 + $0xb0] sm:$0xff] %vm268_vm2, %v4170_v5 }
 0x708   :  { %4083 = vst.msk [vmem:[#allocation3 + $0xc0] sm:$0xff] %vm462_vm4, %v4044_v17  ;;  %v4461_v34 = vld [vmem:[#allocation3 + $0x90] sm:$0xff] }
 0x709   :  { %4306 = vst.msk [vmem:[#allocation3 + $0xb0] sm:$0xff] %vm365_vm3, %v10618_v55  ;;  %4576 = vmatmul.f32.gmra.mxu0 %v4461_v34  ;;  %7466 = vmatmul.msk.f32.gmra.mxu3 %vm44_vm0, %v4481_v48  ;;  %v4484_v55 = vld [vmem:[#allocation3 + $0x148] sm:$0xff]  ;;  %v4490_v48 = vld [vmem:[#allocation3 + $0x178] sm:$0xff] }
 0x70a   :  { %4402 = vst.msk [vmem:[#allocation3 + $0xb0] sm:$0xff] %vm462_vm4, %v10670_v25  ;;  %v4330_v25 = vld [vmem:[#allocation2 + $0x131] sm:$0xff] }
 0x70c   :  { %4185 = vrot.lane.b32.xlu0 %v10493_v29, %s7758_s25  ;;  %4055 = vrot.lane.b32.xlu2 %v10389_v0, %s7760_s20 }
 0x70d   :  { %v4268_v23 = vpop.permute.xlu1 %4267 }
 0x70e   :  { %v3850_v22 = vpop.permute.xlu0 %3849  ;;  %v4366_v41 = vpop.permute.xlu2 %4365 }
 0x70f   :  { %3890 = vst.msk [vmem:[#allocation3 + $0xa8] sm:$0xff] %vm268_vm2, %v3850_v22  ;;  %v4467_v39 = vld [vmem:[#allocation3 + $0xc0] sm:$0xff] }
 0x710   :  { %3986 = vst.msk [vmem:[#allocation3 + $0xa8] sm:$0xff] %vm365_vm3, %v3946_v47 }
 0x711   :  { %4082 = vst.msk [vmem:[#allocation3 + $0xa8] sm:$0xff] %vm462_vm4, %v4042_v36  ;;  %v4465_v35 = vld [vmem:[#allocation3 + $0xb0] sm:$0xff]  ;;  %7467 = vmatmul.msk.f32.gmra.mxu3 %vm44_vm0, %v4484_v55 }
 0x712   :  { %4644 = vmatmul.f32.gmra.mxu1 %v4465_v35 }
 0x714   :  { %4377 = vrot.lane.b32.xlu2 %v4330_v25, %s7760_s20 }
 0x715   :  { %v4270_v29 = vpop.permute.xlu1 %4269 }
 0x716   :  { %v4172_v24 = vpop.permute.xlu0 %4171  ;;  %v4046_v0 = vpop.permute.xlu2 %4045 }
 0x717   :  { %4211 = vst.msk [vmem:[#allocation3 + $0xc8] sm:$0xff] %vm268_vm2, %v4172_v24 }
 0x718   :  { %4307 = vst.msk [vmem:[#allocation3 + $0xc8] sm:$0xff] %vm365_vm3, %v4268_v23  ;;  %v4464_v46 = vld [vmem:[#allocation3 + $0xa8] sm:$0xff]  ;;  %v5709_v23 = vld [vmem:[#allocation2 + $0x132] sm:$0xff] }
 0x719   :  { %4403 = vst.msk [vmem:[#allocation3 + $0xc8] sm:$0xff] %vm462_vm4, %v4364_v27  ;;  %4579 = vmatmul.f32.gmra.mxu0 %v4464_v46  ;;  %7468 = vmatmul.msk.f32.gmra.mxu3 %vm44_vm0, %v4487_v21 }
 0x71a   :  { %5725 = vst.msk [vmem:[#allocation3 + $0x178] sm:$0xff] %vm44_vm0, %v5709_v23 }
 0x71d   :  { %v3950_v60 = vpop.permute.xlu1 %3949 }
 0x71e   :  { %v4174_v40 = vpop.permute.xlu0 %4173  ;;  %v4368_v4 = vpop.permute.xlu2 %4367 }
 0x71f   :  { %4212 = vst.msk [vmem:[#allocation3 + $0xe0] sm:$0xff] %vm268_vm2, %v4174_v40 }
 0x720   :  { %4308 = vst.msk [vmem:[#allocation3 + $0xe0] sm:$0xff] %vm365_vm3, %v4270_v29  ;;  %v4468_v45 = vld [vmem:[#allocation3 + $0xc8] sm:$0xff] }
 0x721   :  { %4404 = vst.msk [vmem:[#allocation3 + $0xe0] sm:$0xff] %vm462_vm4, %v4366_v41  ;;  %4582 = vmatmul.f32.gmra.mxu0 %v4467_v39  ;;  %4647 = vmatmul.f32.gmra.mxu1 %v4468_v45 }
 0x722   :  { %7469 = vmatmul.msk.f32.gmra.mxu3 %vm44_vm0, %v4490_v48 }
 0x724   :  { %v10925_v41 = vpop.f32.mrf.mxu3 }
 0x725   :  { %v4272_v56 = vpop.permute.xlu1 %4271 }
 0x726   :  { %v4048_v10 = vpop.permute.xlu2 %4047  ;;  %v3854_v37 = vpop.permute.xlu0 %3853 }
 0x727   :  { %3892 = vst.msk [vmem:[#allocation3 + $0xd8] sm:$0xff] %vm268_vm2, %v3854_v37 }
 0x728   :  { %v4471_v11 = vld [vmem:[#allocation3 + $0xe0] sm:$0xff]  ;;  %3988 = vst.msk [vmem:[#allocation3 + $0xd8] sm:$0xff] %vm365_vm3, %v3950_v60 }
 0x729   :  { %4650 = vmatmul.f32.gmra.mxu1 %v4471_v11  ;;  %4084 = vst.msk [vmem:[#allocation3 + $0xd8] sm:$0xff] %vm462_vm4, %v4046_v0 }
 0x72c   :  { %v10932_v0 = vpop.f32.mrf.mxu3 }
 0x72d   :  { %v3952_v1 = vpop.permute.xlu1 %3951 }
 0x72e   :  { %v4176_v51 = vpop.permute.xlu0 %4175  ;;  %v4370_v30 = vpop.permute.xlu2 %4369 }
 0x72f   :  { %4213 = vst.msk [vmem:[#allocation3 + $0xf8] sm:$0xff] %vm268_vm2, %v4176_v51  ;;  %v4624_v51 = vpop.f32.mrf.mxu1 }
 0x730   :  { %4309 = vst.msk [vmem:[#allocation3 + $0xf8] sm:$0xff] %vm365_vm3, %v4272_v56  ;;  %v4470_v54 = vld [vmem:[#allocation3 + $0xd8] sm:$0xff] }
 0x731   :  { %4405 = vst.msk [vmem:[#allocation3 + $0xf8] sm:$0xff] %vm462_vm4, %v4368_v4  ;;  %4585 = vmatmul.f32.gmra.mxu0 %v4470_v54 }
 0x734   :  { %v4692_v4 = vpop.f32.mrf.mxu3 }
 0x735   :  { %v4274_v57 = vpop.permute.xlu1 %4273 }
 0x736   :  { %v3856_v33 = vpop.permute.xlu0 %3855  ;;  %v4050_v28 = vpop.permute.xlu2 %4049 }
 0x737   :  { %3893 = vst.msk [vmem:[#allocation3 + $0xf0] sm:$0xff] %vm268_vm2, %v3856_v33 }
 0x738   :  { %3989 = vst.msk [vmem:[#allocation3 + $0xf0] sm:$0xff] %vm365_vm3, %v3952_v1  ;;  %v4474_v53 = vld [vmem:[#allocation3 + $0xf8] sm:$0xff]  ;;  %v4559_v1 = vpop.f32.mrf.mxu0 }
 0x739   :  { %4085 = vst.msk [vmem:[#allocation3 + $0xf0] sm:$0xff] %vm462_vm4, %v4048_v10  ;;  %4653 = vmatmul.f32.gmra.mxu1 %v4474_v53 }
 0x73c   :  { %v4695_v37 = vpop.f32.mrf.mxu3 }
 0x73d   :  { %v3954_v50 = vpop.permute.xlu1 %3953 }
 0x73e   :  { %v4178_v59 = vpop.permute.xlu0 %4177  ;;  %v4372_v8 = vpop.permute.xlu2 %4371 }
 0x73f   :  { %4214 = vst.msk [vmem:[#allocation3 + $0x110] sm:$0xff] %vm268_vm2, %v4178_v59 }
 0x740   :  { %4310 = vst.msk [vmem:[#allocation3 + $0x110] sm:$0xff] %vm365_vm3, %v4274_v57  ;;  %v4473_v15 = vld [vmem:[#allocation3 + $0xf0] sm:$0xff]  ;;  %v4562_v54 = vpop.f32.mrf.mxu0  ;;  %v4627_v57 = vpop.f32.mrf.mxu1 }
 0x741   :  { %4406 = vst.msk [vmem:[#allocation3 + $0x110] sm:$0xff] %vm462_vm4, %v4370_v30  ;;  %4588 = vmatmul.f32.gmra.mxu0 %v4473_v15 }
 0x744   :  { %v4698_v30 = vpop.f32.mrf.mxu3 }
 0x745   :  { %v4276_v32 = vpop.permute.xlu1 %4275 }
 0x746   :  { %v3858_v7 = vpop.permute.xlu0 %3857  ;;  %v4052_v13 = vpop.permute.xlu2 %4051 }
 0x747   :  { %3894 = vst.msk [vmem:[#allocation3 + $0x108] sm:$0xff] %vm268_vm2, %v3858_v7 }
 0x748   :  { %3990 = vst.msk [vmem:[#allocation3 + $0x108] sm:$0xff] %vm365_vm3, %v3954_v50  ;;  %v4477_v36 = vld [vmem:[#allocation3 + $0x110] sm:$0xff]  ;;  %v4565_v53 = vpop.f32.mrf.mxu0 }
 0x749   :  { %4086 = vst.msk [vmem:[#allocation3 + $0x108] sm:$0xff] %vm462_vm4, %v4050_v28  ;;  %4656 = vmatmul.f32.gmra.mxu1 %v4477_v36  ;;  %v4630_v28 = vpop.f32.mrf.mxu1 }
 0x74c   :  { %v4701_v33 = vpop.f32.mrf.mxu3 }
 0x74d   :  { %v3956_v3 = vpop.permute.xlu1 %3955 }
 0x74e   :  { %v4180_v14 = vpop.permute.xlu0 %4179  ;;  %v4374_v42 = vpop.permute.xlu2 %4373 }
 0x74f   :  { %4215 = vst.msk [vmem:[#allocation3 + $0x128] sm:$0xff] %vm268_vm2, %v4180_v14 }
 0x750   :  { %4311 = vst.msk [vmem:[#allocation3 + $0x128] sm:$0xff] %vm365_vm3, %v4276_v32  ;;  %v4476_v26 = vld [vmem:[#allocation3 + $0x108] sm:$0xff] }
 0x751   :  { %4407 = vst.msk [vmem:[#allocation3 + $0x128] sm:$0xff] %vm462_vm4, %v4372_v8  ;;  %4591 = vmatmul.f32.gmra.mxu0 %v4476_v26  ;;  %v4633_v15 = vpop.f32.mrf.mxu1 }
 0x754   :  { %v4704_v59 = vpop.f32.mrf.mxu3 }
 0x755   :  { %v4278_v12 = vpop.permute.xlu1 %4277 }
 0x756   :  { %v3860_v27 = vpop.permute.xlu0 %3859  ;;  %v4054_v34 = vpop.permute.xlu2 %4053 }
 0x757   :  { %3895 = vst.msk [vmem:[#allocation3 + $0x120] sm:$0xff] %vm268_vm2, %v3860_v27  ;;  %v4568_v50 = vpop.f32.mrf.mxu0 }
 0x758   :  { %3991 = vst.msk [vmem:[#allocation3 + $0x120] sm:$0xff] %vm365_vm3, %v3956_v3  ;;  %v4480_v44 = vld [vmem:[#allocation3 + $0x128] sm:$0xff] }
 0x759   :  { %4087 = vst.msk [vmem:[#allocation3 + $0x120] sm:$0xff] %vm462_vm4, %v4052_v13  ;;  %4659 = vmatmul.f32.gmra.mxu1 %v4480_v44 }
 0x75c   :  { %v4707_v7 = vpop.f32.mrf.mxu3 }
 0x75d   :  { %v3958_v17 = vpop.permute.xlu1 %3957 }
 0x75e   :  { %v4182_v47 = vpop.permute.xlu0 %4181  ;;  %v4376_v25 = vpop.permute.xlu2 %4375 }
 0x75f   :  { %4216 = vst.msk [vmem:[#allocation3 + $0x140] sm:$0xff] %vm268_vm2, %v4182_v47  ;;  %v4636_v32 = vpop.f32.mrf.mxu1 }
 0x760   :  { %4312 = vst.msk [vmem:[#allocation3 + $0x140] sm:$0xff] %vm365_vm3, %v4278_v12  ;;  %v4479_v5 = vld [vmem:[#allocation3 + $0x120] sm:$0xff] }
 0x761   :  { %4408 = vst.msk [vmem:[#allocation3 + $0x140] sm:$0xff] %vm462_vm4, %v4374_v42  ;;  %4594 = vmatmul.f32.gmra.mxu0 %v4479_v5 }
 0x764   :  { %v10941_v13 = vpop.f32.mrf.mxu3 }
 0x765   :  { %v4280_v35 = vpop.permute.xlu1 %4279 }
 0x766   :  { %v3862_v22 = vpop.permute.xlu0 %3861  ;;  %v4056_v21 = vpop.permute.xlu2 %4055 }
 0x767   :  { %3896 = vst.msk [vmem:[#allocation3 + $0x138] sm:$0xff] %vm268_vm2, %v3862_v22  ;;  %v4571_v8 = vpop.f32.mrf.mxu0  ;;  %v10952_v22 = vld [vmem:[%s12732_s4 + $0x1] ss:$0 sm:$0xff] }
 0x768   :  { %3992 = vst.msk [vmem:[#allocation3 + $0x138] sm:$0xff] %vm365_vm3, %v3958_v17  ;;  %v4483_v55 = vld [vmem:[#allocation3 + $0x140] sm:$0xff] }
 0x769   :  { %4088 = vst.msk [vmem:[#allocation3 + $0x138] sm:$0xff] %vm462_vm4, %v4054_v34  ;;  %4662 = vmatmul.f32.gmra.mxu1 %v4483_v55 }
 0x76c   :  { %v10943_v27 = vpop.f32.mrf.mxu3 }
 0x76d   :  { %v3960_v46 = vpop.permute.xlu1 %3959 }
 0x76e   :  { %v4184_v29 = vpop.permute.xlu0 %4183  ;;  %v4378_v56 = vpop.permute.xlu2 %4377 }
 0x76f   :  { %4217 = vst.msk [vmem:[#allocation3 + $0x158] sm:$0xff] %vm268_vm2, %v4184_v29  ;;  %v4639_v3 = vpop.f32.mrf.mxu1  ;;  %v4566_v29 = vadd.f32 %v10952_v22, %v4565_v53 }
 0x770   :  { %4313 = vst.msk [vmem:[#allocation3 + $0x158] sm:$0xff] %vm365_vm3, %v4280_v35  ;;  %v4482_v24 = vld [vmem:[#allocation3 + $0x138] sm:$0xff]  ;;  %v4563_v35 = vadd.f32 %v10952_v22, %v4562_v54 }
 0x771   :  { %4409 = vst.msk [vmem:[#allocation3 + $0x158] sm:$0xff] %vm462_vm4, %v4376_v25  ;;  %4597 = vmatmul.f32.gmra.mxu0 %v4482_v24 }
 0x772   :  { %v4628_v24 = vadd.f32 %v4627_v57, %v4563_v35 }
 0x774   :  { %v10945_v44 = vpop.f32.mrf.mxu3 }
 0x775   :  { %v4282_v39 = vpop.permute.xlu1 %4281 }
 0x776   :  { %v3864_v60 = vpop.permute.xlu0 %3863  ;;  %v4574_v36 = vpop.f32.mrf.mxu0 }
 0x777   :  { %3897 = vst.msk [vmem:[#allocation3 + $0x150] sm:$0xff] %vm268_vm2, %v3864_v60  ;;  %v4572_v60 = vadd.f32 %v10952_v22, %v4571_v8 }
 0x778   :  { %3993 = vst.msk [vmem:[#allocation3 + $0x150] sm:$0xff] %vm365_vm3, %v3960_v46  ;;  %v4486_v40 = vld [vmem:[#allocation3 + $0x158] sm:$0xff]  ;;  %v4569_v46 = vadd.f32 %v10952_v22, %v4568_v50 }
 0x779   :  { %4089 = vst.msk [vmem:[#allocation3 + $0x150] sm:$0xff] %vm462_vm4, %v4056_v21  ;;  %4665 = vmatmul.f32.gmra.mxu1 %v4486_v40  ;;  %v4560_v21 = vadd.f32 %v10952_v22, %v4559_v1  ;;  %v4637_v53 = vadd.f32 %v4636_v32, %v4572_v60 }
 0x77a   :  { %v4634_v54 = vadd.f32 %v4633_v15, %v4569_v46 }
 0x77c   :  { %v10947_v34 = vpop.f32.mrf.mxu3 }
 0x77e   :  { %v4186_v45 = vpop.permute.xlu0 %4185  ;;  %v4642_v26 = vpop.f32.mrf.mxu1 }
 0x77f   :  { %4218 = vst.msk [vmem:[#allocation3 + $0x170] sm:$0xff] %vm268_vm2, %v4186_v45  ;;  %v4625_v45 = vadd.f32 %v4624_v51, %v4560_v21 }
 0x780   :  { %4314 = vst.msk [vmem:[#allocation3 + $0x170] sm:$0xff] %vm365_vm3, %v4282_v39  ;;  %v4485_v10 = vld [vmem:[#allocation3 + $0x150] sm:$0xff]  ;;  %v4631_v39 = vadd.f32 %v4630_v28, %v4566_v29  ;;  %v10976_v28 = vadd.f32 %v4698_v30, %v4634_v54 }
 0x781   :  { %4410 = vst.msk [vmem:[#allocation3 + $0x170] sm:$0xff] %vm462_vm4, %v4378_v56  ;;  %4600 = vmatmul.f32.gmra.mxu0 %v4485_v10  ;;  %v4575_v56 = vadd.f32 %v10952_v22, %v4574_v36  ;;  %v10967_v16 = vadd.f32 %v10932_v0, %v4625_v45  ;;  %v10981_v0 = vadd.f32 %v4701_v33, %v4637_v53 }
 0x782   :  { %v10970_v50 = vadd.f32 %v4695_v37, %v4631_v39  ;;  %v4746_v39 = vsel %vm44_vm0, %v10976_v28, 0.0 }
 0x783   :  { %v4640_v8 = vadd.f32 %v4639_v3, %v4575_v56  ;;  %v4779_v15 = vmul.f32 %v10967_v16, %v10967_v16  ;;  %v4741_v30 = vsel %vm44_vm0, %v10967_v16, 0.0  ;;  %v4783_v60 = vmul.f32 %v10981_v0, %v10981_v0 }
 0x784   :  { %v10957_v25 = vpop.f32.mrf.mxu3  ;;  %v4781_v3 = vmul.f32 %v10970_v50, %v10970_v50 }
 0x785   :  { %v10990_v35 = vadd.f32 %v4704_v59, %v4640_v8  ;;  %v4795_v21 = vsel %vm44_vm0, %v4779_v15, 0.0 }
 0x786   :  { %v4577_v14 = vpop.f32.mrf.mxu0 }
 0x787   :  { %v4578_v57 = vadd.f32 %v10952_v22, %v4577_v14 }
 0x788   :  { %v4489_v11 = vld [vmem:[#allocation3 + $0x170] sm:$0xff] }
 0x789   :  { %4668 = vmatmul.f32.gmra.mxu1 %v4489_v11  ;;  %v10964_v11 = vadd.f32 %v4692_v4, %v4628_v24  ;;  %v4643_v32 = vadd.f32 %v4642_v26, %v4578_v57  ;;  %v4744_v26 = vsel %vm44_vm0, %v10970_v50, 0.0  ;;  %v4782_v24 = vmul.f32 %v10976_v28, %v10976_v28 }
 0x78b   :  { %v4780_v51 = vmul.f32 %v10964_v11, %v10964_v11  ;;  %v4742_v37 = vsel %vm44_vm0, %v10964_v11, 0.0  ;;  %v11001_v59 = vadd.f32 %v4707_v7, %v4643_v32  ;;  %v4800_v8 = vsel %vm44_vm0, %v4782_v24, 0.0 }
 0x78c   :  { %v10972_v1 = vpop.f32.mrf.mxu3  ;;  %v4748_v7 = vsel %vm44_vm0, %v10981_v0, 0.0 }
 0x78d   :  { %v4796_v33 = vsel %vm44_vm0, %v4780_v51, 0.0 }
 0x78e   :  { %v4797_v54 = vadd.f32 %v4796_v33, %v4795_v21 }
 0x78f   :  { %v4645_v42 = vpop.f32.mrf.mxu1 }
 0x794   :  { %v4728_v51 = vpop.f32.mrf.mxu3 }
 0x796   :  { %v4580_v12 = vpop.f32.mrf.mxu0 }
 0x797   :  { %v4581_v4 = vadd.f32 %v10952_v22, %v4580_v12 }
 0x799   :  { %v4646_v46 = vadd.f32 %v4645_v42, %v4581_v4  ;;  %v4784_v42 = vmul.f32 %v10990_v35, %v10990_v35 }
 0x79b   :  { %v11013_v4 = vadd.f32 %v10941_v13, %v4646_v46  ;;  %v4804_v33 = vsel %vm44_vm0, %v4784_v42, 0.0  ;;  %v4752_v46 = vsel %vm44_vm0, %v11001_v59, 0.0 }
 0x79d   :  { %v4786_v21 = vmul.f32 %v11013_v4, %v11013_v4 }
 0x79e   :  { %v4583_v47 = vpop.f32.mrf.mxu0  ;;  %v4648_v5 = vpop.f32.mrf.mxu1 }
 0x79f   :  { %v4584_v14 = vadd.f32 %v10952_v22, %v4583_v47  ;;  %v4743_v47 = vadd.f32 %v4742_v37, %v4741_v30  ;;  %v4785_v37 = vmul.f32 %v11001_v59, %v11001_v59 }
 0x7a1   :  { %v4649_v45 = vadd.f32 %v4648_v5, %v4584_v14  ;;  %v4745_v53 = vadd.f32 %v4744_v26, %v4743_v47 }
 0x7a3   :  { %v4747_v32 = vadd.f32 %v4746_v39, %v4745_v53  ;;  %v11022_v14 = vadd.f32 %v10943_v27, %v4649_v45  ;;  %v4808_v53 = vsel %vm44_vm0, %v4786_v21, 0.0 }
 0x7a5   :  { %v4756_v42 = vsel %vm44_vm0, %v11022_v14, 0.0 }
 0x7a6   :  { %v4651_v48 = vpop.f32.mrf.mxu1 }
 0x7ae   :  { %v4586_v17 = vpop.f32.mrf.mxu0 }
 0x7af   :  { %v4587_v12 = vadd.f32 %v10952_v22, %v4586_v17  ;;  %v4798_v17 = vsel %vm44_vm0, %v4781_v3, 0.0 }
 0x7b0   :  { %v4799_v5 = vadd.f32 %v4798_v17, %v4797_v54  ;;  %v4754_v17 = vsel %vm44_vm0, %v11013_v4, 0.0 }
 0x7b1   :  { %v4652_v57 = vadd.f32 %v4651_v48, %v4587_v12  ;;  %v4750_v48 = vsel %vm44_vm0, %v10990_v35, 0.0 }
 0x7b2   :  { %v4801_v12 = vadd.f32 %v4800_v8, %v4799_v5  ;;  %v4731_v5 = vpop.f32.mrf.mxu3 }
 0x7b3   :  { %v11028_v26 = vadd.f32 %v10945_v44, %v4652_v57  ;;  %v4787_v44 = vmul.f32 %v11022_v14, %v11022_v14 }
 0x7b6   :  { %v10954_v55 = vpop.f32.mrf.mxu1 }
 0x7be   :  { %v4589_v23 = vpop.f32.mrf.mxu0 }
 0x7bf   :  { %v4590_v56 = vadd.f32 %v10952_v22, %v4589_v23  ;;  %v4802_v23 = vsel %vm44_vm0, %v4783_v60, 0.0 }
 0x7c1   :  { %v4655_v30 = vadd.f32 %v10954_v55, %v4590_v56  ;;  %v4803_v55 = vadd.f32 %v4802_v23, %v4801_v12 }
 0x7c3   :  { %v11041_v39 = vadd.f32 %v10947_v34, %v4655_v30  ;;  %v4805_v56 = vadd.f32 %v4804_v33, %v4803_v55  ;;  %v4810_v34 = vsel %vm44_vm0, %v4787_v44, 0.0 }
 0x7c6   :  { %v4657_v10 = vpop.f32.mrf.mxu1 }
 0x7ce   :  { %v4592_v40 = vpop.f32.mrf.mxu0 }
 0x7cf   :  { %v4593_v15 = vadd.f32 %v10952_v22, %v4592_v40  ;;  %v4749_v40 = vadd.f32 %v4748_v7, %v4747_v32  ;;  %v4789_v32 = vmul.f32 %v11041_v39, %v11041_v39 }
 0x7d1   :  { %v4658_v27 = vadd.f32 %v4657_v10, %v4593_v15  ;;  %v4751_v60 = vadd.f32 %v4750_v48, %v4749_v40  ;;  %v4788_v10 = vmul.f32 %v11028_v26, %v11028_v26 }
 0x7d3   :  { %v4753_v54 = vadd.f32 %v4752_v46, %v4751_v60  ;;  %v11049_v57 = vadd.f32 %v10957_v25, %v4658_v27  ;;  %v4812_v25 = vsel %vm44_vm0, %v4788_v10, 0.0 }
 0x7d5   :  { %v4755_v15 = vadd.f32 %v4754_v17, %v4753_v54  ;;  %v4790_v12 = vmul.f32 %v11049_v57, %v11049_v57  ;;  %v4762_v21 = vsel %vm44_vm0, %v11049_v57, 0.0  ;;  %v4605_v54 = vadd.f32 %v10952_v22, %v10925_v41 }
 0x7d6   :  { %v4660_v29 = vpop.f32.mrf.mxu1 }
 0x7de   :  { %v4595_v36 = vpop.f32.mrf.mxu0 }
 0x7df   :  { %v4596_v13 = vadd.f32 %v10952_v22, %v4595_v36  ;;  %v4806_v36 = vsel %vm44_vm0, %v4785_v37, 0.0  ;;  %v4757_v37 = vadd.f32 %v4756_v42, %v4755_v15 }
 0x7e0   :  { %v4807_v7 = vadd.f32 %v4806_v36, %v4805_v56  ;;  %v4816_v36 = vsel %vm44_vm0, %v4790_v12, 0.0 }
 0x7e1   :  { %v4661_v45 = vadd.f32 %v4660_v29, %v4596_v13  ;;  %v4758_v29 = vsel %vm44_vm0, %v11028_v26, 0.0  ;;  %v4760_v13 = vsel %vm44_vm0, %v11041_v39, 0.0 }
 0x7e2   :  { %v4759_v46 = vadd.f32 %v4758_v29, %v4757_v37 }
 0x7e3   :  { %v11057_v23 = vadd.f32 %v10972_v1, %v4661_v45  ;;  %v4814_v1 = vsel %vm44_vm0, %v4789_v32, 0.0 }
 0x7e4   :  { %v4761_v60 = vadd.f32 %v4760_v13, %v4759_v46 }
 0x7e5   :  { %v4791_v27 = vmul.f32 %v11057_v23, %v11057_v23 }
 0x7e6   :  { %v4663_v24 = vpop.f32.mrf.mxu1  ;;  %v4763_v56 = vadd.f32 %v4762_v21, %v4761_v60 }
 0x7e7   :  { %v4818_v10 = vsel %vm44_vm0, %v4791_v27, 0.0 }
 0x7ee   :  { %v4598_v3 = vpop.f32.mrf.mxu0 }
 0x7ef   :  { %v4599_v47 = vadd.f32 %v10952_v22, %v4598_v3  ;;  %v4809_v3 = vadd.f32 %v4808_v53, %v4807_v7 }
 0x7f1   :  { %v4664_v8 = vadd.f32 %v4663_v24, %v4599_v47  ;;  %v4811_v24 = vadd.f32 %v4810_v34, %v4809_v3  ;;  %v4734_v34 = vpop.f32.mrf.mxu3 }
 0x7f3   :  { %v11064_v40 = vadd.f32 %v4728_v51, %v4664_v8  ;;  %v4813_v55 = vadd.f32 %v4812_v25, %v4811_v24  ;;  %v4764_v51 = vsel %vm44_vm0, %v11057_v23, 0.0 }
 0x7f4   :  { %v4765_v7 = vadd.f32 %v4764_v51, %v4763_v56 }
 0x7f5   :  { %v4792_v17 = vmul.f32 %v11064_v40, %v11064_v40  ;;  %v4815_v45 = vadd.f32 %v4814_v1, %v4813_v55  ;;  %v4766_v53 = vsel %vm44_vm0, %v11064_v40, 0.0 }
 0x7f6   :  { %v4666_v48 = vpop.f32.mrf.mxu1  ;;  %v4767_v41 = vadd.f32 %v4766_v53, %v4765_v7 }
 0x7f7   :  { %v4817_v8 = vadd.f32 %v4816_v36, %v4815_v45 }
 0x7f9   :  { %v4819_v37 = vadd.f32 %v4818_v10, %v4817_v8 }
 0x7fe   :  { %v4601_v30 = vpop.f32.mrf.mxu0 }
 0x7ff   :  { %v4602_v33 = vadd.f32 %v10952_v22, %v4601_v30 }
 0x801   :  { %v4667_v47 = vadd.f32 %v4666_v48, %v4602_v33 }
 0x803   :  { %v11077_v44 = vadd.f32 %v4731_v5, %v4667_v47  ;;  %v4820_v5 = vsel %vm44_vm0, %v4792_v17, 0.0 }
 0x804   :  { %v4821_v48 = vadd.f32 %v4820_v5, %v4819_v37  ;;  %v7470_v37 = vld [vmem:[%s12733_s5 + $0x1] sm:$0x1] }
 0x805   :  { %v4793_v42 = vmul.f32 %v11077_v44, %v11077_v44  ;;  %v4768_v32 = vsel %vm44_vm0, %v11077_v44, 0.0 }
 0x806   :  { %v4669_v15 = vpop.f32.mrf.mxu1  ;;  %v4769_v25 = vadd.f32 %v4768_v32, %v4767_v41 }
 0x807   :  { %v4670_v29 = vadd.f32 %v4669_v15, %v4605_v54  ;;  %v4822_v3 = vsel %vm44_vm0, %v4793_v42, 0.0 }
 0x808   :  { %v4823_v33 = vadd.f32 %v4822_v3, %v4821_v48 }
 0x809   :  { %v11089_v22 = vadd.f32 %v4734_v34, %v4670_v29 }
 0x80b   :  { %v4770_v30 = vsel %vm44_vm0, %v11089_v22, 0.0  ;;  %v4794_v13 = vmul.f32 %v11089_v22, %v11089_v22 }
 0x80c   :  { %v4771_v12 = vadd.f32 %v4770_v30, %v4769_v25  ;;  %v7471_v30 = vld [vmem:[%s12734_s6 + $0x1] sm:$0x1] }
 0x80d   :  { %v4824_v24 = vsel %vm44_vm0, %v4794_v13, 0.0 }
 0x80e   :  { %v4772_v46 = vrot.slane %v4771_v12, 4  ;;  %v4825_v1 = vadd.f32 %v4824_v24, %v4823_v33  ;;  %v5086_v24 = vld [vmem:[#allocation2 + $0x1] sm:$0xff] }
 0x80f   :  { %5118 = vrot.lane.b32.xlu0 %v5086_v24, %s7758_s25 }
 0x810   :  { %v4773_v21 = vadd.f32 %v4772_v46, %v4771_v12  ;;  %v4826_v27 = vrot.slane %v4825_v1, 4 }
 0x812   :  { %v4774_v47 = vrot.slane %v4773_v21, 2  ;;  %v4827_v55 = vadd.f32 %v4826_v27, %v4825_v1  ;;  %v5182_v27 = vld [vmem:[#allocation2 + $0x2] sm:$0xff] }
 0x813   :  { %5214 = vrot.lane.b32.xlu1 %v5182_v27, %s7759_s26 }
 0x814   :  { %v4775_v60 = vadd.f32 %v4774_v47, %v4773_v21  ;;  %v4828_v36 = vrot.slane %v4827_v55, 2 }
 0x816   :  { %v4776_v51 = vrot.slane %v4775_v60, 1  ;;  %v4829_v17 = vadd.f32 %v4828_v36, %v4827_v55 }
 0x818   :  { %v4777_v45 = vadd.f32 %v4776_v51, %v4775_v60  ;;  %v4830_v56 = vrot.slane %v4829_v17, 1 }
 0x81a   :  { %v4778_v54 = vmul.f32 0.0078125, %v4777_v45  ;;  %v4831_v10 = vadd.f32 %v4830_v56, %v4829_v17 }
 0x81c   :  { %v4832_v53 = vmul.f32 0.0078125, %v4831_v10  ;;  %v4833_v42 = vmul.f32 %v4778_v54, %v4778_v54 }
 0x81e   :  { %v4834_v8 = vsub.f32 %v4832_v53, %v4833_v42 }
 0x820   :  { %v4835_v7 = vadd.f32 1e-05, %v4834_v8 }
 0x822   :  { %7689 = vrsqrt.f32 %v4835_v7  ;;  %vm4842_vm8 = vweird.f32 %v4835_v7 }
 0x828   :  { %v7690_v15 = vpop.eup %7689 }
 0x829   :  { %v4837_v34 = vmul.f32 %v7690_v15, %v4835_v7  ;;  %vm4843_vm7 = vweird.f32 %v7690_v15 }
 0x82a   :  { %vm4844_vm9 = vmor %vm4842_vm8, %vm4843_vm7 }
 0x82b   :  { %v4838_v5 = vmul.f32 %v7690_v15, %v4837_v34 }
 0x82d   :  { %v4839_v29 = vmul.f32 0.5, %v4838_v5 }
 0x82f   :  { %v4840_v32 = vsub.f32 1.5, %v4839_v29 }
 0x831   :  { %v4841_v41 = vmul.f32 %v7690_v15, %v4840_v32 }
 0x833   :  { %v4845_v3 = vsel %vm4844_vm9, %v7690_v15, %v4841_v41  ;;  %v5094_v41 = vld [vmem:[#allocation2 + $0xa1] sm:$0xff] }
 0x834   :  { %v4846_v25 = vmul.f32 %v7470_v37, %v4845_v3  ;;  %5134 = vrot.lane.b32.xlu0 %v5094_v41, %s7758_s25 }
 0x836   :  { %v4847_v48 = vmul.f32 %v4846_v25, %v4778_v54  ;;  %v4850_v12 = vperm.slane %v4846_v25, 0 }
 0x838   :  { %v4848_v13 = vsub.f32 %v7471_v30, %v4847_v48  ;;  %v4852_v46 = vmul.f32 %v4850_v12, %v10967_v16  ;;  %v4853_v1 = vmul.f32 %v4850_v12, %v10964_v11  ;;  %v4854_v21 = vmul.f32 %v4850_v12, %v10970_v50  ;;  %v7523_v48 = vld [vmem:[%s12735_s7 + $0x238] sm:$0xff] }
 0x839   :  { %v4855_v47 = vmul.f32 %v4850_v12, %v10976_v28  ;;  %v4856_v55 = vmul.f32 %v4850_v12, %v10981_v0  ;;  %v4857_v16 = vmul.f32 %v4850_v12, %v10990_v35  ;;  %v4858_v50 = vmul.f32 %v4850_v12, %v11001_v59  ;;  %5967 = vmatpush.msra.mxu1 %v7523_v48 }
 0x83a   :  { %v4869_v33 = vperm.slane %v4848_v13, 0  ;;  %v4859_v17 = vmul.f32 %v4850_v12, %v11013_v4  ;;  %v4860_v28 = vmul.f32 %v4850_v12, %v11022_v14  ;;  %v4861_v0 = vmul.f32 %v4850_v12, %v11028_v26 }
 0x83b   :  { %v4862_v56 = vmul.f32 %v4850_v12, %v11041_v39  ;;  %v4863_v4 = vmul.f32 %v4850_v12, %v11049_v57  ;;  %v4864_v42 = vmul.f32 %v4850_v12, %v11057_v23  ;;  %v4865_v26 = vmul.f32 %v4850_v12, %v11064_v40 }
 0x83c   :  { %v11110_v60 = vadd.f32 %v4869_v33, %v4852_v46  ;;  %v11112_v36 = vadd.f32 %v4869_v33, %v4853_v1  ;;  %v11114_v51 = vadd.f32 %v4869_v33, %v4854_v21  ;;  %v11117_v11 = vadd.f32 %v4869_v33, %v4855_v47 }
 0x83d   :  { %v11121_v45 = vadd.f32 %v4869_v33, %v4856_v55  ;;  %v11126_v54 = vadd.f32 %v4869_v33, %v4857_v16  ;;  %v11128_v10 = vadd.f32 %v4869_v33, %v4858_v50  ;;  %v11135_v8 = vadd.f32 %v4869_v33, %v4859_v17  ;;  %v7520_v17 = vld [vmem:[%s12735_s7 + $0x220] sm:$0xff] }
 0x83e   :  { %v4903_v35 = vmul.f32 1.442695, %v11110_v60  ;;  %v4905_v53 = vmul.f32 1.442695, %v11112_v36  ;;  %v4907_v59 = vmul.f32 1.442695, %v11114_v51  ;;  %v11139_v39 = vadd.f32 %v4869_v33, %v4860_v28 }
 0x83f   :  { %v4909_v14 = vmul.f32 1.442695, %v11117_v11  ;;  %v4911_v7 = vmul.f32 1.442695, %v11121_v45  ;;  %v4866_v15 = vmul.f32 %v4850_v12, %v11077_v44  ;;  %v11143_v34 = vadd.f32 %v4869_v33, %v4861_v0  ;;  %v5190_v44 = vld [vmem:[#allocation2 + $0xa2] sm:$0xff] }
 0x840   :  { %7691 = vpow2.f32 %v4903_v35  ;;  %v4913_v57 = vmul.f32 1.442695, %v11126_v54  ;;  %v4867_v23 = vmul.f32 %v4850_v12, %v11089_v22  ;;  %v11147_v5 = vadd.f32 %v4869_v33, %v4862_v56  ;;  %5230 = vrot.lane.b32.xlu2 %v5190_v44, %s7759_s26  ;;  %v7522_v12 = vld [vmem:[%s12735_s7 + $0x230] sm:$0xff] }
 0x841   :  { %7693 = vpow2.f32 %v4905_v53  ;;  %v4915_v29 = vmul.f32 1.442695, %v11128_v10  ;;  %v11150_v40 = vadd.f32 %v4869_v33, %v4863_v4  ;;  %v11152_v32 = vadd.f32 %v4869_v33, %v4864_v42  ;;  %5968 = vmatpush.msra.mxu1 %v7522_v12  ;;  %v5605_v35 = vld [vmem:[#allocation2 + $0x91] sm:$0xff] }
 0x842   :  { %7695 = vpow2.f32 %v4907_v59  ;;  %v4917_v37 = vmul.f32 1.442695, %v11135_v8  ;;  %v11155_v3 = vadd.f32 %v4869_v33, %v4865_v26  ;;  %v11157_v25 = vadd.f32 %v4869_v33, %v4866_v15  ;;  %v5509_v53 = vld [vmem:[#allocation2 + $0x90] sm:$0xff] }
 0x843   :  { %7697 = vpow2.f32 %v4909_v14  ;;  %v4919_v22 = vmul.f32 1.442695, %v11139_v39  ;;  %v11165_v30 = vadd.f32 %v4869_v33, %v4867_v23  ;;  %vm4887_vm10 = vcmp.gt.f32.partialorder %v11110_v60, 0.0  ;;  %v7521_v33 = vld [vmem:[%s12735_s7 + $0x228] sm:$0xff]  ;;  %5548 = vrot.lane.b32.xlu0 %v5509_v53, %s7759_s26 }
 0x844   :  { %7699 = vpow2.f32 %v4911_v7  ;;  %v4921_v13 = vmul.f32 1.442695, %v11143_v34  ;;  %vm4888_vm11 = vcmp.gt.f32.partialorder %v11112_v36, 0.0  ;;  %vm4889_vm12 = vcmp.gt.f32.partialorder %v11114_v51, 0.0  ;;  %5969 = vmatpush.msra.mxu1 %v7521_v33 }
 0x845   :  { %7701 = vpow2.f32 %v4913_v57  ;;  %v4923_v46 = vmul.f32 1.442695, %v11147_v5  ;;  %vm4890_vm13 = vcmp.gt.f32.partialorder %v11117_v11, 0.0  ;;  %v4925_v21 = vmul.f32 1.442695, %v11150_v40 }
 0x846   :  { %v7692_v24 = vpop.eup %7691  ;;  %7703 = vpow2.f32 %v4915_v29  ;;  %v4927_v55 = vmul.f32 1.442695, %v11152_v32  ;;  %v4929_v16 = vmul.f32 1.442695, %v11155_v3  ;;  %vm4891_vm14 = vcmp.gt.f32.partialorder %v11121_v45, 0.0  ;;  %5970 = vmatpush.msra.mxu1 %v7520_v17 }
 0x847   :  { %v7694_v1 = vpop.eup %7693  ;;  %7705 = vpow2.f32 %v4917_v37  ;;  %v7472_v27 = vadd.f32 -1.0, %v7692_v24  ;;  %vm4892_vm15 = vcmp.gt.f32.partialorder %v11126_v54, 0.0  ;;  %v4931_v4 = vmul.f32 1.442695, %v11157_v25 }
 0x848   :  { %v7696_v47 = vpop.eup %7695  ;;  %7707 = vpow2.f32 %v4919_v22  ;;  %v7473_v50 = vadd.f32 -1.0, %v7694_v1  ;;  %vm4893_vm1 = vcmp.gt.f32.partialorder %v11128_v10, 0.0  ;;  %v4933_v7 = vmul.f32 1.442695, %v11165_v30  ;;  %5644 = vrot.lane.b32.xlu2 %v5605_v35, %s7760_s20 }
 0x849   :  { %v7698_v28 = vpop.eup %7697  ;;  %7709 = vpow2.f32 %v4921_v13  ;;  %v7474_v0 = vadd.f32 -1.0, %v7696_v47  ;;  %v4951_v56 = vmul.f32 1.6732632, %v7472_v27  ;;  %vm4894_vm5 = vcmp.gt.f32.partialorder %v11135_v8, 0.0 }
 0x84a   :  { %v7700_v59 = vpop.eup %7699  ;;  %7711 = vpow2.f32 %v4923_v46  ;;  %v7475_v42 = vadd.f32 -1.0, %v7698_v28  ;;  %v4952_v14 = vmul.f32 1.6732632, %v7473_v50  ;;  %vm4895_vm6 = vcmp.gt.f32.partialorder %v11139_v39, 0.0 }
 0x84b   :  { %v7702_v26 = vpop.eup %7701  ;;  %7713 = vpow2.f32 %v4925_v21  ;;  %v7476_v15 = vadd.f32 -1.0, %v7700_v59  ;;  %v4953_v57 = vmul.f32 1.6732632, %v7474_v0  ;;  %v4967_v48 = vsel %vm4887_vm10, %v11110_v60, %v4951_v56 }
 0x84c   :  { %v7704_v23 = vpop.eup %7703  ;;  %7715 = vpow2.f32 %v4927_v55  ;;  %v7477_v29 = vadd.f32 -1.0, %v7702_v26  ;;  %v4954_v37 = vmul.f32 1.6732632, %v7475_v42  ;;  %vm4896_vm7 = vcmp.gt.f32.partialorder %v11143_v34, 0.0 }
 0x84d   :  { %v7706_v44 = vpop.eup %7705  ;;  %7717 = vpow2.f32 %v4929_v16  ;;  %v7478_v41 = vadd.f32 -1.0, %v7704_v23  ;;  %v4955_v22 = vmul.f32 1.6732632, %v7476_v15  ;;  %v4968_v24 = vsel %vm4888_vm11, %v11112_v36, %v4952_v14 }
 0x84e   :  { %v7708_v13 = vpop.eup %7707  ;;  %7719 = vpow2.f32 %v4931_v4  ;;  %v7479_v12 = vadd.f32 -1.0, %v7706_v44  ;;  %v4956_v1 = vmul.f32 1.6732632, %v7477_v29  ;;  %v4969_v21 = vsel %vm4889_vm12, %v11114_v51, %v4953_v57 }
 0x84f   :  { %v7710_v46 = vpop.eup %7709  ;;  %7721 = vpow2.f32 %v4933_v7  ;;  %v7480_v33 = vadd.f32 -1.0, %v7708_v13  ;;  %v4957_v60 = vmul.f32 1.6732632, %v7478_v41  ;;  %v4970_v55 = vsel %vm4890_vm13, %v11117_v11, %v4954_v37 }
 0x850   :  { %v7712_v27 = vpop.eup %7711  ;;  %v7481_v47 = vadd.f32 -1.0, %v7710_v46  ;;  %v4983_v16 = vmul.f32 1.050701, %v4967_v48  ;;  %v4958_v28 = vmul.f32 1.6732632, %v7479_v12  ;;  %v4971_v36 = vsel %vm4891_vm14, %v11121_v45, %v4955_v22 }
 0x851   :  { %v7714_v50 = vpop.eup %7713  ;;  %v7482_v17 = vadd.f32 -1.0, %v7712_v27  ;;  %v4984_v0 = vmul.f32 1.050701, %v4968_v24  ;;  %v4959_v53 = vmul.f32 1.6732632, %v7480_v33  ;;  %v4972_v11 = vsel %vm4892_vm15, %v11126_v54, %v4956_v1 }
 0x852   :  { %v7716_v56 = vpop.eup %7715  ;;  %v7483_v35 = vadd.f32 -1.0, %v7714_v50  ;;  %v4985_v51 = vmul.f32 1.050701, %v4969_v21  ;;  %4999 = vst.msk [vmem:[#allocation2 + $0x11] sm:$0xff] %vm44_vm0, %v4983_v16  ;;  %v4960_v42 = vmul.f32 1.6732632, %v7481_v47  ;;  %v4973_v15 = vsel %vm4893_vm1, %v11128_v10, %v4957_v60 }
 0x853   :  { %v7718_v59 = vpop.eup %7717  ;;  %v7484_v4 = vadd.f32 -1.0, %v7716_v56  ;;  %v4986_v14 = vmul.f32 1.050701, %v4970_v55  ;;  %5000 = vst.msk [vmem:[#allocation2 + $0x21] sm:$0xff] %vm44_vm0, %v4984_v0  ;;  %v4961_v45 = vmul.f32 1.6732632, %v7482_v17  ;;  %v4974_v54 = vsel %vm4894_vm5, %v11135_v8, %v4958_v28 }
 0x854   :  { %v7720_v26 = vpop.eup %7719  ;;  %v7485_v7 = vadd.f32 -1.0, %v7718_v59  ;;  %v4987_v57 = vmul.f32 1.050701, %v4971_v36  ;;  %5001 = vst.msk [vmem:[#allocation2 + $0x31] sm:$0xff] %vm44_vm0, %v4985_v51  ;;  %vm4897_vm8 = vcmp.gt.f32.partialorder %v11147_v5, 0.0  ;;  %v4975_v10 = vsel %vm4895_vm6, %v11139_v39, %v4959_v53 }
 0x855   :  { %v7722_v23 = vpop.eup %7721  ;;  %v7486_v29 = vadd.f32 -1.0, %v7720_v26  ;;  %v4962_v37 = vmul.f32 1.6732632, %v7483_v35  ;;  %5002 = vst.msk [vmem:[#allocation2 + $0x41] sm:$0xff] %vm44_vm0, %v4986_v14  ;;  %v4963_v41 = vmul.f32 1.6732632, %v7484_v4  ;;  %v4976_v13 = vsel %vm4896_vm7, %v11143_v34, %v4960_v42 }
 0x856   :  { %v7487_v44 = vadd.f32 -1.0, %v7722_v23  ;;  %v4988_v22 = vmul.f32 1.050701, %v4972_v11  ;;  %5003 = vst.msk [vmem:[#allocation2 + $0x51] sm:$0xff] %vm44_vm0, %v4987_v57  ;;  %vm4898_vm9 = vcmp.gt.f32.partialorder %v11150_v40, 0.0  ;;  %vm4899_vm10 = vcmp.gt.f32.partialorder %v11152_v32, 0.0 }
 0x857   :  { %v4964_v48 = vmul.f32 1.6732632, %v7485_v7  ;;  %v4989_v12 = vmul.f32 1.050701, %v4973_v15  ;;  %v4965_v8 = vmul.f32 1.6732632, %v7486_v29  ;;  %v4977_v24 = vsel %vm4897_vm8, %v11147_v5, %v4961_v45 }
 0x858   :  { %v4990_v46 = vmul.f32 1.050701, %v4974_v54  ;;  %vm4900_vm11 = vcmp.gt.f32.partialorder %v11155_v3, 0.0  ;;  %v4966_v39 = vmul.f32 1.6732632, %v7487_v44  ;;  %v4978_v33 = vsel %vm4898_vm9, %v11150_v40, %v4962_v37  ;;  %5004 = vst.msk [vmem:[#allocation2 + $0x61] sm:$0xff] %vm44_vm0, %v4988_v22 }
 0x859   :  { %v4991_v1 = vmul.f32 1.050701, %v4975_v10  ;;  %v4979_v21 = vsel %vm4899_vm10, %v11152_v32, %v4963_v41  ;;  %v4992_v27 = vmul.f32 1.050701, %v4976_v13  ;;  %v5406_v34 = vld [vmem:[#allocation2 + $0x12] sm:$0xff]  ;;  %vm4901_vm12 = vcmp.gt.f32.partialorder %v11157_v25, 0.0 }
 0x85a   :  { %v11240_v47 = vld [vmem:[#allocation2 + $0x10] sm:$0xff]  ;;  %v4980_v5 = vsel %vm4900_vm11, %v11155_v3, %v4964_v48  ;;  %v4993_v55 = vmul.f32 1.050701, %v4977_v24  ;;  %5005 = vst.msk [vmem:[#allocation2 + $0x71] sm:$0xff] %vm44_vm0, %v4989_v12  ;;  %5438 = vrot.lane.b32.xlu1 %v5406_v34, %s7758_s25  ;;  %vm4902_vm13 = vcmp.gt.f32.partialorder %v11165_v30, 0.0  ;;  %v4981_v40 = vsel %vm4901_vm12, %v11157_v25, %v4965_v8  ;;  %v5694_v25 = vld [vmem:[#allocation2 + $0x22] sm:$0xff] }
 0x85b   :  { %v11242_v60 = vld [vmem:[#allocation2 + $0x11] sm:$0xff]  ;;  %5310 = vrot.lane.b32.xlu2 %v11240_v47, %s7760_s20  ;;  %v4994_v32 = vmul.f32 1.050701, %v4978_v33  ;;  %5006 = vst.msk [vmem:[#allocation2 + $0x81] sm:$0xff] %vm44_vm0, %v4990_v46  ;;  %v4982_v3 = vsel %vm4902_vm13, %v11165_v30, %v4966_v39  ;;  %v4995_v16 = vmul.f32 1.050701, %v4979_v21 }
 0x85c   :  { %5120 = vrot.lane.b32.xlu0 %v11242_v60, %s7758_s25  ;;  %5007 = vst.msk [vmem:[#allocation2 + $0xb1] sm:$0xff] %vm44_vm0, %v4991_v1  ;;  %v4996_v50 = vmul.f32 1.050701, %v4980_v5  ;;  %v4997_v17 = vmul.f32 1.050701, %v4981_v40  ;;  %v5279_v36 = vld [vmem:[#allocation2 + $0x20] sm:$0xff] }
 0x85d   :  { %5008 = vst.msk [vmem:[#allocation2 + $0xc1] sm:$0xff] %vm44_vm0, %v4992_v27  ;;  %v4998_v28 = vmul.f32 1.050701, %v4982_v3  ;;  %v11265_v30 = vld [vmem:[#allocation2 + $0x32] sm:$0xff]  ;;  %v11269_v0 = vld [vmem:[#allocation2 + $0x42] sm:$0xff] }
 0x85e   :  { %5009 = vst.msk [vmem:[#allocation2 + $0xd1] sm:$0xff] %vm44_vm0, %v4993_v55  ;;  %v11272_v56 = vld [vmem:[#allocation2 + $0x52] sm:$0xff]  ;;  %v5598_v4 = vld [vmem:[#allocation2 + $0x21] sm:$0xff] }
 0x85f   :  { %5010 = vst.msk [vmem:[#allocation2 + $0xe1] sm:$0xff] %vm44_vm0, %v4994_v32  ;;  %v11276_v35 = vld [vmem:[#allocation2 + $0x62] sm:$0xff]  ;;  %v5280_v57 = vld [vmem:[#allocation2 + $0x30] sm:$0xff]  ;;  %v11392_v27 = vld [vmem:[#allocation3 + $0xb8] sm:$0xff] }
 0x860   :  { %5011 = vst.msk [vmem:[#allocation2 + $0xf1] sm:$0xff] %vm44_vm0, %v4995_v16  ;;  %v5599_v29 = vld [vmem:[#allocation2 + $0x31] sm:$0xff]  ;;  %v11333_v37 = vld [vmem:[#allocation2 + $0x41] sm:$0xff] }
 0x861   :  { %5012 = vst.msk [vmem:[#allocation2 + $0x101] sm:$0xff] %vm44_vm0, %v4996_v50  ;;  %v11280_v53 = vld [vmem:[#allocation2 + $0x72] sm:$0xff]  ;;  %v5281_v54 = vld [vmem:[#allocation2 + $0x40] sm:$0xff]  ;;  %v7501_v40 = vld [vmem:[%s12735_s7 + $0x188] sm:$0xff] }
 0x862   :  { %5013 = vst.msk [vmem:[#allocation2 + $0x111] sm:$0xff] %vm44_vm0, %v4997_v17  ;;  %5312 = vrot.lane.b32.xlu1 %v5279_v36, %s7760_s20  ;;  %v11284_v51 = vld [vmem:[#allocation2 + $0x82] sm:$0xff]  ;;  %v11337_v44 = vld [vmem:[#allocation2 + $0x51] sm:$0xff] }
 0x863   :  { %5216 = vrot.lane.b32.xlu2 %v5406_v34, %s7759_s26  ;;  %5014 = vst.msk [vmem:[#allocation2 + $0x121] sm:$0xff] %vm44_vm0, %v4998_v28  ;;  %v11340_v41 = vld [vmem:[#allocation2 + $0x50] sm:$0xff]  ;;  %v11344_v10 = vld [vmem:[#allocation2 + $0x61] sm:$0xff] }
 0x864   :  { %5534 = vrot.lane.b32.xlu0 %v5279_v36, %s7759_s26  ;;  %5710 = vst.msk [vmem:[#allocation3 + $0x10] sm:$0xff] %vm44_vm0, %v5694_v25  ;;  %v11288_v59 = vld [vmem:[#allocation2 + $0xc2] sm:$0xff]  ;;  %v11355_v13 = vld [vmem:[#allocation2 + $0x71] sm:$0xff] }
 0x865   :  { %5711 = vst.msk [vmem:[#allocation3 + $0x28] sm:$0xff] %vm44_vm0, %v11265_v30  ;;  %v11292_v42 = vld [vmem:[#allocation2 + $0xd2] sm:$0xff]  ;;  %v11350_v22 = vld [vmem:[#allocation2 + $0x60] sm:$0xff] }
 0x866   :  { %5712 = vst.msk [vmem:[#allocation3 + $0x40] sm:$0xff] %vm44_vm0, %v11269_v0  ;;  %v11298_v11 = vld [vmem:[#allocation2 + $0xe2] sm:$0xff]  ;;  %v11360_v12 = vld [vmem:[#allocation2 + $0x70] sm:$0xff] }
 0x867   :  { %5713 = vst.msk [vmem:[#allocation3 + $0x58] sm:$0xff] %vm44_vm0, %v11272_v56  ;;  %v11303_v26 = vld [vmem:[#allocation2 + $0xf2] sm:$0xff]  ;;  %v11364_v8 = vld [vmem:[#allocation2 + $0x81] sm:$0xff] }
 0x868   :  { %5714 = vst.msk [vmem:[#allocation3 + $0x70] sm:$0xff] %vm44_vm0, %v11276_v35  ;;  %v11308_v7 = vld [vmem:[#allocation2 + $0x102] sm:$0xff]  ;;  %v11368_v24 = vld [vmem:[#allocation2 + $0xb0] sm:$0xff] }
 0x869   :  { %5715 = vst.msk [vmem:[#allocation3 + $0x88] sm:$0xff] %vm44_vm0, %v11280_v53  ;;  %v11312_v45 = vld [vmem:[#allocation2 + $0x112] sm:$0xff]  ;;  %v11376_v39 = vld [vmem:[#allocation2 + $0xc0] sm:$0xff] }
 0x86a   :  { %5440 = vrot.lane.b32.xlu1 %v5694_v25, %s7758_s25  ;;  %5716 = vst.msk [vmem:[#allocation3 + $0xa0] sm:$0xff] %vm44_vm0, %v11284_v51  ;;  %v11320_v15 = vld [vmem:[#allocation2 + $0x122] sm:$0xff]  ;;  %v11372_v46 = vld [vmem:[#allocation2 + $0xb1] sm:$0xff] }
 0x86b   :  { %5630 = vrot.lane.b32.xlu2 %v5598_v4, %s7760_s20  ;;  %v5728_v14 = vld [vmem:[#allocation3 + $0x10] sm:$0xff]  ;;  %5718 = vst.msk [vmem:[#allocation3 + $0xd0] sm:$0xff] %vm44_vm0, %v11288_v59  ;;  %v11380_v33 = vld [vmem:[#allocation2 + $0xc1] sm:$0xff] }
 0x86c   :  { %5122 = vrot.lane.b32.xlu0 %v5598_v4, %s7758_s25  ;;  %7525 = vmatmul.msk.f32.vlgmr.msra.gmra.mxu1 %vm44_vm0, %v5728_v14  ;;  %5719 = vst.msk [vmem:[#allocation3 + $0xe8] sm:$0xff] %vm44_vm0, %v11292_v42  ;;  %v5731_v23 = vld [vmem:[#allocation3 + $0x28] sm:$0xff]  ;;  %v11387_v1 = vld [vmem:[#allocation2 + $0xd0] sm:$0xff]  ;;  %v11408_v55 = vld [vmem:[#allocation2 + $0xe0] sm:$0xff] }
 0x86d   :  { %5720 = vst.msk [vmem:[#allocation3 + $0x100] sm:$0xff] %vm44_vm0, %v11298_v11  ;;  %v5734_v48 = vld [vmem:[#allocation3 + $0x40] sm:$0xff]  ;;  %v11394_v34 = vld [vmem:[#allocation2 + $0xd1] sm:$0xff] }
 0x86e   :  { %5721 = vst.msk [vmem:[#allocation3 + $0x118] sm:$0xff] %vm44_vm0, %v11303_v26  ;;  %v5737_v21 = vld [vmem:[#allocation3 + $0x58] sm:$0xff]  ;;  %v7502_v5 = vld [vmem:[%s12735_s7 + $0x190] sm:$0xff]  ;;  %v11413_v32 = vld [vmem:[#allocation2 + $0xe1] sm:$0xff] }
 0x86f   :  { %5722 = vst.msk [vmem:[#allocation3 + $0x130] sm:$0xff] %vm44_vm0, %v11308_v7  ;;  %v11417_v3 = vld [vmem:[#allocation2 + $0xf0] sm:$0xff]  ;;  %v11425_v50 = vld [vmem:[#allocation2 + $0x100] sm:$0xff] }
 0x870   :  { %5723 = vst.msk [vmem:[#allocation3 + $0x148] sm:$0xff] %vm44_vm0, %v11312_v45  ;;  %v11421_v16 = vld [vmem:[#allocation2 + $0xf1] sm:$0xff]  ;;  %v11433_v17 = vld [vmem:[#allocation2 + $0x101] sm:$0xff] }
 0x871   :  { %5390 = vst.msk [vmem:[#allocation3 + $0x8] sm:$0xff] %vm44_vm0, %v11242_v60  ;;  %v7503_v60 = vld [vmem:[%s12735_s7 + $0x198] sm:$0xff]  ;;  %v5740_v28 = vld [vmem:[#allocation3 + $0x70] sm:$0xff]  ;;  %v11454_v14 = vld [vmem:[#allocation2 + $0x121] sm:$0xff] }
 0x872   :  { %5314 = vrot.lane.b32.xlu1 %v5280_v57, %s7760_s20  ;;  %5071 = vst.msk [vmem:[#allocation3 + $0x18] sm:$0xff] %vm44_vm0, %v11240_v47  ;;  %v6961_v47 = vld [vmem:[#allocation2 + $0x92] sm:$0xff]  ;;  %5825 = vmatpush.msrb.mxu2 %v7503_v60 }
 0x873   :  { %5218 = vrot.lane.b32.xlu2 %v5694_v25, %s7759_s26  ;;  %5724 = vst.msk [vmem:[#allocation3 + $0x160] sm:$0xff] %vm44_vm0, %v11320_v15  ;;  %v11439_v25 = vld [vmem:[#allocation2 + $0x110] sm:$0xff]  ;;  %v7491_v60 = vld [vmem:[%s12735_s7 + $0x138] sm:$0xff] }
 0x874   :  { %5536 = vrot.lane.b32.xlu0 %v5280_v57, %s7759_s26  ;;  %7526 = vmatmul.msk.f32.gmra.mxu1 %vm44_vm0, %v5731_v23  ;;  %5391 = vst.msk [vmem:[#allocation3 + $0x20] sm:$0xff] %vm44_vm0, %v5598_v4  ;;  %v11450_v4 = vld [vmem:[#allocation2 + $0x111] sm:$0xff]  ;;  %v7497_v23 = vld [vmem:[%s12735_s7 + $0x168] sm:$0xff] }
 0x875   :  { %5072 = vst.msk [vmem:[#allocation3 + $0x30] sm:$0xff] %vm44_vm0, %v5279_v36  ;;  %5826 = vmatpush.msrb.mxu2 %v7502_v5  ;;  %v7500_v36 = vld [vmem:[%s12735_s7 + $0x180] sm:$0xff]  ;;  %v7490_v5 = vld [vmem:[%s12735_s7 + $0x130] sm:$0xff] }
 0x876   :  { %5392 = vst.msk [vmem:[#allocation3 + $0x38] sm:$0xff] %vm44_vm0, %v5599_v29 }
 0x877   :  { %5073 = vst.msk [vmem:[#allocation3 + $0x48] sm:$0xff] %vm44_vm0, %v5280_v57  ;;  %5827 = vmatpush.msrb.mxu2 %v7501_v40  ;;  %v7498_v57 = vld [vmem:[%s12735_s7 + $0x170] sm:$0xff] }
 0x878   :  { %5393 = vst.msk [vmem:[#allocation3 + $0x50] sm:$0xff] %vm44_vm0, %v11333_v37 }
 0x879   :  { %5074 = vst.msk [vmem:[#allocation3 + $0x60] sm:$0xff] %vm44_vm0, %v5281_v54  ;;  %5828 = vmatpush.msrb.mxu2 %v7500_v36  ;;  %v5062_v36 = vld [vmem:[#allocation2 + $0xa0] sm:$0xff] }
 0x87a   :  { %5442 = vrot.lane.b32.xlu1 %v11265_v30, %s7758_s25  ;;  %5394 = vst.msk [vmem:[#allocation3 + $0x68] sm:$0xff] %vm44_vm0, %v11337_v44 }
 0x87b   :  { %5632 = vrot.lane.b32.xlu2 %v5599_v29, %s7760_s20  ;;  %5075 = vst.msk [vmem:[#allocation3 + $0x78] sm:$0xff] %vm44_vm0, %v11340_v41 }
 0x87c   :  { %5124 = vrot.lane.b32.xlu0 %v5599_v29, %s7758_s25  ;;  %7527 = vmatmul.msk.f32.gmra.mxu1 %vm44_vm0, %v5734_v48  ;;  %5395 = vst.msk [vmem:[#allocation3 + $0x80] sm:$0xff] %vm44_vm0, %v11344_v10  ;;  %v5743_v29 = vld [vmem:[#allocation3 + $0x88] sm:$0xff]  ;;  %v5054_v48 = vld [vmem:[#allocation2] sm:$0xff] }
 0x87d   :  { %5076 = vst.msk [vmem:[#allocation3 + $0x90] sm:$0xff] %vm44_vm0, %v11350_v22 }
 0x87e   :  { %5396 = vst.msk [vmem:[#allocation3 + $0x98] sm:$0xff] %vm44_vm0, %v11355_v13 }
 0x87f   :  { %5077 = vst.msk [vmem:[#allocation3 + $0xa8] sm:$0xff] %vm44_vm0, %v11360_v12 }
 0x880   :  { %5397 = vst.msk [vmem:[#allocation3 + $0xb0] sm:$0xff] %vm44_vm0, %v11364_v8 }
 0x881   :  { %5079 = vst.msk [vmem:[#allocation3 + $0xd8] sm:$0xff] %vm44_vm0, %v11368_v24 }
 0x882   :  { %5316 = vrot.lane.b32.xlu1 %v5281_v54, %s7760_s20  ;;  %5398 = vst.msk [vmem:[#allocation3 + $0xc8] sm:$0xff] %vm44_vm0, %v11372_v46 }
 0x883   :  { %5220 = vrot.lane.b32.xlu2 %v11265_v30, %s7759_s26  ;;  %5080 = vst.msk [vmem:[#allocation3 + $0xf0] sm:$0xff] %vm44_vm0, %v11376_v39  ;;  %v7499_v30 = vld [vmem:[%s12735_s7 + $0x178] sm:$0xff] }
 0x884   :  { %5538 = vrot.lane.b32.xlu0 %v5281_v54, %s7759_s26  ;;  %7528 = vmatmul.msk.f32.gmra.mxu1 %vm44_vm0, %v5737_v21  ;;  %5399 = vst.msk [vmem:[#allocation3 + $0xe0] sm:$0xff] %vm44_vm0, %v11380_v33  ;;  %v7495_v54 = vld [vmem:[%s12735_s7 + $0x158] sm:$0xff]  ;;  %v5746_v21 = vld [vmem:[#allocation3 + $0xa0] sm:$0xff] }
 0x885   :  { %6977 = vst.msk [vmem:[#allocation3 + $0xb8] sm:$0xff] %vm44_vm0, %v6961_v47  ;;  %5829 = vmatpush.msrb.mxu2 %v7499_v30  ;;  %v7492_v47 = vld [vmem:[%s12735_s7 + $0x140] sm:$0xff]  ;;  %v7519_v30 = vld [vmem:[%s12735_s7 + $0x218] sm:$0xff] }
 0x886   :  { %5081 = vst.msk [vmem:[#allocation3 + $0x108] sm:$0xff] %vm44_vm0, %v11387_v1  ;;  %5890 = vmatpush.msrb.mxu0 %v7519_v30  ;;  %v5285_v30 = vld [vmem:[#allocation2 + $0x80] sm:$0xff] }
 0x887   :  { %5400 = vst.msk [vmem:[#allocation3 + $0xf8] sm:$0xff] %vm44_vm0, %v11394_v34  ;;  %5830 = vmatpush.msrb.mxu2 %v7498_v57  ;;  %v5215_v57 = vpop.permute.xlu1 %5214 }
 0x888   :  { %5082 = vst.msk [vmem:[#allocation3 + $0x120] sm:$0xff] %vm44_vm0, %v11408_v55 }
 0x889   :  { %5401 = vst.msk [vmem:[#allocation3 + $0x110] sm:$0xff] %vm44_vm0, %v11413_v32  ;;  %5831 = vmatpush.msrb.mxu2 %v7497_v23  ;;  %v5752_v23 = vld [vmem:[#allocation3 + $0xd0] sm:$0xff] }
 0x88a   :  { %5444 = vrot.lane.b32.xlu1 %v11269_v0, %s7758_s25  ;;  %5083 = vst.msk [vmem:[#allocation3 + $0x138] sm:$0xff] %vm44_vm0, %v11417_v3 }
 0x88b   :  { %5634 = vrot.lane.b32.xlu2 %v11333_v37, %s7760_s20  ;;  %5402 = vst.msk [vmem:[#allocation3 + $0x128] sm:$0xff] %vm44_vm0, %v11421_v16 }
 0x88c   :  { %5126 = vrot.lane.b32.xlu0 %v11333_v37, %s7758_s25  ;;  %7529 = vmatmul.msk.f32.gmra.mxu1 %vm44_vm0, %v5740_v28  ;;  %5084 = vst.msk [vmem:[#allocation3 + $0x150] sm:$0xff] %vm44_vm0, %v11425_v50  ;;  %v7496_v37 = vld [vmem:[%s12735_s7 + $0x160] sm:$0xff] }
 0x88d   :  { %5403 = vst.msk [vmem:[#allocation3 + $0x140] sm:$0xff] %vm44_vm0, %v11433_v17  ;;  %5832 = vmatpush.msrb.mxu2 %v7496_v37  ;;  %v7488_v28 = vld [vmem:[%s12735_s7 + $0x120] sm:$0xff] }
 0x88e   :  { %5085 = vst.msk [vmem:[#allocation3 + $0x168] sm:$0xff] %vm44_vm0, %v11439_v25  ;;  %v7516_v37 = vld [vmem:[%s12735_s7 + $0x200] sm:$0xff] }
 0x88f   :  { %5404 = vst.msk [vmem:[#allocation3 + $0x158] sm:$0xff] %vm44_vm0, %v11450_v4  ;;  %5833 = vmatpush.msrb.mxu2 %v7495_v54  ;;  %v7515_v54 = vld [vmem:[%s12735_s7 + $0x1f8] sm:$0xff] }
 0x890   :  { %5405 = vst.msk [vmem:[#allocation3 + $0x170] sm:$0xff] %vm44_vm0, %v11454_v14 }
 0x891   :  { %5070 = vst.msk [vmem:[#allocation3] sm:$0xff] %vm44_vm0, %v5054_v48  ;;  %v5755_v48 = vld [vmem:[#allocation3 + $0xe8] sm:$0xff] }
 0x892   :  { %5318 = vrot.lane.b32.xlu1 %v11340_v41, %s7760_s20  ;;  %5078 = vst.msk [vmem:[#allocation3 + $0xc0] sm:$0xff] %vm44_vm0, %v5062_v36  ;;  %v7507_v36 = vld [vmem:[%s12735_s7 + $0x1b8] sm:$0xff] }
 0x893   :  { %5222 = vrot.lane.b32.xlu2 %v11269_v0, %s7759_s26  ;;  %v7494_v0 = vld [vmem:[%s12735_s7 + $0x150] sm:$0xff] }
 0x894   :  { %5540 = vrot.lane.b32.xlu0 %v11340_v41, %s7759_s26  ;;  %7530 = vmatmul.msk.f32.gmra.mxu1 %vm44_vm0, %v5743_v29  ;;  %v7493_v41 = vld [vmem:[%s12735_s7 + $0x148] sm:$0xff] }
 0x895   :  { %5834 = vmatpush.msrb.mxu2 %v7494_v0  ;;  %v7517_v29 = vld [vmem:[%s12735_s7 + $0x208] sm:$0xff] }
 0x897   :  { %5835 = vmatpush.msrb.mxu2 %v7493_v41  ;;  %v7513_v41 = vld [vmem:[%s12735_s7 + $0x1e8] sm:$0xff] }
 0x899   :  { %5836 = vmatpush.msrb.mxu2 %v7492_v47 }
 0x89a   :  { %5446 = vrot.lane.b32.xlu1 %v11272_v56, %s7758_s25  ;;  %v5231_v40 = vpop.permute.xlu2 %5230 }
 0x89b   :  { %5636 = vrot.lane.b32.xlu2 %v11337_v44, %s7760_s20  ;;  %5837 = vmatpush.msrb.mxu2 %v7491_v60  ;;  %v5758_v60 = vld [vmem:[#allocation3 + $0x100] sm:$0xff] }
 0x89c   :  { %5128 = vrot.lane.b32.xlu0 %v11337_v44, %s7758_s25  ;;  %7531 = vmatmul.msk.f32.gmra.mxu1 %vm44_vm0, %v5746_v21  ;;  %v7489_v44 = vld [vmem:[%s12735_s7 + $0x128] sm:$0xff]  ;;  %v7512_v21 = vld [vmem:[%s12735_s7 + $0x1e0] sm:$0xff] }
 0x89d   :  { %5838 = vmatpush.msrb.mxu2 %v7490_v5 }
 0x89f   :  { %5839 = vmatpush.msrb.mxu2 %v7489_v44  ;;  %v7509_v44 = vld [vmem:[%s12735_s7 + $0x1c8] sm:$0xff] }
 0x8a1   :  { %5840 = vmatpush.msrb.mxu2 %v7488_v28  ;;  %v7508_v28 = vld [vmem:[%s12735_s7 + $0x1c0] sm:$0xff] }
 0x8a2   :  { %5320 = vrot.lane.b32.xlu1 %v11350_v22, %s7760_s20 }
 0x8a3   :  { %5224 = vrot.lane.b32.xlu2 %v11272_v56, %s7759_s26  ;;  %v7518_v56 = vld [vmem:[%s12735_s7 + $0x210] sm:$0xff] }
 0x8a4   :  { %5542 = vrot.lane.b32.xlu0 %v11350_v22, %s7759_s26  ;;  %7532 = vmatmul.msk.f32.gmra.mxu1 %vm44_vm0, %v11392_v27  ;;  %v5119_v22 = vpop.permute.xlu0 %5118  ;;  %v11531_v27 = vpop.permute.xlu2 %5644 }
 0x8a5   :  { %5891 = vmatpush.msrb.mxu0 %v7518_v56  ;;  %5166 = vst.msk [vmem:[#allocation3] sm:$0xff] %vm268_vm2, %v5119_v22  ;;  %v7505_v56 = vld [vmem:[%s12735_s7 + $0x1a8] sm:$0xff]  ;;  %v5761_v22 = vld [vmem:[#allocation3 + $0x118] sm:$0xff] }
 0x8a6   :  { %5262 = vst.msk [vmem:[#allocation3] sm:$0xff] %vm365_vm3, %v5215_v57 }
 0x8a7   :  { %5892 = vmatpush.msrb.mxu0 %v7517_v29  ;;  %v7504_v29 = vld [vmem:[%s12735_s7 + $0x1a0] sm:$0xff] }
 0x8a9   :  { %5893 = vmatpush.msrb.mxu0 %v7516_v37 }
 0x8aa   :  { %5448 = vrot.lane.b32.xlu1 %v11276_v35, %s7758_s25 }
 0x8ab   :  { %5638 = vrot.lane.b32.xlu2 %v11344_v10, %s7760_s20  ;;  %5894 = vmatpush.msrb.mxu0 %v7515_v54 }
 0x8ac   :  { %5130 = vrot.lane.b32.xlu0 %v11344_v10, %s7758_s25  ;;  %7533 = vmatmul.msk.f32.gmra.mxu1 %vm44_vm0, %v5752_v23  ;;  %v7514_v10 = vld [vmem:[%s12735_s7 + $0x1f0] sm:$0xff]  ;;  %v5135_v47 = vpop.permute.xlu0 %5134 }
 0x8ad   :  { %5895 = vmatpush.msrb.mxu0 %v7514_v10  ;;  %5174 = vst.msk [vmem:[#allocation3 + $0xc0] sm:$0xff] %vm268_vm2, %v5135_v47 }
 0x8ae   :  { %5270 = vst.msk [vmem:[#allocation3 + $0xc0] sm:$0xff] %vm365_vm3, %v5231_v40 }
 0x8af   :  { %5896 = vmatpush.msrb.mxu0 %v7513_v41 }
 0x8b1   :  { %5897 = vmatpush.msrb.mxu0 %v7512_v21 }
 0x8b2   :  { %5322 = vrot.lane.b32.xlu1 %v11360_v12, %s7760_s20 }
 0x8b3   :  { %5226 = vrot.lane.b32.xlu2 %v11276_v35, %s7759_s26  ;;  %v7511_v35 = vld [vmem:[%s12735_s7 + $0x1d8] sm:$0xff] }
 0x8b4   :  { %5544 = vrot.lane.b32.xlu0 %v11360_v12, %s7759_s26  ;;  %7534 = vmatmul.msk.f32.gmra.mxu1 %vm44_vm0, %v5755_v48  ;;  %v7510_v12 = vld [vmem:[%s12735_s7 + $0x1d0] sm:$0xff] }
 0x8b5   :  { %v5311_v0 = vpop.permute.xlu2 %5310  ;;  %5898 = vmatpush.msrb.mxu0 %v7511_v35  ;;  %v11598_v57 = vpop.permute.xlu0 %5548  ;;  %v5191_v48 = vld [vmem:[#allocation2 + $0xb2] sm:$0xff] }
 0x8b6   :  { %5358 = vst.msk [vmem:[#allocation3] sm:$0xff] %vm462_vm4, %v5311_v0 }
 0x8b7   :  { %5899 = vmatpush.msrb.mxu0 %v7510_v12 }
 0x8b9   :  { %5900 = vmatpush.msrb.mxu0 %v7509_v44 }
 0x8ba   :  { %5450 = vrot.lane.b32.xlu1 %v11280_v53, %s7758_s25 }
 0x8bb   :  { %5640 = vrot.lane.b32.xlu2 %v11355_v13, %s7760_s20  ;;  %5901 = vmatpush.msrb.mxu0 %v7508_v28 }
 0x8bc   :  { %5132 = vrot.lane.b32.xlu0 %v11355_v13, %s7758_s25  ;;  %7535 = vmatmul.msk.f32.gmra.mxu1 %vm44_vm0, %v5758_v60  ;;  %v7506_v13 = vld [vmem:[%s12735_s7 + $0x1b0] sm:$0xff] }
 0x8bd   :  { %v5217_v5 = vpop.permute.xlu2 %5216  ;;  %v5726_v40 = vld [vmem:[#allocation3] sm:$0xff]  ;;  %5902 = vmatpush.msrb.mxu0 %v7507_v36 }
 0x8be   :  { %5841 = vmatmul.f32.vlgmr.msrb.gmra.mxu2 %v5726_v40 }
 0x8bf   :  { %5903 = vmatpush.msrb.mxu0 %v7506_v13 }
 0x8c1   :  { %5904 = vmatpush.msrb.mxu0 %v7505_v56 }
 0x8c2   :  { %5324 = vrot.lane.b32.xlu1 %v5285_v30, %s7760_s20 }
 0x8c3   :  { %5228 = vrot.lane.b32.xlu2 %v11280_v53, %s7759_s26  ;;  %5905 = vmatpush.msrb.mxu0 %v7504_v29  ;;  %v5764_v53 = vld [vmem:[#allocation3 + $0x130] sm:$0xff] }
 0x8c4   :  { %5546 = vrot.lane.b32.xlu0 %v5285_v30, %s7759_s26  ;;  %7536 = vmatmul.msk.f32.gmra.mxu1 %vm44_vm0, %v5761_v22 }
 0x8c5   :  { %v5631_v23 = vpop.permute.xlu2 %5630 }
 0x8ca   :  { %5452 = vrot.lane.b32.xlu1 %v11284_v51, %s7758_s25  ;;  %v5767_v51 = vld [vmem:[#allocation3 + $0x148] sm:$0xff] }
 0x8cb   :  { %5642 = vrot.lane.b32.xlu2 %v11364_v8, %s7760_s20 }
 0x8cc   :  { %5136 = vrot.lane.b32.xlu0 %v11372_v46, %s7758_s25  ;;  %7537 = vmatmul.msk.f32.gmra.mxu1 %vm44_vm0, %v5764_v53  ;;  %v5439_v37 = vpop.permute.xlu1 %5438 }
 0x8cd   :  { %v5219_v54 = vpop.permute.xlu2 %5218  ;;  %5486 = vst.msk [vmem:[#allocation3 + $0x8] sm:$0xff] %vm268_vm2, %v5439_v37 }
 0x8ce   :  { %v5121_v10 = vpop.permute.xlu0 %5120 }
 0x8cf   :  { %5167 = vst.msk [vmem:[#allocation3 + $0x18] sm:$0xff] %vm268_vm2, %v5121_v10 }
 0x8d0   :  { %5263 = vst.msk [vmem:[#allocation3 + $0x18] sm:$0xff] %vm365_vm3, %v5217_v5 }
 0x8d2   :  { %5326 = vrot.lane.b32.xlu1 %v11368_v24, %s7760_s20  ;;  %v5770_v24 = vld [vmem:[#allocation3 + $0x160] sm:$0xff] }
 0x8d3   :  { %5232 = vrot.lane.b32.xlu2 %v5191_v48, %s7759_s26 }
 0x8d4   :  { %5550 = vrot.lane.b32.xlu0 %v11376_v39, %s7759_s26  ;;  %7538 = vmatmul.msk.f32.gmra.mxu1 %vm44_vm0, %v5767_v51  ;;  %v5313_v8 = vpop.permute.xlu1 %5312 }
 0x8d5   :  { %v5633_v46 = vpop.permute.xlu2 %5632  ;;  %5359 = vst.msk [vmem:[#allocation3 + $0x18] sm:$0xff] %vm462_vm4, %v5313_v8 }
 0x8d6   :  { %v5535_v0 = vpop.permute.xlu0 %5534 }
 0x8d7   :  { %5582 = vst.msk [vmem:[#allocation3 + $0x8] sm:$0xff] %vm365_vm3, %v5535_v0 }
 0x8d8   :  { %5678 = vst.msk [vmem:[#allocation3 + $0x8] sm:$0xff] %vm462_vm4, %v5631_v23 }
 0x8da   :  { %5454 = vrot.lane.b32.xlu1 %v5191_v48, %s7758_s25 }
 0x8db   :  { %5646 = vrot.lane.b32.xlu2 %v11380_v33, %s7760_s20 }
 0x8dc   :  { %5138 = vrot.lane.b32.xlu0 %v11380_v33, %s7758_s25  ;;  %7539 = vmatmul.msk.f32.gmra.mxu1 %vm44_vm0, %v5770_v24  ;;  %v5441_v41 = vpop.permute.xlu1 %5440  ;;  %v5729_v47 = vld [vmem:[#allocation3 + $0x18] sm:$0xff] }
 0x8dd   :  { %v5221_v21 = vpop.permute.xlu2 %5220  ;;  %5487 = vst.msk [vmem:[#allocation3 + $0x20] sm:$0xff] %vm268_vm2, %v5441_v41  ;;  %5844 = vmatmul.f32.gmra.mxu2 %v5729_v47 }
 0x8de   :  { %v5123_v35 = vpop.permute.xlu0 %5122 }
 0x8df   :  { %5168 = vst.msk [vmem:[#allocation3 + $0x30] sm:$0xff] %vm268_vm2, %v5123_v35  ;;  %v5727_v12 = vld [vmem:[#allocation3 + $0x8] sm:$0xff] }
 0x8e0   :  { %5264 = vst.msk [vmem:[#allocation3 + $0x30] sm:$0xff] %vm365_vm3, %v5219_v54  ;;  %5906 = vmatmul.f32.vlgmr.msrb.gmra.mxu0 %v5727_v12 }
 0x8e2   :  { %5328 = vrot.lane.b32.xlu1 %v11376_v39, %s7760_s20 }
 0x8e3   :  { %5234 = vrot.lane.b32.xlu2 %v11288_v59, %s7759_s26 }
 0x8e4   :  { %5552 = vrot.lane.b32.xlu0 %v11387_v1, %s7759_s26  ;;  %v5315_v33 = vpop.permute.xlu1 %5314 }
 0x8e5   :  { %v5635_v60 = vpop.permute.xlu2 %5634  ;;  %5360 = vst.msk [vmem:[#allocation3 + $0x30] sm:$0xff] %vm462_vm4, %v5315_v33 }
 0x8e6   :  { %v5537_v5 = vpop.permute.xlu0 %5536 }
 0x8e7   :  { %5583 = vst.msk [vmem:[#allocation3 + $0x20] sm:$0xff] %vm365_vm3, %v5537_v5 }
 0x8e8   :  { %5679 = vst.msk [vmem:[#allocation3 + $0x20] sm:$0xff] %vm462_vm4, %v5633_v46 }
 0x8ea   :  { %5456 = vrot.lane.b32.xlu1 %v11288_v59, %s7758_s25 }
 0x8eb   :  { %5648 = vrot.lane.b32.xlu2 %v11394_v34, %s7760_s20 }
 0x8ec   :  { %5140 = vrot.lane.b32.xlu0 %v11394_v34, %s7758_s25  ;;  %v5443_v39 = vpop.permute.xlu1 %5442  ;;  %v5732_v44 = vld [vmem:[#allocation3 + $0x30] sm:$0xff] }
 0x8ed   :  { %v5223_v40 = vpop.permute.xlu2 %5222  ;;  %5488 = vst.msk [vmem:[#allocation3 + $0x38] sm:$0xff] %vm268_vm2, %v5443_v39  ;;  %5847 = vmatmul.f32.gmra.mxu2 %v5732_v44 }
 0x8ee   :  { %v5125_v28 = vpop.permute.xlu0 %5124 }
 0x8ef   :  { %5169 = vst.msk [vmem:[#allocation3 + $0x48] sm:$0xff] %vm268_vm2, %v5125_v28  ;;  %v5730_v36 = vld [vmem:[#allocation3 + $0x20] sm:$0xff]  ;;  %v5517_v28 = vld [vmem:[#allocation2 + $0x130] sm:$0xff] }
 0x8f0   :  { %5265 = vst.msk [vmem:[#allocation3 + $0x48] sm:$0xff] %vm365_vm3, %v5221_v21  ;;  %5909 = vmatmul.f32.gmra.mxu0 %v5730_v36 }
 0x8f2   :  { %5330 = vrot.lane.b32.xlu1 %v11387_v1, %s7760_s20 }
 0x8f3   :  { %5236 = vrot.lane.b32.xlu2 %v11292_v42, %s7759_s26 }
 0x8f4   :  { %5554 = vrot.lane.b32.xlu0 %v11408_v55, %s7759_s26  ;;  %v5317_v59 = vpop.permute.xlu1 %5316 }
 0x8f5   :  { %v5637_v34 = vpop.permute.xlu2 %5636  ;;  %5361 = vst.msk [vmem:[#allocation3 + $0x48] sm:$0xff] %vm462_vm4, %v5317_v59 }
 0x8f6   :  { %v5539_v13 = vpop.permute.xlu0 %5538 }
 0x8f7   :  { %5584 = vst.msk [vmem:[#allocation3 + $0x38] sm:$0xff] %vm365_vm3, %v5539_v13 }
 0x8f8   :  { %5680 = vst.msk [vmem:[#allocation3 + $0x38] sm:$0xff] %vm462_vm4, %v5635_v60 }
 0x8fa   :  { %5458 = vrot.lane.b32.xlu1 %v11292_v42, %s7758_s25 }
 0x8fb   :  { %5650 = vrot.lane.b32.xlu2 %v11413_v32, %s7760_s20 }
 0x8fc   :  { %5142 = vrot.lane.b32.xlu0 %v11413_v32, %s7758_s25  ;;  %v5445_v1 = vpop.permute.xlu1 %5444  ;;  %v5735_v56 = vld [vmem:[#allocation3 + $0x48] sm:$0xff] }
 0x8fd   :  { %v5225_v30 = vpop.permute.xlu2 %5224  ;;  %5489 = vst.msk [vmem:[#allocation3 + $0x50] sm:$0xff] %vm268_vm2, %v5445_v1  ;;  %5850 = vmatmul.f32.gmra.mxu2 %v5735_v56 }
 0x8fe   :  { %v5127_v22 = vpop.permute.xlu0 %5126 }
 0x8ff   :  { %5170 = vst.msk [vmem:[#allocation3 + $0x60] sm:$0xff] %vm268_vm2, %v5127_v22  ;;  %v5733_v23 = vld [vmem:[#allocation3 + $0x38] sm:$0xff] }
 0x900   :  { %5266 = vst.msk [vmem:[#allocation3 + $0x60] sm:$0xff] %vm365_vm3, %v5223_v40  ;;  %5912 = vmatmul.f32.gmra.mxu0 %v5733_v23 }
 0x902   :  { %5332 = vrot.lane.b32.xlu1 %v11408_v55, %s7760_s20 }
 0x903   :  { %5238 = vrot.lane.b32.xlu2 %v11298_v11, %s7759_s26 }
 0x904   :  { %5556 = vrot.lane.b32.xlu0 %v11417_v3, %s7759_s26  ;;  %v5319_v42 = vpop.permute.xlu1 %5318 }
 0x905   :  { %v5639_v32 = vpop.permute.xlu2 %5638  ;;  %5362 = vst.msk [vmem:[#allocation3 + $0x60] sm:$0xff] %vm462_vm4, %v5319_v42 }
 0x906   :  { %v5541_v29 = vpop.permute.xlu0 %5540 }
 0x907   :  { %5585 = vst.msk [vmem:[#allocation3 + $0x50] sm:$0xff] %vm365_vm3, %v5541_v29 }
 0x908   :  { %5681 = vst.msk [vmem:[#allocation3 + $0x50] sm:$0xff] %vm462_vm4, %v5637_v34 }
 0x90a   :  { %5460 = vrot.lane.b32.xlu1 %v11298_v11, %s7758_s25 }
 0x90b   :  { %5652 = vrot.lane.b32.xlu2 %v11421_v16, %s7760_s20 }
 0x90c   :  { %5144 = vrot.lane.b32.xlu0 %v11421_v16, %s7758_s25  ;;  %v5447_v55 = vpop.permute.xlu1 %5446  ;;  %v5738_v37 = vld [vmem:[#allocation3 + $0x60] sm:$0xff] }
 0x90d   :  { %v5227_v53 = vpop.permute.xlu2 %5226  ;;  %5490 = vst.msk [vmem:[#allocation3 + $0x68] sm:$0xff] %vm268_vm2, %v5447_v55  ;;  %5853 = vmatmul.f32.gmra.mxu2 %v5738_v37 }
 0x90e   :  { %v5129_v54 = vpop.permute.xlu0 %5128 }
 0x90f   :  { %5171 = vst.msk [vmem:[#allocation3 + $0x78] sm:$0xff] %vm268_vm2, %v5129_v54  ;;  %v5736_v10 = vld [vmem:[#allocation3 + $0x50] sm:$0xff] }
 0x910   :  { %5267 = vst.msk [vmem:[#allocation3 + $0x78] sm:$0xff] %vm365_vm3, %v5225_v30  ;;  %5915 = vmatmul.f32.gmra.mxu0 %v5736_v10 }
 0x912   :  { %5334 = vrot.lane.b32.xlu1 %v11417_v3, %s7760_s20 }
 0x913   :  { %5240 = vrot.lane.b32.xlu2 %v11303_v26, %s7759_s26 }
 0x914   :  { %5558 = vrot.lane.b32.xlu0 %v11425_v50, %s7759_s26  ;;  %v5321_v11 = vpop.permute.xlu1 %5320 }
 0x915   :  { %v5641_v16 = vpop.permute.xlu2 %5640  ;;  %5363 = vst.msk [vmem:[#allocation3 + $0x78] sm:$0xff] %vm462_vm4, %v5321_v11 }
 0x916   :  { %v5543_v48 = vpop.permute.xlu0 %5542 }
 0x917   :  { %5586 = vst.msk [vmem:[#allocation3 + $0x68] sm:$0xff] %vm365_vm3, %v5543_v48 }
 0x918   :  { %5682 = vst.msk [vmem:[#allocation3 + $0x68] sm:$0xff] %vm462_vm4, %v5639_v32 }
 0x91a   :  { %5462 = vrot.lane.b32.xlu1 %v11303_v26, %s7758_s25 }
 0x91b   :  { %5654 = vrot.lane.b32.xlu2 %v11433_v17, %s7760_s20 }
 0x91c   :  { %5146 = vrot.lane.b32.xlu0 %v11433_v17, %s7758_s25  ;;  %v5449_v3 = vpop.permute.xlu1 %5448  ;;  %v5741_v8 = vld [vmem:[#allocation3 + $0x78] sm:$0xff] }
 0x91d   :  { %v5229_v51 = vpop.permute.xlu2 %5228  ;;  %5491 = vst.msk [vmem:[#allocation3 + $0x80] sm:$0xff] %vm268_vm2, %v5449_v3  ;;  %5856 = vmatmul.f32.gmra.mxu2 %v5741_v8 }
 0x91e   :  { %v5131_v46 = vpop.permute.xlu0 %5130 }
 0x91f   :  { %5172 = vst.msk [vmem:[#allocation3 + $0x90] sm:$0xff] %vm268_vm2, %v5131_v46  ;;  %v5739_v0 = vld [vmem:[#allocation3 + $0x68] sm:$0xff] }
 0x920   :  { %5268 = vst.msk [vmem:[#allocation3 + $0x90] sm:$0xff] %vm365_vm3, %v5227_v53  ;;  %5918 = vmatmul.f32.gmra.mxu0 %v5739_v0 }
 0x922   :  { %5336 = vrot.lane.b32.xlu1 %v11425_v50, %s7760_s20 }
 0x923   :  { %5242 = vrot.lane.b32.xlu2 %v11308_v7, %s7759_s26 }
 0x924   :  { %5560 = vrot.lane.b32.xlu0 %v11439_v25, %s7759_s26  ;;  %v5323_v26 = vpop.permute.xlu1 %5322 }
 0x925   :  { %v5643_v17 = vpop.permute.xlu2 %5642  ;;  %5364 = vst.msk [vmem:[#allocation3 + $0x90] sm:$0xff] %vm462_vm4, %v5323_v26 }
 0x926   :  { %v5545_v24 = vpop.permute.xlu0 %5544 }
 0x927   :  { %5587 = vst.msk [vmem:[#allocation3 + $0x80] sm:$0xff] %vm365_vm3, %v5545_v24 }
 0x928   :  { %5683 = vst.msk [vmem:[#allocation3 + $0x80] sm:$0xff] %vm462_vm4, %v5641_v16 }
 0x92a   :  { %5464 = vrot.lane.b32.xlu1 %v11308_v7, %s7758_s25  ;;  %v5516_v7 = vld [vmem:[#allocation2 + $0x120] sm:$0xff] }
 0x92b   :  { %5656 = vrot.lane.b32.xlu2 %v11450_v4, %s7760_s20 }
 0x92c   :  { %5148 = vrot.lane.b32.xlu0 %v11450_v4, %s7758_s25  ;;  %v5451_v50 = vpop.permute.xlu1 %5450  ;;  %v5744_v21 = vld [vmem:[#allocation3 + $0x90] sm:$0xff] }
 0x92d   :  { %v5233_v41 = vpop.permute.xlu2 %5232  ;;  %5492 = vst.msk [vmem:[#allocation3 + $0x98] sm:$0xff] %vm268_vm2, %v5451_v50  ;;  %5859 = vmatmul.f32.gmra.mxu2 %v5744_v21 }
 0x92e   :  { %v5133_v47 = vpop.permute.xlu0 %5132 }
 0x92f   :  { %5173 = vst.msk [vmem:[#allocation3 + $0xa8] sm:$0xff] %vm268_vm2, %v5133_v47  ;;  %v5742_v35 = vld [vmem:[#allocation3 + $0x80] sm:$0xff] }
 0x930   :  { %5269 = vst.msk [vmem:[#allocation3 + $0xa8] sm:$0xff] %vm365_vm3, %v5229_v51  ;;  %5921 = vmatmul.f32.gmra.mxu0 %v5742_v35 }
 0x932   :  { %5338 = vrot.lane.b32.xlu1 %v11439_v25, %s7760_s20 }
 0x933   :  { %5244 = vrot.lane.b32.xlu2 %v11312_v45, %s7759_s26 }
 0x934   :  { %5562 = vrot.lane.b32.xlu0 %v5516_v7, %s7759_s26  ;;  %v5325_v4 = vpop.permute.xlu1 %5324 }
 0x935   :  { %v5647_v12 = vpop.permute.xlu2 %5646  ;;  %5365 = vst.msk [vmem:[#allocation3 + $0xa8] sm:$0xff] %vm462_vm4, %v5325_v4 }
 0x936   :  { %v5547_v33 = vpop.permute.xlu0 %5546 }
 0x937   :  { %5588 = vst.msk [vmem:[#allocation3 + $0x98] sm:$0xff] %vm365_vm3, %v5547_v33 }
 0x938   :  { %5684 = vst.msk [vmem:[#allocation3 + $0x98] sm:$0xff] %vm462_vm4, %v5643_v17 }
 0x93a   :  { %5466 = vrot.lane.b32.xlu1 %v11312_v45, %s7758_s25  ;;  %v5613_v45 = vld [vmem:[#allocation2 + $0x131] sm:$0xff] }
 0x93b   :  { %5658 = vrot.lane.b32.xlu2 %v11454_v14, %s7760_s20 }
 0x93c   :  { %5468 = vrot.lane.b32.xlu0 %v11320_v15, %s7758_s25  ;;  %v5453_v25 = vpop.permute.xlu1 %5452  ;;  %v5747_v5 = vld [vmem:[#allocation3 + $0xa8] sm:$0xff] }
 0x93d   :  { %v5235_v60 = vpop.permute.xlu2 %5234  ;;  %5493 = vst.msk [vmem:[#allocation3 + $0xb0] sm:$0xff] %vm268_vm2, %v5453_v25  ;;  %5862 = vmatmul.f32.gmra.mxu2 %v5747_v5 }
 0x93e   :  { %v5137_v39 = vpop.permute.xlu0 %5136  ;;  %5589 = vst.msk [vmem:[#allocation3 + $0xb0] sm:$0xff] %vm365_vm3, %v11598_v57 }
 0x93f   :  { %v5745_v40 = vld [vmem:[#allocation3 + $0x98] sm:$0xff]  ;;  %5685 = vst.msk [vmem:[#allocation3 + $0xb0] sm:$0xff] %vm462_vm4, %v11531_v27 }
 0x940   :  { %5924 = vmatmul.f32.gmra.mxu0 %v5745_v40  ;;  %5175 = vst.msk [vmem:[#allocation3 + $0xd8] sm:$0xff] %vm268_vm2, %v5137_v39 }
 0x941   :  { %5271 = vst.msk [vmem:[#allocation3 + $0xd8] sm:$0xff] %vm365_vm3, %v5233_v41 }
 0x942   :  { %5340 = vrot.lane.b32.xlu1 %v5516_v7, %s7760_s20 }
 0x943   :  { %5660 = vrot.lane.b32.xlu2 %v5613_v45, %s7760_s20 }
 0x944   :  { %v5327_v15 = vpop.permute.xlu1 %5326 }
 0x945   :  { %5366 = vst.msk [vmem:[#allocation3 + $0xc0] sm:$0xff] %vm462_vm4, %v5327_v15  ;;  %v5649_v44 = vpop.permute.xlu2 %5648 }
 0x946   :  { %v5551_v14 = vpop.permute.xlu0 %5550  ;;  %v5748_v57 = vld [vmem:[#allocation3 + $0xb0] sm:$0xff] }
 0x948   :  { %5927 = vmatmul.f32.gmra.mxu0 %v5748_v57  ;;  %v5773_v57 = vld [vmem:[#allocation3 + $0x178] sm:$0xff] }
 0x949   :  { %7540 = vmatmul.msk.f32.gmra.mxu1 %vm44_vm0, %v5773_v57 }
 0x94a   :  { %5564 = vrot.lane.b32.xlu1 %v5517_v28, %s7759_s26 }
 0x94c   :  { %v5455_v27 = vpop.permute.xlu1 %5454  ;;  %v5750_v36 = vld [vmem:[#allocation3 + $0xc0] sm:$0xff] }
 0x94d   :  { %5494 = vst.msk [vmem:[#allocation3 + $0xc8] sm:$0xff] %vm268_vm2, %v5455_v27  ;;  %5865 = vmatmul.f32.gmra.mxu2 %v5750_v36  ;;  %v5237_v34 = vpop.permute.xlu2 %5236  ;;  %v11785_v27 = vpop.f32.mrf.mxu1 }
 0x94e   :  { %v5139_v59 = vpop.permute.xlu0 %5138  ;;  %5590 = vst.msk [vmem:[#allocation3 + $0xc8] sm:$0xff] %vm365_vm3, %v5551_v14 }
 0x94f   :  { %5686 = vst.msk [vmem:[#allocation3 + $0xc8] sm:$0xff] %vm462_vm4, %v5647_v12 }
 0x950   :  { %5176 = vst.msk [vmem:[#allocation3 + $0xf0] sm:$0xff] %vm268_vm2, %v5139_v59  ;;  %v6969_v59 = vld [vmem:[#allocation2 + $0x132] sm:$0xff] }
 0x951   :  { %5272 = vst.msk [vmem:[#allocation3 + $0xf0] sm:$0xff] %vm365_vm3, %v5235_v60 }
 0x952   :  { %6985 = vst.msk [vmem:[#allocation3 + $0x178] sm:$0xff] %vm44_vm0, %v6969_v59 }
 0x954   :  { %v5329_v13 = vpop.permute.xlu1 %5328 }
 0x955   :  { %5367 = vst.msk [vmem:[#allocation3 + $0xd8] sm:$0xff] %vm462_vm4, %v5329_v13  ;;  %v5651_v56 = vpop.permute.xlu2 %5650 }
 0x956   :  { %v5553_v1 = vpop.permute.xlu0 %5552  ;;  %v5751_v30 = vld [vmem:[#allocation3 + $0xc8] sm:$0xff] }
 0x957   :  { %5930 = vmatmul.f32.gmra.mxu0 %v5751_v30 }
 0x95c   :  { %v5457_v22 = vpop.permute.xlu1 %5456  ;;  %v5753_v23 = vld [vmem:[#allocation3 + $0xd8] sm:$0xff] }
 0x95d   :  { %5495 = vst.msk [vmem:[#allocation3 + $0xe0] sm:$0xff] %vm268_vm2, %v5457_v22  ;;  %5868 = vmatmul.f32.gmra.mxu2 %v5753_v23  ;;  %v5239_v32 = vpop.permute.xlu2 %5238 }
 0x95e   :  { %v5141_v42 = vpop.permute.xlu0 %5140  ;;  %5591 = vst.msk [vmem:[#allocation3 + $0xe0] sm:$0xff] %vm365_vm3, %v5553_v1  ;;  %v5975_v1 = vpop.f32.mrf.mxu1 }
 0x95f   :  { %5687 = vst.msk [vmem:[#allocation3 + $0xe0] sm:$0xff] %vm462_vm4, %v5649_v44 }
 0x960   :  { %5177 = vst.msk [vmem:[#allocation3 + $0x108] sm:$0xff] %vm268_vm2, %v5141_v42  ;;  %v5842_v42 = vpop.f32.mrf.mxu2 }
 0x961   :  { %5273 = vst.msk [vmem:[#allocation3 + $0x108] sm:$0xff] %vm365_vm3, %v5237_v34 }
 0x964   :  { %v5331_v29 = vpop.permute.xlu1 %5330 }
 0x965   :  { %5368 = vst.msk [vmem:[#allocation3 + $0xf0] sm:$0xff] %vm462_vm4, %v5331_v29  ;;  %v5653_v11 = vpop.permute.xlu2 %5652 }
 0x966   :  { %v5555_v55 = vpop.permute.xlu0 %5554  ;;  %v5754_v53 = vld [vmem:[#allocation3 + $0xe0] sm:$0xff]  ;;  %v5978_v23 = vpop.f32.mrf.mxu1 }
 0x967   :  { %5933 = vmatmul.f32.gmra.mxu0 %v5754_v53 }
 0x968   :  { %v5845_v53 = vpop.f32.mrf.mxu2 }
 0x96c   :  { %v5459_v37 = vpop.permute.xlu1 %5458  ;;  %v5756_v54 = vld [vmem:[#allocation3 + $0xf0] sm:$0xff] }
 0x96d   :  { %5496 = vst.msk [vmem:[#allocation3 + $0xf8] sm:$0xff] %vm268_vm2, %v5459_v37  ;;  %5871 = vmatmul.f32.gmra.mxu2 %v5756_v54  ;;  %v5241_v51 = vpop.permute.xlu2 %5240 }
 0x96e   :  { %v5143_v10 = vpop.permute.xlu0 %5142  ;;  %5592 = vst.msk [vmem:[#allocation3 + $0xf8] sm:$0xff] %vm365_vm3, %v5555_v55  ;;  %v5981_v55 = vpop.f32.mrf.mxu1 }
 0x96f   :  { %5688 = vst.msk [vmem:[#allocation3 + $0xf8] sm:$0xff] %vm462_vm4, %v5651_v56 }
 0x970   :  { %5178 = vst.msk [vmem:[#allocation3 + $0x120] sm:$0xff] %vm268_vm2, %v5143_v10  ;;  %v5848_v54 = vpop.f32.mrf.mxu2 }
 0x971   :  { %5274 = vst.msk [vmem:[#allocation3 + $0x120] sm:$0xff] %vm365_vm3, %v5239_v32  ;;  %v5907_v32 = vpop.f32.mrf.mxu0 }
 0x974   :  { %v5333_v16 = vpop.permute.xlu1 %5332 }
 0x975   :  { %5369 = vst.msk [vmem:[#allocation3 + $0x108] sm:$0xff] %vm462_vm4, %v5333_v16  ;;  %v5655_v26 = vpop.permute.xlu2 %5654 }
 0x976   :  { %v5557_v48 = vpop.permute.xlu0 %5556  ;;  %v5757_v3 = vld [vmem:[#allocation3 + $0xf8] sm:$0xff] }
 0x977   :  { %5936 = vmatmul.f32.gmra.mxu0 %v5757_v3 }
 0x979   :  { %v5910_v37 = vpop.f32.mrf.mxu0 }
 0x97c   :  { %v5461_v8 = vpop.permute.xlu1 %5460  ;;  %v5759_v46 = vld [vmem:[#allocation3 + $0x108] sm:$0xff] }
 0x97d   :  { %5497 = vst.msk [vmem:[#allocation3 + $0x110] sm:$0xff] %vm268_vm2, %v5461_v8  ;;  %5874 = vmatmul.f32.gmra.mxu2 %v5759_v46  ;;  %v5243_v41 = vpop.permute.xlu2 %5242 }
 0x97e   :  { %v5145_v0 = vpop.permute.xlu0 %5144  ;;  %5593 = vst.msk [vmem:[#allocation3 + $0x110] sm:$0xff] %vm365_vm3, %v5557_v48 }
 0x97f   :  { %5689 = vst.msk [vmem:[#allocation3 + $0x110] sm:$0xff] %vm462_vm4, %v5653_v11  ;;  %v5984_v11 = vpop.f32.mrf.mxu1 }
 0x980   :  { %5179 = vst.msk [vmem:[#allocation3 + $0x138] sm:$0xff] %vm268_vm2, %v5145_v0  ;;  %v5851_v16 = vpop.f32.mrf.mxu2 }
 0x981   :  { %5275 = vst.msk [vmem:[#allocation3 + $0x138] sm:$0xff] %vm365_vm3, %v5241_v51  ;;  %v5913_v10 = vpop.f32.mrf.mxu0 }
 0x984   :  { %v5335_v17 = vpop.permute.xlu1 %5334 }
 0x985   :  { %5370 = vst.msk [vmem:[#allocation3 + $0x120] sm:$0xff] %vm462_vm4, %v5335_v17  ;;  %v5657_v12 = vpop.permute.xlu2 %5656 }
 0x986   :  { %v5559_v24 = vpop.permute.xlu0 %5558  ;;  %v5760_v50 = vld [vmem:[#allocation3 + $0x110] sm:$0xff] }
 0x987   :  { %5939 = vmatmul.f32.gmra.mxu0 %v5760_v50  ;;  %v5987_v3 = vpop.f32.mrf.mxu1 }
 0x98c   :  { %v5463_v21 = vpop.permute.xlu1 %5462  ;;  %v5762_v47 = vld [vmem:[#allocation3 + $0x120] sm:$0xff] }
 0x98d   :  { %5498 = vst.msk [vmem:[#allocation3 + $0x128] sm:$0xff] %vm268_vm2, %v5463_v21  ;;  %5877 = vmatmul.f32.gmra.mxu2 %v5762_v47  ;;  %v5245_v39 = vpop.permute.xlu2 %5244  ;;  %v5916_v48 = vpop.f32.mrf.mxu0 }
 0x98e   :  { %v5147_v35 = vpop.permute.xlu0 %5146  ;;  %5594 = vst.msk [vmem:[#allocation3 + $0x128] sm:$0xff] %vm365_vm3, %v5559_v24 }
 0x98f   :  { %5690 = vst.msk [vmem:[#allocation3 + $0x128] sm:$0xff] %vm462_vm4, %v5655_v26  ;;  %v5990_v46 = vpop.f32.mrf.mxu1 }
 0x990   :  { %5180 = vst.msk [vmem:[#allocation3 + $0x150] sm:$0xff] %vm268_vm2, %v5147_v35  ;;  %v5854_v51 = vpop.f32.mrf.mxu2 }
 0x991   :  { %5276 = vst.msk [vmem:[#allocation3 + $0x150] sm:$0xff] %vm365_vm3, %v5243_v41 }
 0x994   :  { %v5337_v7 = vpop.permute.xlu1 %5336 }
 0x995   :  { %5371 = vst.msk [vmem:[#allocation3 + $0x138] sm:$0xff] %vm462_vm4, %v5337_v7  ;;  %v5659_v36 = vpop.permute.xlu2 %5658 }
 0x996   :  { %v5561_v4 = vpop.permute.xlu0 %5560  ;;  %v5763_v33 = vld [vmem:[#allocation3 + $0x128] sm:$0xff] }
 0x997   :  { %5942 = vmatmul.f32.gmra.mxu0 %v5763_v33  ;;  %v11794_v17 = vpop.f32.mrf.mxu1 }
 0x99c   :  { %v5465_v25 = vpop.permute.xlu1 %5464  ;;  %v5765_v60 = vld [vmem:[#allocation3 + $0x138] sm:$0xff] }
 0x99d   :  { %5499 = vst.msk [vmem:[#allocation3 + $0x140] sm:$0xff] %vm268_vm2, %v5465_v25  ;;  %5880 = vmatmul.f32.gmra.mxu2 %v5765_v60  ;;  %v5661_v30 = vpop.permute.xlu2 %5660  ;;  %v5919_v8 = vpop.f32.mrf.mxu0 }
 0x99e   :  { %v5149_v5 = vpop.permute.xlu0 %5148  ;;  %5595 = vst.msk [vmem:[#allocation3 + $0x140] sm:$0xff] %vm365_vm3, %v5561_v4 }
 0x99f   :  { %5691 = vst.msk [vmem:[#allocation3 + $0x140] sm:$0xff] %vm462_vm4, %v5657_v12  ;;  %v11796_v21 = vpop.f32.mrf.mxu1 }
 0x9a0   :  { %5181 = vst.msk [vmem:[#allocation3 + $0x168] sm:$0xff] %vm268_vm2, %v5149_v5  ;;  %v5857_v0 = vpop.f32.mrf.mxu2 }
 0x9a1   :  { %5277 = vst.msk [vmem:[#allocation3 + $0x168] sm:$0xff] %vm365_vm3, %v5245_v39  ;;  %v11807_v39 = vld [vmem:[%s12736_s8 + $0x1] ss:$0 sm:$0xff] }
 0x9a4   :  { %v5339_v40 = vpop.permute.xlu1 %5338 }
 0x9a5   :  { %5372 = vst.msk [vmem:[#allocation3 + $0x150] sm:$0xff] %vm462_vm4, %v5339_v40 }
 0x9a6   :  { %v5563_v45 = vpop.permute.xlu0 %5562  ;;  %v5766_v15 = vld [vmem:[#allocation3 + $0x140] sm:$0xff] }
 0x9a7   :  { %5945 = vmatmul.f32.gmra.mxu0 %v5766_v15  ;;  %v11798_v4 = vpop.f32.mrf.mxu1  ;;  %v5846_v15 = vadd.f32 %v11807_v39, %v5845_v53 }
 0x9a9   :  { %v5911_v57 = vadd.f32 %v5910_v37, %v5846_v15 }
 0x9ac   :  { %v5467_v14 = vpop.permute.xlu1 %5466  ;;  %v5768_v44 = vld [vmem:[#allocation3 + $0x150] sm:$0xff] }
 0x9ad   :  { %5500 = vst.msk [vmem:[#allocation3 + $0x158] sm:$0xff] %vm268_vm2, %v5467_v14  ;;  %5883 = vmatmul.f32.gmra.mxu2 %v5768_v44  ;;  %v5922_v26 = vpop.f32.mrf.mxu0  ;;  %v5843_v14 = vadd.f32 %v11807_v39, %v5842_v42 }
 0x9ae   :  { %v5469_v28 = vpop.permute.xlu0 %5468  ;;  %5596 = vst.msk [vmem:[#allocation3 + $0x158] sm:$0xff] %vm365_vm3, %v5563_v45 }
 0x9af   :  { %5692 = vst.msk [vmem:[#allocation3 + $0x158] sm:$0xff] %vm462_vm4, %v5659_v36  ;;  %v11800_v25 = vpop.f32.mrf.mxu1  ;;  %v5908_v36 = vadd.f32 %v5907_v32, %v5843_v14 }
 0x9b0   :  { %5501 = vst.msk [vmem:[#allocation3 + $0x170] sm:$0xff] %vm268_vm2, %v5469_v28  ;;  %v5860_v24 = vpop.f32.mrf.mxu2  ;;  %v5849_v28 = vadd.f32 %v11807_v39, %v5848_v54 }
 0x9b1   :  { %v5861_v54 = vadd.f32 %v11807_v39, %v5860_v24 }
 0x9b2   :  { %v5914_v59 = vadd.f32 %v5913_v10, %v5849_v28 }
 0x9b4   :  { %v5341_v34 = vpop.permute.xlu1 %5340  ;;  %v11824_v53 = vadd.f32 %v5978_v23, %v5914_v59 }
 0x9b5   :  { %5373 = vst.msk [vmem:[#allocation3 + $0x168] sm:$0xff] %vm462_vm4, %v5341_v34  ;;  %v5852_v34 = vadd.f32 %v11807_v39, %v5851_v16 }
 0x9b6   :  { %v5769_v13 = vld [vmem:[#allocation3 + $0x158] sm:$0xff] }
 0x9b7   :  { %5948 = vmatmul.f32.gmra.mxu0 %v5769_v13  ;;  %v11809_v40 = vpop.f32.mrf.mxu1  ;;  %v11817_v13 = vadd.f32 %v5975_v1, %v5911_v57 }
 0x9b9   :  { %v6063_v1 = vmul.f32 %v11817_v13, %v11817_v13  ;;  %v6025_v23 = vsel %vm44_vm0, %v11817_v13, 0.0 }
 0x9bc   :  { %v5565_v56 = vpop.permute.xlu1 %5564  ;;  %v5771_v22 = vld [vmem:[#allocation3 + $0x168] sm:$0xff] }
 0x9bd   :  { %5597 = vst.msk [vmem:[#allocation3 + $0x170] sm:$0xff] %vm365_vm3, %v5565_v56  ;;  %5886 = vmatmul.f32.gmra.mxu2 %v5771_v22  ;;  %v5925_v50 = vpop.f32.mrf.mxu0  ;;  %v5855_v56 = vadd.f32 %v11807_v39, %v5854_v51  ;;  %v11821_v22 = vadd.f32 %v11785_v27, %v5908_v36 }
 0x9be   :  { %5693 = vst.msk [vmem:[#allocation3 + $0x170] sm:$0xff] %vm462_vm4, %v5661_v30  ;;  %v5917_v30 = vadd.f32 %v5916_v48, %v5852_v34  ;;  %v5926_v48 = vadd.f32 %v5925_v50, %v5861_v54  ;;  %v6079_v50 = vsel %vm44_vm0, %v6063_v1, 0.0 }
 0x9bf   :  { %v5920_v37 = vadd.f32 %v5919_v8, %v5855_v56  ;;  %v11826_v15 = vpop.f32.mrf.mxu1  ;;  %v6062_v27 = vmul.f32 %v11821_v22, %v11821_v22  ;;  %v6064_v8 = vmul.f32 %v11824_v53, %v11824_v53  ;;  %v6024_v14 = vsel %vm44_vm0, %v11821_v22, 0.0 }
 0x9c0   :  { %v5863_v41 = vpop.f32.mrf.mxu2  ;;  %v11831_v16 = vadd.f32 %v5981_v55, %v5917_v30  ;;  %v11853_v36 = vadd.f32 %v5990_v46, %v5926_v48 }
 0x9c1   :  { %v5864_v51 = vadd.f32 %v11807_v39, %v5863_v41  ;;  %v6027_v41 = vsel %vm44_vm0, %v11824_v53, 0.0  ;;  %v6078_v28 = vsel %vm44_vm0, %v6062_v27, 0.0 }
 0x9c2   :  { %v6065_v57 = vmul.f32 %v11831_v16, %v11831_v16  ;;  %v6029_v59 = vsel %vm44_vm0, %v11831_v16, 0.0  ;;  %v6080_v56 = vadd.f32 %v6079_v50, %v6078_v28 }
 0x9c5   :  { %v5772_v29 = vld [vmem:[#allocation3 + $0x170] sm:$0xff]  ;;  %v5928_v47 = vpop.f32.mrf.mxu0 }
 0x9c6   :  { %5951 = vmatmul.f32.gmra.mxu0 %v5772_v29  ;;  %v5858_v29 = vadd.f32 %v11807_v39, %v5857_v0  ;;  %v11840_v0 = vadd.f32 %v5984_v11, %v5920_v37  ;;  %v5929_v24 = vadd.f32 %v5928_v47, %v5864_v51  ;;  %v6026_v11 = vadd.f32 %v6025_v23, %v6024_v14 }
 0x9c7   :  { %v6011_v48 = vpop.f32.mrf.mxu1  ;;  %v6068_v23 = vmul.f32 %v11853_v36, %v11853_v36 }
 0x9c8   :  { %v5923_v32 = vadd.f32 %v5922_v26, %v5858_v29  ;;  %v6066_v34 = vmul.f32 %v11840_v0, %v11840_v0  ;;  %v6028_v29 = vadd.f32 %v6027_v41, %v6026_v11  ;;  %v11864_v46 = vadd.f32 %v11794_v17, %v5929_v24 }
 0x9c9   :  { %v6031_v54 = vsel %vm44_vm0, %v11840_v0, 0.0 }
 0x9ca   :  { %v11842_v26 = vadd.f32 %v5987_v3, %v5923_v32  ;;  %v6083_v32 = vsel %vm44_vm0, %v6065_v57, 0.0  ;;  %v6085_v17 = vsel %vm44_vm0, %v6066_v34, 0.0  ;;  %v6069_v41 = vmul.f32 %v11864_v46, %v11864_v46 }
 0x9cb   :  { %v6037_v34 = vsel %vm44_vm0, %v11864_v46, 0.0 }
 0x9cc   :  { %v6067_v37 = vmul.f32 %v11842_v26, %v11842_v26  ;;  %v6033_v24 = vsel %vm44_vm0, %v11842_v26, 0.0 }
 0x9ce   :  { %v6087_v50 = vsel %vm44_vm0, %v6067_v37, 0.0 }
 0x9d0   :  { %v5866_v35 = vpop.f32.mrf.mxu2 }
 0x9d1   :  { %v5867_v55 = vadd.f32 %v11807_v39, %v5866_v35  ;;  %v6081_v35 = vsel %vm44_vm0, %v6064_v8, 0.0 }
 0x9d2   :  { %v6082_v51 = vadd.f32 %v6081_v35, %v6080_v56 }
 0x9d4   :  { %v5931_v7 = vpop.f32.mrf.mxu0  ;;  %v6084_v14 = vadd.f32 %v6083_v32, %v6082_v51 }
 0x9d5   :  { %v5932_v3 = vadd.f32 %v5931_v7, %v5867_v55 }
 0x9d7   :  { %v11873_v8 = vadd.f32 %v11796_v21, %v5932_v3  ;;  %v6035_v21 = vsel %vm44_vm0, %v11853_v36, 0.0 }
 0x9d9   :  { %v6070_v35 = vmul.f32 %v11873_v8, %v11873_v8  ;;  %v6039_v37 = vsel %vm44_vm0, %v11873_v8, 0.0 }
 0x9e0   :  { %v5869_v12 = vpop.f32.mrf.mxu2 }
 0x9e1   :  { %v5870_v30 = vadd.f32 %v11807_v39, %v5869_v12  ;;  %v6030_v12 = vadd.f32 %v6029_v59, %v6028_v29 }
 0x9e4   :  { %v5934_v33 = vpop.f32.mrf.mxu0 }
 0x9e5   :  { %v5935_v1 = vadd.f32 %v5934_v33, %v5870_v30 }
 0x9e7   :  { %v11886_v57 = vadd.f32 %v11798_v4, %v5935_v1 }
 0x9f0   :  { %v5872_v60 = vpop.f32.mrf.mxu2 }
 0x9f1   :  { %v5873_v27 = vadd.f32 %v11807_v39, %v5872_v60  ;;  %v6032_v60 = vadd.f32 %v6031_v54, %v6030_v12  ;;  %v6071_v54 = vmul.f32 %v11886_v57, %v11886_v57  ;;  %v6041_v12 = vsel %vm44_vm0, %v11886_v57, 0.0 }
 0x9f3   :  { %v6034_v3 = vadd.f32 %v6033_v24, %v6032_v60 }
 0x9f4   :  { %v11802_v5 = vpop.f32.mrf.mxu0 }
 0x9f5   :  { %v5938_v55 = vadd.f32 %v11802_v5, %v5873_v27  ;;  %v6086_v5 = vadd.f32 %v6085_v17, %v6084_v14  ;;  %v6036_v29 = vadd.f32 %v6035_v21, %v6034_v3 }
 0x9f7   :  { %v11896_v30 = vadd.f32 %v11800_v25, %v5938_v55  ;;  %v6038_v51 = vadd.f32 %v6037_v34, %v6036_v29  ;;  %v6014_v55 = vpop.f32.mrf.mxu1 }
 0x9f9   :  { %v6043_v14 = vsel %vm44_vm0, %v11896_v30, 0.0 }
 0xa00   :  { %v5875_v45 = vpop.f32.mrf.mxu2 }
 0xa01   :  { %v5876_v33 = vadd.f32 %v11807_v39, %v5875_v45  ;;  %v6089_v45 = vsel %vm44_vm0, %v6068_v23, 0.0  ;;  %v6072_v23 = vmul.f32 %v11896_v30, %v11896_v30 }
 0xa04   :  { %v11813_v44 = vpop.f32.mrf.mxu0 }
 0xa05   :  { %v5941_v28 = vadd.f32 %v11813_v44, %v5876_v33  ;;  %v6088_v44 = vadd.f32 %v6087_v50, %v6086_v5  ;;  %v6040_v33 = vadd.f32 %v6039_v37, %v6038_v51 }
 0xa07   :  { %v11905_v1 = vadd.f32 %v11809_v40, %v5941_v28  ;;  %v6042_v21 = vadd.f32 %v6041_v12, %v6040_v33  ;;  %v6097_v28 = vsel %vm44_vm0, %v6072_v23, 0.0 }
 0xa09   :  { %v6073_v60 = vmul.f32 %v11905_v1, %v11905_v1 }
 0xa10   :  { %v5878_v42 = vpop.f32.mrf.mxu2 }
 0xa11   :  { %v5879_v11 = vadd.f32 %v11807_v39, %v5878_v42  ;;  %v6091_v42 = vsel %vm44_vm0, %v6069_v41, 0.0 }
 0xa14   :  { %v5943_v10 = vpop.f32.mrf.mxu0 }
 0xa15   :  { %v5944_v4 = vadd.f32 %v5943_v10, %v5879_v11  ;;  %v6090_v10 = vadd.f32 %v6089_v45, %v6088_v44  ;;  %v6044_v45 = vadd.f32 %v6043_v14, %v6042_v21 }
 0xa17   :  { %v11914_v17 = vadd.f32 %v11826_v15, %v5944_v4  ;;  %v6092_v40 = vadd.f32 %v6091_v42, %v6090_v10  ;;  %v6045_v15 = vsel %vm44_vm0, %v11905_v1, 0.0 }
 0xa19   :  { %v6074_v11 = vmul.f32 %v11914_v17, %v11914_v17 }
 0xa1b   :  { %v6101_v29 = vsel %vm44_vm0, %v6074_v11, 0.0 }
 0xa20   :  { %v5881_v47 = vpop.f32.mrf.mxu2 }
 0xa21   :  { %v5882_v56 = vadd.f32 %v11807_v39, %v5881_v47  ;;  %v6093_v47 = vsel %vm44_vm0, %v6070_v35, 0.0  ;;  %v6099_v35 = vsel %vm44_vm0, %v6073_v60, 0.0 }
 0xa22   :  { %v6094_v41 = vadd.f32 %v6093_v47, %v6092_v40 }
 0xa24   :  { %v5946_v7 = vpop.f32.mrf.mxu0 }
 0xa25   :  { %v5947_v27 = vadd.f32 %v5946_v7, %v5882_v56  ;;  %v6095_v7 = vsel %vm44_vm0, %v6071_v54, 0.0  ;;  %v6046_v56 = vadd.f32 %v6045_v15, %v6044_v45 }
 0xa26   :  { %v6096_v3 = vadd.f32 %v6095_v7, %v6094_v41 }
 0xa27   :  { %v11921_v50 = vadd.f32 %v6011_v48, %v5947_v27  ;;  %v6047_v48 = vsel %vm44_vm0, %v11914_v17, 0.0 }
 0xa28   :  { %v6098_v4 = vadd.f32 %v6097_v28, %v6096_v3  ;;  %v6048_v54 = vadd.f32 %v6047_v48, %v6046_v56 }
 0xa29   :  { %v6049_v42 = vsel %vm44_vm0, %v11921_v50, 0.0 }
 0xa30   :  { %v5884_v59 = vpop.f32.mrf.mxu2 }
 0xa31   :  { %v5885_v25 = vadd.f32 %v11807_v39, %v5884_v59  ;;  %v6075_v59 = vmul.f32 %v11921_v50, %v11921_v50 }
 0xa33   :  { %v6103_v10 = vsel %vm44_vm0, %v6075_v59, 0.0 }
 0xa34   :  { %v5949_v32 = vpop.f32.mrf.mxu0 }
 0xa35   :  { %v5950_v24 = vadd.f32 %v5949_v32, %v5885_v25  ;;  %v6100_v32 = vadd.f32 %v6099_v35, %v6098_v4  ;;  %v6017_v25 = vpop.f32.mrf.mxu1 }
 0xa37   :  { %v11928_v5 = vadd.f32 %v6014_v55, %v5950_v24  ;;  %v6102_v12 = vadd.f32 %v6101_v29, %v6100_v32 }
 0xa39   :  { %v6076_v37 = vmul.f32 %v11928_v5, %v11928_v5  ;;  %v6051_v51 = vsel %vm44_vm0, %v11928_v5, 0.0  ;;  %v6104_v55 = vadd.f32 %v6103_v10, %v6102_v12  ;;  %v7541_v12 = vld [vmem:[%s12737_s9 + $0x1] sm:$0x1] }
 0xa3b   :  { %v6105_v23 = vsel %vm44_vm0, %v6076_v37, 0.0 }
 0xa3c   :  { %v6106_v60 = vadd.f32 %v6105_v23, %v6104_v55 }
 0xa40   :  { %v5887_v34 = vpop.f32.mrf.mxu2 }
 0xa41   :  { %v5888_v44 = vadd.f32 %v11807_v39, %v5887_v34  ;;  %v6050_v39 = vadd.f32 %v6049_v42, %v6048_v54 }
 0xa43   :  { %v5952_v27 = vpop.f32.mrf.mxu0  ;;  %v6052_v40 = vadd.f32 %v6051_v51, %v6050_v39 }
 0xa44   :  { %v5953_v47 = vadd.f32 %v5952_v27, %v5888_v44 }
 0xa46   :  { %v11945_v24 = vadd.f32 %v6017_v25, %v5953_v47 }
 0xa48   :  { %v6053_v33 = vsel %vm44_vm0, %v11945_v24, 0.0  ;;  %v6077_v7 = vmul.f32 %v11945_v24, %v11945_v24 }
 0xa49   :  { %v6054_v14 = vadd.f32 %v6053_v33, %v6052_v40  ;;  %v7542_v33 = vld [vmem:[%s12738_s10 + $0x1] sm:$0x1] }
 0xa4a   :  { %v6107_v41 = vsel %vm44_vm0, %v6077_v7, 0.0 }
 0xa4b   :  { %v6055_v21 = vrot.slane %v6054_v14, 4  ;;  %v6108_v28 = vadd.f32 %v6107_v41, %v6106_v60 }
 0xa4d   :  { %v6056_v15 = vadd.f32 %v6055_v21, %v6054_v14  ;;  %v6109_v11 = vrot.slane %v6108_v28, 4 }
 0xa4f   :  { %v6057_v3 = vrot.slane %v6056_v15, 2  ;;  %v6110_v45 = vadd.f32 %v6109_v11, %v6108_v28 }
 0xa51   :  { %v6058_v35 = vadd.f32 %v6057_v3, %v6056_v15  ;;  %v6111_v48 = vrot.slane %v6110_v45, 2 }
 0xa53   :  { %v6059_v59 = vrot.slane %v6058_v35, 1  ;;  %v6112_v34 = vadd.f32 %v6111_v48, %v6110_v45 }
 0xa55   :  { %v6060_v4 = vadd.f32 %v6059_v59, %v6058_v35  ;;  %v6113_v56 = vrot.slane %v6112_v34, 1 }
 0xa57   :  { %v6061_v44 = vmul.f32 0.0078125, %v6060_v4  ;;  %v6114_v29 = vadd.f32 %v6113_v56, %v6112_v34 }
 0xa59   :  { %v6115_v42 = vmul.f32 0.0078125, %v6114_v29  ;;  %v6116_v37 = vmul.f32 %v6061_v44, %v6061_v44 }
 0xa5b   :  { %v6117_v32 = vsub.f32 %v6115_v42, %v6116_v37 }
 0xa5d   :  { %v6118_v54 = vadd.f32 1e-05, %v6117_v32 }
 0xa5f   :  { %7723 = vrsqrt.f32 %v6118_v54  ;;  %vm6125_vm15 = vweird.f32 %v6118_v54 }
 0xa65   :  { %v7724_v27 = vpop.eup %7723 }
 0xa66   :  { %v6120_v25 = vmul.f32 %v7724_v27, %v6118_v54  ;;  %vm6126_vm14 = vweird.f32 %v7724_v27 }
 0xa67   :  { %vm6127_vm1 = vmor %vm6125_vm15, %vm6126_vm14 }
 0xa68   :  { %v6121_v10 = vmul.f32 %v7724_v27, %v6120_v25 }
 0xa6a   :  { %v6122_v51 = vmul.f32 0.5, %v6121_v10 }
 0xa6c   :  { %v6123_v47 = vsub.f32 1.5, %v6122_v51 }
 0xa6e   :  { %v6124_v39 = vmul.f32 %v7724_v27, %v6123_v47 }
 0xa70   :  { %v6128_v23 = vsel %vm6127_vm1, %v7724_v27, %v6124_v39 }
 0xa71   :  { %v6129_v55 = vmul.f32 %v7541_v12, %v6128_v23 }
 0xa73   :  { %v6130_v40 = vmul.f32 %v6129_v55, %v6061_v44  ;;  %v6133_v14 = vperm.slane %v6129_v55, 0 }
 0xa75   :  { %v6131_v7 = vsub.f32 %v7542_v33, %v6130_v40  ;;  %v6135_v41 = vmul.f32 %v6133_v14, %v11821_v22  ;;  %v6136_v21 = vmul.f32 %v6133_v14, %v11817_v13  ;;  %v6137_v28 = vmul.f32 %v6133_v14, %v11824_v53  ;;  %v6346_v33 = vld [vmem:[#allocation2 + $0x1] sm:$0xff] }
 0xa76   :  { %v6138_v15 = vmul.f32 %v6133_v14, %v11831_v16  ;;  %v6139_v11 = vmul.f32 %v6133_v14, %v11840_v0  ;;  %v6140_v48 = vmul.f32 %v6133_v14, %v11842_v26  ;;  %v6141_v34 = vmul.f32 %v6133_v14, %v11853_v36  ;;  %6378 = vrot.lane.b32.xlu0 %v6346_v33, %s7758_s25 }
 0xa77   :  { %v6152_v60 = vperm.slane %v6131_v7, 0  ;;  %v6142_v4 = vmul.f32 %v6133_v14, %v11864_v46  ;;  %v6143_v22 = vmul.f32 %v6133_v14, %v11873_v8  ;;  %v6144_v13 = vmul.f32 %v6133_v14, %v11886_v57  ;;  %v6442_v7 = vld [vmem:[#allocation2 + $0x2] sm:$0xff] }
 0xa78   :  { %v6145_v53 = vmul.f32 %v6133_v14, %v11896_v30  ;;  %v6146_v16 = vmul.f32 %v6133_v14, %v11905_v1  ;;  %v6147_v46 = vmul.f32 %v6133_v14, %v11914_v17  ;;  %v6148_v8 = vmul.f32 %v6133_v14, %v11921_v50  ;;  %6474 = vrot.lane.b32.xlu1 %v6442_v7, %s7759_s26 }
 0xa79   :  { %v6154_v3 = vadd.f32 %v6152_v60, %v6135_v41  ;;  %v6155_v45 = vadd.f32 %v6152_v60, %v6136_v21  ;;  %v6156_v35 = vadd.f32 %v6152_v60, %v6137_v28  ;;  %v6157_v59 = vadd.f32 %v6152_v60, %v6138_v15  ;;  %v7069_v41 = vld [vmem:[%s12739_s11 + $0x118] sm:$0xff]  ;;  %v7068_v21 = vld [vmem:[%s12739_s11 + $0x110] sm:$0xff] }
 0xa7a   :  { %v6158_v56 = vadd.f32 %v6152_v60, %v6139_v11  ;;  %v6159_v0 = vadd.f32 %v6152_v60, %v6140_v48  ;;  %v6160_v44 = vadd.f32 %v6152_v60, %v6141_v34  ;;  %v6161_v57 = vadd.f32 %v6152_v60, %v6142_v4  ;;  %7264 = vmatpush.msra.mxu0 %v7069_v41 }
 0xa7b   :  { %v11971_v29 = vadd.f32 %v6154_v3, %v10269_v43  ;;  %v11974_v26 = vadd.f32 %v6155_v45, %v10274_v31  ;;  %v11977_v36 = vadd.f32 %v6156_v35, %v10276_v20  ;;  %v11982_v30 = vadd.f32 %v6157_v59, %v10283_v18  ;;  %v7067_v59 = vld [vmem:[%s12739_s11 + $0x108] sm:$0xff] }
 0xa7c   :  { %v6149_v1 = vmul.f32 %v6133_v14, %v11928_v5  ;;  %v6150_v42 = vmul.f32 %v6133_v14, %v11945_v24  ;;  %v6162_v43 = vadd.f32 %v6152_v60, %v6143_v22  ;;  %v11987_v37 = vadd.f32 %v6158_v56, %v10290_v62  ;;  %v12788_v14 = vld [vmem:[#allocation4_spill] sm:$0xff]  ;;  %7265 = vmatpush.msra.mxu0 %v7068_v21 }
 0xa7d   :  { %v6163_v31 = vadd.f32 %v6152_v60, %v6144_v13  ;;  %v6164_v32 = vadd.f32 %v6152_v60, %v6145_v53  ;;  %v6165_v20 = vadd.f32 %v6152_v60, %v6146_v16  ;;  %v11990_v54 = vadd.f32 %v6159_v0, %v10303_v49  ;;  %v6769_v0 = vld [vmem:[#allocation2 + $0x90] sm:$0xff] }
 0xa7e   :  { %v11993_v17 = vadd.f32 %v6160_v44, %v10309_v63  ;;  %v6202_v18 = vmul.f32 1.442695, %v11971_v29  ;;  %v6204_v50 = vmul.f32 1.442695, %v11974_v26  ;;  %v6206_v5 = vmul.f32 1.442695, %v11977_v36  ;;  %7266 = vmatpush.msra.mxu0 %v7067_v59 }
 0xa7f   :  { %v6166_v24 = vadd.f32 %v6152_v60, %v6147_v46  ;;  %v6167_v27 = vadd.f32 %v6152_v60, %v6148_v8  ;;  %v11999_v62 = vadd.f32 %v6161_v57, %v10313_v38  ;;  %v6208_v25 = vmul.f32 1.442695, %v11982_v30  ;;  %v6354_v44 = vld [vmem:[#allocation2 + $0xa1] sm:$0xff] }
 0xa80   :  { %v6168_v10 = vadd.f32 %v6152_v60, %v6149_v1  ;;  %v12003_v49 = vadd.f32 %v6162_v43, %v10317_v61  ;;  %7725 = vpow2.f32 %v6202_v18  ;;  %v6210_v63 = vmul.f32 1.442695, %v11987_v37  ;;  %6808 = vrot.lane.b32.xlu1 %v6769_v0, %s7759_s26  ;;  %6394 = vrot.lane.b32.xlu0 %v6354_v44, %s7758_s25 }
 0xa81   :  { %v6169_v51 = vadd.f32 %v6152_v60, %v6150_v42  ;;  %v12007_v47 = vadd.f32 %v6163_v31, %v10321_v19  ;;  %7727 = vpow2.f32 %v6204_v50  ;;  %v6212_v12 = vmul.f32 1.442695, %v11990_v54  ;;  %v7066_v42 = vld [vmem:[%s12739_s11 + $0x100] sm:$0xff] }
 0xa82   :  { %v12011_v39 = vadd.f32 %v6164_v32, %v10327_v52  ;;  %7729 = vpow2.f32 %v6206_v5  ;;  %v6214_v38 = vmul.f32 1.442695, %v11993_v17  ;;  %v12015_v23 = vadd.f32 %v6165_v20, %v10333_v6  ;;  %7267 = vmatpush.msra.mxu0 %v7066_v42 }
 0xa83   :  { %v12018_v61 = vadd.f32 %v6166_v24, %v10338_v9  ;;  %7731 = vpow2.f32 %v6208_v25  ;;  %v6216_v55 = vmul.f32 1.442695, %v11999_v62  ;;  %v12022_v19 = vadd.f32 %v6167_v27, %v10342_v58  ;;  %v6865_v58 = vld [vmem:[#allocation2 + $0x91] sm:$0xff] }
 0xa84   :  { %v12025_v40 = vadd.f32 %v6168_v10, %v10346_v2  ;;  %7733 = vpow2.f32 %v6210_v63  ;;  %v6218_v52 = vmul.f32 1.442695, %v12003_v49  ;;  %v12029_v6 = vadd.f32 %v6169_v51, %v12788_v14  ;;  %6904 = vrot.lane.b32.xlu2 %v6865_v58, %s7760_s20 }
 0xa85   :  { %vm6186_vm5 = vcmp.gt.f32.partialorder %v11971_v29, 0.0  ;;  %7735 = vpow2.f32 %v6212_v12  ;;  %v6220_v9 = vmul.f32 1.442695, %v12007_v47  ;;  %vm6187_vm6 = vcmp.gt.f32.partialorder %v11974_v26, 0.0 }
 0xa86   :  { %v7726_v2 = vpop.eup %7725  ;;  %vm6188_vm7 = vcmp.gt.f32.partialorder %v11977_v36, 0.0  ;;  %7737 = vpow2.f32 %v6214_v38  ;;  %v6222_v60 = vmul.f32 1.442695, %v12011_v39  ;;  %vm6189_vm8 = vcmp.gt.f32.partialorder %v11982_v30, 0.0 }
 0xa87   :  { %v7728_v28 = vpop.eup %7727  ;;  %7739 = vpow2.f32 %v6216_v55  ;;  %v6224_v15 = vmul.f32 1.442695, %v12015_v23  ;;  %v7543_v11 = vadd.f32 -1.0, %v7726_v2  ;;  %vm6190_vm9 = vcmp.gt.f32.partialorder %v11987_v37, 0.0  ;;  %v6450_v2 = vld [vmem:[#allocation2 + $0xa2] sm:$0xff] }
 0xa88   :  { %v7730_v3 = vpop.eup %7729  ;;  %7741 = vpow2.f32 %v6218_v52  ;;  %v6226_v45 = vmul.f32 1.442695, %v12018_v61  ;;  %v6228_v35 = vmul.f32 1.442695, %v12022_v19  ;;  %v7544_v48 = vadd.f32 -1.0, %v7728_v28  ;;  %6490 = vrot.lane.b32.xlu1 %v6450_v2, %s7759_s26 }
 0xa89   :  { %v7732_v34 = vpop.eup %7731  ;;  %7743 = vpow2.f32 %v6220_v9  ;;  %v6230_v4 = vmul.f32 1.442695, %v12025_v40  ;;  %v7545_v22 = vadd.f32 -1.0, %v7730_v3  ;;  %v6250_v56 = vmul.f32 1.6732632, %v7543_v11 }
 0xa8a   :  { %v7734_v13 = vpop.eup %7733  ;;  %vm6191_vm10 = vcmp.gt.f32.partialorder %v11990_v54, 0.0  ;;  %7745 = vpow2.f32 %v6222_v60  ;;  %v7546_v53 = vadd.f32 -1.0, %v7732_v34  ;;  %v6251_v16 = vmul.f32 1.6732632, %v7544_v48 }
 0xa8b   :  { %v7736_v46 = vpop.eup %7735  ;;  %vm6192_vm11 = vcmp.gt.f32.partialorder %v11993_v17, 0.0  ;;  %7747 = vpow2.f32 %v6224_v15  ;;  %v6232_v8 = vmul.f32 1.442695, %v12029_v6  ;;  %v7547_v57 = vadd.f32 -1.0, %v7734_v13 }
 0xa8c   :  { %v6252_v1 = vmul.f32 1.6732632, %v7545_v22  ;;  %v7738_v43 = vpop.eup %7737  ;;  %vm6193_vm12 = vcmp.gt.f32.partialorder %v11999_v62, 0.0  ;;  %7749 = vpow2.f32 %v6226_v45  ;;  %v7548_v31 = vadd.f32 -1.0, %v7736_v46 }
 0xa8d   :  { %v6253_v32 = vmul.f32 1.6732632, %v7546_v53  ;;  %v7740_v20 = vpop.eup %7739  ;;  %vm6194_vm13 = vcmp.gt.f32.partialorder %v12003_v49, 0.0  ;;  %7751 = vpow2.f32 %v6228_v35  ;;  %v7549_v18 = vadd.f32 -1.0, %v7738_v43 }
 0xa8e   :  { %v6254_v50 = vmul.f32 1.6732632, %v7547_v57  ;;  %v6266_v5 = vsel %vm6186_vm5, %v11971_v29, %v6250_v56  ;;  %v7742_v24 = vpop.eup %7741  ;;  %vm6195_vm14 = vcmp.gt.f32.partialorder %v12007_v47, 0.0  ;;  %7753 = vpow2.f32 %v6230_v4 }
 0xa8f   :  { %v7550_v27 = vadd.f32 -1.0, %v7740_v20  ;;  %v6267_v25 = vsel %vm6187_vm6, %v11974_v26, %v6251_v16  ;;  %v7744_v10 = vpop.eup %7743  ;;  %7755 = vpow2.f32 %v6232_v8  ;;  %v7551_v63 = vadd.f32 -1.0, %v7742_v24 }
 0xa90   :  { %v6255_v51 = vmul.f32 1.6732632, %v7548_v31  ;;  %v6268_v29 = vsel %vm6188_vm7, %v11977_v36, %v6252_v1  ;;  %v7746_v12 = vpop.eup %7745  ;;  %v7552_v38 = vadd.f32 -1.0, %v7744_v10  ;;  %v6256_v55 = vmul.f32 1.6732632, %v7549_v18 }
 0xa91   :  { %v6269_v52 = vsel %vm6189_vm8, %v11982_v30, %v6253_v32  ;;  %v6282_v33 = vmul.f32 1.050701, %v6266_v5  ;;  %v7748_v7 = vpop.eup %7747  ;;  %v7553_v14 = vadd.f32 -1.0, %v7746_v12  ;;  %v6257_v26 = vmul.f32 1.6732632, %v7550_v27 }
 0xa92   :  { %v6270_v9 = vsel %vm6190_vm9, %v11987_v37, %v6254_v50  ;;  %v6283_v58 = vmul.f32 1.050701, %v6267_v25  ;;  %v7750_v60 = vpop.eup %7749  ;;  %v7554_v41 = vadd.f32 -1.0, %v7748_v7  ;;  %v6258_v36 = vmul.f32 1.6732632, %v7551_v63 }
 0xa93   :  { %v6284_v21 = vmul.f32 1.050701, %v6268_v29  ;;  %6298 = vst.msk [vmem:[#allocation2 + $0x11] sm:$0xff] %vm44_vm0, %v6282_v33  ;;  %v7752_v28 = vpop.eup %7751  ;;  %v7555_v15 = vadd.f32 -1.0, %v7750_v60  ;;  %v6259_v11 = vmul.f32 1.6732632, %v7552_v38  ;;  %v6271_v30 = vsel %vm6191_vm10, %v11990_v54, %v6255_v51 }
 0xa94   :  { %v6285_v3 = vmul.f32 1.050701, %v6269_v52  ;;  %6299 = vst.msk [vmem:[#allocation2 + $0x21] sm:$0xff] %vm44_vm0, %v6283_v58  ;;  %v7754_v45 = vpop.eup %7753  ;;  %v7556_v37 = vadd.f32 -1.0, %v7752_v28  ;;  %v6260_v35 = vmul.f32 1.6732632, %v7553_v14  ;;  %v6272_v48 = vsel %vm6192_vm11, %v11993_v17, %v6256_v55 }
 0xa95   :  { %v6286_v59 = vmul.f32 1.050701, %v6270_v9  ;;  %6300 = vst.msk [vmem:[#allocation2 + $0x31] sm:$0xff] %vm44_vm0, %v6284_v21  ;;  %v7756_v34 = vpop.eup %7755  ;;  %vm6196_vm15 = vcmp.gt.f32.partialorder %v12011_v39, 0.0  ;;  %v7557_v4 = vadd.f32 -1.0, %v7754_v45  ;;  %v6273_v54 = vsel %vm6193_vm12, %v11999_v62, %v6257_v26 }
 0xa96   :  { %v6261_v22 = vmul.f32 1.6732632, %v7554_v41  ;;  %6301 = vst.msk [vmem:[#allocation2 + $0x41] sm:$0xff] %vm44_vm0, %v6285_v3  ;;  %v7558_v56 = vadd.f32 -1.0, %v7756_v34  ;;  %v6262_v13 = vmul.f32 1.6732632, %v7555_v15  ;;  %v6274_v17 = vsel %vm6194_vm13, %v12003_v49, %v6258_v36 }
 0xa97   :  { %v6287_v53 = vmul.f32 1.050701, %v6271_v30  ;;  %6302 = vst.msk [vmem:[#allocation2 + $0x51] sm:$0xff] %vm44_vm0, %v6286_v59  ;;  %vm6197_vm1 = vcmp.gt.f32.partialorder %v12015_v23, 0.0  ;;  %v6263_v16 = vmul.f32 1.6732632, %v7556_v37  ;;  %v6275_v62 = vsel %vm6195_vm14, %v12007_v47, %v6259_v11 }
 0xa98   :  { %v6288_v0 = vmul.f32 1.050701, %v6272_v48  ;;  %vm6198_vm5 = vcmp.gt.f32.partialorder %v12018_v61, 0.0  ;;  %v6264_v44 = vmul.f32 1.6732632, %v7557_v4  ;;  %v6276_v46 = vsel %vm6196_vm15, %v12011_v39, %v6260_v35 }
 0xa99   :  { %v6289_v8 = vmul.f32 1.050701, %v6273_v54  ;;  %vm6199_vm6 = vcmp.gt.f32.partialorder %v12022_v19, 0.0  ;;  %v6265_v49 = vmul.f32 1.6732632, %v7558_v56  ;;  %v6277_v57 = vsel %vm6197_vm1, %v12015_v23, %v6261_v22  ;;  %6303 = vst.msk [vmem:[#allocation2 + $0x61] sm:$0xff] %vm44_vm0, %v6287_v53 }
 0xa9a   :  { %v6290_v1 = vmul.f32 1.050701, %v6274_v17  ;;  %v6278_v42 = vsel %vm6198_vm5, %v12018_v61, %v6262_v13  ;;  %v6291_v43 = vmul.f32 1.050701, %v6275_v62  ;;  %v6666_v31 = vld [vmem:[#allocation2 + $0x12] sm:$0xff]  ;;  %vm6200_vm7 = vcmp.gt.f32.partialorder %v12025_v40, 0.0 }
 0xa9b   :  { %v12111_v47 = vld [vmem:[#allocation2 + $0x20] sm:$0xff]  ;;  %v12113_v32 = vld [vmem:[#allocation2 + $0x10] sm:$0xff]  ;;  %v6279_v39 = vsel %vm6199_vm6, %v12022_v19, %v6263_v16  ;;  %v6292_v20 = vmul.f32 1.050701, %v6276_v46  ;;  %6304 = vst.msk [vmem:[#allocation2 + $0x71] sm:$0xff] %vm44_vm0, %v6288_v0  ;;  %6698 = vrot.lane.b32.xlu0 %v6666_v31, %s7758_s25  ;;  %vm6201_vm8 = vcmp.gt.f32.partialorder %v12029_v6, 0.0  ;;  %v6280_v23 = vsel %vm6200_vm7, %v12025_v40, %v6264_v44 }
 0xa9c   :  { %6570 = vrot.lane.b32.xlu2 %v12113_v32, %s7760_s20  ;;  %v6293_v61 = vmul.f32 1.050701, %v6277_v57  ;;  %6305 = vst.msk [vmem:[#allocation2 + $0x81] sm:$0xff] %vm44_vm0, %v6289_v8  ;;  %v6281_v18 = vsel %vm6201_vm8, %v12029_v6, %v6265_v49  ;;  %v6294_v50 = vmul.f32 1.050701, %v6278_v42  ;;  %6794 = vrot.lane.b32.xlu1 %v12111_v47, %s7759_s26  ;;  %v6954_v40 = vld [vmem:[#allocation2 + $0x22] sm:$0xff] }
 0xa9d   :  { %6306 = vst.msk [vmem:[#allocation2 + $0xb1] sm:$0xff] %vm44_vm0, %v6290_v1  ;;  %v6295_v19 = vmul.f32 1.050701, %v6279_v39  ;;  %v6296_v5 = vmul.f32 1.050701, %v6280_v23  ;;  %v6858_v6 = vld [vmem:[#allocation2 + $0x21] sm:$0xff] }
 0xa9e   :  { %6307 = vst.msk [vmem:[#allocation2 + $0xc1] sm:$0xff] %vm44_vm0, %v6291_v43  ;;  %v6297_v24 = vmul.f32 1.050701, %v6281_v18  ;;  %v6347_v27 = vld [vmem:[#allocation2 + $0x11] sm:$0xff]  ;;  %v12139_v10 = vld [vmem:[#allocation2 + $0x42] sm:$0xff] }
 0xa9f   :  { %6308 = vst.msk [vmem:[#allocation2 + $0xd1] sm:$0xff] %vm44_vm0, %v6292_v20  ;;  %v12136_v25 = vld [vmem:[#allocation2 + $0x32] sm:$0xff]  ;;  %v12204_v41 = vld [vmem:[#allocation2 + $0x41] sm:$0xff] }
 0xaa0   :  { %6309 = vst.msk [vmem:[#allocation2 + $0xe1] sm:$0xff] %vm44_vm0, %v6293_v61  ;;  %v12143_v63 = vld [vmem:[#allocation2 + $0x52] sm:$0xff]  ;;  %v12147_v51 = vld [vmem:[#allocation2 + $0x62] sm:$0xff] }
 0xaa1   :  { %6310 = vst.msk [vmem:[#allocation2 + $0xf1] sm:$0xff] %vm44_vm0, %v6294_v50  ;;  %v6763_v7 = vld [vmem:[#allocation2 + $0x30] sm:$0xff]  ;;  %v6764_v36 = vld [vmem:[#allocation2 + $0x40] sm:$0xff]  ;;  %v7049_v56 = vld [vmem:[%s12739_s11 + $0x78] sm:$0xff] }
 0xaa2   :  { %6311 = vst.msk [vmem:[#allocation2 + $0x101] sm:$0xff] %vm44_vm0, %v6295_v19  ;;  %v12151_v29 = vld [vmem:[#allocation2 + $0x72] sm:$0xff]  ;;  %v12216_v15 = vld [vmem:[#allocation2 + $0x61] sm:$0xff]  ;;  %7122 = vmatpush.msrb.mxu3 %v7049_v56 }
 0xaa3   :  { %6312 = vst.msk [vmem:[#allocation2 + $0x111] sm:$0xff] %vm44_vm0, %v6296_v5  ;;  %6380 = vrot.lane.b32.xlu0 %v6347_v27, %s7758_s25  ;;  %v12155_v12 = vld [vmem:[#allocation2 + $0x82] sm:$0xff]  ;;  %v6859_v2 = vld [vmem:[#allocation2 + $0x31] sm:$0xff] }
 0xaa4   :  { %6890 = vrot.lane.b32.xlu2 %v6858_v6, %s7760_s20  ;;  %6313 = vst.msk [vmem:[#allocation2 + $0x121] sm:$0xff] %vm44_vm0, %v6297_v24  ;;  %6476 = vrot.lane.b32.xlu1 %v6666_v31, %s7759_s26  ;;  %v12209_v21 = vld [vmem:[#allocation2 + $0x51] sm:$0xff]  ;;  %v12222_v11 = vld [vmem:[#allocation2 + $0x60] sm:$0xff]  ;;  %v7047_v16 = vld [vmem:[%s12739_s11 + $0x68] sm:$0xff] }
 0xaa5   :  { %6970 = vst.msk [vmem:[#allocation3 + $0x10] sm:$0xff] %vm44_vm0, %v6954_v40  ;;  %v12159_v38 = vld [vmem:[#allocation2 + $0xc2] sm:$0xff]  ;;  %v12212_v28 = vld [vmem:[#allocation2 + $0x50] sm:$0xff]  ;;  %v7045_v42 = vld [vmem:[%s12739_s11 + $0x58] sm:$0xff] }
 0xaa6   :  { %6971 = vst.msk [vmem:[#allocation3 + $0x28] sm:$0xff] %vm44_vm0, %v12136_v25  ;;  %v12163_v55 = vld [vmem:[#allocation2 + $0xd2] sm:$0xff]  ;;  %v12236_v37 = vld [vmem:[#allocation2 + $0x81] sm:$0xff] }
 0xaa7   :  { %6972 = vst.msk [vmem:[#allocation3 + $0x40] sm:$0xff] %vm44_vm0, %v12139_v10  ;;  %v12170_v52 = vld [vmem:[#allocation2 + $0xe2] sm:$0xff]  ;;  %v12226_v3 = vld [vmem:[#allocation2 + $0x71] sm:$0xff] }
 0xaa8   :  { %6973 = vst.msk [vmem:[#allocation3 + $0x58] sm:$0xff] %vm44_vm0, %v12143_v63  ;;  %v12174_v14 = vld [vmem:[#allocation2 + $0xf2] sm:$0xff]  ;;  %v12248_v59 = vld [vmem:[#allocation2 + $0xc1] sm:$0xff] }
 0xaa9   :  { %6974 = vst.msk [vmem:[#allocation3 + $0x70] sm:$0xff] %vm44_vm0, %v12147_v51  ;;  %v12180_v26 = vld [vmem:[#allocation2 + $0x102] sm:$0xff]  ;;  %v12232_v45 = vld [vmem:[#allocation2 + $0x70] sm:$0xff]  ;;  %v7041_v20 = vld [vmem:[%s12739_s11 + $0x38] sm:$0xff] }
 0xaaa   :  { %6975 = vst.msk [vmem:[#allocation3 + $0x88] sm:$0xff] %vm44_vm0, %v12151_v29  ;;  %v12184_v9 = vld [vmem:[#allocation2 + $0x112] sm:$0xff]  ;;  %v12252_v34 = vld [vmem:[#allocation2 + $0xc0] sm:$0xff]  ;;  %v7043_v31 = vld [vmem:[%s12739_s11 + $0x48] sm:$0xff] }
 0xaab   :  { %6700 = vrot.lane.b32.xlu0 %v6954_v40, %s7758_s25  ;;  %6976 = vst.msk [vmem:[#allocation3 + $0xa0] sm:$0xff] %vm44_vm0, %v12155_v12  ;;  %v12190_v58 = vld [vmem:[#allocation2 + $0x122] sm:$0xff]  ;;  %v12240_v35 = vld [vmem:[#allocation2 + $0xb1] sm:$0xff] }
 0xaac   :  { %6572 = vrot.lane.b32.xlu2 %v12111_v47, %s7760_s20  ;;  %v6988_v33 = vld [vmem:[#allocation3 + $0x10] sm:$0xff]  ;;  %6978 = vst.msk [vmem:[#allocation3 + $0xd0] sm:$0xff] %vm44_vm0, %v12159_v38  ;;  %6796 = vrot.lane.b32.xlu1 %v6763_v7, %s7759_s26  ;;  %v12276_v17 = vld [vmem:[#allocation2 + $0xe1] sm:$0xff]  ;;  %v7037_v5 = vld [vmem:[%s12739_s11 + $0x18] sm:$0xff] }
 0xaad   :  { %7559 = vmatmul.msk.f32.vlgmr.msra.gmra.mxu0 %vm44_vm0, %v6988_v33  ;;  %6979 = vst.msk [vmem:[#allocation3 + $0xe8] sm:$0xff] %vm44_vm0, %v12163_v55  ;;  %v6991_v60 = vld [vmem:[#allocation3 + $0x28] sm:$0xff]  ;;  %v12244_v48 = vld [vmem:[#allocation2 + $0xb0] sm:$0xff]  ;;  %v12280_v53 = vld [vmem:[#allocation2 + $0xe0] sm:$0xff] }
 0xaae   :  { %6980 = vst.msk [vmem:[#allocation3 + $0x100] sm:$0xff] %vm44_vm0, %v12170_v52  ;;  %v6994_v30 = vld [vmem:[#allocation3 + $0x40] sm:$0xff]  ;;  %v12259_v4 = vld [vmem:[#allocation2 + $0xd1] sm:$0xff]  ;;  %v7039_v18 = vld [vmem:[%s12739_s11 + $0x28] sm:$0xff] }
 0xaaf   :  { %6981 = vst.msk [vmem:[#allocation3 + $0x118] sm:$0xff] %vm44_vm0, %v12174_v14  ;;  %v6997_v22 = vld [vmem:[#allocation3 + $0x58] sm:$0xff]  ;;  %v12263_v54 = vld [vmem:[#allocation2 + $0xd0] sm:$0xff]  ;;  %v12295_v44 = vld [vmem:[#allocation2 + $0x101] sm:$0xff] }
 0xab0   :  { %6982 = vst.msk [vmem:[#allocation3 + $0x130] sm:$0xff] %vm44_vm0, %v12180_v26  ;;  %v7048_v13 = vld [vmem:[%s12739_s11 + $0x70] sm:$0xff]  ;;  %v12299_v46 = vld [vmem:[#allocation2 + $0x100] sm:$0xff]  ;;  %v7065_v24 = vld [vmem:[%s12739_s11 + $0xf8] sm:$0xff] }
 0xab1   :  { %6983 = vst.msk [vmem:[#allocation3 + $0x148] sm:$0xff] %vm44_vm0, %v12184_v9  ;;  %v12287_v62 = vld [vmem:[#allocation2 + $0xf1] sm:$0xff]  ;;  %7123 = vmatpush.msrb.mxu3 %v7048_v13  ;;  %v7046_v1 = vld [vmem:[%s12739_s11 + $0x60] sm:$0xff]  ;;  %7187 = vmatpush.msra.mxu2 %v7065_v24  ;;  %v7063_v33 = vld [vmem:[%s12739_s11 + $0xe8] sm:$0xff] }
 0xab2   :  { %6650 = vst.msk [vmem:[#allocation3 + $0x8] sm:$0xff] %vm44_vm0, %v6347_v27  ;;  %v12291_v0 = vld [vmem:[#allocation2 + $0xf0] sm:$0xff]  ;;  %v12323_v43 = vld [vmem:[#allocation2 + $0x121] sm:$0xff] }
 0xab3   :  { %6382 = vrot.lane.b32.xlu0 %v6858_v6, %s7758_s25  ;;  %6984 = vst.msk [vmem:[#allocation3 + $0x160] sm:$0xff] %vm44_vm0, %v12190_v58  ;;  %7124 = vmatpush.msrb.mxu3 %v7047_v16  ;;  %v12306_v8 = vld [vmem:[#allocation2 + $0x111] sm:$0xff]  ;;  %v7042_v39 = vld [vmem:[%s12739_s11 + $0x40] sm:$0xff]  ;;  %v7035_v27 = vld [vmem:[%s12739_s11 + $0x8] sm:$0xff] }
 0xab4   :  { %6892 = vrot.lane.b32.xlu2 %v6859_v2, %s7760_s20  ;;  %6331 = vst.msk [vmem:[#allocation3 + $0x18] sm:$0xff] %vm44_vm0, %v12113_v32  ;;  %6478 = vrot.lane.b32.xlu1 %v6954_v40, %s7759_s26  ;;  %v7000_v49 = vld [vmem:[#allocation3 + $0x70] sm:$0xff]  ;;  %v7003_v32 = vld [vmem:[#allocation3 + $0x88] sm:$0xff]  ;;  %v6314_v23 = vld [vmem:[#allocation2] sm:$0xff] }
 0xab5   :  { %7560 = vmatmul.msk.f32.gmra.mxu0 %vm44_vm0, %v6991_v60  ;;  %6651 = vst.msk [vmem:[#allocation3 + $0x20] sm:$0xff] %vm44_vm0, %v6858_v6  ;;  %v12310_v57 = vld [vmem:[#allocation2 + $0x110] sm:$0xff]  ;;  %7125 = vmatpush.msrb.mxu3 %v7046_v1  ;;  %v7006_v50 = vld [vmem:[#allocation3 + $0xa0] sm:$0xff]  ;;  %v7055_v13 = vld [vmem:[%s12739_s11 + $0xa8] sm:$0xff] }
 0xab6   :  { %6332 = vst.msk [vmem:[#allocation3 + $0x30] sm:$0xff] %vm44_vm0, %v12111_v47  ;;  %v7044_v47 = vld [vmem:[%s12739_s11 + $0x50] sm:$0xff]  ;;  %v7038_v19 = vld [vmem:[%s12739_s11 + $0x20] sm:$0xff] }
 0xab7   :  { %6652 = vst.msk [vmem:[#allocation3 + $0x38] sm:$0xff] %vm44_vm0, %v6859_v2  ;;  %7126 = vmatpush.msrb.mxu3 %v7045_v42  ;;  %v7040_v61 = vld [vmem:[%s12739_s11 + $0x30] sm:$0xff]  ;;  %v7054_v16 = vld [vmem:[%s12739_s11 + $0xa0] sm:$0xff] }
 0xab8   :  { %6333 = vst.msk [vmem:[#allocation3 + $0x48] sm:$0xff] %vm44_vm0, %v6763_v7  ;;  %v7064_v40 = vld [vmem:[%s12739_s11 + $0xf0] sm:$0xff]  ;;  %v7018_v42 = vld [vmem:[#allocation3 + $0x100] sm:$0xff] }
 0xab9   :  { %6653 = vst.msk [vmem:[#allocation3 + $0x50] sm:$0xff] %vm44_vm0, %v12204_v41  ;;  %7127 = vmatpush.msrb.mxu3 %v7044_v47  ;;  %v7036_v6 = vld [vmem:[%s12739_s11 + $0x10] sm:$0xff]  ;;  %7188 = vmatpush.msra.mxu2 %v7064_v40  ;;  %v6768_v47 = vld [vmem:[#allocation2 + $0x80] sm:$0xff] }
 0xaba   :  { %6334 = vst.msk [vmem:[#allocation3 + $0x60] sm:$0xff] %vm44_vm0, %v6764_v36 }
 0xabb   :  { %6702 = vrot.lane.b32.xlu0 %v12136_v25, %s7758_s25  ;;  %6654 = vst.msk [vmem:[#allocation3 + $0x68] sm:$0xff] %vm44_vm0, %v12209_v21  ;;  %7128 = vmatpush.msrb.mxu3 %v7043_v31 }
 0xabc   :  { %6574 = vrot.lane.b32.xlu2 %v6763_v7, %s7760_s20  ;;  %6335 = vst.msk [vmem:[#allocation3 + $0x78] sm:$0xff] %vm44_vm0, %v12212_v28  ;;  %6798 = vrot.lane.b32.xlu1 %v6764_v36, %s7759_s26  ;;  %v7062_v7 = vld [vmem:[%s12739_s11 + $0xe0] sm:$0xff] }
 0xabd   :  { %7561 = vmatmul.msk.f32.gmra.mxu0 %vm44_vm0, %v6994_v30  ;;  %6655 = vst.msk [vmem:[#allocation3 + $0x80] sm:$0xff] %vm44_vm0, %v12216_v15  ;;  %7129 = vmatpush.msrb.mxu3 %v7042_v39  ;;  %v7056_v30 = vld [vmem:[%s12739_s11 + $0xb0] sm:$0xff]  ;;  %v7050_v39 = vld [vmem:[%s12739_s11 + $0x80] sm:$0xff] }
 0xabe   :  { %6336 = vst.msk [vmem:[#allocation3 + $0x90] sm:$0xff] %vm44_vm0, %v12222_v11  ;;  %7189 = vmatpush.msra.mxu2 %v7063_v33 }
 0xabf   :  { %6656 = vst.msk [vmem:[#allocation3 + $0x98] sm:$0xff] %vm44_vm0, %v12226_v3  ;;  %7130 = vmatpush.msrb.mxu3 %v7041_v20 }
 0xac0   :  { %6337 = vst.msk [vmem:[#allocation3 + $0xa8] sm:$0xff] %vm44_vm0, %v12232_v45  ;;  %7190 = vmatpush.msra.mxu2 %v7062_v7 }
 0xac1   :  { %6657 = vst.msk [vmem:[#allocation3 + $0xb0] sm:$0xff] %vm44_vm0, %v12236_v37  ;;  %7131 = vmatpush.msrb.mxu3 %v7040_v61  ;;  %v7021_v61 = vld [vmem:[#allocation3 + $0x118] sm:$0xff] }
 0xac2   :  { %6658 = vst.msk [vmem:[#allocation3 + $0xc8] sm:$0xff] %vm44_vm0, %v12240_v35 }
 0xac3   :  { %6384 = vrot.lane.b32.xlu0 %v6859_v2, %s7758_s25  ;;  %6339 = vst.msk [vmem:[#allocation3 + $0xd8] sm:$0xff] %vm44_vm0, %v12244_v48  ;;  %7132 = vmatpush.msrb.mxu3 %v7039_v18  ;;  %v7061_v2 = vld [vmem:[%s12739_s11 + $0xd8] sm:$0xff] }
 0xac4   :  { %6894 = vrot.lane.b32.xlu2 %v12204_v41, %s7760_s20  ;;  %6659 = vst.msk [vmem:[#allocation3 + $0xe0] sm:$0xff] %vm44_vm0, %v12248_v59  ;;  %6480 = vrot.lane.b32.xlu1 %v12136_v25, %s7759_s26  ;;  %v7009_v25 = vld [vmem:[#allocation3 + $0xb8] sm:$0xff] }
 0xac5   :  { %7562 = vmatmul.msk.f32.gmra.mxu0 %vm44_vm0, %v6997_v22  ;;  %6340 = vst.msk [vmem:[#allocation3 + $0xf0] sm:$0xff] %vm44_vm0, %v12252_v34  ;;  %7133 = vmatpush.msrb.mxu3 %v7038_v19  ;;  %v7015_v22 = vld [vmem:[#allocation3 + $0xe8] sm:$0xff]  ;;  %v7024_v19 = vld [vmem:[#allocation3 + $0x130] sm:$0xff] }
 0xac6   :  { %6660 = vst.msk [vmem:[#allocation3 + $0xf8] sm:$0xff] %vm44_vm0, %v12259_v4  ;;  %7191 = vmatpush.msra.mxu2 %v7061_v2 }
 0xac7   :  { %6341 = vst.msk [vmem:[#allocation3 + $0x108] sm:$0xff] %vm44_vm0, %v12263_v54  ;;  %7134 = vmatpush.msrb.mxu3 %v7037_v5  ;;  %v6451_v5 = vld [vmem:[#allocation2 + $0xb2] sm:$0xff] }
 0xac8   :  { %6661 = vst.msk [vmem:[#allocation3 + $0x110] sm:$0xff] %vm44_vm0, %v12276_v17 }
 0xac9   :  { %6342 = vst.msk [vmem:[#allocation3 + $0x120] sm:$0xff] %vm44_vm0, %v12280_v53  ;;  %7135 = vmatpush.msrb.mxu3 %v7036_v6 }
 0xaca   :  { %6662 = vst.msk [vmem:[#allocation3 + $0x128] sm:$0xff] %vm44_vm0, %v12287_v62 }
 0xacb   :  { %6704 = vrot.lane.b32.xlu0 %v12139_v10, %s7758_s25  ;;  %6343 = vst.msk [vmem:[#allocation3 + $0x138] sm:$0xff] %vm44_vm0, %v12291_v0  ;;  %7136 = vmatpush.msrb.mxu3 %v7035_v27 }
 0xacc   :  { %6576 = vrot.lane.b32.xlu2 %v6764_v36, %s7760_s20  ;;  %6663 = vst.msk [vmem:[#allocation3 + $0x140] sm:$0xff] %vm44_vm0, %v12295_v44  ;;  %6800 = vrot.lane.b32.xlu1 %v12212_v28, %s7759_s26  ;;  %v7059_v36 = vld [vmem:[%s12739_s11 + $0xc8] sm:$0xff] }
 0xacd   :  { %7563 = vmatmul.msk.f32.gmra.mxu0 %vm44_vm0, %v7000_v49  ;;  %6344 = vst.msk [vmem:[#allocation3 + $0x150] sm:$0xff] %vm44_vm0, %v12299_v46 }
 0xace   :  { %6664 = vst.msk [vmem:[#allocation3 + $0x158] sm:$0xff] %vm44_vm0, %v12306_v8 }
 0xacf   :  { %6345 = vst.msk [vmem:[#allocation3 + $0x168] sm:$0xff] %vm44_vm0, %v12310_v57 }
 0xad0   :  { %6665 = vst.msk [vmem:[#allocation3 + $0x170] sm:$0xff] %vm44_vm0, %v12323_v43 }
 0xad1   :  { %6330 = vst.msk [vmem:[#allocation3] sm:$0xff] %vm44_vm0, %v6314_v23 }
 0xad3   :  { %6386 = vrot.lane.b32.xlu0 %v12204_v41, %s7758_s25  ;;  %v7012_v41 = vld [vmem:[#allocation3 + $0xd0] sm:$0xff] }
 0xad4   :  { %6896 = vrot.lane.b32.xlu2 %v12209_v21, %s7760_s20  ;;  %6482 = vrot.lane.b32.xlu1 %v12139_v10, %s7759_s26  ;;  %v7034_v10 = vld [vmem:[%s12739_s11] sm:$0xff] }
 0xad5   :  { %7564 = vmatmul.msk.f32.gmra.mxu0 %vm44_vm0, %v7003_v32  ;;  %7137 = vmatpush.msrb.mxu3 %v7034_v10  ;;  %v7051_v32 = vld [vmem:[%s12739_s11 + $0x88] sm:$0xff] }
 0xadb   :  { %6706 = vrot.lane.b32.xlu0 %v12143_v63, %s7758_s25 }
 0xadc   :  { %6578 = vrot.lane.b32.xlu2 %v12212_v28, %s7760_s20  ;;  %6802 = vrot.lane.b32.xlu1 %v12222_v11, %s7759_s26  ;;  %v7058_v28 = vld [vmem:[%s12739_s11 + $0xc0] sm:$0xff] }
 0xadd   :  { %7565 = vmatmul.msk.f32.gmra.mxu0 %vm44_vm0, %v7006_v50 }
 0xade   :  { %v12410_v60 = vpop.permute.xlu2 %6904 }
 0xae3   :  { %6388 = vrot.lane.b32.xlu0 %v12209_v21, %s7758_s25  ;;  %v6322_v21 = vld [vmem:[#allocation2 + $0xa0] sm:$0xff] }
 0xae4   :  { %6898 = vrot.lane.b32.xlu2 %v12216_v15, %s7760_s20  ;;  %6484 = vrot.lane.b32.xlu1 %v12143_v63, %s7759_s26  ;;  %v7060_v63 = vld [vmem:[%s12739_s11 + $0xd0] sm:$0xff]  ;;  %6338 = vst.msk [vmem:[#allocation3 + $0xc0] sm:$0xff] %vm44_vm0, %v6322_v21 }
 0xae5   :  { %7566 = vmatmul.msk.f32.gmra.mxu0 %vm44_vm0, %v7009_v25  ;;  %7192 = vmatpush.msra.mxu2 %v7060_v63 }
 0xae7   :  { %7193 = vmatpush.msra.mxu2 %v7059_v36 }
 0xae8   :  { %v6379_v49 = vpop.permute.xlu0 %6378 }
 0xae9   :  { %7194 = vmatpush.msra.mxu2 %v7058_v28  ;;  %6426 = vst.msk [vmem:[#allocation3] sm:$0xff] %vm268_vm2, %v6379_v49 }
 0xaea   :  { %v6475_v1 = vpop.permute.xlu1 %6474 }
 0xaeb   :  { %6708 = vrot.lane.b32.xlu0 %v12147_v51, %s7758_s25  ;;  %6522 = vst.msk [vmem:[#allocation3] sm:$0xff] %vm365_vm3, %v6475_v1 }
 0xaec   :  { %6580 = vrot.lane.b32.xlu2 %v12222_v11, %s7760_s20  ;;  %6804 = vrot.lane.b32.xlu1 %v12232_v45, %s7759_s26  ;;  %v7057_v11 = vld [vmem:[%s12739_s11 + $0xb8] sm:$0xff] }
 0xaed   :  { %7567 = vmatmul.msk.f32.gmra.mxu0 %vm44_vm0, %v7012_v41  ;;  %7195 = vmatpush.msra.mxu2 %v7057_v11 }
 0xaef   :  { %7196 = vmatpush.msra.mxu2 %v7056_v30 }
 0xaf1   :  { %7197 = vmatpush.msra.mxu2 %v7055_v13 }
 0xaf2   :  { %v6395_v20 = vpop.permute.xlu0 %6394 }
 0xaf3   :  { %6390 = vrot.lane.b32.xlu0 %v12216_v15, %s7758_s25  ;;  %v7053_v15 = vld [vmem:[%s12739_s11 + $0x98] sm:$0xff]  ;;  %7198 = vmatpush.msra.mxu2 %v7054_v16  ;;  %6434 = vst.msk [vmem:[#allocation3 + $0xc0] sm:$0xff] %vm268_vm2, %v6395_v20 }
 0xaf4   :  { %6900 = vrot.lane.b32.xlu2 %v12226_v3, %s7760_s20  ;;  %6486 = vrot.lane.b32.xlu1 %v12147_v51, %s7759_s26  ;;  %v7052_v51 = vld [vmem:[%s12739_s11 + $0x90] sm:$0xff] }
 0xaf5   :  { %7568 = vmatmul.msk.f32.gmra.mxu0 %vm44_vm0, %v7015_v22  ;;  %7199 = vmatpush.msra.mxu2 %v7053_v15 }
 0xaf6   :  { %v6571_v56 = vpop.permute.xlu2 %6570 }
 0xaf7   :  { %6618 = vst.msk [vmem:[#allocation3] sm:$0xff] %vm462_vm4, %v6571_v56  ;;  %7200 = vmatpush.msra.mxu2 %v7052_v51 }
 0xaf9   :  { %7201 = vmatpush.msra.mxu2 %v7051_v32 }
 0xafb   :  { %6710 = vrot.lane.b32.xlu0 %v12151_v29, %s7758_s25  ;;  %7202 = vmatpush.msra.mxu2 %v7050_v39 }
 0xafc   :  { %6582 = vrot.lane.b32.xlu2 %v12232_v45, %s7760_s20  ;;  %6806 = vrot.lane.b32.xlu1 %v6768_v47, %s7759_s26  ;;  %v12462_v45 = vpop.permute.xlu1 %6808 }
 0xafd   :  { %7569 = vmatmul.msk.f32.gmra.mxu0 %vm44_vm0, %v7018_v42 }
 0xafe   :  { %v6891_v31 = vpop.permute.xlu2 %6890  ;;  %v6986_v23 = vld [vmem:[#allocation3] sm:$0xff] }
 0xaff   :  { %7138 = vmatmul.f32.vlgmr.msrb.gmra.mxu3 %v6986_v23 }
 0xb03   :  { %6392 = vrot.lane.b32.xlu0 %v12226_v3, %s7758_s25 }
 0xb04   :  { %6902 = vrot.lane.b32.xlu2 %v12236_v37, %s7760_s20  ;;  %6488 = vrot.lane.b32.xlu1 %v12151_v29, %s7759_s26  ;;  %v6491_v50 = vpop.permute.xlu1 %6490 }
 0xb05   :  { %7570 = vmatmul.msk.f32.gmra.mxu0 %vm44_vm0, %v7021_v61  ;;  %6530 = vst.msk [vmem:[#allocation3 + $0xc0] sm:$0xff] %vm365_vm3, %v6491_v50 }
 0xb06   :  { %v6573_v18 = vpop.permute.xlu2 %6572 }
 0xb0b   :  { %6712 = vrot.lane.b32.xlu0 %v12155_v12, %s7758_s25  ;;  %v7027_v12 = vld [vmem:[#allocation3 + $0x148] sm:$0xff] }
 0xb0c   :  { %6584 = vrot.lane.b32.xlu2 %v6768_v47, %s7760_s20  ;;  %6810 = vrot.lane.b32.xlu1 %v12252_v34, %s7759_s26 }
 0xb0d   :  { %7571 = vmatmul.msk.f32.gmra.mxu0 %vm44_vm0, %v7024_v19  ;;  %v6699_v3 = vpop.permute.xlu0 %6698 }
 0xb0e   :  { %v6893_v37 = vpop.permute.xlu2 %6892  ;;  %6746 = vst.msk [vmem:[#allocation3 + $0x8] sm:$0xff] %vm268_vm2, %v6699_v3  ;;  %v6795_v29 = vpop.permute.xlu1 %6794 }
 0xb0f   :  { %6842 = vst.msk [vmem:[#allocation3 + $0x8] sm:$0xff] %vm365_vm3, %v6795_v29  ;;  %v6777_v29 = vld [vmem:[#allocation2 + $0x130] sm:$0xff] }
 0xb10   :  { %6938 = vst.msk [vmem:[#allocation3 + $0x8] sm:$0xff] %vm462_vm4, %v6891_v31 }
 0xb13   :  { %6714 = vrot.lane.b32.xlu0 %v6451_v5, %s7758_s25 }
 0xb14   :  { %6586 = vrot.lane.b32.xlu2 %v12244_v48, %s7760_s20  ;;  %6492 = vrot.lane.b32.xlu1 %v6451_v5, %s7759_s26  ;;  %v7030_v48 = vld [vmem:[#allocation3 + $0x160] sm:$0xff] }
 0xb15   :  { %7572 = vmatmul.msk.f32.gmra.mxu0 %vm44_vm0, %v7027_v12  ;;  %v6381_v40 = vpop.permute.xlu0 %6380 }
 0xb16   :  { %v6575_v24 = vpop.permute.xlu2 %6574  ;;  %6427 = vst.msk [vmem:[#allocation3 + $0x18] sm:$0xff] %vm268_vm2, %v6381_v40  ;;  %v6477_v6 = vpop.permute.xlu1 %6476 }
 0xb17   :  { %6523 = vst.msk [vmem:[#allocation3 + $0x18] sm:$0xff] %vm365_vm3, %v6477_v6  ;;  %v6987_v27 = vld [vmem:[#allocation3 + $0x8] sm:$0xff] }
 0xb18   :  { %6619 = vst.msk [vmem:[#allocation3 + $0x18] sm:$0xff] %vm462_vm4, %v6573_v18  ;;  %7203 = vmatmul.f32.vlgmr.msra.gmra.mxu2 %v6987_v27 }
 0xb1b   :  { %6396 = vrot.lane.b32.xlu0 %v12240_v35, %s7758_s25 }
 0xb1c   :  { %6906 = vrot.lane.b32.xlu2 %v12248_v59, %s7760_s20  ;;  %6812 = vrot.lane.b32.xlu1 %v12263_v54, %s7759_s26 }
 0xb1d   :  { %7573 = vmatmul.msk.f32.gmra.mxu0 %vm44_vm0, %v7030_v48  ;;  %v6701_v10 = vpop.permute.xlu0 %6700 }
 0xb1e   :  { %v6895_v25 = vpop.permute.xlu2 %6894  ;;  %6747 = vst.msk [vmem:[#allocation3 + $0x20] sm:$0xff] %vm268_vm2, %v6701_v10  ;;  %v6797_v33 = vpop.permute.xlu1 %6796 }
 0xb1f   :  { %6843 = vst.msk [vmem:[#allocation3 + $0x20] sm:$0xff] %vm365_vm3, %v6797_v33  ;;  %v6989_v7 = vld [vmem:[#allocation3 + $0x18] sm:$0xff]  ;;  %v12622_v33 = vld [vmem:[%s12740_s12] ss:$0 sm:$0xff] }
 0xb20   :  { %6939 = vst.msk [vmem:[#allocation3 + $0x20] sm:$0xff] %vm462_vm4, %v6893_v37  ;;  %7141 = vmatmul.f32.gmra.mxu3 %v6989_v7 }
 0xb23   :  { %6716 = vrot.lane.b32.xlu0 %v12159_v38, %s7758_s25 }
 0xb24   :  { %6588 = vrot.lane.b32.xlu2 %v12252_v34, %s7760_s20  ;;  %6494 = vrot.lane.b32.xlu1 %v12159_v38, %s7759_s26 }
 0xb25   :  { %v6383_v2 = vpop.permute.xlu0 %6382 }
 0xb26   :  { %v6577_v35 = vpop.permute.xlu2 %6576  ;;  %6428 = vst.msk [vmem:[#allocation3 + $0x30] sm:$0xff] %vm268_vm2, %v6383_v2  ;;  %v6479_v63 = vpop.permute.xlu1 %6478 }
 0xb27   :  { %6524 = vst.msk [vmem:[#allocation3 + $0x30] sm:$0xff] %vm365_vm3, %v6479_v63  ;;  %v6990_v41 = vld [vmem:[#allocation3 + $0x20] sm:$0xff] }
 0xb28   :  { %6620 = vst.msk [vmem:[#allocation3 + $0x30] sm:$0xff] %vm462_vm4, %v6575_v24  ;;  %7206 = vmatmul.f32.gmra.mxu2 %v6990_v41 }
 0xb2b   :  { %6398 = vrot.lane.b32.xlu0 %v12248_v59, %s7758_s25 }
 0xb2c   :  { %6908 = vrot.lane.b32.xlu2 %v12259_v4, %s7760_s20  ;;  %6814 = vrot.lane.b32.xlu1 %v12280_v53, %s7759_s26 }
 0xb2d   :  { %v6703_v34 = vpop.permute.xlu0 %6702 }
 0xb2e   :  { %v6897_v38 = vpop.permute.xlu2 %6896  ;;  %6748 = vst.msk [vmem:[#allocation3 + $0x38] sm:$0xff] %vm268_vm2, %v6703_v34  ;;  %v6799_v36 = vpop.permute.xlu1 %6798 }
 0xb2f   :  { %6844 = vst.msk [vmem:[#allocation3 + $0x38] sm:$0xff] %vm365_vm3, %v6799_v36  ;;  %v6992_v21 = vld [vmem:[#allocation3 + $0x30] sm:$0xff] }
 0xb30   :  { %6940 = vst.msk [vmem:[#allocation3 + $0x38] sm:$0xff] %vm462_vm4, %v6895_v25  ;;  %7144 = vmatmul.f32.gmra.mxu3 %v6992_v21 }
 0xb33   :  { %6718 = vrot.lane.b32.xlu0 %v12163_v55, %s7758_s25 }
 0xb34   :  { %6590 = vrot.lane.b32.xlu2 %v12263_v54, %s7760_s20  ;;  %6496 = vrot.lane.b32.xlu1 %v12163_v55, %s7759_s26 }
 0xb35   :  { %v6385_v28 = vpop.permute.xlu0 %6384 }
 0xb36   :  { %v6579_v59 = vpop.permute.xlu2 %6578  ;;  %6429 = vst.msk [vmem:[#allocation3 + $0x48] sm:$0xff] %vm268_vm2, %v6385_v28  ;;  %v6481_v11 = vpop.permute.xlu1 %6480 }
 0xb37   :  { %6525 = vst.msk [vmem:[#allocation3 + $0x48] sm:$0xff] %vm365_vm3, %v6481_v11  ;;  %v6993_v30 = vld [vmem:[#allocation3 + $0x38] sm:$0xff] }
 0xb38   :  { %6621 = vst.msk [vmem:[#allocation3 + $0x48] sm:$0xff] %vm462_vm4, %v6577_v35  ;;  %7209 = vmatmul.f32.gmra.mxu2 %v6993_v30 }
 0xb3b   :  { %6400 = vrot.lane.b32.xlu0 %v12259_v4, %s7758_s25 }
 0xb3c   :  { %6910 = vrot.lane.b32.xlu2 %v12276_v17, %s7760_s20  ;;  %6816 = vrot.lane.b32.xlu1 %v12291_v0, %s7759_s26 }
 0xb3d   :  { %v6705_v54 = vpop.permute.xlu0 %6704 }
 0xb3e   :  { %v6899_v55 = vpop.permute.xlu2 %6898  ;;  %6749 = vst.msk [vmem:[#allocation3 + $0x50] sm:$0xff] %vm268_vm2, %v6705_v54  ;;  %v6801_v22 = vpop.permute.xlu1 %6800 }
 0xb3f   :  { %6845 = vst.msk [vmem:[#allocation3 + $0x50] sm:$0xff] %vm365_vm3, %v6801_v22  ;;  %v6995_v56 = vld [vmem:[#allocation3 + $0x48] sm:$0xff] }
 0xb40   :  { %6941 = vst.msk [vmem:[#allocation3 + $0x50] sm:$0xff] %vm462_vm4, %v6897_v38  ;;  %7147 = vmatmul.f32.gmra.mxu3 %v6995_v56  ;;  %v7269_v38 = vpop.f32.mrf.mxu0 }
 0xb43   :  { %6720 = vrot.lane.b32.xlu0 %v12170_v52, %s7758_s25 }
 0xb44   :  { %6592 = vrot.lane.b32.xlu2 %v12280_v53, %s7760_s20  ;;  %6498 = vrot.lane.b32.xlu1 %v12170_v52, %s7759_s26 }
 0xb45   :  { %v6387_v13 = vpop.permute.xlu0 %6386 }
 0xb46   :  { %v6581_v4 = vpop.permute.xlu2 %6580  ;;  %6430 = vst.msk [vmem:[#allocation3 + $0x60] sm:$0xff] %vm268_vm2, %v6387_v13  ;;  %v6483_v16 = vpop.permute.xlu1 %6482 }
 0xb47   :  { %6526 = vst.msk [vmem:[#allocation3 + $0x60] sm:$0xff] %vm365_vm3, %v6483_v16  ;;  %v6996_v49 = vld [vmem:[#allocation3 + $0x50] sm:$0xff] }
 0xb48   :  { %6622 = vst.msk [vmem:[#allocation3 + $0x60] sm:$0xff] %vm462_vm4, %v6579_v59  ;;  %7212 = vmatmul.f32.gmra.mxu2 %v6996_v49  ;;  %v7272_v49 = vpop.f32.mrf.mxu0 }
 0xb4b   :  { %6402 = vrot.lane.b32.xlu0 %v12276_v17, %s7758_s25 }
 0xb4c   :  { %6912 = vrot.lane.b32.xlu2 %v12287_v62, %s7760_s20  ;;  %6818 = vrot.lane.b32.xlu1 %v12299_v46, %s7759_s26 }
 0xb4d   :  { %v6707_v53 = vpop.permute.xlu0 %6706 }
 0xb4e   :  { %v6901_v52 = vpop.permute.xlu2 %6900  ;;  %6750 = vst.msk [vmem:[#allocation3 + $0x68] sm:$0xff] %vm268_vm2, %v6707_v53  ;;  %v6803_v1 = vpop.permute.xlu1 %6802 }
 0xb4f   :  { %6846 = vst.msk [vmem:[#allocation3 + $0x68] sm:$0xff] %vm365_vm3, %v6803_v1  ;;  %v6998_v15 = vld [vmem:[#allocation3 + $0x60] sm:$0xff] }
 0xb50   :  { %6942 = vst.msk [vmem:[#allocation3 + $0x68] sm:$0xff] %vm462_vm4, %v6899_v55  ;;  %7150 = vmatmul.f32.gmra.mxu3 %v6998_v15 }
 0xb53   :  { %6722 = vrot.lane.b32.xlu0 %v12174_v14, %s7758_s25 }
 0xb54   :  { %6594 = vrot.lane.b32.xlu2 %v12291_v0, %s7760_s20  ;;  %6500 = vrot.lane.b32.xlu1 %v12174_v14, %s7759_s26 }
 0xb55   :  { %v6389_v51 = vpop.permute.xlu0 %6388 }
 0xb56   :  { %v6583_v17 = vpop.permute.xlu2 %6582  ;;  %6431 = vst.msk [vmem:[#allocation3 + $0x78] sm:$0xff] %vm268_vm2, %v6389_v51  ;;  %v6485_v42 = vpop.permute.xlu1 %6484 }
 0xb57   :  { %6527 = vst.msk [vmem:[#allocation3 + $0x78] sm:$0xff] %vm365_vm3, %v6485_v42  ;;  %v6999_v47 = vld [vmem:[#allocation3 + $0x68] sm:$0xff] }
 0xb58   :  { %6623 = vst.msk [vmem:[#allocation3 + $0x78] sm:$0xff] %vm462_vm4, %v6581_v4  ;;  %7215 = vmatmul.f32.gmra.mxu2 %v6999_v47 }
 0xb5b   :  { %6404 = vrot.lane.b32.xlu0 %v12287_v62, %s7758_s25 }
 0xb5c   :  { %6914 = vrot.lane.b32.xlu2 %v12295_v44, %s7760_s20  ;;  %6820 = vrot.lane.b32.xlu1 %v12310_v57, %s7759_s26 }
 0xb5d   :  { %v6709_v0 = vpop.permute.xlu0 %6708 }
 0xb5e   :  { %v6903_v14 = vpop.permute.xlu2 %6902  ;;  %6751 = vst.msk [vmem:[#allocation3 + $0x80] sm:$0xff] %vm268_vm2, %v6709_v0  ;;  %v6805_v31 = vpop.permute.xlu1 %6804 }
 0xb5f   :  { %6847 = vst.msk [vmem:[#allocation3 + $0x80] sm:$0xff] %vm365_vm3, %v6805_v31  ;;  %v7001_v32 = vld [vmem:[#allocation3 + $0x78] sm:$0xff] }
 0xb60   :  { %6943 = vst.msk [vmem:[#allocation3 + $0x80] sm:$0xff] %vm462_vm4, %v6901_v52  ;;  %7153 = vmatmul.f32.gmra.mxu3 %v7001_v32 }
 0xb63   :  { %6724 = vrot.lane.b32.xlu0 %v12180_v26, %s7758_s25 }
 0xb64   :  { %6596 = vrot.lane.b32.xlu2 %v12299_v46, %s7760_s20  ;;  %6502 = vrot.lane.b32.xlu1 %v12180_v26, %s7759_s26  ;;  %v6776_v46 = vld [vmem:[#allocation2 + $0x120] sm:$0xff] }
 0xb65   :  { %v6391_v39 = vpop.permute.xlu0 %6390 }
 0xb66   :  { %v6585_v62 = vpop.permute.xlu2 %6584  ;;  %6432 = vst.msk [vmem:[#allocation3 + $0x90] sm:$0xff] %vm268_vm2, %v6391_v39  ;;  %v6487_v20 = vpop.permute.xlu1 %6486 }
 0xb67   :  { %6528 = vst.msk [vmem:[#allocation3 + $0x90] sm:$0xff] %vm365_vm3, %v6487_v20  ;;  %v7002_v23 = vld [vmem:[#allocation3 + $0x80] sm:$0xff]  ;;  %v7275_v39 = vpop.f32.mrf.mxu0 }
 0xb68   :  { %6624 = vst.msk [vmem:[#allocation3 + $0x90] sm:$0xff] %vm462_vm4, %v6583_v17  ;;  %7218 = vmatmul.f32.gmra.mxu2 %v7002_v23 }
 0xb6b   :  { %6406 = vrot.lane.b32.xlu0 %v12295_v44, %s7758_s25 }
 0xb6c   :  { %6916 = vrot.lane.b32.xlu2 %v12306_v8, %s7760_s20  ;;  %6822 = vrot.lane.b32.xlu1 %v6776_v46, %s7759_s26 }
 0xb6d   :  { %v6711_v61 = vpop.permute.xlu0 %6710 }
 0xb6e   :  { %v6587_v26 = vpop.permute.xlu2 %6586  ;;  %v6807_v18 = vpop.permute.xlu1 %6806  ;;  %6752 = vst.msk [vmem:[#allocation3 + $0x98] sm:$0xff] %vm268_vm2, %v6711_v61 }
 0xb6f   :  { %6626 = vst.msk [vmem:[#allocation3 + $0xc0] sm:$0xff] %vm462_vm4, %v6587_v26  ;;  %v7004_v50 = vld [vmem:[#allocation3 + $0x90] sm:$0xff] }
 0xb70   :  { %6848 = vst.msk [vmem:[#allocation3 + $0x98] sm:$0xff] %vm365_vm3, %v6807_v18  ;;  %7156 = vmatmul.f32.gmra.mxu3 %v7004_v50 }
 0xb71   :  { %6944 = vst.msk [vmem:[#allocation3 + $0x98] sm:$0xff] %vm462_vm4, %v6903_v14 }
 0xb73   :  { %6726 = vrot.lane.b32.xlu0 %v12184_v9, %s7758_s25 }
 0xb74   :  { %6598 = vrot.lane.b32.xlu2 %v12310_v57, %s7760_s20  ;;  %6504 = vrot.lane.b32.xlu1 %v12184_v9, %s7759_s26 }
 0xb75   :  { %v6393_v19 = vpop.permute.xlu0 %6392 }
 0xb76   :  { %v6907_v44 = vpop.permute.xlu2 %6906  ;;  %6433 = vst.msk [vmem:[#allocation3 + $0xa8] sm:$0xff] %vm268_vm2, %v6393_v19  ;;  %v6489_v3 = vpop.permute.xlu1 %6488  ;;  %v7010_v6 = vld [vmem:[#allocation3 + $0xc0] sm:$0xff] }
 0xb77   :  { %6529 = vst.msk [vmem:[#allocation3 + $0xa8] sm:$0xff] %vm365_vm3, %v6489_v3 }
 0xb78   :  { %v7005_v37 = vld [vmem:[#allocation3 + $0x98] sm:$0xff]  ;;  %6625 = vst.msk [vmem:[#allocation3 + $0xa8] sm:$0xff] %vm462_vm4, %v6585_v62 }
 0xb79   :  { %7221 = vmatmul.f32.gmra.mxu2 %v7005_v37 }
 0xb7b   :  { %6408 = vrot.lane.b32.xlu0 %v12306_v8, %s7758_s25 }
 0xb7c   :  { %6918 = vrot.lane.b32.xlu2 %v12323_v43, %s7760_s20  ;;  %6824 = vrot.lane.b32.xlu1 %v6777_v29, %s7759_s26 }
 0xb7d   :  { %v6713_v9 = vpop.permute.xlu0 %6712 }
 0xb7e   :  { %v6589_v57 = vpop.permute.xlu2 %6588  ;;  %6753 = vst.msk [vmem:[#allocation3 + $0xb0] sm:$0xff] %vm268_vm2, %v6713_v9  ;;  %v6811_v5 = vpop.permute.xlu1 %6810 }
 0xb7f   :  { %6849 = vst.msk [vmem:[#allocation3 + $0xb0] sm:$0xff] %vm365_vm3, %v12462_v45  ;;  %v7007_v12 = vld [vmem:[#allocation3 + $0xa8] sm:$0xff]  ;;  %v6873_v45 = vld [vmem:[#allocation2 + $0x131] sm:$0xff] }
 0xb80   :  { %6945 = vst.msk [vmem:[#allocation3 + $0xb0] sm:$0xff] %vm462_vm4, %v12410_v60  ;;  %7159 = vmatmul.f32.gmra.mxu3 %v7007_v12 }
 0xb82   :  { %v7139_v35 = vpop.f32.mrf.mxu3 }
 0xb83   :  { %6728 = vrot.lane.b32.xlu0 %v12190_v58, %s7758_s25  ;;  %v7140_v63 = vadd.f32 %v12622_v33, %v7139_v35 }
 0xb84   :  { %6600 = vrot.lane.b32.xlu2 %v6776_v46, %s7760_s20 }
 0xb85   :  { %v6715_v43 = vpop.permute.xlu0 %6714 }
 0xb86   :  { %v6909_v8 = vpop.permute.xlu2 %6908  ;;  %v6493_v24 = vpop.permute.xlu1 %6492  ;;  %6754 = vst.msk [vmem:[#allocation3 + $0xc8] sm:$0xff] %vm268_vm2, %v6715_v43 }
 0xb87   :  { %v7008_v40 = vld [vmem:[#allocation3 + $0xb0] sm:$0xff]  ;;  %6850 = vst.msk [vmem:[#allocation3 + $0xc8] sm:$0xff] %vm365_vm3, %v6811_v5 }
 0xb88   :  { %7224 = vmatmul.f32.gmra.mxu2 %v7008_v40  ;;  %6946 = vst.msk [vmem:[#allocation3 + $0xc8] sm:$0xff] %vm462_vm4, %v6907_v44  ;;  %7162 = vmatmul.f32.gmra.mxu3 %v7010_v6 }
 0xb8c   :  { %6920 = vrot.lane.b32.xlu2 %v6873_v45, %s7760_s20 }
 0xb8d   :  { %v6397_v27 = vpop.permute.xlu0 %6396 }
 0xb8e   :  { %v6591_v60 = vpop.permute.xlu2 %6590  ;;  %v6813_v48 = vpop.permute.xlu1 %6812  ;;  %6435 = vst.msk [vmem:[#allocation3 + $0xd8] sm:$0xff] %vm268_vm2, %v6397_v27 }
 0xb8f   :  { %6531 = vst.msk [vmem:[#allocation3 + $0xd8] sm:$0xff] %vm365_vm3, %v6493_v24  ;;  %v7011_v58 = vld [vmem:[#allocation3 + $0xc8] sm:$0xff] }
 0xb90   :  { %6627 = vst.msk [vmem:[#allocation3 + $0xd8] sm:$0xff] %vm462_vm4, %v6589_v57  ;;  %7227 = vmatmul.f32.gmra.mxu2 %v7011_v58  ;;  %v7278_v57 = vpop.f32.mrf.mxu0 }
 0xb95   :  { %v6717_v10 = vpop.permute.xlu0 %6716 }
 0xb96   :  { %v6911_v25 = vpop.permute.xlu2 %6910  ;;  %v6495_v7 = vpop.permute.xlu1 %6494  ;;  %6755 = vst.msk [vmem:[#allocation3 + $0xe0] sm:$0xff] %vm268_vm2, %v6717_v10 }
 0xb97   :  { %6851 = vst.msk [vmem:[#allocation3 + $0xe0] sm:$0xff] %vm365_vm3, %v6813_v48  ;;  %v7013_v2 = vld [vmem:[#allocation3 + $0xd8] sm:$0xff] }
 0xb98   :  { %6947 = vst.msk [vmem:[#allocation3 + $0xe0] sm:$0xff] %vm462_vm4, %v6909_v8  ;;  %7165 = vmatmul.f32.gmra.mxu3 %v7013_v2 }
 0xb9b   :  { %v7204_v41 = vpop.f32.mrf.mxu2 }
 0xb9c   :  { %v7205_v34 = vadd.f32 %v7204_v41, %v7140_v63  ;;  %v7033_v41 = vld [vmem:[#allocation3 + $0x178] sm:$0xff] }
 0xb9d   :  { %v6399_v21 = vpop.permute.xlu0 %6398  ;;  %7574 = vmatmul.msk.f32.gmra.mxu0 %vm44_vm0, %v7033_v41 }
 0xb9e   :  { %v6593_v36 = vpop.permute.xlu2 %6592  ;;  %v7270_v59 = vadd.f32 %v7269_v38, %v7205_v34  ;;  %v6815_v28 = vpop.permute.xlu1 %6814  ;;  %6436 = vst.msk [vmem:[#allocation3 + $0xf0] sm:$0xff] %vm268_vm2, %v6399_v21 }
 0xb9f   :  { %6532 = vst.msk [vmem:[#allocation3 + $0xf0] sm:$0xff] %vm365_vm3, %v6495_v7  ;;  %v7014_v11 = vld [vmem:[#allocation3 + $0xe0] sm:$0xff] }
 0xba0   :  { %7317 = vst [vmem:[%s12741_s13] sm:$0xff] %v7270_v59  ;;  %7230 = vmatmul.f32.gmra.mxu2 %v7014_v11 }
 0xba1   :  { %6628 = vst.msk [vmem:[#allocation3 + $0xf0] sm:$0xff] %vm462_vm4, %v6591_v60 }
 0xba3   :  { %v7142_v54 = vpop.f32.mrf.mxu3 }
 0xba4   :  { %v7143_v4 = vadd.f32 %v12622_v33, %v7142_v54 }
 0xba5   :  { %v6719_v30 = vpop.permute.xlu0 %6718 }
 0xba6   :  { %v6497_v55 = vpop.permute.xlu1 %6496  ;;  %6756 = vst.msk [vmem:[#allocation3 + $0xf8] sm:$0xff] %vm268_vm2, %v6719_v30  ;;  %v6913_v22 = vpop.permute.xlu2 %6912 }
 0xba7   :  { %6852 = vst.msk [vmem:[#allocation3 + $0xf8] sm:$0xff] %vm365_vm3, %v6815_v28 }
 0xba8   :  { %6948 = vst.msk [vmem:[#allocation3 + $0xf8] sm:$0xff] %vm462_vm4, %v6911_v25  ;;  %v7016_v56 = vld [vmem:[#allocation3 + $0xf0] sm:$0xff]  ;;  %v7281_v25 = vpop.f32.mrf.mxu0 }
 0xba9   :  { %7168 = vmatmul.f32.gmra.mxu3 %v7016_v56 }
 0xbab   :  { %v7207_v13 = vpop.f32.mrf.mxu2 }
 0xbac   :  { %v7208_v16 = vadd.f32 %v7207_v13, %v7143_v4 }
 0xbad   :  { %v6401_v52 = vpop.permute.xlu0 %6400 }
 0xbae   :  { %v7273_v53 = vadd.f32 %v7272_v49, %v7208_v16  ;;  %v6817_v1 = vpop.permute.xlu1 %6816  ;;  %6437 = vst.msk [vmem:[#allocation3 + $0x108] sm:$0xff] %vm268_vm2, %v6401_v52  ;;  %v6595_v17 = vpop.permute.xlu2 %6594 }
 0xbaf   :  { %6533 = vst.msk [vmem:[#allocation3 + $0x108] sm:$0xff] %vm365_vm3, %v6497_v55  ;;  %v7017_v15 = vld [vmem:[#allocation3 + $0xf8] sm:$0xff] }
 0xbb0   :  { %7318 = vst [vmem:[%s12741_s13 + $0x8] sm:$0xff] %v7273_v53  ;;  %7233 = vmatmul.f32.gmra.mxu2 %v7017_v15  ;;  %v7284_v28 = vpop.f32.mrf.mxu0 }
 0xbb1   :  { %6629 = vst.msk [vmem:[#allocation3 + $0x108] sm:$0xff] %vm462_vm4, %v6593_v36 }
 0xbb3   :  { %v7145_v47 = vpop.f32.mrf.mxu3 }
 0xbb4   :  { %v7146_v0 = vadd.f32 %v12622_v33, %v7145_v47 }
 0xbb5   :  { %v6721_v51 = vpop.permute.xlu0 %6720 }
 0xbb6   :  { %v6499_v42 = vpop.permute.xlu1 %6498  ;;  %6757 = vst.msk [vmem:[#allocation3 + $0x110] sm:$0xff] %vm268_vm2, %v6721_v51  ;;  %v6915_v31 = vpop.permute.xlu2 %6914 }
 0xbb7   :  { %6853 = vst.msk [vmem:[#allocation3 + $0x110] sm:$0xff] %vm365_vm3, %v6817_v1 }
 0xbb8   :  { %6949 = vst.msk [vmem:[#allocation3 + $0x110] sm:$0xff] %vm462_vm4, %v6913_v22  ;;  %v7019_v14 = vld [vmem:[#allocation3 + $0x108] sm:$0xff] }
 0xbb9   :  { %7171 = vmatmul.f32.gmra.mxu3 %v7019_v14 }
 0xbbb   :  { %v7210_v32 = vpop.f32.mrf.mxu2 }
 0xbbc   :  { %v7211_v62 = vadd.f32 %v7210_v32, %v7146_v0 }
 0xbbd   :  { %v6403_v20 = vpop.permute.xlu0 %6402 }
 0xbbe   :  { %v7276_v23 = vadd.f32 %v7275_v39, %v7211_v62  ;;  %v6819_v46 = vpop.permute.xlu1 %6818  ;;  %6438 = vst.msk [vmem:[#allocation3 + $0x120] sm:$0xff] %vm268_vm2, %v6403_v20  ;;  %v6597_v61 = vpop.permute.xlu2 %6596 }
 0xbbf   :  { %6534 = vst.msk [vmem:[#allocation3 + $0x120] sm:$0xff] %vm365_vm3, %v6499_v42  ;;  %v7020_v26 = vld [vmem:[#allocation3 + $0x110] sm:$0xff] }
 0xbc0   :  { %7319 = vst [vmem:[%s12741_s13 + $0x10] sm:$0xff] %v7276_v23  ;;  %7236 = vmatmul.f32.gmra.mxu2 %v7020_v26 }
 0xbc1   :  { %6630 = vst.msk [vmem:[#allocation3 + $0x120] sm:$0xff] %vm462_vm4, %v6595_v17  ;;  %v7287_v17 = vpop.f32.mrf.mxu0 }
 0xbc3   :  { %v7148_v44 = vpop.f32.mrf.mxu3 }
 0xbc4   :  { %v7149_v3 = vadd.f32 %v12622_v33, %v7148_v44 }
 0xbc5   :  { %v6723_v18 = vpop.permute.xlu0 %6722 }
 0xbc6   :  { %v6501_v50 = vpop.permute.xlu1 %6500  ;;  %6758 = vst.msk [vmem:[#allocation3 + $0x128] sm:$0xff] %vm268_vm2, %v6723_v18  ;;  %v6917_v8 = vpop.permute.xlu2 %6916 }
 0xbc7   :  { %6854 = vst.msk [vmem:[#allocation3 + $0x128] sm:$0xff] %vm365_vm3, %v6819_v46 }
 0xbc8   :  { %6950 = vst.msk [vmem:[#allocation3 + $0x128] sm:$0xff] %vm462_vm4, %v6915_v31  ;;  %v7022_v19 = vld [vmem:[#allocation3 + $0x120] sm:$0xff] }
 0xbc9   :  { %7174 = vmatmul.f32.gmra.mxu3 %v7022_v19  ;;  %v7290_v31 = vpop.f32.mrf.mxu0 }
 0xbcb   :  { %v7213_v37 = vpop.f32.mrf.mxu2 }
 0xbcc   :  { %v7214_v29 = vadd.f32 %v7213_v37, %v7149_v3 }
 0xbcd   :  { %v6405_v9 = vpop.permute.xlu0 %6404 }
 0xbce   :  { %v7279_v5 = vadd.f32 %v7278_v57, %v7214_v29  ;;  %v6821_v12 = vpop.permute.xlu1 %6820  ;;  %6439 = vst.msk [vmem:[#allocation3 + $0x138] sm:$0xff] %vm268_vm2, %v6405_v9  ;;  %v6599_v60 = vpop.permute.xlu2 %6598 }
 0xbcf   :  { %6535 = vst.msk [vmem:[#allocation3 + $0x138] sm:$0xff] %vm365_vm3, %v6501_v50  ;;  %v7023_v43 = vld [vmem:[#allocation3 + $0x128] sm:$0xff] }
 0xbd0   :  { %7320 = vst [vmem:[%s12741_s13 + $0x18] sm:$0xff] %v7279_v5  ;;  %7239 = vmatmul.f32.gmra.mxu2 %v7023_v43 }
 0xbd1   :  { %6631 = vst.msk [vmem:[#allocation3 + $0x138] sm:$0xff] %vm462_vm4, %v6597_v61  ;;  %v7293_v26 = vpop.f32.mrf.mxu0 }
 0xbd3   :  { %v7151_v40 = vpop.f32.mrf.mxu3 }
 0xbd4   :  { %v7152_v27 = vadd.f32 %v12622_v33, %v7151_v40 }
 0xbd5   :  { %v6725_v24 = vpop.permute.xlu0 %6724 }
 0xbd6   :  { %6759 = vst.msk [vmem:[#allocation3 + $0x140] sm:$0xff] %vm268_vm2, %v6725_v24  ;;  %v6503_v6 = vpop.permute.xlu1 %6502  ;;  %v6919_v63 = vpop.permute.xlu2 %6918 }
 0xbd7   :  { %6855 = vst.msk [vmem:[#allocation3 + $0x140] sm:$0xff] %vm365_vm3, %v6821_v12 }
 0xbd8   :  { %6951 = vst.msk [vmem:[#allocation3 + $0x140] sm:$0xff] %vm462_vm4, %v6917_v8  ;;  %v7025_v45 = vld [vmem:[#allocation3 + $0x138] sm:$0xff] }
 0xbd9   :  { %7177 = vmatmul.f32.gmra.mxu3 %v7025_v45  ;;  %v7296_v3 = vpop.f32.mrf.mxu0 }
 0xbdb   :  { %v7216_v48 = vpop.f32.mrf.mxu2 }
 0xbdc   :  { %v7217_v58 = vadd.f32 %v7216_v48, %v7152_v27 }
 0xbdd   :  { %v6407_v10 = vpop.permute.xlu0 %6406 }
 0xbde   :  { %v7282_v7 = vadd.f32 %v7281_v25, %v7217_v58  ;;  %6440 = vst.msk [vmem:[#allocation3 + $0x150] sm:$0xff] %vm268_vm2, %v6407_v10  ;;  %v6823_v2 = vpop.permute.xlu1 %6822  ;;  %v6601_v55 = vpop.permute.xlu2 %6600 }
 0xbdf   :  { %6536 = vst.msk [vmem:[#allocation3 + $0x150] sm:$0xff] %vm365_vm3, %v6503_v6  ;;  %v7026_v35 = vld [vmem:[#allocation3 + $0x140] sm:$0xff] }
 0xbe0   :  { %7321 = vst [vmem:[%s12741_s13 + $0x20] sm:$0xff] %v7282_v7  ;;  %7242 = vmatmul.f32.gmra.mxu2 %v7026_v35 }
 0xbe1   :  { %6632 = vst.msk [vmem:[#allocation3 + $0x150] sm:$0xff] %vm462_vm4, %v6599_v60  ;;  %v7299_v12 = vpop.f32.mrf.mxu0 }
 0xbe3   :  { %v7154_v34 = vpop.f32.mrf.mxu3 }
 0xbe4   :  { %v7155_v21 = vadd.f32 %v12622_v33, %v7154_v34 }
 0xbe5   :  { %v6727_v38 = vpop.permute.xlu0 %6726 }
 0xbe6   :  { %6760 = vst.msk [vmem:[#allocation3 + $0x158] sm:$0xff] %vm268_vm2, %v6727_v38  ;;  %v6505_v11 = vpop.permute.xlu1 %6504  ;;  %v6921_v16 = vpop.permute.xlu2 %6920 }
 0xbe7   :  { %6856 = vst.msk [vmem:[#allocation3 + $0x158] sm:$0xff] %vm365_vm3, %v6823_v2 }
 0xbe8   :  { %6952 = vst.msk [vmem:[#allocation3 + $0x158] sm:$0xff] %vm462_vm4, %v6919_v63  ;;  %v7028_v36 = vld [vmem:[#allocation3 + $0x150] sm:$0xff] }
 0xbe9   :  { %7180 = vmatmul.f32.gmra.mxu3 %v7028_v36  ;;  %v7302_v45 = vpop.f32.mrf.mxu0 }
 0xbeb   :  { %v7219_v59 = vpop.f32.mrf.mxu2 }
 0xbec   :  { %v7220_v30 = vadd.f32 %v7219_v59, %v7155_v21 }
 0xbed   :  { %v6409_v54 = vpop.permute.xlu0 %6408 }
 0xbee   :  { %v7285_v22 = vadd.f32 %v7284_v28, %v7220_v30  ;;  %6441 = vst.msk [vmem:[#allocation3 + $0x168] sm:$0xff] %vm268_vm2, %v6409_v54  ;;  %v6825_v4 = vpop.permute.xlu1 %6824 }
 0xbef   :  { %6537 = vst.msk [vmem:[#allocation3 + $0x168] sm:$0xff] %vm365_vm3, %v6505_v11  ;;  %v7029_v56 = vld [vmem:[#allocation3 + $0x158] sm:$0xff] }
 0xbf0   :  { %7322 = vst [vmem:[%s12741_s13 + $0x28] sm:$0xff] %v7285_v22  ;;  %7245 = vmatmul.f32.gmra.mxu2 %v7029_v56 }
 0xbf1   :  { %6633 = vst.msk [vmem:[#allocation3 + $0x168] sm:$0xff] %vm462_vm4, %v6601_v55  ;;  %v7305_v10 = vpop.f32.mrf.mxu0 }
 0xbf3   :  { %v7157_v49 = vpop.f32.mrf.mxu3 }
 0xbf4   :  { %v7158_v53 = vadd.f32 %v12622_v33, %v7157_v49 }
 0xbf5   :  { %v6729_v13 = vpop.permute.xlu0 %6728 }
 0xbf6   :  { %6761 = vst.msk [vmem:[#allocation3 + $0x170] sm:$0xff] %vm268_vm2, %v6729_v13 }
 0xbf7   :  { %6857 = vst.msk [vmem:[#allocation3 + $0x170] sm:$0xff] %vm365_vm3, %v6825_v4 }
 0xbf8   :  { %6953 = vst.msk [vmem:[#allocation3 + $0x170] sm:$0xff] %vm462_vm4, %v6921_v16  ;;  %v7031_v52 = vld [vmem:[#allocation3 + $0x168] sm:$0xff] }
 0xbf9   :  { %7183 = vmatmul.f32.gmra.mxu3 %v7031_v52  ;;  %v7308_v38 = vpop.f32.mrf.mxu0 }
 0xbfc   :  { %v7222_v1 = vpop.f32.mrf.mxu2 }
 0xbfd   :  { %v7223_v15 = vadd.f32 %v7222_v1, %v7158_v53 }
 0xbff   :  { %v7288_v51 = vadd.f32 %v7287_v17, %v7223_v15  ;;  %v7032_v42 = vld [vmem:[#allocation3 + $0x170] sm:$0xff] }
 0xc00   :  { %7248 = vmatmul.f32.gmra.mxu2 %v7032_v42 }
 0xc01   :  { %7323 = vst [vmem:[%s12741_s13 + $0x30] sm:$0xff] %v7288_v51  ;;  %v7311_v11 = vpop.f32.mrf.mxu0 }
 0xc03   :  { %v7160_v47 = vpop.f32.mrf.mxu3 }
 0xc04   :  { %v7161_v14 = vadd.f32 %v12622_v33, %v7160_v47 }
 0xc0b   :  { %v7225_v0 = vpop.f32.mrf.mxu2  ;;  %v7163_v39 = vpop.f32.mrf.mxu3 }
 0xc0c   :  { %v7226_v32 = vadd.f32 %v7225_v0, %v7161_v14  ;;  %v7164_v20 = vadd.f32 %v12622_v33, %v7163_v39 }
 0xc0e   :  { %v7291_v62 = vadd.f32 %v7290_v31, %v7226_v32 }
 0xc10   :  { %7324 = vst [vmem:[%s12741_s13 + $0x38] sm:$0xff] %v7291_v62 }
 0xc13   :  { %v7228_v23 = vpop.f32.mrf.mxu2 }
 0xc14   :  { %v7229_v46 = vadd.f32 %v7228_v23, %v7164_v20 }
 0xc16   :  { %v7294_v61 = vadd.f32 %v7293_v26, %v7229_v46 }
 0xc18   :  { %7325 = vst [vmem:[%s12741_s13 + $0x40] sm:$0xff] %v7294_v61 }
 0xc1a   :  { %v7314_v56 = vpop.f32.mrf.mxu0 }
 0xc1b   :  { %v7166_v18 = vpop.f32.mrf.mxu3 }
 0xc1c   :  { %v7167_v50 = vadd.f32 %v12622_v33, %v7166_v18 }
 0xc23   :  { %v7231_v44 = vpop.f32.mrf.mxu2 }
 0xc24   :  { %v7232_v19 = vadd.f32 %v7231_v44, %v7167_v50 }
 0xc26   :  { %v7297_v37 = vadd.f32 %v7296_v3, %v7232_v19 }
 0xc28   :  { %7326 = vst [vmem:[%s12741_s13 + $0x48] sm:$0xff] %v7297_v37 }
 0xc2c   :  { %v7169_v29 = vpop.f32.mrf.mxu3 }
 0xc2d   :  { %v7170_v57 = vadd.f32 %v12622_v33, %v7169_v29 }
 0xc33   :  { %v7234_v9 = vpop.f32.mrf.mxu2 }
 0xc34   :  { %v7235_v5 = vadd.f32 %v7234_v9, %v7170_v57 }
 0xc36   :  { %v7300_v8 = vadd.f32 %v7299_v12, %v7235_v5 }
 0xc38   :  { %7327 = vst [vmem:[%s12741_s13 + $0x50] sm:$0xff] %v7300_v8 }
 0xc3c   :  { %v7172_v43 = vpop.f32.mrf.mxu3 }
 0xc3d   :  { %v7173_v24 = vadd.f32 %v12622_v33, %v7172_v43 }
 0xc43   :  { %v7237_v40 = vpop.f32.mrf.mxu2 }
 0xc44   :  { %v7238_v6 = vadd.f32 %v7237_v40, %v7173_v24 }
 0xc46   :  { %v7303_v60 = vadd.f32 %v7302_v45, %v7238_v6 }
 0xc48   :  { %7328 = vst [vmem:[%s12741_s13 + $0x58] sm:$0xff] %v7303_v60 }
 0xc4c   :  { %v7175_v27 = vpop.f32.mrf.mxu3 }
 0xc4d   :  { %v7176_v48 = vadd.f32 %v12622_v33, %v7175_v27 }
 0xc53   :  { %v7240_v58 = vpop.f32.mrf.mxu2 }
 0xc54   :  { %v7241_v25 = vadd.f32 %v7240_v58, %v7176_v48 }
 0xc56   :  { %v7306_v7 = vadd.f32 %v7305_v10, %v7241_v25 }
 0xc58   :  { %7329 = vst [vmem:[%s12741_s13 + $0x60] sm:$0xff] %v7306_v7 }
 0xc5c   :  { %v7178_v35 = vpop.f32.mrf.mxu3 }
 0xc5d   :  { %v7179_v2 = vadd.f32 %v12622_v33, %v7178_v35 }
 0xc63   :  { %v7243_v63 = vpop.f32.mrf.mxu2 }
 0xc64   :  { %v7244_v41 = vadd.f32 %v7243_v63, %v7179_v2 }
 0xc66   :  { %v7309_v34 = vadd.f32 %v7308_v38, %v7244_v41 }
 0xc68   :  { %7330 = vst [vmem:[%s12741_s13 + $0x68] sm:$0xff] %v7309_v34 }
 0xc6c   :  { %v7181_v36 = vpop.f32.mrf.mxu3 }
 0xc6d   :  { %v7182_v21 = vadd.f32 %v12622_v33, %v7181_v36 }
 0xc73   :  { %v7246_v59 = vpop.f32.mrf.mxu2 }
 0xc74   :  { %v7247_v28 = vadd.f32 %v7246_v59, %v7182_v21 }
 0xc76   :  { %v7312_v30 = vadd.f32 %v7311_v11, %v7247_v28 }
 0xc78   :  { %7331 = vst [vmem:[%s12741_s13 + $0x70] sm:$0xff] %v7312_v30 }
 0xc7c   :  { %v7184_v55 = vpop.f32.mrf.mxu3 }
 0xc7d   :  { %v7185_v54 = vadd.f32 %v12622_v33, %v7184_v55 }
 0xc83   :  { %v7249_v22 = vpop.f32.mrf.mxu2 }
 0xc84   :  { %v7250_v4 = vadd.f32 %v7249_v22, %v7185_v54 }
 0xc86   :  { %v7315_v13 = vadd.f32 %v7314_v56, %v7250_v4 }
 0xc88   :  { %7332 = vst [vmem:[%s12741_s13 + $0x78] sm:$0xff] %v7315_v13 }

</bundles_post_ra>
